<compile_context>
chip_gen: v6e
topology: v6e:2x2x1
jax: 0.10.0
libtpu: 0.0.40
codegen_flags: <defaults>
</compile_context>

<pallas_src>
import numpy as np

import jax
import jax.numpy as jnp
from jax.experimental import pallas as pl
from jax.experimental.pallas import tpu as pltpu


# -----------------------------------------------------------------------------
# Fused kernel: avgpool(5,3) -> 1x1 conv + ReLU -> fc1 + ReLU -> fc2
# One grid step per batch tile of B samples.
# -----------------------------------------------------------------------------
def fused_aux_kernel(x_ref, pmat_ref, cw_ref, cb_ref, w1_ref, b1_ref,
                     w2_ref, b2_ref, o_ref):
    # x_ref:    (B, 196, Cpad)  bf16  NHWC tile, spatial flattened (q = h*14 + w)
    # pmat_ref: (16, 196)       bf16  0/1 avg-pool tap mask (exact in bf16)
    # cw_ref:   (Cpad, 128)     bf16  1x1 conv weight; cb_ref: (1, 128) f32 bias
    # w1_ref:   (2048, 1024)    bf16  fc1 weight, rows permuted to (pos*128 + c)
    # b1_ref:   (1, 1024)       f32
    # w2_ref:   (1024, NCpad)   bf16  fc2 weight (output lanes padded to 128)
    # b2_ref:   (1, NCpad)      f32
    # o_ref:    (B, NCpad)      f32
    B, Q, C = x_ref.shape
    P = pmat_ref.shape[0]                                  # 16 pooled positions

    # --- AvgPool2d(5, stride=3): one batched MXU contraction over the tile ---
    pmask = jnp.broadcast_to(pmat_ref[...], (B, P, Q))     # bf16 0/1 taps
    pooled = jnp.einsum('bpq,bqc->bpc', pmask, x_ref[...],
                        preferred_element_type=jnp.float32)
    pooled = pooled * jnp.float32(1.0 / 25.0)              # (B, 16, Cpad) f32

    # --- 1x1 conv + bias + ReLU: single matmul with M = B*16 ---
    pooled2 = pooled.reshape(B * P, C).astype(jnp.bfloat16)
    conv = jnp.dot(pooled2, cw_ref[...], preferred_element_type=jnp.float32)
    conv = jnp.maximum(conv + cb_ref[...], 0.0)            # (B*16, 128) f32
    conv3 = conv.reshape(B, P, 128)

    # dropout(p=0.5, training=False) -> identity
    # TODO(synk): training-mode dropout (stochastic mask) is not implemented.

    # --- fc1 + bias + ReLU, accumulated over the 16 pooled positions ---------
    # No (B, 2048) feature slab is materialized; w1 rows were pre-permuted so
    # chunk p of w1 corresponds exactly to pooled position p.
    h = jnp.zeros((B, w1_ref.shape[1]), jnp.float32)
    for p in range(P):
        lhs = conv3[:, p, :].astype(jnp.bfloat16)          # (B, 128)
        h = h + jnp.dot(lhs, w1_ref[p * 128:(p + 1) * 128, :],
                        preferred_element_type=jnp.float32)
    h = jnp.maximum(h + b1_ref[...], 0.0)                  # (B, 1024) f32

    # --- fc2 (padded output lanes) ---
    o = jnp.dot(h.astype(jnp.bfloat16), w2_ref[...],
                preferred_element_type=jnp.float32)
    o_ref[...] = (o + b2_ref[...]).astype(o_ref.dtype)


# -----------------------------------------------------------------------------
# One-time parameter preparation (hoisted out of the forward path).
# -----------------------------------------------------------------------------
def _pooling_mask():
    """0/1 tap mask for AvgPool2d(kernel=5, stride=3) on a 14x14 map -> 4x4."""
    pm = np.zeros((16, 14 * 14), np.float32)
    for i in range(4):
        for j in range(4):
            p = i * 4 + j
            for di in range(5):
                for dj in range(5):
                    pm[p, (3 * i + di) * 14 + (3 * j + dj)] = 1.0
    return pm


def prepare_params(params):
    """params = (conv_w (C,128), conv_b, fc1_w (2048,1024), fc1_b,
                 fc2_w (1024,num_classes), fc2_b).
    Weight layout is (in, out), i.e. the transpose of PyTorch's storage."""
    conv_w, conv_b, fc1_w, fc1_b, fc2_w, fc2_b = params
    C = conv_w.shape[0]
    num_classes = fc2_w.shape[1]
    c_pad = ((C + 127) // 128) * 128
    nc_pad = ((num_classes + 127) // 128) * 128

    conv_w_p = jnp.pad(conv_w, ((0, c_pad - C), (0, 0))).astype(jnp.bfloat16)
    conv_b_p = jnp.asarray(conv_b).reshape(1, -1).astype(jnp.float32)

    # torch flatten order (c*16 + pos) -> kernel order (pos*128 + c).
    pos = np.arange(16)
    ch = np.arange(128)
    src = (ch[None, :] * 16 + pos[:, None]).reshape(-1)    # src[pos*128+c] = c*16+pos
    fc1_w_p = jnp.asarray(fc1_w)[src].astype(jnp.bfloat16)
    fc1_b_p = jnp.asarray(fc1_b).reshape(1, -1).astype(jnp.float32)

    fc2_w_p = jnp.pad(fc2_w, ((0, 0), (0, nc_pad - num_classes))).astype(jnp.bfloat16)
    fc2_b_p = jnp.pad(jnp.asarray(fc2_b).reshape(1, -1),
                      ((0, 0), (0, nc_pad - num_classes))).astype(jnp.float32)

    pmat = jnp.asarray(_pooling_mask()).astype(jnp.bfloat16)

    return dict(pmat=pmat, conv_w=conv_w_p, conv_b=conv_b_p,
                fc1_w=fc1_w_p, fc1_b=fc1_b_p, fc2_w=fc2_w_p, fc2_b=fc2_b_p,
                c=C, c_pad=c_pad, num_classes=num_classes, nc_pad=nc_pad)


def _pick_b_tile(n, c_pad):
    """Batch-tile heuristic sized for v7x (64 MiB VMEM): double-buffered bf16
    x block <= ~16 MiB.  v5e/v6e (128 MiB) could go larger still."""
    per_sample = 196 * c_pad * 2                 # bf16 bytes per sample
    cap = (16 << 20) // (2 * per_sample)
    cap = max(8, min(256, (cap // 8) * 8))
    if n <= cap:
        # Small batches fit in one tile; keep >=2 grid steps for batches >=16
        # so both v7x TensorCores get work.
        if n >= 16:
            half = (((n + 1) // 2 + 7) // 8) * 8
            if half < n:
                return half
        return n
    return cap


# -----------------------------------------------------------------------------
# Forward wrapper
# -----------------------------------------------------------------------------
def inception_aux_forward(x_nchw, prep, *, b_tile=None):
    """x_nchw: (N, C, 14, 14) float32 (PyTorch layout). Returns (N, num_classes)."""
    N, C, H, W = x_nchw.shape
    assert (H, W) == (14, 14), "fc1 expects a 4x4 pooled map -> input must be 14x14"
    assert C == prep["c"]
    c_pad, nc_pad = prep["c_pad"], prep["nc_pad"]
    num_classes = prep["num_classes"]

    # NCHW -> NHWC -> (N, 196, Cpad) bf16: channels on lanes, spatial on sublanes.
    # TODO(synk): if the producing layer emits NHWC directly this transpose (an
    # extra HBM pass over x) disappears.
    x_r = jnp.transpose(x_nchw, (0, 2, 3, 1)).reshape(N, H * W, C)
    if c_pad != C:
        x_r = jnp.pad(x_r, ((0, 0), (0, 0), (0, c_pad - C)))
    x_r = x_r.astype(jnp.bfloat16)

    if b_tile is None:
        b_tile = _pick_b_tile(N, c_pad)
    if b_tile >= N:
        b_tile, n_pad = N, N                       # block == full batch dim
    else:
        b_tile = max(8, (b_tile // 8) * 8)         # out-block sublane constraint
        n_pad = ((N + b_tile - 1) // b_tile) * b_tile
    if n_pad != N:
        x_r = jnp.pad(x_r, ((0, n_pad - N), (0, 0), (0, 0)))

    resident = dict(pipeline_mode=pl.Buffered(buffer_count=1))  # constant-index weights

    grid = (n_pad // b_tile,)
    out = pl.pallas_call(
        fused_aux_kernel,
        out_shape=jax.ShapeDtypeStruct((n_pad, nc_pad), jnp.float32),
        grid_spec=pltpu.PrefetchScalarGridSpec(
            num_scalar_prefetch=0,
            grid=grid,
            in_specs=[
                pl.BlockSpec((b_tile, H * W, c_pad), lambda n: (n, 0, 0)),
                pl.BlockSpec((16, H * W), lambda n: (0, 0), **resident),
                pl.BlockSpec((c_pad, 128), lambda n: (0, 0), **resident),
                pl.BlockSpec((1, 128), lambda n: (0, 0), **resident),
                pl.BlockSpec((2048, 1024), lambda n: (0, 0), **resident),
                pl.BlockSpec((1, 1024), lambda n: (0, 0), **resident),
                pl.BlockSpec((1024, nc_pad), lambda n: (0, 0), **resident),
                pl.BlockSpec((1, nc_pad), lambda n: (0, 0), **resident),
            ],
            out_specs=pl.BlockSpec((b_tile, nc_pad), lambda n: (n, 0)),
        ),
        compiler_params=pltpu.CompilerParams(
            dimension_semantics=("parallel",),
            vmem_limit_bytes=48 << 20),   # worst-case live use ~25 MiB; safe on v7x
    )(x_r, prep["pmat"], prep["conv_w"], prep["conv_b"],
      prep["fc1_w"], prep["fc1_b"], prep["fc2_w"], prep["fc2_b"])

    return out[:N, :num_classes]


# Pure-JAX reference for a correctness check (torch semantics, eval mode, f32).
def reference_forward(x_nchw, params):
    conv_w, conv_b, fc1_w, fc1_b, fc2_w, fc2_b = params
    N, C, H, W = x_nchw.shape
    x = jnp.transpose(x_nchw, (0, 2, 3, 1))  # NHWC
    pooled = jnp.stack(
        [jnp.mean(x[:, 3 * i:3 * i + 5, 3 * j:3 * j + 5, :], axis=(1, 2))
         for i in range(4) for j in range(4)], axis=1)                  # (N, 16, C)
    conv = jnp.maximum(pooled @ conv_w + jnp.asarray(conv_b).reshape(1, 1, -1), 0.0)
    feat = jnp.transpose(conv.reshape(N, 4, 4, 128), (0, 3, 1, 2)).reshape(N, -1)
    h = jnp.maximum(feat @ fc1_w + jnp.asarray(fc1_b).reshape(1, -1), 0.0)
    return h @ fc2_w + jnp.asarray(fc2_b).reshape(1, -1)


if __name__ == "__main__":
    N, C, H, W = 12, 32, 14, 14
    num_classes = 10

    key = jax.random.PRNGKey(0)
    kx, k1, k2, k3, k4, k5, k6 = jax.random.split(key, 7)

    x = jax.random.normal(kx, (N, C, H, W), dtype=jnp.float32)

    # Parameters (deterministic synthetic init). Weight layout is (in, out),
    # i.e. the transpose of PyTorch's nn.Linear / 1x1-conv weight storage.
    conv_w = 0.1 * jax.random.normal(k1, (C, 128), dtype=jnp.float32)
    conv_b = 0.1 * jax.random.normal(k2, (128,), dtype=jnp.float32)
    fc1_w = 0.03 * jax.random.normal(k3, (128 * 4 * 4, 1024), dtype=jnp.float32)
    fc1_b = 0.03 * jax.random.normal(k4, (1024,), dtype=jnp.float32)
    fc2_w = 0.05 * jax.random.normal(k5, (1024, num_classes), dtype=jnp.float32)
    fc2_b = 0.05 * jax.random.normal(k6, (num_classes,), dtype=jnp.float32)
    params = (conv_w, conv_b, fc1_w, fc1_b, fc2_w, fc2_b)

    prep = prepare_params(params)   # one-time layout permutation / padding / bf16

    # b_tile=8 forces a 2-step grid plus batch padding (12 -> 16) to exercise
    # the tiling path; production callers can omit it (auto-picked).
    out = inception_aux_forward(x, prep, b_tile=8)
    out = jax.block_until_ready(out)
    assert out.shape == (N, num_classes)

    ref = jax.block_until_ready(reference_forward(x, params))
    err = float(jnp.max(jnp.abs(out - ref)))
    assert err < 2e-2, f"mismatch vs reference: max abs err {err}"

    print("KERNEL_OK")
</pallas_src>

<mosaic_0001>
module attributes {stable_mosaic.version = 11 : i64} {
  func.func @fused_aux_kernel(%arg0: i32, %arg1: memref<8x196x128xbf16, #tpu.memory_space<vmem>>, %arg2: memref<16x196xbf16, #tpu.memory_space<vmem>>, %arg3: memref<128x128xbf16, #tpu.memory_space<vmem>>, %arg4: memref<1x128xf32, #tpu.memory_space<vmem>>, %arg5: memref<2048x1024xbf16, #tpu.memory_space<vmem>>, %arg6: memref<1x1024xf32, #tpu.memory_space<vmem>>, %arg7: memref<1024x128xbf16, #tpu.memory_space<vmem>>, %arg8: memref<1x128xf32, #tpu.memory_space<vmem>>, %arg9: memref<8x128xf32, #tpu.memory_space<vmem>>) attributes {dimension_semantics = [#tpu.dimension_semantics<parallel>], iteration_bounds = array<i64: 2>, scalar_prefetch = 0 : i64, scratch_operands = 0 : i64, tpu.core_type = #tpu.core_type<tc>, window_params = [{transform_indices = @transform_0, window_bounds = array<i64: 8, 196, 128>}, {pipeline_mode = #tpu.pipeline_mode<synchronous>, transform_indices = @transform_1, window_bounds = array<i64: 16, 196>}, {pipeline_mode = #tpu.pipeline_mode<synchronous>, transform_indices = @transform_2, window_bounds = array<i64: 128, 128>}, {pipeline_mode = #tpu.pipeline_mode<synchronous>, transform_indices = @transform_3, window_bounds = array<i64: 1, 128>}, {pipeline_mode = #tpu.pipeline_mode<synchronous>, transform_indices = @transform_4, window_bounds = array<i64: 2048, 1024>}, {pipeline_mode = #tpu.pipeline_mode<synchronous>, transform_indices = @transform_5, window_bounds = array<i64: 1, 1024>}, {pipeline_mode = #tpu.pipeline_mode<synchronous>, transform_indices = @transform_6, window_bounds = array<i64: 1024, 128>}, {pipeline_mode = #tpu.pipeline_mode<synchronous>, transform_indices = @transform_7, window_bounds = array<i64: 1, 128>}, {transform_indices = @transform_8, window_bounds = array<i64: 8, 128>}]} {
    %c0 = arith.constant 0 : index
    %c0_0 = arith.constant 0 : index
    %0 = vector.load %arg2[%c0, %c0_0] : memref<16x196xbf16, #tpu.memory_space<vmem>>, vector<16x196xbf16>
    %1 = vector.shape_cast %0 : vector<16x196xbf16> to vector<1x16x196xbf16>
    %2 = vector.broadcast %1 : vector<1x16x196xbf16> to vector<8x16x196xbf16>
    %c0_1 = arith.constant 0 : index
    %c0_2 = arith.constant 0 : index
    %c0_3 = arith.constant 0 : index
    %3 = vector.load %arg1[%c0_1, %c0_2, %c0_3] : memref<8x196x128xbf16, #tpu.memory_space<vmem>>, vector<8x196x128xbf16>
    "tpu.trace_start"() <{level = 10 : i32, message = "bpq,bqc->bpc"}> : () -> ()
    %cst = arith.constant dense<0.000000e+00> : vector<8x16x128xf32>
    %4 = tpu.matmul %2, %3, %cst {dimension_numbers = #tpu.dot_dimension_numbers<[2], [1], [1], [2], [0, 0, 0, 1, 1, 2], [0], [0]>} : vector<8x16x196xbf16>, vector<8x196x128xbf16>, vector<8x16x128xf32> -> vector<8x16x128xf32>
    "tpu.trace_stop"() : () -> ()
    %cst_4 = arith.constant 4.000000e-02 : f32
    %5 = vector.broadcast %cst_4 : f32 to vector<8x16x128xf32>
    %6 = arith.mulf %4, %5 : vector<8x16x128xf32>
    %7 = vector.shape_cast %6 : vector<8x16x128xf32> to vector<128x128xf32>
    %8 = arith.truncf %7 : vector<128x128xf32> to vector<128x128xbf16>
    %c0_5 = arith.constant 0 : index
    %c0_6 = arith.constant 0 : index
    %9 = vector.load %arg3[%c0_5, %c0_6] : memref<128x128xbf16, #tpu.memory_space<vmem>>, vector<128x128xbf16>
    %cst_7 = arith.constant dense<0.000000e+00> : vector<128x128xf32>
    %10 = tpu.matmul %8, %9, %cst_7 {dimension_numbers = #tpu.dot_dimension_numbers<[1], [0], [0], [1], [0, 0, 1, 1], [], []>} : vector<128x128xbf16>, vector<128x128xbf16>, vector<128x128xf32> -> vector<128x128xf32>
    %c0_8 = arith.constant 0 : index
    %c0_9 = arith.constant 0 : index
    %11 = vector.load %arg4[%c0_8, %c0_9] : memref<1x128xf32, #tpu.memory_space<vmem>>, vector<1x128xf32>
    %12 = vector.broadcast %11 : vector<1x128xf32> to vector<128x128xf32>
    %13 = arith.addf %10, %12 : vector<128x128xf32>
    %cst_10 = arith.constant 0.000000e+00 : f32
    %14 = vector.broadcast %cst_10 : f32 to vector<128x128xf32>
    %15 = arith.maximumf %13, %14 : vector<128x128xf32>
    %16 = vector.shape_cast %15 : vector<128x128xf32> to vector<8x16x128xf32>
    %cst_11 = arith.constant 0.000000e+00 : f32
    %17 = vector.broadcast %cst_11 : f32 to vector<8x1024xf32>
    %18 = vector.extract_strided_slice %16 {offsets = [0, 0, 0], sizes = [8, 1, 128], strides = [1, 1, 1]} : vector<8x16x128xf32> to vector<8x1x128xf32>
    %19 = vector.shape_cast %18 : vector<8x1x128xf32> to vector<8x128xf32>
    %20 = arith.truncf %19 : vector<8x128xf32> to vector<8x128xbf16>
    %c0_12 = arith.constant 0 : index
    %c0_13 = arith.constant 0 : index
    %21 = vector.load %arg5[%c0_12, %c0_13] : memref<2048x1024xbf16, #tpu.memory_space<vmem>>, vector<128x1024xbf16>
    %cst_14 = arith.constant dense<0.000000e+00> : vector<8x1024xf32>
    %22 = tpu.matmul %20, %21, %cst_14 {dimension_numbers = #tpu.dot_dimension_numbers<[1], [0], [0], [1], [0, 0, 1, 1], [], []>} : vector<8x128xbf16>, vector<128x1024xbf16>, vector<8x1024xf32> -> vector<8x1024xf32>
    %23 = arith.addf %17, %22 : vector<8x1024xf32>
    %24 = vector.extract_strided_slice %16 {offsets = [0, 1, 0], sizes = [8, 1, 128], strides = [1, 1, 1]} : vector<8x16x128xf32> to vector<8x1x128xf32>
    %25 = vector.shape_cast %24 : vector<8x1x128xf32> to vector<8x128xf32>
    %26 = arith.truncf %25 : vector<8x128xf32> to vector<8x128xbf16>
    %c128 = arith.constant 128 : index
    %c0_15 = arith.constant 0 : index
    %27 = vector.load %arg5[%c128, %c0_15] : memref<2048x1024xbf16, #tpu.memory_space<vmem>>, vector<128x1024xbf16>
    %cst_16 = arith.constant dense<0.000000e+00> : vector<8x1024xf32>
    %28 = tpu.matmul %26, %27, %cst_16 {dimension_numbers = #tpu.dot_dimension_numbers<[1], [0], [0], [1], [0, 0, 1, 1], [], []>} : vector<8x128xbf16>, vector<128x1024xbf16>, vector<8x1024xf32> -> vector<8x1024xf32>
    %29 = arith.addf %23, %28 : vector<8x1024xf32>
    %30 = vector.extract_strided_slice %16 {offsets = [0, 2, 0], sizes = [8, 1, 128], strides = [1, 1, 1]} : vector<8x16x128xf32> to vector<8x1x128xf32>
    %31 = vector.shape_cast %30 : vector<8x1x128xf32> to vector<8x128xf32>
    %32 = arith.truncf %31 : vector<8x128xf32> to vector<8x128xbf16>
    %c256 = arith.constant 256 : index
    %c0_17 = arith.constant 0 : index
    %33 = vector.load %arg5[%c256, %c0_17] : memref<2048x1024xbf16, #tpu.memory_space<vmem>>, vector<128x1024xbf16>
    %cst_18 = arith.constant dense<0.000000e+00> : vector<8x1024xf32>
    %34 = tpu.matmul %32, %33, %cst_18 {dimension_numbers = #tpu.dot_dimension_numbers<[1], [0], [0], [1], [0, 0, 1, 1], [], []>} : vector<8x128xbf16>, vector<128x1024xbf16>, vector<8x1024xf32> -> vector<8x1024xf32>
    %35 = arith.addf %29, %34 : vector<8x1024xf32>
    %36 = vector.extract_strided_slice %16 {offsets = [0, 3, 0], sizes = [8, 1, 128], strides = [1, 1, 1]} : vector<8x16x128xf32> to vector<8x1x128xf32>
    %37 = vector.shape_cast %36 : vector<8x1x128xf32> to vector<8x128xf32>
    %38 = arith.truncf %37 : vector<8x128xf32> to vector<8x128xbf16>
    %c384 = arith.constant 384 : index
    %c0_19 = arith.constant 0 : index
    %39 = vector.load %arg5[%c384, %c0_19] : memref<2048x1024xbf16, #tpu.memory_space<vmem>>, vector<128x1024xbf16>
    %cst_20 = arith.constant dense<0.000000e+00> : vector<8x1024xf32>
    %40 = tpu.matmul %38, %39, %cst_20 {dimension_numbers = #tpu.dot_dimension_numbers<[1], [0], [0], [1], [0, 0, 1, 1], [], []>} : vector<8x128xbf16>, vector<128x1024xbf16>, vector<8x1024xf32> -> vector<8x1024xf32>
    %41 = arith.addf %35, %40 : vector<8x1024xf32>
    %42 = vector.extract_strided_slice %16 {offsets = [0, 4, 0], sizes = [8, 1, 128], strides = [1, 1, 1]} : vector<8x16x128xf32> to vector<8x1x128xf32>
    %43 = vector.shape_cast %42 : vector<8x1x128xf32> to vector<8x128xf32>
    %44 = arith.truncf %43 : vector<8x128xf32> to vector<8x128xbf16>
    %c512 = arith.constant 512 : index
    %c0_21 = arith.constant 0 : index
    %45 = vector.load %arg5[%c512, %c0_21] : memref<2048x1024xbf16, #tpu.memory_space<vmem>>, vector<128x1024xbf16>
    %cst_22 = arith.constant dense<0.000000e+00> : vector<8x1024xf32>
    %46 = tpu.matmul %44, %45, %cst_22 {dimension_numbers = #tpu.dot_dimension_numbers<[1], [0], [0], [1], [0, 0, 1, 1], [], []>} : vector<8x128xbf16>, vector<128x1024xbf16>, vector<8x1024xf32> -> vector<8x1024xf32>
    %47 = arith.addf %41, %46 : vector<8x1024xf32>
    %48 = vector.extract_strided_slice %16 {offsets = [0, 5, 0], sizes = [8, 1, 128], strides = [1, 1, 1]} : vector<8x16x128xf32> to vector<8x1x128xf32>
    %49 = vector.shape_cast %48 : vector<8x1x128xf32> to vector<8x128xf32>
    %50 = arith.truncf %49 : vector<8x128xf32> to vector<8x128xbf16>
    %c640 = arith.constant 640 : index
    %c0_23 = arith.constant 0 : index
    %51 = vector.load %arg5[%c640, %c0_23] : memref<2048x1024xbf16, #tpu.memory_space<vmem>>, vector<128x1024xbf16>
    %cst_24 = arith.constant dense<0.000000e+00> : vector<8x1024xf32>
    %52 = tpu.matmul %50, %51, %cst_24 {dimension_numbers = #tpu.dot_dimension_numbers<[1], [0], [0], [1], [0, 0, 1, 1], [], []>} : vector<8x128xbf16>, vector<128x1024xbf16>, vector<8x1024xf32> -> vector<8x1024xf32>
    %53 = arith.addf %47, %52 : vector<8x1024xf32>
    %54 = vector.extract_strided_slice %16 {offsets = [0, 6, 0], sizes = [8, 1, 128], strides = [1, 1, 1]} : vector<8x16x128xf32> to vector<8x1x128xf32>
    %55 = vector.shape_cast %54 : vector<8x1x128xf32> to vector<8x128xf32>
    %56 = arith.truncf %55 : vector<8x128xf32> to vector<8x128xbf16>
    %c768 = arith.constant 768 : index
    %c0_25 = arith.constant 0 : index
    %57 = vector.load %arg5[%c768, %c0_25] : memref<2048x1024xbf16, #tpu.memory_space<vmem>>, vector<128x1024xbf16>
    %cst_26 = arith.constant dense<0.000000e+00> : vector<8x1024xf32>
    %58 = tpu.matmul %56, %57, %cst_26 {dimension_numbers = #tpu.dot_dimension_numbers<[1], [0], [0], [1], [0, 0, 1, 1], [], []>} : vector<8x128xbf16>, vector<128x1024xbf16>, vector<8x1024xf32> -> vector<8x1024xf32>
    %59 = arith.addf %53, %58 : vector<8x1024xf32>
    %60 = vector.extract_strided_slice %16 {offsets = [0, 7, 0], sizes = [8, 1, 128], strides = [1, 1, 1]} : vector<8x16x128xf32> to vector<8x1x128xf32>
    %61 = vector.shape_cast %60 : vector<8x1x128xf32> to vector<8x128xf32>
    %62 = arith.truncf %61 : vector<8x128xf32> to vector<8x128xbf16>
    %c896 = arith.constant 896 : index
    %c0_27 = arith.constant 0 : index
    %63 = vector.load %arg5[%c896, %c0_27] : memref<2048x1024xbf16, #tpu.memory_space<vmem>>, vector<128x1024xbf16>
    %cst_28 = arith.constant dense<0.000000e+00> : vector<8x1024xf32>
    %64 = tpu.matmul %62, %63, %cst_28 {dimension_numbers = #tpu.dot_dimension_numbers<[1], [0], [0], [1], [0, 0, 1, 1], [], []>} : vector<8x128xbf16>, vector<128x1024xbf16>, vector<8x1024xf32> -> vector<8x1024xf32>
    %65 = arith.addf %59, %64 : vector<8x1024xf32>
    %66 = vector.extract_strided_slice %16 {offsets = [0, 8, 0], sizes = [8, 1, 128], strides = [1, 1, 1]} : vector<8x16x128xf32> to vector<8x1x128xf32>
    %67 = vector.shape_cast %66 : vector<8x1x128xf32> to vector<8x128xf32>
    %68 = arith.truncf %67 : vector<8x128xf32> to vector<8x128xbf16>
    %c1024 = arith.constant 1024 : index
    %c0_29 = arith.constant 0 : index
    %69 = vector.load %arg5[%c1024, %c0_29] : memref<2048x1024xbf16, #tpu.memory_space<vmem>>, vector<128x1024xbf16>
    %cst_30 = arith.constant dense<0.000000e+00> : vector<8x1024xf32>
    %70 = tpu.matmul %68, %69, %cst_30 {dimension_numbers = #tpu.dot_dimension_numbers<[1], [0], [0], [1], [0, 0, 1, 1], [], []>} : vector<8x128xbf16>, vector<128x1024xbf16>, vector<8x1024xf32> -> vector<8x1024xf32>
    %71 = arith.addf %65, %70 : vector<8x1024xf32>
    %72 = vector.extract_strided_slice %16 {offsets = [0, 9, 0], sizes = [8, 1, 128], strides = [1, 1, 1]} : vector<8x16x128xf32> to vector<8x1x128xf32>
    %73 = vector.shape_cast %72 : vector<8x1x128xf32> to vector<8x128xf32>
    %74 = arith.truncf %73 : vector<8x128xf32> to vector<8x128xbf16>
    %c1152 = arith.constant 1152 : index
    %c0_31 = arith.constant 0 : index
    %75 = vector.load %arg5[%c1152, %c0_31] : memref<2048x1024xbf16, #tpu.memory_space<vmem>>, vector<128x1024xbf16>
    %cst_32 = arith.constant dense<0.000000e+00> : vector<8x1024xf32>
    %76 = tpu.matmul %74, %75, %cst_32 {dimension_numbers = #tpu.dot_dimension_numbers<[1], [0], [0], [1], [0, 0, 1, 1], [], []>} : vector<8x128xbf16>, vector<128x1024xbf16>, vector<8x1024xf32> -> vector<8x1024xf32>
    %77 = arith.addf %71, %76 : vector<8x1024xf32>
    %78 = vector.extract_strided_slice %16 {offsets = [0, 10, 0], sizes = [8, 1, 128], strides = [1, 1, 1]} : vector<8x16x128xf32> to vector<8x1x128xf32>
    %79 = vector.shape_cast %78 : vector<8x1x128xf32> to vector<8x128xf32>
    %80 = arith.truncf %79 : vector<8x128xf32> to vector<8x128xbf16>
    %c1280 = arith.constant 1280 : index
    %c0_33 = arith.constant 0 : index
    %81 = vector.load %arg5[%c1280, %c0_33] : memref<2048x1024xbf16, #tpu.memory_space<vmem>>, vector<128x1024xbf16>
    %cst_34 = arith.constant dense<0.000000e+00> : vector<8x1024xf32>
    %82 = tpu.matmul %80, %81, %cst_34 {dimension_numbers = #tpu.dot_dimension_numbers<[1], [0], [0], [1], [0, 0, 1, 1], [], []>} : vector<8x128xbf16>, vector<128x1024xbf16>, vector<8x1024xf32> -> vector<8x1024xf32>
    %83 = arith.addf %77, %82 : vector<8x1024xf32>
    %84 = vector.extract_strided_slice %16 {offsets = [0, 11, 0], sizes = [8, 1, 128], strides = [1, 1, 1]} : vector<8x16x128xf32> to vector<8x1x128xf32>
    %85 = vector.shape_cast %84 : vector<8x1x128xf32> to vector<8x128xf32>
    %86 = arith.truncf %85 : vector<8x128xf32> to vector<8x128xbf16>
    %c1408 = arith.constant 1408 : index
    %c0_35 = arith.constant 0 : index
    %87 = vector.load %arg5[%c1408, %c0_35] : memref<2048x1024xbf16, #tpu.memory_space<vmem>>, vector<128x1024xbf16>
    %cst_36 = arith.constant dense<0.000000e+00> : vector<8x1024xf32>
    %88 = tpu.matmul %86, %87, %cst_36 {dimension_numbers = #tpu.dot_dimension_numbers<[1], [0], [0], [1], [0, 0, 1, 1], [], []>} : vector<8x128xbf16>, vector<128x1024xbf16>, vector<8x1024xf32> -> vector<8x1024xf32>
    %89 = arith.addf %83, %88 : vector<8x1024xf32>
    %90 = vector.extract_strided_slice %16 {offsets = [0, 12, 0], sizes = [8, 1, 128], strides = [1, 1, 1]} : vector<8x16x128xf32> to vector<8x1x128xf32>
    %91 = vector.shape_cast %90 : vector<8x1x128xf32> to vector<8x128xf32>
    %92 = arith.truncf %91 : vector<8x128xf32> to vector<8x128xbf16>
    %c1536 = arith.constant 1536 : index
    %c0_37 = arith.constant 0 : index
    %93 = vector.load %arg5[%c1536, %c0_37] : memref<2048x1024xbf16, #tpu.memory_space<vmem>>, vector<128x1024xbf16>
    %cst_38 = arith.constant dense<0.000000e+00> : vector<8x1024xf32>
    %94 = tpu.matmul %92, %93, %cst_38 {dimension_numbers = #tpu.dot_dimension_numbers<[1], [0], [0], [1], [0, 0, 1, 1], [], []>} : vector<8x128xbf16>, vector<128x1024xbf16>, vector<8x1024xf32> -> vector<8x1024xf32>
    %95 = arith.addf %89, %94 : vector<8x1024xf32>
    %96 = vector.extract_strided_slice %16 {offsets = [0, 13, 0], sizes = [8, 1, 128], strides = [1, 1, 1]} : vector<8x16x128xf32> to vector<8x1x128xf32>
    %97 = vector.shape_cast %96 : vector<8x1x128xf32> to vector<8x128xf32>
    %98 = arith.truncf %97 : vector<8x128xf32> to vector<8x128xbf16>
    %c1664 = arith.constant 1664 : index
    %c0_39 = arith.constant 0 : index
    %99 = vector.load %arg5[%c1664, %c0_39] : memref<2048x1024xbf16, #tpu.memory_space<vmem>>, vector<128x1024xbf16>
    %cst_40 = arith.constant dense<0.000000e+00> : vector<8x1024xf32>
    %100 = tpu.matmul %98, %99, %cst_40 {dimension_numbers = #tpu.dot_dimension_numbers<[1], [0], [0], [1], [0, 0, 1, 1], [], []>} : vector<8x128xbf16>, vector<128x1024xbf16>, vector<8x1024xf32> -> vector<8x1024xf32>
    %101 = arith.addf %95, %100 : vector<8x1024xf32>
    %102 = vector.extract_strided_slice %16 {offsets = [0, 14, 0], sizes = [8, 1, 128], strides = [1, 1, 1]} : vector<8x16x128xf32> to vector<8x1x128xf32>
    %103 = vector.shape_cast %102 : vector<8x1x128xf32> to vector<8x128xf32>
    %104 = arith.truncf %103 : vector<8x128xf32> to vector<8x128xbf16>
    %c1792 = arith.constant 1792 : index
    %c0_41 = arith.constant 0 : index
    %105 = vector.load %arg5[%c1792, %c0_41] : memref<2048x1024xbf16, #tpu.memory_space<vmem>>, vector<128x1024xbf16>
    %cst_42 = arith.constant dense<0.000000e+00> : vector<8x1024xf32>
    %106 = tpu.matmul %104, %105, %cst_42 {dimension_numbers = #tpu.dot_dimension_numbers<[1], [0], [0], [1], [0, 0, 1, 1], [], []>} : vector<8x128xbf16>, vector<128x1024xbf16>, vector<8x1024xf32> -> vector<8x1024xf32>
    %107 = arith.addf %101, %106 : vector<8x1024xf32>
    %108 = vector.extract_strided_slice %16 {offsets = [0, 15, 0], sizes = [8, 1, 128], strides = [1, 1, 1]} : vector<8x16x128xf32> to vector<8x1x128xf32>
    %109 = vector.shape_cast %108 : vector<8x1x128xf32> to vector<8x128xf32>
    %110 = arith.truncf %109 : vector<8x128xf32> to vector<8x128xbf16>
    %c1920 = arith.constant 1920 : index
    %c0_43 = arith.constant 0 : index
    %111 = vector.load %arg5[%c1920, %c0_43] : memref<2048x1024xbf16, #tpu.memory_space<vmem>>, vector<128x1024xbf16>
    %cst_44 = arith.constant dense<0.000000e+00> : vector<8x1024xf32>
    %112 = tpu.matmul %110, %111, %cst_44 {dimension_numbers = #tpu.dot_dimension_numbers<[1], [0], [0], [1], [0, 0, 1, 1], [], []>} : vector<8x128xbf16>, vector<128x1024xbf16>, vector<8x1024xf32> -> vector<8x1024xf32>
    %113 = arith.addf %107, %112 : vector<8x1024xf32>
    %c0_45 = arith.constant 0 : index
    %c0_46 = arith.constant 0 : index
    %114 = vector.load %arg6[%c0_45, %c0_46] : memref<1x1024xf32, #tpu.memory_space<vmem>>, vector<1x1024xf32>
    %115 = vector.broadcast %114 : vector<1x1024xf32> to vector<8x1024xf32>
    %116 = arith.addf %113, %115 : vector<8x1024xf32>
    %cst_47 = arith.constant 0.000000e+00 : f32
    %117 = vector.broadcast %cst_47 : f32 to vector<8x1024xf32>
    %118 = arith.maximumf %116, %117 : vector<8x1024xf32>
    %119 = arith.truncf %118 : vector<8x1024xf32> to vector<8x1024xbf16>
    %c0_48 = arith.constant 0 : index
    %c0_49 = arith.constant 0 : index
    %120 = vector.load %arg7[%c0_48, %c0_49] : memref<1024x128xbf16, #tpu.memory_space<vmem>>, vector<1024x128xbf16>
    %cst_50 = arith.constant dense<0.000000e+00> : vector<8x128xf32>
    %121 = tpu.matmul %119, %120, %cst_50 {dimension_numbers = #tpu.dot_dimension_numbers<[1], [0], [0], [1], [0, 0, 1, 1], [], []>} : vector<8x1024xbf16>, vector<1024x128xbf16>, vector<8x128xf32> -> vector<8x128xf32>
    %c0_51 = arith.constant 0 : index
    %c0_52 = arith.constant 0 : index
    %122 = vector.load %arg8[%c0_51, %c0_52] : memref<1x128xf32, #tpu.memory_space<vmem>>, vector<1x128xf32>
    %123 = vector.broadcast %122 : vector<1x128xf32> to vector<8x128xf32>
    %124 = arith.addf %121, %123 : vector<8x128xf32>
    %c0_53 = arith.constant 0 : index
    %c0_54 = arith.constant 0 : index
    %125 = vector.load %arg9[%c0_53, %c0_54] : memref<8x128xf32, #tpu.memory_space<vmem>>, vector<8x128xf32>
    tpu.vector_store %arg9[%c0_53, %c0_54], %124 {strides = array<i32>} : memref<8x128xf32, #tpu.memory_space<vmem>>, vector<8x128xf32>,
    return
  }
  func.func @transform_0(%arg0: i32) -> (i32, i32, i32) {
    %c0_i32 = arith.constant 0 : i32
    %c0_i32_0 = arith.constant 0 : i32
    %c0_i32_1 = arith.constant 0 : i32
    return %arg0, %c0_i32, %c0_i32_0 : i32, i32, i32
  }
  func.func @transform_1(%arg0: i32) -> (i32, i32) {
    %c0_i32 = arith.constant 0 : i32
    %c0_i32_0 = arith.constant 0 : i32
    %c0_i32_1 = arith.constant 0 : i32
    return %c0_i32, %c0_i32_0 : i32, i32
  }
  func.func @transform_2(%arg0: i32) -> (i32, i32) {
    %c0_i32 = arith.constant 0 : i32
    %c0_i32_0 = arith.constant 0 : i32
    %c0_i32_1 = arith.constant 0 : i32
    return %c0_i32, %c0_i32_0 : i32, i32
  }
  func.func @transform_3(%arg0: i32) -> (i32, i32) {
    %c0_i32 = arith.constant 0 : i32
    %c0_i32_0 = arith.constant 0 : i32
    %c0_i32_1 = arith.constant 0 : i32
    return %c0_i32, %c0_i32_0 : i32, i32
  }
  func.func @transform_4(%arg0: i32) -> (i32, i32) {
    %c0_i32 = arith.constant 0 : i32
    %c0_i32_0 = arith.constant 0 : i32
    %c0_i32_1 = arith.constant 0 : i32
    return %c0_i32, %c0_i32_0 : i32, i32
  }
  func.func @transform_5(%arg0: i32) -> (i32, i32) {
    %c0_i32 = arith.constant 0 : i32
    %c0_i32_0 = arith.constant 0 : i32
    %c0_i32_1 = arith.constant 0 : i32
    return %c0_i32, %c0_i32_0 : i32, i32
  }
  func.func @transform_6(%arg0: i32) -> (i32, i32) {
    %c0_i32 = arith.constant 0 : i32
    %c0_i32_0 = arith.constant 0 : i32
    %c0_i32_1 = arith.constant 0 : i32
    return %c0_i32, %c0_i32_0 : i32, i32
  }
  func.func @transform_7(%arg0: i32) -> (i32, i32) {
    %c0_i32 = arith.constant 0 : i32
    %c0_i32_0 = arith.constant 0 : i32
    %c0_i32_1 = arith.constant 0 : i32
    return %c0_i32, %c0_i32_0 : i32, i32
  }
  func.func @transform_8(%arg0: i32) -> (i32, i32) {
    %c0_i32 = arith.constant 0 : i32
    %c0_i32_0 = arith.constant 0 : i32
    return %arg0, %c0_i32 : i32, i32
  }
}

</mosaic_0001>

<bundles_post_ra>
// kernel: tpu_custom_call.1
= control target key start
LH: loop header
LB: loop body
LE: loop exit
PB: predicated region body
PF: predicated region fallthrough
CT: control target
= control target key end

     0   :  { %13 = vsyncpa [#allocation3], 0  ;;  %s15250_s0 = inlined_call_operand.vmem [shape: bf16[16,196,128], index: 0, kind: input, shape index: {}]   ;;  %s15251_s1 = inlined_call_operand.hbm [shape: bf16[16,196], index: 1, kind: input, shape index: {}]   ;;  %s15252_s2 = inlined_call_operand.hbm [shape: bf16[128,128], index: 2, kind: input, shape index: {}]   ;;  %s15253_s3 = inlined_call_operand.hbm [shape: f32[1,128], index: 3, kind: input, shape index: {}]   ;;  %s15254_s4 = inlined_call_operand.hbm [shape: bf16[2048,1024], index: 4, kind: input, shape index: {}]   ;;  %s15255_s5 = inlined_call_operand.hbm [shape: f32[1,1024], index: 5, kind: input, shape index: {}]   ;;  %s15256_s6 = inlined_call_operand.hbm [shape: bf16[1024,128], index: 6, kind: input, shape index: {}]   ;;  %s15257_s7 = inlined_call_operand.hbm [shape: f32[1,128], index: 7, kind: input, shape index: {}]   ;;  %s15258_s8 = inlined_call_operand.hbm [shape: f32[16,128], index: 8, kind: output, shape index: {}]  }
   0x1   :  { %14 = vsyncpa [#allocation6], 0 }
   0x2   :  { %15 = vsyncpa [#allocation9], 0 }
   0x3   :  { %16 = vsyncpa [#allocation12], 0 }
   0x4   :  { %17 = vsyncpa [#allocation4], 0 }
   0x5   :  { %19 = vsyncpa [#allocation4 + $0x1], 0  ;;  %s13852_s27 = smov 0   ;;  %s13854_s28 = smov 0  }
   0x6   :  { %s13856_s29 = smov 0   ;;  %s13858_s30 = smov 0  }
   0x7 LB: > { %s13873_s9 = sadd.s32 4294967295, %s13790_s30   ;;  %s11861_s10 = sadd.s32 4294967294, %s13790_s30   ;;  %s13790_s30 = sphi %s13858_s30, %s15287_s30   ;;  %s13786_s29 = sphi %s13856_s29, %s15286_s29   ;;  %s13782_s28 = sphi %s13854_s28, %s15285_s28   ;;  %s13778_s27 = sphi %s13852_s27, %s15284_s27  }
   0x8   : > { %s13877_s11 = sadd.s32 1, %s13790_s30   ;;  %s205_s12 = sadd.s32 1, %s13786_s29 }
   0x9   : > { %s202_s13 = ssub.s32 %s13790_s30, %s13877_s11  ;;  %p215_p0 = scmp.ne.s32.totalorder %s13786_s29, %s13782_s28 }
   0xa   : > { %p203_p1 = scmp.eq.s32.totalorder %s202_s13, 0  ;;  %p216_p2 = scmp.eq.s32.totalorder %s13873_s9, 1 }
   0xb   : > { %p221_p3 = scmp.ne.s32.totalorder %s13782_s28, %s13778_s27  ;;  %p222_p4 = scmp.eq.s32.totalorder %s11861_s10, 1 }
   0xc   : > { %s13888_s14 = scalar_select %p203_p1, %s13786_s29, %s205_s12  }
   0xd   : > { %p13890_p5 = por %p216_p2, %p215_p0  ;;  %p13894_p6 = por %p222_p4, %p221_p3 }
   0xe   : > { %15264 = sst [smem:[#allocation20_spill]] %s13888_s14  ;;  %p11862_p7 = scmp.ge.s32.totalorder %s13790_s30, 1 }
   0xf   : > { %s15265_s15 = scalar_select %p13890_p5, 1, 0 }
  0x10   : > { %s15266_s16 = scalar_select %p13894_p6, 1, 0 }
  0x11   : > { %p229_p8 = scmp.lt.s32.totalorder %s13790_s30, 3  ;;  %p15261_p9 = scmp.eq.s32.totalorder %s13873_s9, 0 }
  0x12   : > { %s13792_s18 = smov [#allocation5]   ;;  %s13793_s21 = smov [#allocation8]  }
  0x13   : > { %p13901_p10 = pnand %p11862_p7, %p229_p8  ;;  %s254_s19 = sshll.u32 %s13792_s18, 4  ;;  %s255_s19 = int_to_ptr.vmem [resolvable:$true] %s254_s19 }
  0x14   : > { %s278_s22 = sshll.u32 %s13793_s21, 4  ;;  %s13543_s24 = scalar_lea.vmem %s255_s19, 1024  ;;  %s279_s22 = int_to_ptr.vmem [resolvable:$true] %s278_s22 }
  0x15   : > { %s15267_s17 = scalar_select %p13901_p10, 1, 0 }
  0x16   : > { %p13265_p11 = pneg %p13901_p10  ;;  %p13544_p0 = scmp.ne.s32.totalorder %s255_s19, %s13543_s24 }
  0x17   : > { %p13551_p3 = scmp.lt.s32.totalorder %s255_s19, %s255_s19  ;;  %p13552_p4 = scmp.lt.s32.totalorder %s13543_s24, %s13543_s24 }
  0x18   : > { %p13909_p12 = pnand %p15261_p9, %p13265_p11 }
  0x19   : > { %p13553_p7 = por %p13552_p4, %p13551_p3 }
  0x1a   : > { %p13915_p13 = pneg %p13909_p12 }
  0x1c   : > { %p13546_p1 = pnand %p13544_p0, %p13915_p13 }
  0x1e   : > { %p13547_p2 = pneg %p13546_p1 }
  0x20   : > { %p13554_p8 = pnand %p13553_p7, %p13547_p2 }
  0x22   : > { %13557 = shalt.err (!%p13554_p8)
}
  0x23   : > { %s15259_s25 = smov 64   ;;  %s15260_s26 = smov 4  }
  0x24   : > { %13271 = dma.hbm_to_vmem [thread:$0]  (!%p13909_p12), %s15252_s2, 1024, %s255_s19, [#allocation6], %s15259_s25, %s15259_s25, %s15260_s26  }
  0x25   : > { %s13569_s13 = scalar_lea.vmem %s279_s22, 131072  ;;  %p13577_p3 = scmp.lt.s32.totalorder %s279_s22, %s279_s22 }
  0x26   : > { %p13570_p11 = scmp.ne.s32.totalorder %s279_s22, %s13569_s13  ;;  %p13578_p2 = scmp.lt.s32.totalorder %s13569_s13, %s13569_s13 }
  0x28   : > { %p13572_p0 = pnand %p13570_p11, %p13915_p13  ;;  %p13579_p4 = por %p13578_p2, %p13577_p3 }
  0x2a   : > { %p13573_p1 = pneg %p13572_p0 }
  0x2c   : > { %p13580_p7 = pnand %p13579_p4, %p13573_p1 }
  0x2e   : > { %13583 = shalt.err (!%p13580_p7)
}
  0x2f   : > { %s13796_s18 = smov 512   ;;  %s13797_s21 = smov 32  }
  0x30   : > { %13277 = dma.hbm_to_vmem [thread:$0]  (!%p13909_p12), %s15254_s4, 131072, %s279_s22, [#allocation9], %s13796_s18, %s13796_s18, %s13797_s21  }
  0x31   : > { %s13798_s19 = smov [#allocation11]   ;;  %s13799_s12 = smov [#allocation2]  }
  0x32   : > { %s302_s10 = sshll.u32 %s13798_s19, 4  ;;  %s241_s25 = sshll.u32 %s13799_s12, 4  ;;  %s303_s10 = int_to_ptr.vmem [resolvable:$true] %s302_s10  ;;  %s242_s25 = int_to_ptr.vmem [resolvable:$true] %s241_s25 }
  0x33   : > { %s13595_s26 = scalar_lea.vmem %s303_s10, 8192  ;;  %p13603_p1 = scmp.lt.s32.totalorder %s303_s10, %s303_s10 }
  0x34   : > { %p13596_p8 = scmp.ne.s32.totalorder %s303_s10, %s13595_s26  ;;  %p13604_p3 = scmp.lt.s32.totalorder %s13595_s26, %s13595_s26 }
  0x36   : > { %p13598_p11 = pnand %p13596_p8, %p13915_p13  ;;  %p13605_p2 = por %p13604_p3, %p13603_p1 }
  0x38   : > { %p13599_p0 = pneg %p13598_p11 }
  0x3a   : > { %p13606_p4 = pnand %p13605_p2, %p13599_p0 }
  0x3c   : > { %13609 = shalt.err (!%p13606_p4)
}
  0x3d   : > { %s15270_s14 = smov 4   ;;  %s15271_s22 = smov 64  }
  0x3e   : > { %13283 = dma.hbm_to_vmem [thread:$0]  (!%p13909_p12), %s15256_s6, 8192, %s303_s10, [#allocation12], %s15271_s22, %s15271_s22, %s15270_s14  }
  0x3f   : > { %s13621_s21 = scalar_lea.vmem %s242_s25, 256  ;;  %p13629_p9 = scmp.lt.s32.totalorder %s242_s25, %s242_s25 }
  0x40   : > { %p13622_p7 = scmp.ne.s32.totalorder %s242_s25, %s13621_s21  ;;  %p13630_p6 = scmp.lt.s32.totalorder %s13621_s21, %s13621_s21 }
  0x42   : > { %p13624_p8 = pnand %p13622_p7, %p13915_p13  ;;  %p13631_p1 = por %p13630_p6, %p13629_p9 }
  0x44   : > { %p13625_p11 = pneg %p13624_p8 }
  0x46   : > { %p13632_p0 = pnand %p13631_p1, %p13625_p11 }
  0x48   : > { %13635 = shalt.err (!%p13632_p0)
}
  0x49   : > { %s13800_s26 = smov 128   ;;  %s13801_s24 = smov 8  }
  0x4a   : > { %13268 = dma.hbm_to_vmem [thread:$0]  (!%p13909_p12), %s15251_s1, 256, %s242_s25, [#allocation3], %s13800_s26, %s13800_s26, %s13801_s24  }
  0x4b   : > { %s13802_s10 = smov [#allocation7]   ;;  %s13803_s22 = smov [#allocation10]  }
  0x4c   : > { %s268_s14 = sshll.u32 %s13802_s10, 4  ;;  %s292_s13 = sshll.u32 %s13803_s22, 4  ;;  %s269_s14 = int_to_ptr.vmem [resolvable:$true] %s268_s14  ;;  %s293_s13 = int_to_ptr.vmem [resolvable:$true] %s292_s13 }
  0x4d   : > { %s13647_s18 = scalar_lea.vmem %s269_s14, 16  ;;  %s13654_s21 = scalar_lea.vmem %s269_s14, 32 }
  0x4e   : > { %p13648_p3 = scmp.ne.s32.totalorder %s269_s14, %s13647_s18  ;;  %p13655_p2 = scmp.lt.s32.totalorder %s269_s14, %s269_s14 }
  0x4f   : > { %p13656_p4 = scmp.lt.s32.totalorder %s13654_s21, %s13647_s18 }
  0x50   : > { %p13650_p6 = pnand %p13648_p3, %p13915_p13 }
  0x51   : > { %p13657_p7 = por %p13656_p4, %p13655_p2 }
  0x52   : > { %p13651_p9 = pneg %p13650_p6 }
  0x54   : > { %p13658_p8 = pnand %p13657_p7, %p13651_p9 }
  0x56   : > { %13661 = shalt.err (!%p13658_p8)
}
  0x57   : > { %13274 = dma.hbm_to_vmem [thread:$0]  (!%p13909_p12), %s15253_s3, 16, %s269_s14, [#allocation6]  }
  0x58   : > { %s13673_s24 = scalar_lea.vmem %s293_s13, 128  ;;  %p13681_p3 = scmp.lt.s32.totalorder %s293_s13, %s293_s13 }
  0x59   : > { %p13674_p11 = scmp.ne.s32.totalorder %s293_s13, %s13673_s24  ;;  %p13682_p6 = scmp.lt.s32.totalorder %s13673_s24, %s13673_s24 }
  0x5b   : > { %p13676_p1 = pnand %p13674_p11, %p13915_p13  ;;  %p13683_p5 = por %p13682_p6, %p13681_p3 }
  0x5d   : > { %p13677_p0 = pneg %p13676_p1 }
  0x5f   : > { %p13684_p10 = pnand %p13683_p5, %p13677_p0 }
  0x61   : > { %13687 = shalt.err (!%p13684_p10)
}
  0x62   : > { %13280 = dma.hbm_to_vmem [thread:$0]  (!%p13909_p12), %s15255_s5, 128, %s293_s13, [#allocation9]  }
  0x63   : > { %s13804_s10 = smov [#allocation13]  }
  0x64   : > { %s316_s22 = sshll.u32 %s13804_s10, 4  ;;  %s317_s22 = int_to_ptr.vmem [resolvable:$true] %s316_s22 }
  0x65   : > { %s13699_s14 = scalar_lea.vmem %s317_s22, 16  ;;  %s13706_s18 = scalar_lea.vmem %s317_s22, 32 }
  0x66   : > { %p13700_p9 = scmp.ne.s32.totalorder %s317_s22, %s13699_s14  ;;  %p13707_p7 = scmp.lt.s32.totalorder %s317_s22, %s317_s22 }
  0x67   : > { %p13708_p8 = scmp.lt.s32.totalorder %s13706_s18, %s13699_s14 }
  0x68   : > { %p13702_p2 = pnand %p13700_p9, %p13915_p13 }
  0x69   : > { %p13709_p5 = por %p13708_p8, %p13707_p7 }
  0x6a   : > { %p13703_p4 = pneg %p13702_p2 }
  0x6c   : > { %p13710_p10 = pnand %p13709_p5, %p13703_p4 }
  0x6e   : > { %13713 = shalt.err (!%p13710_p10)
}
  0x6f   : > { %13286 = dma.hbm_to_vmem [thread:$0]  (!%p13909_p12), %s15257_s7, 16, %s317_s22, [#allocation12]  }
  0x70   : > { %p15272_p11 = scmp.ne.s32.totalorder %s15267_s17, 0 }
  0x71   : > { %p15273_p1 = scmp.eq.s32.totalorder (!%p15272_p11), %s13873_s9, 0 }
  0x72   : > { %339 = sbr.rel (%p15272_p11) target bundleno = 2165 (0x875), region = 52 }
  0x77   : > { %13757 = dma.done.wait (%p15273_p1), [#allocation3], 256   ;;  %p15274_p13 = pmov %p15273_p1 }
  0x78   : > { %p15275_p0 = pmov %p15273_p1 }
  0x79   : > { %13759 = vsyncadd (%p15274_p13), [#allocation3], 4294967040 }
  0x7a   : > { %13761 = dma.done.wait (%p15275_p0), [#allocation6], 1040   ;;  %p15276_p3 = pmov %p15275_p0 }
  0x7b   : > { %p15277_p6 = pmov %p15275_p0 }
  0x7c   : > { %13763 = vsyncadd (%p15276_p3), [#allocation6], 4294966256 }
  0x7d   : > { %13765 = dma.done.wait (%p15277_p6), [#allocation9], 131200   ;;  %p15278_p12 = pmov %p15275_p0 }
  0x7e   : > { %p15279_p9 = pmov %p15275_p0 }
  0x7f   : > { %13767 = vsyncadd (%p15278_p12), [#allocation9], 4294836096 }
  0x80   : > { %13769 = dma.done.wait (%p15279_p9), [#allocation12], 8208   ;;  %p15280_p2 = pmov %p15275_p0 }
  0x81   : > { %s11880_s17 = sshll.u32 %s13873_s9, 3  ;;  %v13805_v0 = vmov 0   ;;  %vm692_vm0 = vcmask 556032   ;;  %v14000_v1 = vld [vmem:[#allocation2 + $0x4] ss:$8 sps:$4 sm:$0xff]   ;;  %vm696_vm1 = vcmask 1041408  }
  0x82   : > { %13771 = vsyncadd (%p15280_p2), [#allocation12], 4294959088  ;;  %700 = vmatprep.subr.bf16.mxu0 %v13805_v0  ;;  %819 = vmatprep.subr.bf16.mxu1 %v13805_v0  ;;  %p399_p4 = scmp.lt.s32.totalorder %s11880_s17, 15  ;;  %v14058_v30 = vld [vmem:[#allocation2] ss:$8 sps:$4 sm:$0xff]   ;;  %vm1935_vm2 = vcmask 1041409  }
  0x83   : > { %11897 = vmatprep.mubr.msk.bf16.mxu0 %vm692_vm0, %v14000_v1  ;;  %11911 = vmatprep.mubr.msk.bf16.mxu1 %vm692_vm0, %v14000_v1  ;;  %vm1938_vm3 = vcmask 1042434   ;;  %vm1941_vm4 = vcmask 1043459   ;;  %vm1944_vm5 = vcmask 1044484   ;;  %vm1947_vm6 = vcmask 1045509   ;;  %s395_s24 = sand.u32 1, %s13782_s28   ;;  %s13095_s12 = sshll.u32 %s13873_s9, 7 }
  0x84   : > { %s15289_s17 = smov (!%p399_p4, %s11880_s17), 15  ;;  %vm1950_vm7 = vcmask 1046534   ;;  %vm1953_vm8 = vcmask 1047559   ;;  %s11879_s19 = sshll.u32 %s395_s24, 3 }
  0x85   : > { %s13234_s20 = smul.u32 100, %s15289_s17  ;;  %s397_s10 = scalar_lea.vmem [#allocation14], %s11879_s19 }
  0x86   : > { %s11733_s22 = sshll.u32 %s397_s10, 4  ;;  %s11731_s21 = scalar_lea.hbm %s15258_s8, %s13095_s12  ;;  %s11734_s22 = int_to_ptr.vmem [resolvable:$true] %s11733_s22 }
  0x87   : > { %s13998_s26 = scalar_lea.vmem %s15250_s0, %s13234_s20  ;;  %s11720_s25 = scalar_lea.sflag [#allocation4], %s395_s24 }
  0x88   : > { %v13352_v2 = vld [vmem:[%s13998_s26 + $0x38] sm:$0xff]   ;;  %v13354_v4 = vld [vmem:[%s13998_s26 + $0x30] sm:$0xff]   ;;  %v13356_v6 = vld [vmem:[%s13998_s26 + $0x28] sm:$0xff]   ;;  %s13714_s17 = scalar_lea.vmem %s11734_s22, 128  ;;  %p15281_p8 = scmp.ne.s32.totalorder %s15265_s15, 0 }
  0x89   : > { %v13353_v3 = vld [vmem:[%s13998_s26 + $0x9c] sm:$0xff]   ;;  %701 = vmatpush1.bf16.msra.mxu0 %v13352_v2  ;;  %v13355_v5 = vld [vmem:[%s13998_s26 + $0x94] sm:$0xff]   ;;  %v13357_v7 = vld [vmem:[%s13998_s26 + $0x8c] sm:$0xff]   ;;  %p13715_p7 = scmp.ne.s32.totalorder %s11734_s22, %s13714_s17  ;;  %s13806_s9 = smov [#allocation14]  }
  0x8a   : > { %820 = vmatpush1.bf16.msra.mxu1 %v13353_v3  ;;  %702 = vmatprep.subr.bf16.mxu0 %v13805_v0  ;;  %v13358_v8 = vld [vmem:[%s13998_s26 + $0x20] sm:$0xff]   ;;  %v13360_v10 = vld [vmem:[%s13998_s26 + $0x18] sm:$0xff]   ;;  %v13362_v12 = vld [vmem:[%s13998_s26 + $0x10] sm:$0xff]   ;;  %s13718_s20 = sshll.u32 %s13806_s9, 4  ;;  %s13719_s20 = int_to_ptr.vmem [resolvable:$false] %s13718_s20 }
  0x8b   : > { %821 = vmatprep.subr.bf16.mxu1 %v13805_v0  ;;  %v13359_v9 = vld [vmem:[%s13998_s26 + $0x84] sm:$0xff]   ;;  %v13361_v11 = vld [vmem:[%s13998_s26 + $0x7c] sm:$0xff]   ;;  %v13363_v13 = vld [vmem:[%s13998_s26 + $0x74] sm:$0xff]   ;;  %p13716_p5 = pnand %p13715_p7, %p15281_p8  ;;  %s13720_s23 = scalar_lea.vmem %s13719_s20, 256 }
  0x8c   : > { %v13364_v14 = vld [vmem:[%s13998_s26 + $0x8] sm:$0xff]   ;;  %v13368_v16 = vld [vmem:[%s13998_s26 + $0x60] ss:$0 sps:$4 sm:$0x33]   ;;  %v13370_v22 = vld [vmem:[%s13998_s26 + $0x58] sm:$0xff]   ;;  %p13721_p11 = scmp.lt.s32.totalorder %s11734_s22, %s13719_s20  ;;  %p13722_p1 = scmp.lt.s32.totalorder %s13720_s23, %s13714_s17 }
  0x8d   : > { %703 = vmatpush1.bf16.msra.mxu0 %v13354_v4  ;;  %v13365_v15 = vld [vmem:[%s13998_s26 + $0x6c] sm:$0xff]   ;;  %v13366_v17 = vld [vmem:[%s13998_s26] sm:$0xff]   ;;  %v698_v20 = vsel %vm696_vm1, %v13368_v16, 0  ;;  %v13373_v25 = vld [vmem:[%s13998_s26 + $0xb4] sm:$0xff]   ;;  %p13717_p10 = pneg %p13716_p5 }
  0x8e   : > { %822 = vmatpush1.bf16.msra.mxu1 %v13355_v5  ;;  %704 = vmatprep.subr.bf16.mxu0 %v13805_v0  ;;  %v13369_v18 = vld [vmem:[%s13998_s26 + $0xc4] ss:$0 sps:$4 sm:$0x33]   ;;  %v13371_v23 = vld [vmem:[%s13998_s26 + $0xbc] sm:$0xff]   ;;  %v13372_v24 = vld [vmem:[%s13998_s26 + $0x50] sm:$0xff]   ;;  %p13723_p13 = por %p13722_p1, %p13721_p11 }
  0x8f   : > { %823 = vmatprep.subr.bf16.mxu1 %v13805_v0  ;;  %v13367_v19 = vld [vmem:[%s13998_s26 + $0x64] sm:$0xff]   ;;  %v817_v21 = vsel %vm696_vm1, %v13369_v18, 0  ;;  %v13375_v27 = vld [vmem:[%s13998_s26 + $0xac] sm:$0xff]   ;;  %v13383_v33 = vld [vmem:[%s13998_s26 + $0xf8] sm:$0xff]  }
  0x90   : > { %v13374_v26 = vld [vmem:[%s13998_s26 + $0x48] sm:$0xff]   ;;  %v13376_v28 = vld [vmem:[%s13998_s26 + $0x40] sm:$0xff]   ;;  %v13385_v35 = vld [vmem:[%s13998_s26 + $0xf0] sm:$0xff]   ;;  %p13724_p0 = pnand %p13723_p13, %p13717_p10 }
  0x91   : > { %705 = vmatpush1.bf16.msra.mxu0 %v13356_v6  ;;  %v13377_v29 = vld [vmem:[%s13998_s26 + $0xa4] sm:$0xff]   ;;  %v13384_v34 = vld [vmem:[%s13998_s26 + $0x15c] sm:$0xff]   ;;  %v13386_v36 = vld [vmem:[%s13998_s26 + $0x154] sm:$0xff]  }
  0x92   : > { %824 = vmatpush1.bf16.msra.mxu1 %v13357_v7  ;;  %706 = vmatprep.subr.bf16.mxu0 %v13805_v0  ;;  %v13381_v31 = vld [vmem:[%s13998_s26 + $0x100] sm:$0xff]   ;;  %v13387_v37 = vld [vmem:[%s13998_s26 + $0xe8] sm:$0xff]   ;;  %v13391_v41 = vld [vmem:[%s13998_s26 + $0xd8] sm:$0xff]  }
  0x93   : > { %825 = vmatprep.subr.bf16.mxu1 %v13805_v0  ;;  %v13382_v32 = vld [vmem:[%s13998_s26 + $0x164] sm:$0xff]   ;;  %v13388_v38 = vld [vmem:[%s13998_s26 + $0x14c] sm:$0xff]   ;;  %v13392_v42 = vld [vmem:[%s13998_s26 + $0x13c] sm:$0xff]  }
  0x94   : > { %v13389_v39 = vld [vmem:[%s13998_s26 + $0xe0] sm:$0xff]   ;;  %v13393_v43 = vld [vmem:[%s13998_s26 + $0xd0] sm:$0xff]   ;;  %v13397_v45 = vld [vmem:[%s13998_s26 + $0x128] ss:$0 sps:$4 sm:$0x33]  }
  0x95   : > { %707 = vmatpush1.bf16.msra.mxu0 %v13358_v8  ;;  %v13390_v40 = vld [vmem:[%s13998_s26 + $0x144] sm:$0xff]   ;;  %v13394_v44 = vld [vmem:[%s13998_s26 + $0x134] sm:$0xff]   ;;  %v13398_v47 = vld [vmem:[%s13998_s26 + $0x18c] ss:$0 sps:$4 sm:$0x33]   ;;  %v936_v49 = vsel %vm696_vm1, %v13397_v45, 0 }
  0x96   : > { %826 = vmatpush1.bf16.msra.mxu1 %v13359_v9  ;;  %708 = vmatprep.subr.bf16.mxu0 %v13805_v0  ;;  %v13395_v46 = vld [vmem:[%s13998_s26 + $0xc8] sm:$0xff]   ;;  %v1055_v50 = vsel %vm696_vm1, %v13398_v47, 0  ;;  %v13399_v51 = vld [vmem:[%s13998_s26 + $0x120] sm:$0xff]   ;;  %v13401_v53 = vld [vmem:[%s13998_s26 + $0x118] sm:$0xff]  }
  0x97   : > { %827 = vmatprep.subr.bf16.mxu1 %v13805_v0  ;;  %v13396_v48 = vld [vmem:[%s13998_s26 + $0x12c] sm:$0xff]   ;;  %v13400_v52 = vld [vmem:[%s13998_s26 + $0x184] sm:$0xff]   ;;  %v13402_v54 = vld [vmem:[%s13998_s26 + $0x17c] sm:$0xff]  }
  0x98   : > { %v13403_v55 = vld [vmem:[%s13998_s26 + $0x110] sm:$0xff]   ;;  %v13405_v57 = vld [vmem:[%s13998_s26 + $0x108] sm:$0xff]   ;;  %v13409_v61 = vld [vmem:[%s13998_s26 + $0x1c0] sm:$0xff]  }
  0x99   : > { %709 = vmatpush1.bf16.msra.mxu0 %v13360_v10  ;;  %v13404_v56 = vld [vmem:[%s13998_s26 + $0x174] sm:$0xff]   ;;  %v13406_v58 = vld [vmem:[%s13998_s26 + $0x16c] sm:$0xff]   ;;  %v13410_v62 = vld [vmem:[%s13998_s26 + $0x224] sm:$0xff]  }
  0x9a   : > { %828 = vmatpush1.bf16.msra.mxu1 %v13361_v11  ;;  %710 = vmatprep.subr.bf16.mxu0 %v13805_v0  ;;  %v13407_v59 = vld [vmem:[%s13998_s26 + $0x1c8] sm:$0xff]   ;;  %v13411_v63 = vld [vmem:[%s13998_s26 + $0x1b8] sm:$0xff]   ;;  %v13413_v3 = vld [vmem:[%s13998_s26 + $0x1b0] sm:$0xff]  }
  0x9b   : > { %829 = vmatprep.subr.bf16.mxu1 %v13805_v0  ;;  %v13408_v60 = vld [vmem:[%s13998_s26 + $0x22c] sm:$0xff]   ;;  %v13412_v2 = vld [vmem:[%s13998_s26 + $0x21c] sm:$0xff]   ;;  %v13414_v4 = vld [vmem:[%s13998_s26 + $0x214] sm:$0xff]  }
  0x9c   : > { %v13415_v5 = vld [vmem:[%s13998_s26 + $0x1a8] sm:$0xff]   ;;  %v13423_v6 = vld [vmem:[%s13998_s26 + $0x1f0] ss:$0 sps:$4 sm:$0x33]   ;;  %v13417_v8 = vld [vmem:[%s13998_s26 + $0x1a0] sm:$0xff]  }
  0x9d   : > { %711 = vmatpush1.bf16.msra.mxu0 %v13362_v12  ;;  %v13416_v7 = vld [vmem:[%s13998_s26 + $0x20c] sm:$0xff]   ;;  %v13418_v9 = vld [vmem:[%s13998_s26 + $0x204] sm:$0xff]   ;;  %v1174_v10 = vsel %vm696_vm1, %v13423_v6, 0  ;;  %v13419_v12 = vld [vmem:[%s13998_s26 + $0x198] sm:$0xff]  }
  0x9e   : > { %830 = vmatpush1.bf16.msra.mxu1 %v13363_v13  ;;  %712 = vmatprep.subr.bf16.mxu0 %v13805_v0  ;;  %v13420_v13 = vld [vmem:[%s13998_s26 + $0x1fc] sm:$0xff]   ;;  %v13425_v16 = vld [vmem:[%s13998_s26 + $0x1e8] sm:$0xff]   ;;  %v13452_v47 = vld [vmem:[%s13998_s26 + $0x314] sm:$0xff]  }
  0x9f   : > { %831 = vmatprep.subr.bf16.mxu1 %v13805_v0  ;;  %v13427_v18 = vld [vmem:[%s13998_s26 + $0x1e0] sm:$0xff]  }
  0xa1   : > { %713 = vmatpush1.bf16.msra.mxu0 %v13364_v14  ;;  %v13421_v14 = vld [vmem:[%s13998_s26 + $0x190] sm:$0xff]  }
  0xa2   : > { %832 = vmatpush1.bf16.msra.mxu1 %v13365_v15  ;;  %714 = vmatprep.subr.bf16.mxu0 %v13805_v0  ;;  %v13422_v15 = vld [vmem:[%s13998_s26 + $0x1f4] sm:$0xff]  }
  0xa3   : > { %833 = vmatprep.subr.bf16.mxu1 %v13805_v0 }
  0xa5   : > { %715 = vmatpush1.bf16.msra.mxu0 %v13366_v17  ;;  %v13426_v17 = vld [vmem:[%s13998_s26 + $0x24c] sm:$0xff]  }
  0xa6   : > { %834 = vmatpush1.bf16.msra.mxu1 %v13367_v19  ;;  %722 = vmatprep.subr.bf16.mxu0 %v13805_v0  ;;  %v13428_v19 = vld [vmem:[%s13998_s26 + $0x244] sm:$0xff]  }
  0xa7   : > { %841 = vmatprep.subr.bf16.mxu1 %v13805_v0 }
  0xa9   : > { %723 = vmatpush2.bf16.msra.mxu0 %v698_v20  ;;  %v13429_v20 = vld [vmem:[%s13998_s26 + $0x1d8] sm:$0xff]  }
  0xaa   : > { %842 = vmatpush2.bf16.msra.mxu1 %v817_v21  ;;  %724 = vmatprep.subr.bf16.mxu0 %v13805_v0  ;;  %v13430_v21 = vld [vmem:[%s13998_s26 + $0x23c] sm:$0xff]  }
  0xab   : > { %843 = vmatprep.subr.bf16.mxu1 %v13805_v0 }
  0xad   : > { %725 = vmatpush2.bf16.msra.mxu0 %v13370_v22  ;;  %v13431_v22 = vld [vmem:[%s13998_s26 + $0x1d0] sm:$0xff]  }
  0xae   : > { %844 = vmatpush2.bf16.msra.mxu1 %v13371_v23  ;;  %726 = vmatprep.subr.bf16.mxu0 %v13805_v0  ;;  %v13432_v23 = vld [vmem:[%s13998_s26 + $0x234] sm:$0xff]  }
  0xaf   : > { %845 = vmatprep.subr.bf16.mxu1 %v13805_v0 }
  0xb1   : > { %727 = vmatpush2.bf16.msra.mxu0 %v13372_v24  ;;  %v13433_v24 = vld [vmem:[%s13998_s26 + $0x290] sm:$0xff]  }
  0xb2   : > { %846 = vmatpush2.bf16.msra.mxu1 %v13373_v25  ;;  %728 = vmatprep.subr.bf16.mxu0 %v13805_v0  ;;  %v13434_v25 = vld [vmem:[%s13998_s26 + $0x2f4] sm:$0xff]  }
  0xb3   : > { %847 = vmatprep.subr.bf16.mxu1 %v13805_v0 }
  0xb5   : > { %729 = vmatpush2.bf16.msra.mxu0 %v13374_v26  ;;  %v13435_v26 = vld [vmem:[%s13998_s26 + $0x288] sm:$0xff]  }
  0xb6   : > { %848 = vmatpush2.bf16.msra.mxu1 %v13375_v27  ;;  %730 = vmatprep.subr.bf16.mxu0 %v13805_v0  ;;  %v13436_v27 = vld [vmem:[%s13998_s26 + $0x2ec] sm:$0xff]  }
  0xb7   : > { %849 = vmatprep.subr.bf16.mxu1 %v13805_v0 }
  0xb9   : > { %731 = vmatpush2.bf16.msra.mxu0 %v13376_v28  ;;  %v13531_v28 = vld [vmem:[#allocation2 + $0x4] ss:$8 sps:$4 sm:$0xff]  }
  0xba   : > { %850 = vmatpush2.bf16.msra.mxu1 %v13377_v29  ;;  %938 = vmatprep.subr.bf16.mxu0 %v13805_v0  ;;  %v13437_v29 = vld [vmem:[%s13998_s26 + $0x280] sm:$0xff]  }
  0xbb   : > { %1057 = vmatprep.subr.bf16.mxu1 %v13805_v0 }
  0xbc   : > { %733 = vmatmul.mubr.bf16.vlgmr.msra.gmra.mxu0 %v14058_v30 }
  0xbd   : > { %852 = vmatmul.mubr.bf16.vlgmr.msra.gmra.mxu1 %v14058_v30  ;;  %939 = vmatpush1.bf16.msra.mxu0 %v13381_v31  ;;  %v13438_v31 = vld [vmem:[%s13998_s26 + $0x2e4] sm:$0xff]  }
  0xbe   : > { %1058 = vmatpush1.bf16.msra.mxu1 %v13382_v32  ;;  %940 = vmatprep.subr.bf16.mxu0 %v13805_v0  ;;  %v13439_v32 = vld [vmem:[%s13998_s26 + $0x278] sm:$0xff]  }
  0xbf   : > { %1059 = vmatprep.subr.bf16.mxu1 %v13805_v0  ;;  %11925 = vmatprep.mubr.msk.bf16.mxu0 %vm692_vm0, %v14000_v1 }
  0xc0   : > { %11939 = vmatprep.mubr.msk.bf16.mxu1 %vm692_vm0, %v14000_v1 }
  0xc1   : > { %941 = vmatpush1.bf16.msra.mxu0 %v13383_v33  ;;  %v13440_v33 = vld [vmem:[%s13998_s26 + $0x2dc] sm:$0xff]  }
  0xc2   : > { %1060 = vmatpush1.bf16.msra.mxu1 %v13384_v34  ;;  %942 = vmatprep.subr.bf16.mxu0 %v13805_v0  ;;  %v13441_v34 = vld [vmem:[%s13998_s26 + $0x270] sm:$0xff]  }
  0xc3   : > { %1061 = vmatprep.subr.bf16.mxu1 %v13805_v0 }
  0xc5   : > { %943 = vmatpush1.bf16.msra.mxu0 %v13385_v35  ;;  %v13442_v35 = vld [vmem:[%s13998_s26 + $0x2d4] sm:$0xff]  }
  0xc6   : > { %1062 = vmatpush1.bf16.msra.mxu1 %v13386_v36  ;;  %944 = vmatprep.subr.bf16.mxu0 %v13805_v0  ;;  %v13443_v36 = vld [vmem:[%s13998_s26 + $0x268] sm:$0xff]  }
  0xc7   : > { %1063 = vmatprep.subr.bf16.mxu1 %v13805_v0 }
  0xc9   : > { %945 = vmatpush1.bf16.msra.mxu0 %v13387_v37  ;;  %v13444_v37 = vld [vmem:[%s13998_s26 + $0x2cc] sm:$0xff]  }
  0xca   : > { %1064 = vmatpush1.bf16.msra.mxu1 %v13388_v38  ;;  %946 = vmatprep.subr.bf16.mxu0 %v13805_v0  ;;  %v13445_v38 = vld [vmem:[%s13998_s26 + $0x260] sm:$0xff]  }
  0xcb   : > { %1065 = vmatprep.subr.bf16.mxu1 %v13805_v0 }
  0xcd   : > { %947 = vmatpush1.bf16.msra.mxu0 %v13389_v39  ;;  %v13446_v39 = vld [vmem:[%s13998_s26 + $0x2c4] sm:$0xff]  }
  0xce   : > { %1066 = vmatpush1.bf16.msra.mxu1 %v13390_v40  ;;  %948 = vmatprep.subr.bf16.mxu0 %v13805_v0  ;;  %v13447_v40 = vld [vmem:[%s13998_s26 + $0x258] sm:$0xff]  }
  0xcf   : > { %1067 = vmatprep.subr.bf16.mxu1 %v13805_v0 }
  0xd1   : > { %949 = vmatpush1.bf16.msra.mxu0 %v13391_v41  ;;  %v13448_v41 = vld [vmem:[%s13998_s26 + $0x2bc] sm:$0xff]  }
  0xd2   : > { %1068 = vmatpush1.bf16.msra.mxu1 %v13392_v42  ;;  %950 = vmatprep.subr.bf16.mxu0 %v13805_v0  ;;  %v13449_v42 = vld [vmem:[%s13998_s26 + $0x2b8] ss:$0 sps:$4 sm:$0x33]  }
  0xd3   : > { %1069 = vmatprep.subr.bf16.mxu1 %v13805_v0 }
  0xd5   : > { %951 = vmatpush1.bf16.msra.mxu0 %v13393_v43  ;;  %v13450_v43 = vld [vmem:[%s13998_s26 + $0x31c] ss:$0 sps:$4 sm:$0x33]  }
  0xd6   : > { %1070 = vmatpush1.bf16.msra.mxu1 %v13394_v44  ;;  %952 = vmatprep.subr.bf16.mxu0 %v13805_v0  ;;  %v1412_v44 = vsel %vm696_vm1, %v13449_v42, 0  ;;  %v1531_v45 = vsel %vm696_vm1, %v13450_v43, 0 }
  0xd7   : > { %1071 = vmatprep.subr.bf16.mxu1 %v13805_v0 }
  0xd9   : > { %953 = vmatpush1.bf16.msra.mxu0 %v13395_v46  ;;  %v13451_v46 = vld [vmem:[%s13998_s26 + $0x2b0] sm:$0xff]  }
  0xda   : > { %1072 = vmatpush1.bf16.msra.mxu1 %v13396_v48  ;;  %960 = vmatprep.subr.bf16.mxu0 %v13805_v0  ;;  %v13453_v48 = vld [vmem:[%s13998_s26 + $0x2a8] sm:$0xff]  }
  0xdb   : > { %1079 = vmatprep.subr.bf16.mxu1 %v13805_v0 }
  0xdd   : > { %961 = vmatpush2.bf16.msra.mxu0 %v936_v49  ;;  %v13454_v49 = vld [vmem:[%s13998_s26 + $0x30c] sm:$0xff]  }
  0xde   : > { %1080 = vmatpush2.bf16.msra.mxu1 %v1055_v50  ;;  %962 = vmatprep.subr.bf16.mxu0 %v13805_v0  ;;  %v13455_v50 = vld [vmem:[%s13998_s26 + $0x2a0] sm:$0xff]  }
  0xdf   : > { %1081 = vmatprep.subr.bf16.mxu1 %v13805_v0 }
  0xe1   : > { %963 = vmatpush2.bf16.msra.mxu0 %v13399_v51  ;;  %v13456_v51 = vld [vmem:[%s13998_s26 + $0x304] sm:$0xff]  }
  0xe2   : > { %1082 = vmatpush2.bf16.msra.mxu1 %v13400_v52  ;;  %964 = vmatprep.subr.bf16.mxu0 %v13805_v0  ;;  %v13457_v52 = vld [vmem:[%s13998_s26 + $0x298] sm:$0xff]  }
  0xe3   : > { %1083 = vmatprep.subr.bf16.mxu1 %v13805_v0 }
  0xe5   : > { %965 = vmatpush2.bf16.msra.mxu0 %v13401_v53  ;;  %v13458_v53 = vld [vmem:[%s13998_s26 + $0x2fc] sm:$0xff]  }
  0xe6   : > { %1084 = vmatpush2.bf16.msra.mxu1 %v13402_v54  ;;  %966 = vmatprep.subr.bf16.mxu0 %v13805_v0  ;;  %v13459_v54 = vld [vmem:[#allocation5 + $0x38] sm:$0xff]  }
  0xe7   : > { %1085 = vmatprep.subr.bf16.mxu1 %v13805_v0 }
  0xe9   : > { %967 = vmatpush2.bf16.msra.mxu0 %v13403_v55  ;;  %v13460_v55 = vld [vmem:[#allocation5 + $0x30] sm:$0xff]  }
  0xea   : > { %1086 = vmatpush2.bf16.msra.mxu1 %v13404_v56  ;;  %968 = vmatprep.subr.bf16.mxu0 %v13805_v0  ;;  %v13461_v56 = vld [vmem:[#allocation5 + $0x28] sm:$0xff]  }
  0xeb   : > { %1087 = vmatprep.subr.bf16.mxu1 %v13805_v0 }
  0xed   : > { %969 = vmatpush2.bf16.msra.mxu0 %v13405_v57  ;;  %v13462_v57 = vld [vmem:[#allocation5 + $0x20] sm:$0xff]  }
  0xee   : > { %1088 = vmatpush2.bf16.msra.mxu1 %v13406_v58  ;;  %1176 = vmatprep.subr.bf16.mxu0 %v13805_v0  ;;  %v13463_v58 = vld [vmem:[#allocation5 + $0x18] sm:$0xff]  }
  0xef   : > { %1295 = vmatprep.subr.bf16.mxu1 %v13805_v0 }
  0xf0   : > { %971 = vmatmul.mubr.bf16.vlgmr.msra.gmra.mxu0 %v14058_v30 }
  0xf1   : > { %1090 = vmatmul.mubr.bf16.vlgmr.msra.gmra.mxu1 %v14058_v30  ;;  %1177 = vmatpush1.bf16.msra.mxu0 %v13407_v59  ;;  %v13464_v59 = vld [vmem:[#allocation5 + $0x10] sm:$0xff]  }
  0xf2   : > { %1296 = vmatpush1.bf16.msra.mxu1 %v13408_v60  ;;  %1178 = vmatprep.subr.bf16.mxu0 %v13805_v0  ;;  %v13465_v60 = vld [vmem:[#allocation5 + $0x8] sm:$0xff]  }
  0xf3   : > { %1297 = vmatprep.subr.bf16.mxu1 %v13805_v0  ;;  %11953 = vmatprep.mubr.msk.bf16.mxu0 %vm692_vm0, %v14000_v1 }
  0xf4   : > { %11967 = vmatprep.mubr.msk.bf16.mxu1 %vm692_vm0, %v14000_v1  ;;  %v13424_v1 = vld [vmem:[%s13998_s26 + $0x254] ss:$0 sps:$4 sm:$0x33]  }
  0xf5   : > { %1179 = vmatpush1.bf16.msra.mxu0 %v13409_v61  ;;  %v1293_v11 = vsel %vm696_vm1, %v13424_v1, 0 }
  0xf6   : > { %1298 = vmatpush1.bf16.msra.mxu1 %v13410_v62  ;;  %1180 = vmatprep.subr.bf16.mxu0 %v13805_v0 }
  0xf7   : > { %1299 = vmatprep.subr.bf16.mxu1 %v13805_v0 }
  0xf9   : > { %1181 = vmatpush1.bf16.msra.mxu0 %v13411_v63 }
  0xfa   : > { %1300 = vmatpush1.bf16.msra.mxu1 %v13412_v2  ;;  %1182 = vmatprep.subr.bf16.mxu0 %v13805_v0 }
  0xfb   : > { %1301 = vmatprep.subr.bf16.mxu1 %v13805_v0 }
  0xfd   : > { %1183 = vmatpush1.bf16.msra.mxu0 %v13413_v3 }
  0xfe   : > { %1302 = vmatpush1.bf16.msra.mxu1 %v13414_v4  ;;  %1184 = vmatprep.subr.bf16.mxu0 %v13805_v0 }
  0xff   : > { %1303 = vmatprep.subr.bf16.mxu1 %v13805_v0 }
 0x101   : > { %1185 = vmatpush1.bf16.msra.mxu0 %v13415_v5 }
 0x102   : > { %1304 = vmatpush1.bf16.msra.mxu1 %v13416_v7  ;;  %1186 = vmatprep.subr.bf16.mxu0 %v13805_v0 }
 0x103   : > { %1305 = vmatprep.subr.bf16.mxu1 %v13805_v0 }
 0x105   : > { %1187 = vmatpush1.bf16.msra.mxu0 %v13417_v8 }
 0x106   : > { %1306 = vmatpush1.bf16.msra.mxu1 %v13418_v9  ;;  %1188 = vmatprep.subr.bf16.mxu0 %v13805_v0 }
 0x107   : > { %1307 = vmatprep.subr.bf16.mxu1 %v13805_v0 }
 0x109   : > { %1189 = vmatpush1.bf16.msra.mxu0 %v13419_v12 }
 0x10a   : > { %1308 = vmatpush1.bf16.msra.mxu1 %v13420_v13  ;;  %1190 = vmatprep.subr.bf16.mxu0 %v13805_v0 }
 0x10b   : > { %1309 = vmatprep.subr.bf16.mxu1 %v13805_v0 }
 0x10d   : > { %1191 = vmatpush1.bf16.msra.mxu0 %v13421_v14 }
 0x10e   : > { %1310 = vmatpush1.bf16.msra.mxu1 %v13422_v15  ;;  %1198 = vmatprep.subr.bf16.mxu0 %v13805_v0 }
 0x10f   : > { %1317 = vmatprep.subr.bf16.mxu1 %v13805_v0 }
 0x111   : > { %1199 = vmatpush2.bf16.msra.mxu0 %v1174_v10 }
 0x112   : > { %1318 = vmatpush2.bf16.msra.mxu1 %v1293_v11  ;;  %1200 = vmatprep.subr.bf16.mxu0 %v13805_v0 }
 0x113   : > { %1319 = vmatprep.subr.bf16.mxu1 %v13805_v0 }
 0x115   : > { %1201 = vmatpush2.bf16.msra.mxu0 %v13425_v16 }
 0x116   : > { %1320 = vmatpush2.bf16.msra.mxu1 %v13426_v17  ;;  %1202 = vmatprep.subr.bf16.mxu0 %v13805_v0 }
 0x117   : > { %1321 = vmatprep.subr.bf16.mxu1 %v13805_v0 }
 0x119   : > { %1203 = vmatpush2.bf16.msra.mxu0 %v13427_v18 }
 0x11a   : > { %1322 = vmatpush2.bf16.msra.mxu1 %v13428_v19  ;;  %1204 = vmatprep.subr.bf16.mxu0 %v13805_v0 }
 0x11b   : > { %1323 = vmatprep.subr.bf16.mxu1 %v13805_v0 }
 0x11d   : > { %1205 = vmatpush2.bf16.msra.mxu0 %v13429_v20 }
 0x11e   : > { %1324 = vmatpush2.bf16.msra.mxu1 %v13430_v21  ;;  %1206 = vmatprep.subr.bf16.mxu0 %v13805_v0 }
 0x11f   : > { %1325 = vmatprep.subr.bf16.mxu1 %v13805_v0 }
 0x121   : > { %1207 = vmatpush2.bf16.msra.mxu0 %v13431_v22 }
 0x122   : > { %1326 = vmatpush2.bf16.msra.mxu1 %v13432_v23  ;;  %1414 = vmatprep.subr.bf16.mxu0 %v13805_v0 }
 0x123   : > { %1533 = vmatprep.subr.bf16.mxu1 %v13805_v0 }
 0x124   : > { %1209 = vmatmul.mubr.bf16.vlgmr.msra.gmra.mxu0 %v14058_v30 }
 0x125   : > { %1328 = vmatmul.mubr.bf16.vlgmr.msra.gmra.mxu1 %v14058_v30  ;;  %1415 = vmatpush1.bf16.msra.mxu0 %v13433_v24 }
 0x126   : > { %1534 = vmatpush1.bf16.msra.mxu1 %v13434_v25  ;;  %1416 = vmatprep.subr.bf16.mxu0 %v13805_v0 }
 0x127   : > { %1535 = vmatprep.subr.bf16.mxu1 %v13805_v0  ;;  %11981 = vmatprep.mubr.msk.bf16.mxu0 %vm692_vm0, %v13531_v28 }
 0x128   : > { %11995 = vmatprep.mubr.msk.bf16.mxu1 %vm692_vm0, %v13531_v28 }
 0x129   : > { %1417 = vmatpush1.bf16.msra.mxu0 %v13435_v26 }
 0x12a   : > { %1536 = vmatpush1.bf16.msra.mxu1 %v13436_v27  ;;  %1418 = vmatprep.subr.bf16.mxu0 %v13805_v0 }
 0x12b   : > { %1537 = vmatprep.subr.bf16.mxu1 %v13805_v0 }
 0x12d   : > { %1419 = vmatpush1.bf16.msra.mxu0 %v13437_v29 }
 0x12e   : > { %1538 = vmatpush1.bf16.msra.mxu1 %v13438_v31  ;;  %1420 = vmatprep.subr.bf16.mxu0 %v13805_v0 }
 0x12f   : > { %1539 = vmatprep.subr.bf16.mxu1 %v13805_v0 }
 0x131   : > { %1421 = vmatpush1.bf16.msra.mxu0 %v13439_v32 }
 0x132   : > { %1540 = vmatpush1.bf16.msra.mxu1 %v13440_v33  ;;  %1422 = vmatprep.subr.bf16.mxu0 %v13805_v0 }
 0x133   : > { %1541 = vmatprep.subr.bf16.mxu1 %v13805_v0 }
 0x135   : > { %1423 = vmatpush1.bf16.msra.mxu0 %v13441_v34 }
 0x136   : > { %1542 = vmatpush1.bf16.msra.mxu1 %v13442_v35  ;;  %1424 = vmatprep.subr.bf16.mxu0 %v13805_v0 }
 0x137   : > { %1543 = vmatprep.subr.bf16.mxu1 %v13805_v0 }
 0x139   : > { %1425 = vmatpush1.bf16.msra.mxu0 %v13443_v36 }
 0x13a   : > { %1544 = vmatpush1.bf16.msra.mxu1 %v13444_v37  ;;  %1426 = vmatprep.subr.bf16.mxu0 %v13805_v0 }
 0x13b   : > { %1545 = vmatprep.subr.bf16.mxu1 %v13805_v0 }
 0x13d   : > { %1427 = vmatpush1.bf16.msra.mxu0 %v13445_v38 }
 0x13e   : > { %1546 = vmatpush1.bf16.msra.mxu1 %v13446_v39  ;;  %1428 = vmatprep.subr.bf16.mxu0 %v13805_v0 }
 0x13f   : > { %1547 = vmatprep.subr.bf16.mxu1 %v13805_v0 }
 0x141   : > { %1429 = vmatpush1.bf16.msra.mxu0 %v13447_v40 }
 0x142   : > { %1548 = vmatpush1.bf16.msra.mxu1 %v13448_v41  ;;  %1436 = vmatprep.subr.bf16.mxu0 %v13805_v0 }
 0x143   : > { %1555 = vmatprep.subr.bf16.mxu1 %v13805_v0 }
 0x145   : > { %1437 = vmatpush2.bf16.msra.mxu0 %v1412_v44 }
 0x146   : > { %1556 = vmatpush2.bf16.msra.mxu1 %v1531_v45  ;;  %1438 = vmatprep.subr.bf16.mxu0 %v13805_v0 }
 0x147   : > { %1557 = vmatprep.subr.bf16.mxu1 %v13805_v0 }
 0x149   : > { %1439 = vmatpush2.bf16.msra.mxu0 %v13451_v46 }
 0x14a   : > { %1558 = vmatpush2.bf16.msra.mxu1 %v13452_v47  ;;  %1440 = vmatprep.subr.bf16.mxu0 %v13805_v0 }
 0x14b   : > { %1559 = vmatprep.subr.bf16.mxu1 %v13805_v0 }
 0x14d   : > { %1441 = vmatpush2.bf16.msra.mxu0 %v13453_v48 }
 0x14e   : > { %1560 = vmatpush2.bf16.msra.mxu1 %v13454_v49  ;;  %1442 = vmatprep.subr.bf16.mxu0 %v13805_v0 }
 0x14f   : > { %1561 = vmatprep.subr.bf16.mxu1 %v13805_v0 }
 0x151   : > { %1443 = vmatpush2.bf16.msra.mxu0 %v13455_v50 }
 0x152   : > { %1562 = vmatpush2.bf16.msra.mxu1 %v13456_v51  ;;  %1444 = vmatprep.subr.bf16.mxu0 %v13805_v0 }
 0x153   : > { %1563 = vmatprep.subr.bf16.mxu1 %v13805_v0 }
 0x155   : > { %1445 = vmatpush2.bf16.msra.mxu0 %v13457_v52 }
 0x156   : > { %1564 = vmatpush2.bf16.msra.mxu1 %v13458_v53  ;;  %13202 = vmatprep.subr.bf16.mxu0 %v13459_v54 }
 0x158   : > { %1447 = vmatmul.mubr.bf16.vlgmr.msra.gmra.mxu0 %v14058_v30 }
 0x159   : > { %1566 = vmatmul.mubr.bf16.vlgmr.msra.gmra.mxu1 %v14058_v30  ;;  %13203 = vmatpush3.bf16.msra.mxu0 %v13459_v54  ;;  %v13466_v30 = vld [vmem:[#allocation5] sm:$0xff]  }
 0x15a   : > { %13204 = vmatprep.subr.bf16.mxu0 %v13460_v55  ;;  %2309 = vmatprep.mubr.bf16.mxu1 %v13805_v0 }
 0x15d   : > { %13205 = vmatpush3.bf16.msra.mxu0 %v13460_v55  ;;  %v1910_v55 = vld [vmem:[#allocation8 + $0x3c0] sm:$0xff] }
 0x15e   : > { %13206 = vmatprep.subr.bf16.mxu0 %v13461_v56 }
 0x161   : > { %13207 = vmatpush3.bf16.msra.mxu0 %v13461_v56  ;;  %v1914_v56 = vld [vmem:[#allocation8 + $0x3e0] sm:$0xff] }
 0x162   : > { %13208 = vmatprep.subr.bf16.mxu0 %v13462_v57 }
 0x165   : > { %13209 = vmatpush3.bf16.msra.mxu0 %v13462_v57  ;;  %v1911_v57 = vld [vmem:[#allocation8 + $0x3c8] sm:$0xff] }
 0x166   : > { %13210 = vmatprep.subr.bf16.mxu0 %v13463_v58 }
 0x169   : > { %13211 = vmatpush3.bf16.msra.mxu0 %v13463_v58  ;;  %v12061_v58 = vcombine.low %v1910_v55, %v1914_v56 }
 0x16a   : > { %13212 = vmatprep.subr.bf16.mxu0 %v13464_v59 }
 0x16d   : > { %13213 = vmatpush3.bf16.msra.mxu0 %v13464_v59  ;;  %v12062_v59 = vcombine.high %v1910_v55, %v1914_v56 }
 0x16e   : > { %13214 = vmatprep.subr.bf16.mxu0 %v13465_v60 }
 0x16f   : > { %2277 = vmatprep.subr.bf16.mxu1 %v12062_v59 }
 0x170   : > { %2278 = vmatpush1.bf16.msra.mxu1 %v12061_v58 }
 0x171   : > { %13215 = vmatpush3.bf16.msra.mxu0 %v13465_v60  ;;  %v1915_v60 = vld [vmem:[#allocation8 + $0x3e8] sm:$0xff] }
 0x172   : > { %13216 = vmatprep.subr.bf16.mxu0 %v13466_v30 }
 0x175   : > { %13217 = vmatpush3.bf16.msra.mxu0 %v13466_v30  ;;  %v1902_v30 = vld [vmem:[#allocation8 + $0x380] sm:$0xff] }
 0x17c   : > { %v734_v61 = vpop.f32.mrf.mxu0 }
 0x17d   : > { %v853_v62 = vpop.f32.mrf.mxu1  ;;  %v1574_v4 = vmul.f32 0.04, %v734_v61  ;;  %v1906_v61 = vld [vmem:[#allocation8 + $0x3a0] sm:$0xff] }
 0x17e   : > { %v736_v63 = vpop.f32.mrf.mxu0  ;;  %v1576_v1 = vmul.f32 0.04, %v853_v62  ;;  %v12063_v62 = vcombine.low %v1911_v57, %v1915_v60 }
 0x17f   : > { %v855_v2 = vpop.f32.mrf.mxu1  ;;  %v12064_v63 = vcombine.high %v1911_v57, %v1915_v60 }
 0x180   : > { %v737_v3 = vpop.f32.mrf.mxu0  ;;  %v12054_v2 = vcombine.high %v1902_v30, %v1906_v61 }
 0x181   : > { %v1575_v5 = vmul.f32 0.04, %v737_v3  ;;  %v856_v6 = vpop.f32.mrf.mxu1  ;;  %v1903_v3 = vld [vmem:[#allocation8 + $0x388] sm:$0xff]  ;;  %2318 = vmatprep.subr.bf16.mxu0 %v12064_v63 }
 0x182   : > { %v1577_v7 = vmul.f32 0.04, %v856_v6  ;;  %v739_v8 = vpop.f32.mrf.mxu0  ;;  %2279 = vmatprep.subr.bf16.mxu1 %v12054_v2 }
 0x183   : > { %v1590_v9 = vpack.c.bf16 %v1575_v5, %v1574_v4  ;;  %v858_v10 = vpop.f32.mrf.mxu1  ;;  %v1907_v4 = vld [vmem:[#allocation8 + $0x3a8] sm:$0xff]  ;;  %v1894_v5 = vld [vmem:[#allocation8 + $0x340] sm:$0xff] }
 0x184   : > { %v1591_v11 = vpack.c.bf16 %v1577_v7, %v1576_v1  ;;  %v12056_v6 = vcombine.high %v1903_v3, %v1907_v4  ;;  %v1898_v1 = vld [vmem:[#allocation8 + $0x360] sm:$0xff]  ;;  %v1895_v7 = vld [vmem:[#allocation8 + $0x348] sm:$0xff]  ;;  %v12055_v10 = vcombine.low %v1903_v3, %v1907_v4 }
 0x185   : > { %13218 = vmatprep.mubr.bf16.mxu0 %v1590_v9  ;;  %v1899_v8 = vld [vmem:[#allocation8 + $0x368] sm:$0xff]  ;;  %v12053_v9 = vcombine.low %v1902_v30, %v1906_v61 }
 0x186   : > { %13219 = vmatmul.mubr.bf16.vlgmr.msra.gmra.mxu0 %v1591_v11  ;;  %v12046_v11 = vcombine.high %v1894_v5, %v1898_v1 }
 0x187   : > { %2319 = vmatpush1.bf16.msra.mxu0 %v12063_v62  ;;  %2280 = vmatpush1.bf16.msra.mxu1 %v12053_v9 }
 0x188   : > { %2320 = vmatprep.subr.bf16.mxu0 %v12056_v6  ;;  %2281 = vmatprep.subr.bf16.mxu1 %v12046_v11 }
 0x18b   : > { %2321 = vmatpush1.bf16.msra.mxu0 %v12055_v10 }
 0x1b0   : > { %v972_v12 = vpop.f32.mrf.mxu0 }
 0x1b1   : > { %v1091_v13 = vpop.f32.mrf.mxu1  ;;  %v1578_v17 = vmul.f32 0.04, %v972_v12  ;;  %v12048_v12 = vcombine.high %v1895_v7, %v1899_v8 }
 0x1b2   : > { %v974_v14 = vpop.f32.mrf.mxu0  ;;  %v1580_v20 = vmul.f32 0.04, %v1091_v13  ;;  %v1886_v13 = vld [vmem:[#allocation8 + $0x300] sm:$0xff] }
 0x1b3   : > { %v1093_v15 = vpop.f32.mrf.mxu1  ;;  %v1890_v14 = vld [vmem:[#allocation8 + $0x320] sm:$0xff]  ;;  %2322 = vmatprep.subr.bf16.mxu0 %v12048_v12 }
 0x1b4   : > { %v975_v16 = vpop.f32.mrf.mxu0  ;;  %v1887_v15 = vld [vmem:[#allocation8 + $0x308] sm:$0xff] }
 0x1b5   : > { %v1579_v18 = vmul.f32 0.04, %v975_v16  ;;  %v1094_v19 = vpop.f32.mrf.mxu1  ;;  %v1891_v16 = vld [vmem:[#allocation8 + $0x328] sm:$0xff] }
 0x1b6   : > { %v1581_v21 = vmul.f32 0.04, %v1094_v19  ;;  %v977_v22 = vpop.f32.mrf.mxu0  ;;  %v12047_v19 = vcombine.low %v1895_v7, %v1899_v8 }
 0x1b7   : > { %v1592_v23 = vpack.c.bf16 %v1579_v18, %v1578_v17  ;;  %v1096_v24 = vpop.f32.mrf.mxu1  ;;  %v12045_v17 = vcombine.low %v1894_v5, %v1898_v1  ;;  %v14242_v18 = vld [vmem:[#allocation7] ss:$0 sm:$0xff] }
 0x1b8   : > { %v1593_v25 = vpack.c.bf16 %v1581_v21, %v1580_v20  ;;  %v12038_v20 = vcombine.high %v1886_v13, %v1890_v14  ;;  %v12040_v21 = vcombine.high %v1887_v15, %v1891_v16  ;;  %v12037_v24 = vcombine.low %v1886_v13, %v1890_v14  ;;  %2323 = vmatpush1.bf16.msra.mxu0 %v12047_v19 }
 0x1b9   : > { %13222 = vmatprep.mubr.bf16.mxu0 %v1592_v23  ;;  %2282 = vmatpush1.bf16.msra.mxu1 %v12045_v17 }
 0x1ba   : > { %13223 = vmatmul.mubr.bf16.gmra.mxu0 %v1593_v25  ;;  %2283 = vmatprep.subr.bf16.mxu1 %v12038_v20 }
 0x1bb   : > { %2324 = vmatprep.subr.bf16.mxu0 %v12040_v21 }
 0x1bd   : > { %2284 = vmatpush1.bf16.msra.mxu1 %v12037_v24  ;;  %v1878_v24 = vld [vmem:[#allocation8 + $0x2c0] sm:$0xff] }
 0x1e4   : > { %v1210_v26 = vpop.f32.mrf.mxu0 }
 0x1e5   : > { %v1329_v27 = vpop.f32.mrf.mxu1  ;;  %v1582_v32 = vmul.f32 0.04, %v1210_v26  ;;  %v12039_v26 = vcombine.low %v1887_v15, %v1891_v16 }
 0x1e6   : > { %v1212_v28 = vpop.f32.mrf.mxu0  ;;  %v1584_v35 = vmul.f32 0.04, %v1329_v27 }
 0x1e7   : > { %v1331_v29 = vpop.f32.mrf.mxu1  ;;  %2325 = vmatpush1.bf16.msra.mxu0 %v12039_v26  ;;  %v1879_v26 = vld [vmem:[#allocation8 + $0x2c8] sm:$0xff] }
 0x1e8   : > { %v1213_v31 = vpop.f32.mrf.mxu0 }
 0x1e9   : > { %v1583_v33 = vmul.f32 0.04, %v1213_v31  ;;  %v1332_v34 = vpop.f32.mrf.mxu1 }
 0x1ea   : > { %v1585_v36 = vmul.f32 0.04, %v1332_v34  ;;  %v1215_v37 = vpop.f32.mrf.mxu0 }
 0x1eb   : > { %v1594_v38 = vpack.c.bf16 %v1583_v33, %v1582_v32  ;;  %v1334_v39 = vpop.f32.mrf.mxu1 }
 0x1ec   : > { %v1595_v40 = vpack.c.bf16 %v1585_v36, %v1584_v35 }
 0x1ed   : > { %13226 = vmatprep.mubr.bf16.mxu0 %v1594_v38 }
 0x1ee   : > { %13227 = vmatmul.mubr.bf16.gmra.mxu0 %v1595_v40 }
 0x218   : > { %v1448_v41 = vpop.f32.mrf.mxu0 }
 0x219   : > { %v1567_v42 = vpop.f32.mrf.mxu1  ;;  %v1586_v46 = vmul.f32 0.04, %v1448_v41 }
 0x21a   : > { %v1450_v43 = vpop.f32.mrf.mxu0  ;;  %v1588_v49 = vmul.f32 0.04, %v1567_v42 }
 0x21b   : > { %v1569_v44 = vpop.f32.mrf.mxu1 }
 0x21c   : > { %v1451_v45 = vpop.f32.mrf.mxu0 }
 0x21d   : > { %v1587_v47 = vmul.f32 0.04, %v1451_v45  ;;  %v1570_v48 = vpop.f32.mrf.mxu1 }
 0x21e   : > { %v1589_v50 = vmul.f32 0.04, %v1570_v48  ;;  %v1453_v51 = vpop.f32.mrf.mxu0 }
 0x21f   : > { %v1596_v52 = vpack.c.bf16 %v1587_v47, %v1586_v46  ;;  %v1572_v53 = vpop.f32.mrf.mxu1 }
 0x220   : > { %v1597_v54 = vpack.c.bf16 %v1589_v50, %v1588_v49 }
 0x221   : > { %13230 = vmatprep.mubr.bf16.mxu0 %v1596_v52 }
 0x222   : > { %13231 = vmatmul.mubr.bf16.gmra.mxu0 %v1597_v54 }
 0x223   : > { %2350 = vmatprep.mubr.bf16.mxu0 %v13805_v0 }
 0x246   : > { %v13220_v22 = vpop.f32.mrf.mxu0 }
 0x247   : > { %v1712_v23 = vadd.f32 %v13220_v22, %v14242_v18 }
 0x248   : > { %v1703_v25 = vpop.f32.mrf.mxu0 }
 0x249   : > { %v1768_v27 = vmax.f32 %v1712_v23, 0.0  ;;  %v1704_v28 = vadd.f32 %v14242_v18, %v1703_v25  ;;  %v1882_v25 = vld [vmem:[#allocation8 + $0x2e0] sm:$0xff] }
 0x24a   : > { %v13221_v29 = vpop.f32.mrf.mxu0 }
 0x24b   : > { %v1783_v31 = vpack.c.bf16 %v1768_v27, %v1768_v27  ;;  %v1766_v32 = vmax.f32 %v1704_v28, 0.0  ;;  %v1715_v33 = vadd.f32 %v13221_v29, %v14242_v18  ;;  %v12030_v27 = vcombine.high %v1878_v24, %v1882_v25  ;;  %v1883_v28 = vld [vmem:[#allocation8 + $0x2e8] sm:$0xff] }
 0x24c   : > { %v1706_v34 = vpop.f32.mrf.mxu0  ;;  %v12029_v29 = vcombine.low %v1878_v24, %v1882_v25 }
 0x24d   : > { %v14247_v35 = vunpack.c.l.b16 %v1783_v31  ;;  %v1782_v36 = vpack.c.bf16 %v1766_v32, %v1766_v32  ;;  %v1769_v37 = vmax.f32 %v1715_v33, 0.0  ;;  %v1707_v38 = vadd.f32 %v14242_v18, %v1706_v34  ;;  %2285 = vmatprep.subr.bf16.mxu1 %v12030_v27  ;;  %v1870_v33 = vld [vmem:[#allocation8 + $0x280] sm:$0xff] }
 0x24e   : > { %v12031_v31 = vcombine.low %v1879_v26, %v1883_v28  ;;  %v12032_v32 = vcombine.high %v1879_v26, %v1883_v28  ;;  %2286 = vmatpush1.bf16.msra.mxu1 %v12029_v29  ;;  %v1874_v34 = vld [vmem:[#allocation8 + $0x2a0] sm:$0xff] }
 0x24f   : > { %v14250_v39 = vunpack.c.l.b16 %v1782_v36  ;;  %v6374_v40 = vpack.c.bf16 %v1769_v37, %v1769_v37  ;;  %v1767_v41 = vmax.f32 %v1707_v38, 0.0  ;;  %v2441_v42 = vrot.slane %v14247_v35, 7  ;;  %v1871_v36 = vld [vmem:[#allocation8 + $0x288] sm:$0xff] }
 0x250   : > { %v3006_v43 = vrot.slane %v14247_v35, 1  ;;  %v3578_v44 = vrot.slane %v14247_v35, 2  ;;  %v4150_v45 = vrot.slane %v14247_v35, 3  ;;  %v4722_v49 = vrot.slane %v14247_v35, 4  ;;  %2326 = vmatprep.subr.bf16.mxu0 %v12032_v32  ;;  %v1875_v38 = vld [vmem:[#allocation8 + $0x2a8] sm:$0xff] }
 0x251   : > { %v6454_v46 = vunpack.c.l.b16 %v6374_v40  ;;  %v6373_v47 = vpack.c.bf16 %v1767_v41, %v1767_v41  ;;  %v14258_v48 = vsel %vm1935_vm2, %v2441_v42, %v14250_v39  ;;  %v3005_v50 = vrot.slane %v14250_v39, 2  ;;  %2327 = vmatpush1.bf16.msra.mxu0 %v12031_v31 }
 0x252   : > { %v3577_v51 = vrot.slane %v14250_v39, 3  ;;  %v4149_v52 = vrot.slane %v14250_v39, 4  ;;  %v4721_v53 = vrot.slane %v14250_v39, 5  ;;  %v5293_v55 = vrot.slane %v14250_v39, 6 }
 0x253   : > { %v6453_v54 = vunpack.c.l.b16 %v6373_v47  ;;  %v5294_v56 = vrot.slane %v14247_v35, 5  ;;  %v14268_v57 = vsel %vm1935_vm2, %v3006_v43, %v3005_v50  ;;  %v5865_v61 = vrot.slane %v14250_v39, 7  ;;  %v1862_v43 = vld [vmem:[#allocation8 + $0x240] sm:$0xff]  ;;  %v1867_v47 = vld [vmem:[#allocation8 + $0x268] sm:$0xff] }
 0x254   : > { %v14271_v58 = vsel %vm1935_vm2, %v3578_v44, %v3577_v51  ;;  %v14274_v59 = vsel %vm1935_vm2, %v4150_v45, %v4149_v52  ;;  %v14277_v60 = vsel %vm1935_vm2, %v4722_v49, %v4721_v53  ;;  %v5866_v62 = vrot.slane %v14247_v35, 6  ;;  %v1866_v44 = vld [vmem:[#allocation8 + $0x260] sm:$0xff]  ;;  %v1863_v45 = vld [vmem:[#allocation8 + $0x248] sm:$0xff] }
 0x255   : > { %v14280_v30 = vsel %vm1935_vm2, %v5294_v56, %v5293_v55  ;;  %v6461_v63 = vrot.slane %v6454_v46, 7  ;;  %v7033_v2 = vrot.slane %v6453_v54, 1  ;;  %v7605_v3 = vrot.slane %v6453_v54, 2  ;;  %v1854_v52 = vld [vmem:[#allocation8 + $0x200] sm:$0xff]  ;;  %v1859_v56 = vld [vmem:[#allocation8 + $0x228] sm:$0xff] }
 0x256   : > { %v7606_v4 = vrot.slane %v6454_v46, 1  ;;  %v8177_v5 = vrot.slane %v6453_v54, 3  ;;  %v14285_v6 = vsel %vm1935_vm2, %v5866_v62, %v5865_v61  ;;  %v8178_v7 = vrot.slane %v6454_v46, 2  ;;  %v1858_v53 = vld [vmem:[#allocation8 + $0x220] sm:$0xff] }
 0x257   : > { %v14288_v1 = vsel %vm1935_vm2, %v6461_v63, %v6453_v54  ;;  %v8749_v8 = vrot.slane %v6453_v54, 4  ;;  %v14291_v9 = vsel %vm1935_vm2, %v6454_v46, %v7033_v2  ;;  %v8750_v11 = vrot.slane %v6454_v46, 3  ;;  %v14311_v2 = vld [vmem:[#allocation8 + $0x3d0] sm:$0xff] }
 0x258   : > { %v14294_v10 = vsel %vm1935_vm2, %v7606_v4, %v7605_v3  ;;  %v9321_v12 = vrot.slane %v6453_v54, 5  ;;  %v14297_v13 = vsel %vm1935_vm2, %v8178_v7, %v8177_v5  ;;  %v9322_v14 = vrot.slane %v6454_v46, 4  ;;  %v14313_v3 = vld [vmem:[#allocation8 + $0x3f0] sm:$0xff]  ;;  %v14315_v4 = vld [vmem:[#allocation8 + $0x3d8] sm:$0xff] }
 0x259   : > { %v9893_v15 = vrot.slane %v6453_v54, 6  ;;  %v9894_v16 = vrot.slane %v6454_v46, 5  ;;  %v14300_v17 = vsel %vm1935_vm2, %v8750_v11, %v8749_v8  ;;  %v10465_v19 = vrot.slane %v6453_v54, 7  ;;  %v1855_v54 = vld [vmem:[#allocation8 + $0x208] sm:$0xff]  ;;  %v14321_v8 = vld [vmem:[#allocation8 + $0x3f8] sm:$0xff] }
 0x25a   : > { %v10466_v20 = vrot.slane %v6454_v46, 6  ;;  %v14303_v21 = vsel %vm1935_vm2, %v9322_v14, %v9321_v12  ;;  %v12022_v37 = vcombine.high %v1870_v33, %v1874_v34  ;;  %v12021_v40 = vcombine.low %v1870_v33, %v1874_v34 }
 0x25b   : > { %v14306_v22 = vsel %vm1935_vm2, %v9894_v16, %v9893_v15  ;;  %v12023_v41 = vcombine.low %v1871_v36, %v1875_v38  ;;  %v12024_v42 = vcombine.high %v1871_v36, %v1875_v38  ;;  %v12014_v46 = vcombine.high %v1862_v43, %v1866_v44 }
 0x25c   : > { %v14309_v23 = vsel %vm1935_vm2, %v10466_v20, %v10465_v19  ;;  %2287 = vmatprep.subr.bf16.mxu1 %v12022_v37  ;;  %v12013_v49 = vcombine.low %v1862_v43, %v1866_v44  ;;  %v12015_v50 = vcombine.low %v1863_v45, %v1867_v47  ;;  %v12016_v51 = vcombine.high %v1863_v45, %v1867_v47 }
 0x25d   : > { %2328 = vmatprep.subr.bf16.mxu0 %v12024_v42  ;;  %2288 = vmatpush1.bf16.msra.mxu1 %v12021_v40  ;;  %v12006_v55 = vcombine.high %v1854_v52, %v1858_v53  ;;  %v12005_v61 = vcombine.low %v1854_v52, %v1858_v53  ;;  %v12007_v62 = vcombine.low %v1855_v54, %v1859_v56 }
 0x25e   : > { %2329 = vmatpush1.bf16.msra.mxu0 %v12023_v41  ;;  %2289 = vmatprep.subr.bf16.mxu1 %v12014_v46  ;;  %v12008_v63 = vcombine.high %v1855_v54, %v1859_v56  ;;  %v12065_v5 = vcombine.low %v14311_v2, %v14313_v3  ;;  %v12066_v7 = vcombine.high %v14311_v2, %v14313_v3 }
 0x25f   : > { %2330 = vmatprep.subr.bf16.mxu0 %v12016_v51  ;;  %v12067_v11 = vcombine.low %v14315_v4, %v14321_v8  ;;  %v12068_v12 = vcombine.high %v14315_v4, %v14321_v8  ;;  %v1889_v8 = vld [vmem:[#allocation8 + $0x318] sm:$0xff] }
 0x261   : > { %2290 = vmatpush1.bf16.msra.mxu1 %v12013_v49 }
 0x262   : > { %2331 = vmatpush1.bf16.msra.mxu0 %v12015_v50  ;;  %2291 = vmatprep.subr.bf16.mxu1 %v12006_v55 }
 0x263   : > { %2332 = vmatprep.subr.bf16.mxu0 %v12008_v63 }
 0x265   : > { %2292 = vmatpush1.bf16.msra.mxu1 %v12005_v61 }
 0x266   : > { %2333 = vmatpush1.bf16.msra.mxu0 %v12007_v62  ;;  %2359 = vmatprep.subr.bf16.mxu1 %v12066_v7 }
 0x267   : > { %2400 = vmatprep.subr.bf16.mxu0 %v12068_v12 }
 0x27a   : > { %v13224_v14 = vpop.f32.mrf.mxu0 }
 0x27b   : > { %v1728_v15 = vadd.f32 %v13224_v14, %v14242_v18 }
 0x27c   : > { %v1719_v16 = vpop.f32.mrf.mxu0 }
 0x27d   : > { %v1772_v19 = vmax.f32 %v1728_v15, 0.0  ;;  %v1720_v20 = vadd.f32 %v14242_v18, %v1719_v16 }
 0x27e   : > { %v13225_v24 = vpop.f32.mrf.mxu0 }
 0x27f   : > { %v1785_v25 = vpack.c.bf16 %v1772_v19, %v1772_v19  ;;  %v1770_v26 = vmax.f32 %v1720_v20, 0.0  ;;  %v1731_v27 = vadd.f32 %v13225_v24, %v14242_v18 }
 0x280   : > { %v1722_v28 = vpop.f32.mrf.mxu0 }
 0x281   : > { %v14330_v29 = vunpack.c.l.b16 %v1785_v25  ;;  %v1784_v31 = vpack.c.bf16 %v1770_v26, %v1770_v26  ;;  %v1723_v32 = vadd.f32 %v14242_v18, %v1722_v28  ;;  %v1773_v34 = vmax.f32 %v1731_v27, 0.0 }
 0x283   : > { %v14333_v33 = vunpack.c.l.b16 %v1784_v31  ;;  %v1771_v36 = vmax.f32 %v1723_v32, 0.0  ;;  %v3009_v37 = vrot.slane %v14330_v29, 7  ;;  %v6376_v41 = vpack.c.bf16 %v1773_v34, %v1773_v34 }
 0x284   : > { %v2445_v42 = vrot.slane %v14330_v29, 5  ;;  %v4154_v52 = vrot.slane %v14330_v29, 1  ;;  %v4726_v61 = vrot.slane %v14330_v29, 2  ;;  %v5870_v15 = vrot.slane %v14330_v29, 4 }
 0x285   : > { %v6375_v38 = vpack.c.bf16 %v1771_v36, %v1771_v36  ;;  %v2443_v40 = vrot.slane %v14333_v33, 6  ;;  %v3008_v43 = vsel %vm1938_vm3, %v14333_v33, %v14268_v57  ;;  %v3580_v44 = vrot.slane %v14333_v33, 1 }
 0x286   : > { %v14345_v47 = vsel %vm1941_vm4, %v3009_v37, %v3008_v43  ;;  %v4152_v49 = vrot.slane %v14333_v33, 2  ;;  %v6456_v53 = vunpack.c.l.b16 %v6376_v41  ;;  %v4724_v55 = vrot.slane %v14333_v33, 3 }
 0x287   : > { %v6455_v45 = vunpack.c.l.b16 %v6375_v38  ;;  %v2444_v46 = vsel %vm1938_vm3, %v2443_v40, %v14258_v48  ;;  %v3581_v51 = vsel %vm1938_vm3, %v3580_v44, %v14271_v58  ;;  %v5296_v56 = vrot.slane %v14333_v33, 4 }
 0x288   : > { %v14349_v50 = vsel %vm1941_vm4, %v2445_v42, %v2444_v46  ;;  %v14356_v57 = vsel %vm1941_vm4, %v14330_v29, %v3581_v51  ;;  %v4153_v48 = vsel %vm1938_vm3, %v4152_v49, %v14274_v59  ;;  %v5298_v58 = vrot.slane %v14330_v29, 3 }
 0x289   : > { %v14361_v54 = vsel %vm1941_vm4, %v4154_v52, %v4153_v48  ;;  %v5868_v62 = vrot.slane %v14333_v33, 5  ;;  %v7608_v63 = vsel %vm1938_vm3, %v6455_v45, %v14294_v10  ;;  %v4725_v59 = vsel %vm1938_vm3, %v4724_v55, %v14277_v60 }
 0x28a   : > { %v5297_v7 = vsel %vm1938_vm3, %v5296_v56, %v14280_v30  ;;  %v14375_v12 = vsel %vm1941_vm4, %v4726_v61, %v4725_v59  ;;  %v6463_v19 = vrot.slane %v6455_v45, 6  ;;  %v7035_v20 = vrot.slane %v6455_v45, 7 }
 0x28b   : > { %v14378_v14 = vsel %vm1941_vm4, %v5298_v58, %v5297_v7  ;;  %v5869_v16 = vsel %vm1938_vm3, %v5868_v62, %v14285_v6  ;;  %v6465_v60 = vrot.slane %v6456_v53, 5  ;;  %v7609_v24 = vrot.slane %v6456_v53, 7 }
 0x28c   : > { %v14384_v10 = vsel %vm1941_vm4, %v5870_v15, %v5869_v16  ;;  %v8180_v25 = vrot.slane %v6455_v45, 1  ;;  %v6464_v30 = vsel %vm1938_vm3, %v6463_v19, %v14288_v1  ;;  %v7036_v26 = vsel %vm1938_vm3, %v7035_v20, %v14291_v9 }
 0x28d   : > { %v7037_v27 = vrot.slane %v6456_v53, 6  ;;  %v8752_v28 = vrot.slane %v6455_v45, 2  ;;  %v14391_v31 = vsel %vm1941_vm4, %v6465_v60, %v6464_v30  ;;  %v14397_v32 = vsel %vm1941_vm4, %v7609_v24, %v7608_v63 }
 0x28e   : > { %v8181_v34 = vsel %vm1938_vm3, %v8180_v25, %v14297_v13  ;;  %v8754_v9 = vrot.slane %v6456_v53, 1  ;;  %v9324_v37 = vrot.slane %v6455_v45, 3  ;;  %v9326_v38 = vrot.slane %v6456_v53, 2 }
 0x28f   : > { %v14394_v6 = vsel %vm1941_vm4, %v7037_v27, %v7036_v26  ;;  %v8753_v1 = vsel %vm1938_vm3, %v8752_v28, %v14300_v17  ;;  %v14404_v36 = vsel %vm1941_vm4, %v6456_v53, %v8181_v34  ;;  %v9896_v40 = vrot.slane %v6455_v45, 4 }
 0x290   : > { %v8755_v41 = vsel %vm1941_vm4, %v8754_v9, %v8753_v1  ;;  %v9325_v42 = vsel %vm1938_vm3, %v9324_v37, %v14303_v21  ;;  %v9898_v43 = vrot.slane %v6456_v53, 3  ;;  %v10468_v17 = vrot.slane %v6455_v45, 5 }
 0x291   : > { %v14410_v44 = vsel %vm1941_vm4, %v9326_v38, %v9325_v42  ;;  %v9897_v13 = vsel %vm1938_vm3, %v9896_v40, %v14306_v22  ;;  %v10470_v49 = vrot.slane %v6456_v53, 4 }
 0x292   : > { %v14415_v46 = vsel %vm1941_vm4, %v9898_v43, %v9897_v13  ;;  %v10469_v51 = vsel %vm1938_vm3, %v10468_v17, %v14309_v23 }
 0x293   : > { %v14420_v52 = vsel %vm1941_vm4, %v10470_v49, %v10469_v51 }
 0x2ae   : > { %v13228_v48 = vpop.f32.mrf.mxu0 }
 0x2af   : > { %v1744_v21 = vadd.f32 %v13228_v48, %v14242_v18 }
 0x2b0   : > { %v1735_v55 = vpop.f32.mrf.mxu0 }
 0x2b1   : > { %v1776_v56 = vmax.f32 %v1744_v21, 0.0  ;;  %v1736_v61 = vadd.f32 %v14242_v18, %v1735_v55 }
 0x2b2   : > { %v13229_v58 = vpop.f32.mrf.mxu0 }
 0x2b3   : > { %v1787_v22 = vpack.c.bf16 %v1776_v56, %v1776_v56  ;;  %v1774_v45 = vmax.f32 %v1736_v61, 0.0  ;;  %v1747_v62 = vadd.f32 %v13229_v58, %v14242_v18 }
 0x2b4   : > { %v1738_v63 = vpop.f32.mrf.mxu0 }
 0x2b5   : > { %v1786_v53 = vpack.c.bf16 %v1774_v45, %v1774_v45  ;;  %v1739_v59 = vadd.f32 %v14242_v18, %v1738_v63  ;;  %v14426_v23 = vunpack.c.l.b16 %v1787_v22  ;;  %v1777_v15 = vmax.f32 %v1747_v62, 0.0 }
 0x2b7   : > { %v14428_v7 = vunpack.c.l.b16 %v1786_v53  ;;  %v1775_v16 = vmax.f32 %v1739_v59, 0.0  ;;  %v2449_v60 = vrot.slane %v14426_v23, 3  ;;  %v6378_v24 = vpack.c.bf16 %v1777_v15, %v1777_v15 }
 0x2b8   : > { %v3013_v26 = vrot.slane %v14426_v23, 5  ;;  %v3585_v37 = vrot.slane %v14426_v23, 6  ;;  %v5302_v17 = vrot.slane %v14426_v23, 1  ;;  %v5874_v56 = vrot.slane %v14426_v23, 2 }
 0x2b9   : > { %v6377_v19 = vpack.c.bf16 %v1775_v16, %v1775_v16  ;;  %v2447_v20 = vrot.slane %v14428_v7, 4  ;;  %v3011_v30 = vrot.slane %v14428_v7, 6  ;;  %v3583_v34 = vrot.slane %v14428_v7, 7 }
 0x2ba   : > { %v4156_v1 = vsel %vm1944_vm5, %v14428_v7, %v14361_v54  ;;  %v4728_v54 = vrot.slane %v14428_v7, 1  ;;  %v6458_v13 = vunpack.c.l.b16 %v6378_v24  ;;  %v5872_v49 = vrot.slane %v14428_v7, 3 }
 0x2bb   : > { %v2448_v25 = vsel %vm1944_vm5, %v2447_v20, %v14349_v50  ;;  %v6457_v27 = vunpack.c.l.b16 %v6377_v19  ;;  %v3012_v9 = vsel %vm1944_vm5, %v3011_v30, %v14345_v47  ;;  %v4157_v50 = vrot.slane %v14426_v23, 7 }
 0x2bc   : > { %v14437_v28 = vsel %vm1947_vm6, %v2449_v60, %v2448_v25  ;;  %v14448_v38 = vsel %vm1947_vm6, %v3013_v26, %v3012_v9  ;;  %v3584_v40 = vsel %vm1944_vm5, %v3583_v34, %v14356_v57  ;;  %v5300_v47 = vrot.slane %v14428_v7, 2 }
 0x2bd   : > { %v14453_v42 = vsel %vm1947_vm6, %v3585_v37, %v3584_v40  ;;  %v14456_v43 = vsel %vm1947_vm6, %v4157_v50, %v4156_v1  ;;  %v8756_v51 = vsel %vm1944_vm5, %v6457_v27, %v8755_v41  ;;  %v4729_v57 = vsel %vm1944_vm5, %v4728_v54, %v14375_v12 }
 0x2be   : > { %v5301_v48 = vsel %vm1944_vm5, %v5300_v47, %v14378_v14  ;;  %v14469_v21 = vsel %vm1947_vm6, %v14426_v23, %v4729_v57  ;;  %v5873_v61 = vsel %vm1944_vm5, %v5872_v49, %v14384_v10  ;;  %v6467_v58 = vrot.slane %v6457_v27, 4 }
 0x2bf   : > { %v14472_v55 = vsel %vm1947_vm6, %v5302_v17, %v5301_v48  ;;  %v7039_v41 = vrot.slane %v6457_v27, 5  ;;  %v14478_v22 = vsel %vm1947_vm6, %v5874_v56, %v5873_v61  ;;  %v6469_v12 = vrot.slane %v6458_v13, 3 }
 0x2c0   : > { %v7041_v45 = vrot.slane %v6458_v13, 4  ;;  %v7611_v14 = vrot.slane %v6457_v27, 6  ;;  %v6468_v62 = vsel %vm1944_vm5, %v6467_v58, %v14391_v31  ;;  %v7613_v10 = vrot.slane %v6458_v13, 5 }
 0x2c1   : > { %v7040_v63 = vsel %vm1944_vm5, %v7039_v41, %v14394_v6  ;;  %v14485_v53 = vsel %vm1947_vm6, %v6469_v12, %v6468_v62  ;;  %v8183_v16 = vrot.slane %v6457_v27, 7  ;;  %v8757_v19 = vrot.slane %v6458_v13, 7  ;;  %v14529_v12 = vld [vmem:[#allocation8 + $0x390] sm:$0xff]  ;;  %v14536_v62 = vld [vmem:[#allocation8 + $0x398] sm:$0xff] }
 0x2c2   : > { %v14488_v59 = vsel %vm1947_vm6, %v7041_v45, %v7040_v63  ;;  %v7612_v15 = vsel %vm1944_vm5, %v7611_v14, %v14397_v32  ;;  %v8185_v60 = vrot.slane %v6458_v13, 6  ;;  %v9328_v31 = vrot.slane %v6457_v27, 1  ;;  %v14531_v45 = vld [vmem:[#allocation8 + $0x3b0] sm:$0xff]  ;;  %v14538_v63 = vld [vmem:[#allocation8 + $0x3b8] sm:$0xff] }
 0x2c3   : > { %v14493_v20 = vsel %vm1947_vm6, %v7613_v10, %v7612_v15  ;;  %v9900_v24 = vrot.slane %v6457_v27, 2  ;;  %v8184_v6 = vsel %vm1944_vm5, %v8183_v16, %v14404_v36  ;;  %v14498_v25 = vsel %vm1947_vm6, %v8757_v19, %v8756_v51 }
 0x2c4   : > { %v14501_v30 = vsel %vm1947_vm6, %v8185_v60, %v8184_v6  ;;  %v9329_v32 = vsel %vm1944_vm5, %v9328_v31, %v14410_v44  ;;  %v9902_v26 = vrot.slane %v6458_v13, 1  ;;  %v10472_v9 = vrot.slane %v6457_v27, 3 }
 0x2c5   : > { %v14506_v34 = vsel %vm1947_vm6, %v6458_v13, %v9329_v32  ;;  %v9901_v1 = vsel %vm1944_vm5, %v9900_v24, %v14415_v46  ;;  %v10474_v36 = vrot.slane %v6458_v13, 2  ;;  %v1934_v44 = vrot.slane %v14250_v39, 1 }
 0x2c6   : > { %v14511_v37 = vsel %vm1947_vm6, %v9902_v26, %v9901_v1  ;;  %v10473_v50 = vsel %vm1944_vm5, %v10472_v9, %v14420_v52  ;;  %v1937_v17 = vrot.slane %v14333_v33, 7  ;;  %v1943_v56 = vrot.slane %v14428_v7, 5 }
 0x2c7   : > { %v14516_v40 = vsel %vm1947_vm6, %v10474_v36, %v10473_v50  ;;  %v1936_v13 = vsel %vm1935_vm2, %v14247_v35, %v1934_v44  ;;  %v1940_v39 = vrot.slane %v14330_v29, 6  ;;  %v1946_v15 = vrot.slane %v14426_v23, 4 }
 0x2c8   : > { %v1939_v48 = vsel %vm1938_vm3, %v1937_v17, %v1936_v13  ;;  %v12060_v60 = vcombine.high %v14536_v62, %v14538_v63  ;;  %v1897_v13 = vld [vmem:[#allocation8 + $0x358] sm:$0xff] }
 0x2c9   : > { %v1942_v35 = vsel %vm1941_vm4, %v1940_v39, %v1939_v48 }
 0x2ca   : > { %v1945_v10 = vsel %vm1944_vm5, %v1943_v56, %v1942_v35 }
 0x2cb   : > { %v1948_v24 = vsel %vm1947_vm6, %v1946_v15, %v1945_v10 }
 0x2e2   : > { %v13232_v54 = vpop.f32.mrf.mxu0 }
 0x2e3   : > { %v1760_v47 = vadd.f32 %v13232_v54, %v14242_v18 }
 0x2e4   : > { %v1751_v49 = vpop.f32.mrf.mxu0 }
 0x2e5   : > { %v1780_v46 = vmax.f32 %v1760_v47, 0.0  ;;  %v1752_v27 = vadd.f32 %v14242_v18, %v1751_v49 }
 0x2e6   : > { %v13233_v51 = vpop.f32.mrf.mxu0 }
 0x2e7   : > { %v1789_v57 = vpack.c.bf16 %v1780_v46, %v1780_v46  ;;  %v1778_v52 = vmax.f32 %v1752_v27, 0.0  ;;  %v1763_v33 = vadd.f32 %v13233_v51, %v14242_v18  ;;  %v1896_v46 = vld [vmem:[#allocation8 + $0x350] sm:$0xff] }
 0x2e8   : > { %v1754_v61 = vpop.f32.mrf.mxu0  ;;  %v1900_v51 = vld [vmem:[#allocation8 + $0x370] sm:$0xff] }
 0x2e9   : > { %v1788_v58 = vpack.c.bf16 %v1778_v52, %v1778_v52  ;;  %v1755_v41 = vadd.f32 %v14242_v18, %v1754_v61  ;;  %v14533_v14 = vunpack.c.l.b16 %v1789_v57  ;;  %v12058_v18 = vcombine.high %v14529_v12, %v14531_v45  ;;  %v1901_v57 = vld [vmem:[#allocation8 + $0x378] sm:$0xff] }
 0x2ea   : > { %v1781_v16 = vmax.f32 %v1763_v33, 0.0  ;;  %v12049_v4 = vcombine.low %v1896_v46, %v1900_v51 }
 0x2eb   : > { %v14540_v7 = vunpack.c.l.b16 %v1788_v58  ;;  %v1779_v29 = vmax.f32 %v1755_v41, 0.0  ;;  %v1952_v6 = vrot.slane %v14533_v14, 2  ;;  %v2453_v32 = vrot.slane %v14533_v14, 1 }
 0x2ec   : > { %v3017_v23 = vrot.slane %v14533_v14, 3  ;;  %v6380_v17 = vpack.c.bf16 %v1781_v16, %v1781_v16  ;;  %v4161_v61 = vrot.slane %v14533_v14, 5  ;;  %v12050_v41 = vcombine.high %v1896_v46, %v1900_v51  ;;  %v1872_v46 = vld [vmem:[#allocation8 + $0x290] sm:$0xff]  ;;  %v1877_v51 = vld [vmem:[#allocation8 + $0x2b8] sm:$0xff] }
 0x2ed   : > { %v1949_v19 = vrot.slane %v14540_v7, 3  ;;  %v2451_v31 = vrot.slane %v14540_v7, 2  ;;  %v6379_v26 = vpack.c.bf16 %v1779_v29, %v1779_v29  ;;  %v3015_v36 = vrot.slane %v14540_v7, 4 }
 0x2ee   : > { %v3587_v44 = vrot.slane %v14540_v7, 5  ;;  %v4159_v47 = vrot.slane %v14540_v7, 6  ;;  %v4731_v58 = vrot.slane %v14540_v7, 7  ;;  %v5305_v2 = vrot.slane %v14533_v14, 7 }
 0x2ef   : > { %v1951_v1 = vsel %vm1950_vm7, %v1949_v19, %v1948_v24  ;;  %v2452_v9 = vsel %vm1950_vm7, %v2451_v31, %v14437_v28  ;;  %v3016_v27 = vsel %vm1950_vm7, %v3015_v36, %v14448_v38  ;;  %v3589_v28 = vrot.slane %v14533_v14, 4  ;;  %v1881_v24 = vld [vmem:[#allocation8 + $0x2d8] sm:$0xff] }
 0x2f0   : > { %v1954_v50 = vsel %vm1953_vm8, %v1952_v6, %v1951_v1  ;;  %v14560_v54 = vsel %vm1953_vm8, %v2453_v32, %v2452_v9  ;;  %v14570_v52 = vsel %vm1953_vm8, %v3017_v23, %v3016_v27  ;;  %v3588_v48 = vsel %vm1950_vm7, %v3587_v44, %v14453_v42  ;;  %v1885_v6 = vld [vmem:[#allocation8 + $0x2f8] sm:$0xff]  ;;  %v1876_v27 = vld [vmem:[#allocation8 + $0x2b0] sm:$0xff] }
 0x2f1   : > { %v14564_v49 = vpack.c.b16 %v1954_v50, %v1954_v50  ;;  %v4160_v56 = vsel %vm1950_vm7, %v4159_v47, %v14456_v43  ;;  %v14577_v39 = vunpack.c.l.b16 %v6379_v26  ;;  %v12057_v38 = vcombine.low %v14529_v12, %v14531_v45  ;;  %v1888_v45 = vld [vmem:[#allocation8 + $0x310] sm:$0xff] }
 0x2f2   : > { %v12059_v42 = vcombine.low %v14536_v62, %v14538_v63  ;;  %v14593_v43 = vsel %vm1953_vm8, %v3589_v28, %v3588_v48  ;;  %v14596_v33 = vsel %vm1953_vm8, %v4161_v61, %v4160_v56  ;;  %v12052_v12 = vcombine.high %v1897_v13, %v1901_v57  ;;  %v1873_v28 = vld [vmem:[#allocation8 + $0x298] sm:$0xff] }
 0x2f3   : > { %2310 = vmatmul.mubr.bf16.vlgmr.msra.gmra.mxu1 %v14564_v49  ;;  %2351 = vmatmul.mubr.bf16.vlgmr.msra.gmra.mxu0 %v14564_v49  ;;  %v14599_v3 = vunpack.c.l.b16 %v6380_v17  ;;  %v4733_v35 = vrot.slane %v14533_v14, 6  ;;  %v5876_v62 = vrot.slane %v14540_v7, 1  ;;  %v12051_v63 = vcombine.low %v1897_v13, %v1901_v57 }
 0x2f4   : > { %2360 = vmatpush1.bf16.msra.mxu1 %v12065_v5  ;;  %2401 = vmatpush1.bf16.msra.mxu0 %v12067_v11  ;;  %v1892_v5 = vld [vmem:[#allocation8 + $0x330] sm:$0xff]  ;;  %v1893_v11 = vld [vmem:[#allocation8 + $0x338] sm:$0xff]  ;;  %v4732_v29 = vsel %vm1950_vm7, %v4731_v58, %v14469_v21  ;;  %v5304_v10 = vsel %vm1950_vm7, %v14540_v7, %v14472_v55  ;;  %v6471_v15 = vrot.slane %v14577_v39, 2  ;;  %v7615_v36 = vrot.slane %v14577_v39, 4 }
 0x2f5   : > { %2361 = vmatprep.subr.bf16.mxu1 %v12058_v18  ;;  %2402 = vmatprep.subr.bf16.mxu0 %v12060_v60  ;;  %v14612_v18 = vsel %vm1953_vm8, %v4733_v35, %v4732_v29  ;;  %v14615_v16 = vsel %vm1953_vm8, %v5305_v2, %v5304_v10  ;;  %v5877_v19 = vsel %vm1950_vm7, %v5876_v62, %v14478_v22  ;;  %v7043_v60 = vrot.slane %v14577_v39, 3  ;;  %v1880_v55 = vld [vmem:[#allocation8 + $0x2d0] sm:$0xff] }
 0x2f6   : > { %2391 = vmatprep.mubr.bf16.mxu1 %v13805_v0  ;;  %2432 = vmatprep.mubr.bf16.mxu0 %v13805_v0  ;;  %v12042_v21 = vcombine.high %v1888_v45, %v1892_v5  ;;  %v12044_v31 = vcombine.high %v1889_v8, %v1893_v11  ;;  %v1884_v7 = vld [vmem:[#allocation8 + $0x2f0] sm:$0xff]  ;;  %v14622_v32 = vsel %vm1953_vm8, %v14533_v14, %v5877_v19  ;;  %v6473_v23 = vrot.slane %v14599_v3, 1 }
 0x2f7   : > { %v7045_v26 = vrot.slane %v14599_v3, 2  ;;  %v12041_v1 = vcombine.low %v1888_v45, %v1892_v5  ;;  %v6472_v22 = vsel %vm1950_vm7, %v6471_v15, %v14485_v53  ;;  %v7044_v9 = vsel %vm1950_vm7, %v7043_v60, %v14488_v59  ;;  %v1864_v45 = vld [vmem:[#allocation8 + $0x250] sm:$0xff] }
 0x2f8   : > { %2362 = vmatpush1.bf16.msra.mxu1 %v12057_v38  ;;  %2403 = vmatpush1.bf16.msra.mxu0 %v12059_v42  ;;  %v12043_v50 = vcombine.low %v1889_v8, %v1893_v11  ;;  %v14632_v44 = vsel %vm1953_vm8, %v6473_v23, %v6472_v22  ;;  %v8187_v47 = vrot.slane %v14577_v39, 5  ;;  %v12034_v17 = vcombine.high %v1880_v55, %v1884_v7  ;;  %v1868_v5 = vld [vmem:[#allocation8 + $0x270] sm:$0xff]  ;;  %v1865_v8 = vld [vmem:[#allocation8 + $0x258] sm:$0xff]  ;;  %v1846_v22 = vld [vmem:[#allocation8 + $0x1c0] sm:$0xff] }
 0x2f9   : > { %2363 = vmatprep.subr.bf16.mxu1 %v12050_v41  ;;  %2404 = vmatprep.subr.bf16.mxu0 %v12052_v12  ;;  %v14635_v14 = vsel %vm1953_vm8, %v7045_v26, %v7044_v9  ;;  %v12036_v53 = vcombine.high %v1881_v24, %v1885_v6  ;;  %v7617_v59 = vrot.slane %v14599_v3, 3  ;;  %v7616_v13 = vsel %vm1950_vm7, %v7615_v36, %v14493_v20  ;;  %v1869_v11 = vld [vmem:[#allocation8 + $0x278] sm:$0xff]  ;;  %v1850_v9 = vld [vmem:[#allocation8 + $0x1e0] sm:$0xff]  ;;  %v1847_v36 = vld [vmem:[#allocation8 + $0x1c8] sm:$0xff] }
 0x2fa   : > { %v8189_v57 = vrot.slane %v14599_v3, 4  ;;  %v12033_v48 = vcombine.low %v1880_v55, %v1884_v7  ;;  %v8188_v61 = vsel %vm1950_vm7, %v8187_v47, %v14501_v30  ;;  %v8759_v38 = vrot.slane %v14577_v39, 6  ;;  %v1860_v55 = vld [vmem:[#allocation8 + $0x230] sm:$0xff]  ;;  %v1857_v7 = vld [vmem:[#allocation8 + $0x218] sm:$0xff] }
 0x2fb   : > { %v14643_v56 = vsel %vm1953_vm8, %v7617_v59, %v7616_v13  ;;  %v12035_v58 = vcombine.low %v1881_v24, %v1885_v6  ;;  %v12026_v42 = vcombine.high %v1872_v46, %v1876_v27  ;;  %v9331_v20 = vrot.slane %v14577_v39, 7  ;;  %v1861_v24 = vld [vmem:[#allocation8 + $0x238] sm:$0xff]  ;;  %v1843_v59 = vld [vmem:[#allocation8 + $0x1a8] sm:$0xff] }
 0x2fc   : > { %2364 = vmatpush1.bf16.msra.mxu1 %v12049_v4  ;;  %2405 = vmatpush1.bf16.msra.mxu0 %v12051_v63  ;;  %v14649_v41 = vsel %vm1953_vm8, %v8189_v57, %v8188_v61  ;;  %v12028_v12 = vcombine.high %v1873_v28, %v1877_v51  ;;  %v8761_v2 = vrot.slane %v14599_v3, 5  ;;  %v9333_v4 = vrot.slane %v14599_v3, 6  ;;  %v1834_v61 = vld [vmem:[#allocation8 + $0x160] sm:$0xff] }
 0x2fd   : > { %2365 = vmatprep.subr.bf16.mxu1 %v12042_v21  ;;  %2406 = vmatprep.subr.bf16.mxu0 %v12044_v31  ;;  %v9905_v30 = vrot.slane %v14599_v3, 7  ;;  %v8760_v35 = vsel %vm1950_vm7, %v8759_v38, %v14498_v25  ;;  %v9332_v62 = vsel %vm1950_vm7, %v9331_v20, %v14506_v34  ;;  %v9904_v10 = vsel %vm1950_vm7, %v14577_v39, %v14511_v37  ;;  %v1856_v31 = vld [vmem:[#allocation8 + $0x210] sm:$0xff]  ;;  %v1831_v38 = vld [vmem:[#allocation8 + $0x148] sm:$0xff] }
 0x2fe   : > { %v14660_v63 = vsel %vm1953_vm8, %v8761_v2, %v8760_v35  ;;  %v14663_v29 = vsel %vm1953_vm8, %v9333_v4, %v9332_v62  ;;  %v10476_v15 = vrot.slane %v14577_v39, 1  ;;  %v12025_v19 = vcombine.low %v1872_v46, %v1876_v27  ;;  %v1842_v46 = vld [vmem:[#allocation8 + $0x1a0] sm:$0xff]  ;;  %v1839_v27 = vld [vmem:[#allocation8 + $0x188] sm:$0xff] }
 0x2ff   : > { %v12027_v60 = vcombine.low %v1873_v28, %v1877_v51  ;;  %v14670_v25 = vsel %vm1953_vm8, %v9905_v30, %v9904_v10  ;;  %v12018_v34 = vcombine.high %v1864_v45, %v1868_v5  ;;  %v12020_v21 = vcombine.high %v1865_v8, %v1869_v11  ;;  %v1822_v2 = vld [vmem:[#allocation8 + $0x100] sm:$0xff]  ;;  %v1823_v30 = vld [vmem:[#allocation8 + $0x108] sm:$0xff] }
 0x300   : > { %2366 = vmatpush1.bf16.msra.mxu1 %v12041_v1  ;;  %2407 = vmatpush1.bf16.msra.mxu0 %v12043_v50  ;;  %v10477_v37 = vsel %vm1950_vm7, %v10476_v15, %v14516_v40  ;;  %v12017_v6 = vcombine.low %v1864_v45, %v1868_v5  ;;  %v12019_v23 = vcombine.low %v1865_v8, %v1869_v11  ;;  %v1851_v50 = vld [vmem:[#allocation8 + $0x1e8] sm:$0xff]  ;;  %v1826_v4 = vld [vmem:[#allocation8 + $0x120] sm:$0xff] }
 0x301   : > { %2367 = vmatprep.subr.bf16.mxu1 %v12034_v17  ;;  %2408 = vmatprep.subr.bf16.mxu0 %v12036_v53  ;;  %v14676_v39 = vsel %vm1953_vm8, %v14599_v3, %v10477_v37  ;;  %v12010_v26 = vcombine.high %v1856_v31, %v1860_v55  ;;  %v12012_v1 = vcombine.high %v1857_v7, %v1861_v24  ;;  %v1838_v53 = vld [vmem:[#allocation8 + $0x180] sm:$0xff]  ;;  %v1827_v5 = vld [vmem:[#allocation8 + $0x128] sm:$0xff] }
 0x302   : > { %v12009_v47 = vcombine.low %v1856_v31, %v1860_v55  ;;  %v12011_v40 = vcombine.low %v1857_v7, %v1861_v24  ;;  %v12126_v3 = vcombine.high %v1846_v22, %v1850_v9  ;;  %v12128_v17 = vcombine.high %v1847_v36, %v1851_v50  ;;  %v1814_v62 = vld [vmem:[#allocation8 + $0xc0] sm:$0xff]  ;;  %v1815_v15 = vld [vmem:[#allocation8 + $0xc8] sm:$0xff] }
 0x303   : > { %v12125_v28 = vcombine.low %v1846_v22, %v1850_v9  ;;  %v12127_v51 = vcombine.low %v1847_v36, %v1851_v50  ;;  %v12118_v13 = vcombine.high %v1838_v53, %v1842_v46  ;;  %v12120_v57 = vcombine.high %v1839_v27, %v1843_v59  ;;  %v1818_v10 = vld [vmem:[#allocation8 + $0xe0] sm:$0xff]  ;;  %v1807_v24 = vld [vmem:[#allocation8 + $0x88] sm:$0xff] }
 0x304   : > { %2368 = vmatpush1.bf16.msra.mxu1 %v12033_v48  ;;  %2409 = vmatpush1.bf16.msra.mxu0 %v12035_v58  ;;  %v1830_v48 = vld [vmem:[#allocation8 + $0x140] sm:$0xff]  ;;  %v1835_v58 = vld [vmem:[#allocation8 + $0x168] sm:$0xff]  ;;  %v12119_v20 = vcombine.low %v1839_v27, %v1843_v59  ;;  %v12102_v11 = vcombine.high %v1822_v2, %v1826_v4  ;;  %v12104_v35 = vcombine.high %v1823_v30, %v1827_v5 }
 0x305   : > { %2369 = vmatprep.subr.bf16.mxu1 %v12026_v42  ;;  %2410 = vmatprep.subr.bf16.mxu0 %v12028_v12  ;;  %v12117_v42 = vcombine.low %v1838_v53, %v1842_v46  ;;  %v12110_v12 = vcombine.high %v1830_v48, %v1834_v61  ;;  %v12112_v45 = vcombine.high %v1831_v38, %v1835_v58  ;;  %v1806_v55 = vld [vmem:[#allocation8 + $0x80] sm:$0xff]  ;;  %v1811_v37 = vld [vmem:[#allocation8 + $0xa8] sm:$0xff] }
 0x306   : > { %v12109_v8 = vcombine.low %v1830_v48, %v1834_v61  ;;  %v1810_v7 = vld [vmem:[#allocation8 + $0xa0] sm:$0xff]  ;;  %v1799_v36 = vld [vmem:[#allocation8 + $0x48] sm:$0xff]  ;;  %v1848_v48 = vld [vmem:[#allocation8 + $0x1d0] sm:$0xff] }
 0x307   : > { %v1798_v22 = vld [vmem:[#allocation8 + $0x40] sm:$0xff]  ;;  %v1803_v50 = vld [vmem:[#allocation8 + $0x68] sm:$0xff]  ;;  %v1852_v61 = vld [vmem:[#allocation8 + $0x1f0] sm:$0xff] }
 0x308   : > { %2370 = vmatpush1.bf16.msra.mxu1 %v12025_v19  ;;  %2411 = vmatpush1.bf16.msra.mxu0 %v12027_v60  ;;  %v1819_v19 = vld [vmem:[#allocation8 + $0xe8] sm:$0xff]  ;;  %v12101_v60 = vcombine.low %v1822_v2, %v1826_v4  ;;  %v1802_v9 = vld [vmem:[#allocation8 + $0x60] sm:$0xff]  ;;  %v1840_v2 = vld [vmem:[#allocation8 + $0x190] sm:$0xff] }
 0x309   : > { %2371 = vmatprep.subr.bf16.mxu1 %v12018_v34  ;;  %2412 = vmatprep.subr.bf16.mxu0 %v12020_v21  ;;  %v12103_v34 = vcombine.low %v1823_v30, %v1827_v5  ;;  %v12094_v21 = vcombine.high %v1814_v62, %v1818_v10  ;;  %v12096_v31 = vcombine.high %v1815_v15, %v1819_v19  ;;  %v1790_v53 = vld [vmem:[#allocation8] sm:$0xff]  ;;  %v1791_v27 = vld [vmem:[#allocation8 + $0x8] sm:$0xff]  ;;  %v1844_v4 = vld [vmem:[#allocation8 + $0x1b0] sm:$0xff] }
 0x30a   : > { %v1794_v46 = vld [vmem:[#allocation8 + $0x20] sm:$0xff]  ;;  %v1795_v59 = vld [vmem:[#allocation8 + $0x28] sm:$0xff]  ;;  %v1841_v30 = vld [vmem:[#allocation8 + $0x198] sm:$0xff] }
 0x30b   : > { %v1845_v5 = vld [vmem:[#allocation8 + $0x1b8] sm:$0xff] }
 0x30c   : > { %2372 = vmatpush1.bf16.msra.mxu1 %v12017_v6  ;;  %2413 = vmatpush1.bf16.msra.mxu0 %v12019_v23  ;;  %v12093_v6 = vcombine.low %v1814_v62, %v1818_v10  ;;  %v12095_v23 = vcombine.low %v1815_v15, %v1819_v19  ;;  %v12124_v62 = vcombine.high %v1841_v30, %v1845_v5  ;;  %v1832_v10 = vld [vmem:[#allocation8 + $0x150] sm:$0xff]  ;;  %v1833_v19 = vld [vmem:[#allocation8 + $0x158] sm:$0xff] }
 0x30d   : > { %2373 = vmatprep.subr.bf16.mxu1 %v12010_v26  ;;  %2414 = vmatprep.subr.bf16.mxu0 %v12012_v1  ;;  %v12086_v26 = vcombine.high %v1806_v55, %v1810_v7  ;;  %v12088_v1 = vcombine.high %v1807_v24, %v1811_v37  ;;  %v1836_v15 = vld [vmem:[#allocation8 + $0x170] sm:$0xff] }
 0x310   : > { %2374 = vmatpush1.bf16.msra.mxu1 %v12009_v47  ;;  %2415 = vmatpush1.bf16.msra.mxu0 %v12011_v40  ;;  %v12085_v47 = vcombine.low %v1806_v55, %v1810_v7  ;;  %v12087_v40 = vcombine.low %v1807_v24, %v1811_v37  ;;  %v1824_v55 = vld [vmem:[#allocation8 + $0x110] sm:$0xff]  ;;  %v1825_v24 = vld [vmem:[#allocation8 + $0x118] sm:$0xff] }
 0x311   : > { %2777 = vmatprep.subr.bf16.mxu1 %v12126_v3  ;;  %2818 = vmatprep.subr.bf16.mxu0 %v12128_v17  ;;  %v12078_v3 = vcombine.high %v1798_v22, %v1802_v9  ;;  %v12080_v17 = vcombine.high %v1799_v36, %v1803_v50  ;;  %v1828_v7 = vld [vmem:[#allocation8 + $0x130] sm:$0xff]  ;;  %v1829_v37 = vld [vmem:[#allocation8 + $0x138] sm:$0xff] }
 0x313   : > { %2392 = vmatmul.mubr.bf16.vlgmr.msra.gmra.mxu1 %v14564_v49  ;;  %2433 = vmatmul.mubr.bf16.vlgmr.msra.gmra.mxu0 %v14564_v49  ;;  %v12111_v49 = vcombine.low %v1831_v38, %v1835_v58  ;;  %v1849_v38 = vld [vmem:[#allocation8 + $0x1d8] sm:$0xff] }
 0x314   : > { %2778 = vmatpush1.bf16.msra.mxu1 %v12125_v28  ;;  %2819 = vmatpush1.bf16.msra.mxu0 %v12127_v51  ;;  %v12077_v28 = vcombine.low %v1798_v22, %v1802_v9  ;;  %v12079_v51 = vcombine.low %v1799_v36, %v1803_v50  ;;  %v1853_v58 = vld [vmem:[#allocation8 + $0x1f8] sm:$0xff]  ;;  %v1816_v22 = vld [vmem:[#allocation8 + $0xd0] sm:$0xff] }
 0x315   : > { %2779 = vmatprep.subr.bf16.mxu1 %v12118_v13  ;;  %2820 = vmatprep.subr.bf16.mxu0 %v12120_v57  ;;  %v12070_v13 = vcombine.high %v1790_v53, %v1794_v46  ;;  %v12072_v57 = vcombine.high %v1791_v27, %v1795_v59  ;;  %v1820_v9 = vld [vmem:[#allocation8 + $0xf0] sm:$0xff]  ;;  %v1817_v36 = vld [vmem:[#allocation8 + $0xd8] sm:$0xff] }
 0x316   : > { %2809 = vmatprep.mubr.bf16.mxu1 %v13805_v0  ;;  %2850 = vmatprep.mubr.bf16.mxu0 %v13805_v0  ;;  %v1821_v50 = vld [vmem:[#allocation8 + $0xf8] sm:$0xff] }
 0x318   : > { %2780 = vmatpush1.bf16.msra.mxu1 %v12117_v42  ;;  %2821 = vmatpush1.bf16.msra.mxu0 %v12119_v20  ;;  %v12069_v42 = vcombine.low %v1790_v53, %v1794_v46  ;;  %v12071_v20 = vcombine.low %v1791_v27, %v1795_v59  ;;  %v1808_v53 = vld [vmem:[#allocation8 + $0x90] sm:$0xff]  ;;  %v1809_v27 = vld [vmem:[#allocation8 + $0x98] sm:$0xff] }
 0x319   : > { %2781 = vmatprep.subr.bf16.mxu1 %v12110_v12  ;;  %2822 = vmatprep.subr.bf16.mxu0 %v12112_v45  ;;  %v12130_v12 = vcombine.high %v1848_v48, %v1852_v61  ;;  %v12132_v45 = vcombine.high %v1849_v38, %v1853_v58  ;;  %v1812_v46 = vld [vmem:[#allocation8 + $0xb0] sm:$0xff]  ;;  %v1813_v59 = vld [vmem:[#allocation8 + $0xb8] sm:$0xff] }
 0x31c   : > { %2782 = vmatpush1.bf16.msra.mxu1 %v12109_v8  ;;  %2823 = vmatpush1.bf16.msra.mxu0 %v12111_v49  ;;  %v12129_v8 = vcombine.low %v1848_v48, %v1852_v61  ;;  %v12131_v49 = vcombine.low %v1849_v38, %v1853_v58  ;;  %v1800_v48 = vld [vmem:[#allocation8 + $0x50] sm:$0xff]  ;;  %v1801_v38 = vld [vmem:[#allocation8 + $0x58] sm:$0xff] }
 0x31d   : > { %2783 = vmatprep.subr.bf16.mxu1 %v12102_v11  ;;  %2824 = vmatprep.subr.bf16.mxu0 %v12104_v35  ;;  %v14684_v11 = vpack.c.b16 %v14560_v54, %v14560_v54  ;;  %v12122_v35 = vcombine.high %v1840_v2, %v1844_v4  ;;  %v12114_v54 = vcombine.high %v1832_v10, %v1836_v15  ;;  %v1804_v61 = vld [vmem:[#allocation8 + $0x70] sm:$0xff]  ;;  %v1805_v58 = vld [vmem:[#allocation8 + $0x78] sm:$0xff] }
 0x320   : > { %2784 = vmatpush1.bf16.msra.mxu1 %v12101_v60  ;;  %2825 = vmatpush1.bf16.msra.mxu0 %v12103_v34  ;;  %v1837_v60 = vld [vmem:[#allocation8 + $0x178] sm:$0xff]  ;;  %v12121_v34 = vcombine.low %v1840_v2, %v1844_v4  ;;  %v1792_v2 = vld [vmem:[#allocation8 + $0x10] sm:$0xff] }
 0x321   : > { %2785 = vmatprep.subr.bf16.mxu1 %v12094_v21  ;;  %2826 = vmatprep.subr.bf16.mxu0 %v12096_v31  ;;  %v12123_v21 = vcombine.low %v1841_v30, %v1845_v5  ;;  %v12116_v31 = vcombine.high %v1833_v19, %v1837_v60  ;;  %v1796_v4 = vld [vmem:[#allocation8 + $0x30] sm:$0xff]  ;;  %v1793_v30 = vld [vmem:[#allocation8 + $0x18] sm:$0xff] }
 0x322   : > { %v1797_v5 = vld [vmem:[#allocation8 + $0x38] sm:$0xff] }
 0x324   : > { %2786 = vmatpush1.bf16.msra.mxu1 %v12093_v6  ;;  %2827 = vmatpush1.bf16.msra.mxu0 %v12095_v23  ;;  %v12113_v6 = vcombine.low %v1832_v10, %v1836_v15  ;;  %v12115_v23 = vcombine.low %v1833_v19, %v1837_v60  ;;  %v2997_v10 = vld [vmem:[#allocation8 + $0x5c0] sm:$0xff]  ;;  %v2998_v19 = vld [vmem:[#allocation8 + $0x5c8] sm:$0xff] }
 0x325   : > { %2787 = vmatprep.subr.bf16.mxu1 %v12086_v26  ;;  %2828 = vmatprep.subr.bf16.mxu0 %v12088_v1  ;;  %v12106_v26 = vcombine.high %v1824_v55, %v1828_v7  ;;  %v12108_v1 = vcombine.high %v1825_v24, %v1829_v37  ;;  %v3001_v15 = vld [vmem:[#allocation8 + $0x5e0] sm:$0xff]  ;;  %v3002_v60 = vld [vmem:[#allocation8 + $0x5e8] sm:$0xff] }
 0x328   : > { %2788 = vmatpush1.bf16.msra.mxu1 %v12085_v47  ;;  %2829 = vmatpush1.bf16.msra.mxu0 %v12087_v40  ;;  %v12105_v47 = vcombine.low %v1824_v55, %v1828_v7  ;;  %v12107_v40 = vcombine.low %v1825_v24, %v1829_v37  ;;  %v2989_v55 = vld [vmem:[#allocation8 + $0x580] sm:$0xff]  ;;  %v2990_v24 = vld [vmem:[#allocation8 + $0x588] sm:$0xff] }
 0x329   : > { %2789 = vmatprep.subr.bf16.mxu1 %v12078_v3  ;;  %2830 = vmatprep.subr.bf16.mxu0 %v12080_v17  ;;  %v12098_v3 = vcombine.high %v1816_v22, %v1820_v9  ;;  %v12100_v17 = vcombine.high %v1817_v36, %v1821_v50  ;;  %v2993_v7 = vld [vmem:[#allocation8 + $0x5a0] sm:$0xff]  ;;  %v2994_v37 = vld [vmem:[#allocation8 + $0x5a8] sm:$0xff] }
 0x32c   : > { %2790 = vmatpush1.bf16.msra.mxu1 %v12077_v28  ;;  %2831 = vmatpush1.bf16.msra.mxu0 %v12079_v51  ;;  %v12097_v28 = vcombine.low %v1816_v22, %v1820_v9  ;;  %v12099_v51 = vcombine.low %v1817_v36, %v1821_v50  ;;  %v2981_v22 = vld [vmem:[#allocation8 + $0x540] sm:$0xff]  ;;  %v2982_v36 = vld [vmem:[#allocation8 + $0x548] sm:$0xff] }
 0x32d   : > { %2791 = vmatprep.subr.bf16.mxu1 %v12070_v13  ;;  %2832 = vmatprep.subr.bf16.mxu0 %v12072_v57  ;;  %v12090_v13 = vcombine.high %v1808_v53, %v1812_v46  ;;  %v12092_v57 = vcombine.high %v1809_v27, %v1813_v59  ;;  %v2985_v9 = vld [vmem:[#allocation8 + $0x560] sm:$0xff]  ;;  %v2986_v50 = vld [vmem:[#allocation8 + $0x568] sm:$0xff] }
 0x330   : > { %2792 = vmatpush1.bf16.msra.mxu1 %v12069_v42  ;;  %2833 = vmatpush1.bf16.msra.mxu0 %v12071_v20  ;;  %v12089_v42 = vcombine.low %v1808_v53, %v1812_v46  ;;  %v12091_v20 = vcombine.low %v1809_v27, %v1813_v59  ;;  %v2973_v53 = vld [vmem:[#allocation8 + $0x500] sm:$0xff]  ;;  %v2974_v27 = vld [vmem:[#allocation8 + $0x508] sm:$0xff] }
 0x331   : > { %2859 = vmatprep.subr.bf16.mxu1 %v12130_v12  ;;  %2900 = vmatprep.subr.bf16.mxu0 %v12132_v45  ;;  %v12082_v12 = vcombine.high %v1800_v48, %v1804_v61  ;;  %v12084_v45 = vcombine.high %v1801_v38, %v1805_v58  ;;  %v2977_v46 = vld [vmem:[#allocation8 + $0x520] sm:$0xff]  ;;  %v2978_v59 = vld [vmem:[#allocation8 + $0x528] sm:$0xff] }
 0x333   : > { %2810 = vmatmul.mubr.bf16.vlgmr.msra.gmra.mxu1 %v14684_v11  ;;  %2851 = vmatmul.mubr.bf16.vlgmr.msra.gmra.mxu0 %v14684_v11 }
 0x334   : > { %2860 = vmatpush1.bf16.msra.mxu1 %v12129_v8  ;;  %2901 = vmatpush1.bf16.msra.mxu0 %v12131_v49  ;;  %v12081_v8 = vcombine.low %v1800_v48, %v1804_v61  ;;  %v12083_v49 = vcombine.low %v1801_v38, %v1805_v58  ;;  %v2969_v48 = vld [vmem:[#allocation8 + $0x4e0] sm:$0xff]  ;;  %v2966_v61 = vld [vmem:[#allocation8 + $0x4c8] sm:$0xff]  ;;  %v12165_v58 = vcombine.low %v2973_v53, %v2977_v46 }
 0x335   : > { %2861 = vmatprep.subr.bf16.mxu1 %v12122_v35  ;;  %2902 = vmatprep.subr.bf16.mxu0 %v12124_v62  ;;  %v12074_v35 = vcombine.high %v1792_v2, %v1796_v4  ;;  %v12076_v62 = vcombine.high %v1793_v30, %v1797_v5  ;;  %v2970_v38 = vld [vmem:[#allocation8 + $0x4e8] sm:$0xff] }
 0x336   : > { %2891 = vmatprep.mubr.bf16.mxu1 %v13805_v0  ;;  %2932 = vmatprep.mubr.bf16.mxu0 %v13805_v0 }
 0x338   : > { %2862 = vmatpush1.bf16.msra.mxu1 %v12121_v34  ;;  %2903 = vmatpush1.bf16.msra.mxu0 %v12123_v21  ;;  %v12073_v34 = vcombine.low %v1792_v2, %v1796_v4  ;;  %v12075_v21 = vcombine.low %v1793_v30, %v1797_v5  ;;  %v2961_v2 = vld [vmem:[#allocation8 + $0x4a0] sm:$0xff]  ;;  %v2958_v4 = vld [vmem:[#allocation8 + $0x488] sm:$0xff] }
 0x339   : > { %2863 = vmatprep.subr.bf16.mxu1 %v12114_v54  ;;  %2904 = vmatprep.subr.bf16.mxu0 %v12116_v31  ;;  %v12190_v54 = vcombine.high %v2997_v10, %v3001_v15  ;;  %v12192_v31 = vcombine.high %v2998_v19, %v3002_v60  ;;  %v2962_v30 = vld [vmem:[#allocation8 + $0x4a8] sm:$0xff] }
 0x33c   : > { %2864 = vmatpush1.bf16.msra.mxu1 %v12113_v6  ;;  %2905 = vmatpush1.bf16.msra.mxu0 %v12115_v23  ;;  %v12189_v6 = vcombine.low %v2997_v10, %v3001_v15  ;;  %v12191_v23 = vcombine.low %v2998_v19, %v3002_v60  ;;  %v2953_v10 = vld [vmem:[#allocation8 + $0x460] sm:$0xff]  ;;  %v2950_v15 = vld [vmem:[#allocation8 + $0x448] sm:$0xff] }
 0x33d   : > { %2865 = vmatprep.subr.bf16.mxu1 %v12106_v26  ;;  %2906 = vmatprep.subr.bf16.mxu0 %v12108_v1  ;;  %v12182_v26 = vcombine.high %v2989_v55, %v2993_v7  ;;  %v12184_v1 = vcombine.high %v2990_v24, %v2994_v37  ;;  %v2954_v19 = vld [vmem:[#allocation8 + $0x468] sm:$0xff] }
 0x340   : > { %2866 = vmatpush1.bf16.msra.mxu1 %v12105_v47  ;;  %2907 = vmatpush1.bf16.msra.mxu0 %v12107_v40  ;;  %v12181_v47 = vcombine.low %v2989_v55, %v2993_v7  ;;  %v12183_v40 = vcombine.low %v2990_v24, %v2994_v37  ;;  %v2945_v55 = vld [vmem:[#allocation8 + $0x420] sm:$0xff]  ;;  %v2942_v7 = vld [vmem:[#allocation8 + $0x408] sm:$0xff] }
 0x341   : > { %2867 = vmatprep.subr.bf16.mxu1 %v12098_v3  ;;  %2908 = vmatprep.subr.bf16.mxu0 %v12100_v17  ;;  %v12174_v3 = vcombine.high %v2981_v22, %v2985_v9  ;;  %v12176_v17 = vcombine.high %v2982_v36, %v2986_v50  ;;  %v2946_v24 = vld [vmem:[#allocation8 + $0x428] sm:$0xff] }
 0x344   : > { %2868 = vmatpush1.bf16.msra.mxu1 %v12097_v28  ;;  %2909 = vmatpush1.bf16.msra.mxu0 %v12099_v51  ;;  %v12173_v28 = vcombine.low %v2981_v22, %v2985_v9  ;;  %v12166_v51 = vcombine.high %v2973_v53, %v2977_v46  ;;  %v3003_v22 = vld [vmem:[#allocation8 + $0x5f0] sm:$0xff]  ;;  %v3000_v9 = vld [vmem:[#allocation8 + $0x5d8] sm:$0xff] }
 0x345   : > { %2869 = vmatprep.subr.bf16.mxu1 %v12090_v13  ;;  %2910 = vmatprep.subr.bf16.mxu0 %v12092_v57  ;;  %v12168_v13 = vcombine.high %v2974_v27, %v2978_v59  ;;  %v2965_v57 = vld [vmem:[#allocation8 + $0x4c0] sm:$0xff]  ;;  %v2995_v53 = vld [vmem:[#allocation8 + $0x5b0] sm:$0xff]  ;;  %v2992_v46 = vld [vmem:[#allocation8 + $0x598] sm:$0xff] }
 0x346   : > { %v12157_v5 = vcombine.low %v2965_v57, %v2969_v48 }
 0x348   : > { %2870 = vmatpush1.bf16.msra.mxu1 %v12089_v42  ;;  %2911 = vmatpush1.bf16.msra.mxu0 %v12091_v20  ;;  %v12167_v42 = vcombine.low %v2974_v27, %v2978_v59  ;;  %v12158_v20 = vcombine.high %v2965_v57, %v2969_v48  ;;  %v2996_v27 = vld [vmem:[#allocation8 + $0x5b8] sm:$0xff]  ;;  %v2983_v57 = vld [vmem:[#allocation8 + $0x550] sm:$0xff] }
 0x349   : > { %2871 = vmatprep.subr.bf16.mxu1 %v12082_v12  ;;  %2912 = vmatprep.subr.bf16.mxu0 %v12084_v45  ;;  %v12160_v12 = vcombine.high %v2966_v61, %v2970_v38  ;;  %v2957_v45 = vld [vmem:[#allocation8 + $0x480] sm:$0xff]  ;;  %v2987_v48 = vld [vmem:[#allocation8 + $0x570] sm:$0xff] }
 0x34a   : > { %v12149_v60 = vcombine.low %v2957_v45, %v2961_v2 }
 0x34c   : > { %2872 = vmatpush1.bf16.msra.mxu1 %v12081_v8  ;;  %2913 = vmatpush1.bf16.msra.mxu0 %v12083_v49  ;;  %v12159_v8 = vcombine.low %v2966_v61, %v2970_v38  ;;  %v12150_v49 = vcombine.high %v2957_v45, %v2961_v2  ;;  %v2984_v61 = vld [vmem:[#allocation8 + $0x558] sm:$0xff]  ;;  %v2979_v45 = vld [vmem:[#allocation8 + $0x530] sm:$0xff] }
 0x34d   : > { %2873 = vmatprep.subr.bf16.mxu1 %v12074_v35  ;;  %2914 = vmatprep.subr.bf16.mxu0 %v12076_v62  ;;  %v12152_v35 = vcombine.high %v2958_v4, %v2962_v30  ;;  %v2949_v62 = vld [vmem:[#allocation8 + $0x440] sm:$0xff]  ;;  %v2988_v38 = vld [vmem:[#allocation8 + $0x578] sm:$0xff] }
 0x34e   : > { %v12141_v37 = vcombine.low %v2949_v62, %v2953_v10  ;;  %v2976_v2 = vld [vmem:[#allocation8 + $0x518] sm:$0xff] }
 0x350   : > { %2874 = vmatpush1.bf16.msra.mxu1 %v12073_v34  ;;  %2915 = vmatpush1.bf16.msra.mxu0 %v12075_v21  ;;  %v12151_v34 = vcombine.low %v2958_v4, %v2962_v30  ;;  %v12142_v21 = vcombine.high %v2949_v62, %v2953_v10  ;;  %v2980_v4 = vld [vmem:[#allocation8 + $0x538] sm:$0xff]  ;;  %v12177_v30 = vcombine.low %v2983_v57, %v2987_v48  ;;  %v2971_v62 = vld [vmem:[#allocation8 + $0x4f0] sm:$0xff] }
 0x351   : > { %3341 = vmatprep.subr.bf16.mxu1 %v12190_v54  ;;  %3382 = vmatprep.subr.bf16.mxu0 %v12192_v31  ;;  %v12144_v54 = vcombine.high %v2950_v15, %v2954_v19  ;;  %v2941_v31 = vld [vmem:[#allocation8 + $0x400] sm:$0xff]  ;;  %v2968_v10 = vld [vmem:[#allocation8 + $0x4d8] sm:$0xff] }
 0x353   : > { %2892 = vmatmul.mubr.bf16.vlgmr.msra.gmra.mxu1 %v14684_v11  ;;  %2933 = vmatmul.mubr.bf16.vlgmr.msra.gmra.mxu0 %v14684_v11  ;;  %v12175_v11 = vcombine.low %v2982_v36, %v2986_v50  ;;  %v3004_v36 = vld [vmem:[#allocation8 + $0x5f8] sm:$0xff]  ;;  %v12133_v50 = vcombine.low %v2941_v31, %v2945_v55 }
 0x354   : > { %3342 = vmatpush1.bf16.msra.mxu1 %v12189_v6  ;;  %3383 = vmatpush1.bf16.msra.mxu0 %v12191_v23  ;;  %v12143_v6 = vcombine.low %v2950_v15, %v2954_v19  ;;  %v12134_v23 = vcombine.high %v2941_v31, %v2945_v55  ;;  %v2972_v15 = vld [vmem:[#allocation8 + $0x4f8] sm:$0xff]  ;;  %v2963_v31 = vld [vmem:[#allocation8 + $0x4b0] sm:$0xff] }
 0x355   : > { %3343 = vmatprep.subr.bf16.mxu1 %v12182_v26  ;;  %3384 = vmatprep.subr.bf16.mxu0 %v12184_v1  ;;  %v12136_v26 = vcombine.high %v2942_v7, %v2946_v24  ;;  %v2999_v1 = vld [vmem:[#allocation8 + $0x5d0] sm:$0xff]  ;;  %v2960_v55 = vld [vmem:[#allocation8 + $0x498] sm:$0xff] }
 0x356   : > { %3373 = vmatprep.mubr.bf16.mxu1 %v13805_v0  ;;  %3414 = vmatprep.mubr.bf16.mxu0 %v13805_v0  ;;  %v12193_v59 = vcombine.low %v2999_v1, %v3003_v22 }
 0x358   : > { %3344 = vmatpush1.bf16.msra.mxu1 %v12181_v47  ;;  %3385 = vmatpush1.bf16.msra.mxu0 %v12183_v40  ;;  %v12135_v47 = vcombine.low %v2942_v7, %v2946_v24  ;;  %v12194_v40 = vcombine.high %v2999_v1, %v3003_v22  ;;  %v2964_v7 = vld [vmem:[#allocation8 + $0x4b8] sm:$0xff]  ;;  %v2955_v1 = vld [vmem:[#allocation8 + $0x470] sm:$0xff] }
 0x359   : > { %3345 = vmatprep.subr.bf16.mxu1 %v12174_v3  ;;  %3386 = vmatprep.subr.bf16.mxu0 %v12176_v17  ;;  %v12196_v3 = vcombine.high %v3000_v9, %v3004_v36  ;;  %v2991_v17 = vld [vmem:[#allocation8 + $0x590] sm:$0xff]  ;;  %v2952_v22 = vld [vmem:[#allocation8 + $0x458] sm:$0xff] }
 0x35c   : > { %3346 = vmatpush1.bf16.msra.mxu1 %v12173_v28  ;;  %3387 = vmatpush1.bf16.msra.mxu0 %v12175_v11  ;;  %v12195_v28 = vcombine.low %v3000_v9, %v3004_v36  ;;  %v14696_v11 = vpack.c.b16 %v14570_v52, %v14570_v52  ;;  %v12178_v52 = vcombine.high %v2983_v57, %v2987_v48  ;;  %v2956_v9 = vld [vmem:[#allocation8 + $0x478] sm:$0xff]  ;;  %v3573_v57 = vld [vmem:[#allocation8 + $0x7e0] sm:$0xff]  ;;  %v3570_v48 = vld [vmem:[#allocation8 + $0x7c8] sm:$0xff] }
 0x35d   : > { %3347 = vmatprep.subr.bf16.mxu1 %v12166_v51  ;;  %3388 = vmatprep.subr.bf16.mxu0 %v12168_v13  ;;  %v12186_v51 = vcombine.high %v2991_v17, %v2995_v53  ;;  %v12188_v13 = vcombine.high %v2992_v46, %v2996_v27 }
 0x360   : > { %3348 = vmatpush1.bf16.msra.mxu1 %v12165_v58  ;;  %3389 = vmatpush1.bf16.msra.mxu0 %v12167_v42  ;;  %v12185_v58 = vcombine.low %v2991_v17, %v2995_v53  ;;  %v12187_v42 = vcombine.low %v2992_v46, %v2996_v27  ;;  %v2947_v17 = vld [vmem:[#allocation8 + $0x430] sm:$0xff]  ;;  %v2944_v53 = vld [vmem:[#allocation8 + $0x418] sm:$0xff] }
 0x361   : > { %3349 = vmatprep.subr.bf16.mxu1 %v12158_v20  ;;  %3390 = vmatprep.subr.bf16.mxu0 %v12160_v12  ;;  %v12180_v20 = vcombine.high %v2984_v61, %v2988_v38  ;;  %v2975_v12 = vld [vmem:[#allocation8 + $0x510] sm:$0xff]  ;;  %v2948_v46 = vld [vmem:[#allocation8 + $0x438] sm:$0xff] }
 0x362   : > { %v12169_v19 = vcombine.low %v2975_v12, %v2979_v45 }
 0x364   : > { %3350 = vmatpush1.bf16.msra.mxu1 %v12157_v5  ;;  %3391 = vmatpush1.bf16.msra.mxu0 %v12159_v8  ;;  %v12179_v5 = vcombine.low %v2984_v61, %v2988_v38  ;;  %v12170_v8 = vcombine.high %v2975_v12, %v2979_v45  ;;  %v3574_v61 = vld [vmem:[#allocation8 + $0x7e8] sm:$0xff]  ;;  %v3565_v12 = vld [vmem:[#allocation8 + $0x7a0] sm:$0xff] }
 0x365   : > { %3351 = vmatprep.subr.bf16.mxu1 %v12150_v49  ;;  %3392 = vmatprep.subr.bf16.mxu0 %v12152_v35  ;;  %v12172_v49 = vcombine.high %v2976_v2, %v2980_v4  ;;  %v2967_v35 = vld [vmem:[#allocation8 + $0x4d0] sm:$0xff]  ;;  %v3562_v45 = vld [vmem:[#allocation8 + $0x788] sm:$0xff] }
 0x366   : > { %v12161_v24 = vcombine.low %v2967_v35, %v2971_v62 }
 0x368   : > { %3352 = vmatpush1.bf16.msra.mxu1 %v12149_v60  ;;  %3393 = vmatpush1.bf16.msra.mxu0 %v12151_v34  ;;  %v12171_v60 = vcombine.low %v2976_v2, %v2980_v4  ;;  %v12162_v34 = vcombine.high %v2967_v35, %v2971_v62  ;;  %v3566_v2 = vld [vmem:[#allocation8 + $0x7a8] sm:$0xff]  ;;  %v3557_v35 = vld [vmem:[#allocation8 + $0x760] sm:$0xff] }
 0x369   : > { %3353 = vmatprep.subr.bf16.mxu1 %v12142_v21  ;;  %3394 = vmatprep.subr.bf16.mxu0 %v12144_v54  ;;  %v12164_v21 = vcombine.high %v2968_v10, %v2972_v15  ;;  %v2959_v54 = vld [vmem:[#allocation8 + $0x490] sm:$0xff]  ;;  %v3554_v62 = vld [vmem:[#allocation8 + $0x748] sm:$0xff] }
 0x36a   : > { %v12153_v36 = vcombine.low %v2959_v54, %v2963_v31 }
 0x36c   : > { %3354 = vmatpush1.bf16.msra.mxu1 %v12141_v37  ;;  %3395 = vmatpush1.bf16.msra.mxu0 %v12143_v6  ;;  %v12163_v37 = vcombine.low %v2968_v10, %v2972_v15  ;;  %v12154_v6 = vcombine.high %v2959_v54, %v2963_v31  ;;  %v3558_v10 = vld [vmem:[#allocation8 + $0x768] sm:$0xff]  ;;  %v3549_v54 = vld [vmem:[#allocation8 + $0x720] sm:$0xff] }
 0x36d   : > { %3355 = vmatprep.subr.bf16.mxu1 %v12134_v23  ;;  %3396 = vmatprep.subr.bf16.mxu0 %v12136_v26  ;;  %v12156_v23 = vcombine.high %v2960_v55, %v2964_v7  ;;  %v2951_v26 = vld [vmem:[#allocation8 + $0x450] sm:$0xff]  ;;  %v3546_v31 = vld [vmem:[#allocation8 + $0x708] sm:$0xff] }
 0x36e   : > { %v12145_v27 = vcombine.low %v2951_v26, %v2955_v1 }
 0x370   : > { %3356 = vmatpush1.bf16.msra.mxu1 %v12133_v50  ;;  %3397 = vmatpush1.bf16.msra.mxu0 %v12135_v47  ;;  %v12155_v50 = vcombine.low %v2960_v55, %v2964_v7  ;;  %v12146_v47 = vcombine.high %v2951_v26, %v2955_v1  ;;  %v3550_v55 = vld [vmem:[#allocation8 + $0x728] sm:$0xff] }
 0x371   : > { %3423 = vmatprep.subr.bf16.mxu1 %v12194_v40  ;;  %3464 = vmatprep.subr.bf16.mxu0 %v12196_v3  ;;  %v12148_v40 = vcombine.high %v2952_v22, %v2956_v9  ;;  %v2943_v3 = vld [vmem:[#allocation8 + $0x410] sm:$0xff]  ;;  %v3538_v26 = vld [vmem:[#allocation8 + $0x6c8] sm:$0xff] }
 0x372   : > { %v12137_v38 = vcombine.low %v2943_v3, %v2947_v17  ;;  %v3542_v1 = vld [vmem:[#allocation8 + $0x6e8] sm:$0xff] }
 0x373   : > { %3374 = vmatmul.mubr.bf16.vlgmr.msra.gmra.mxu1 %v14696_v11  ;;  %3415 = vmatmul.mubr.bf16.vlgmr.msra.gmra.mxu0 %v14696_v11 }
 0x374   : > { %3424 = vmatpush1.bf16.msra.mxu1 %v12193_v59  ;;  %3465 = vmatpush1.bf16.msra.mxu0 %v12195_v28  ;;  %v12147_v59 = vcombine.low %v2952_v22, %v2956_v9  ;;  %v12138_v28 = vcombine.high %v2943_v3, %v2947_v17  ;;  %v12231_v9 = vcombine.low %v3546_v31, %v3550_v55  ;;  %v3530_v3 = vld [vmem:[#allocation8 + $0x688] sm:$0xff] }
 0x375   : > { %3425 = vmatprep.subr.bf16.mxu1 %v12186_v51  ;;  %3466 = vmatprep.subr.bf16.mxu0 %v12188_v13  ;;  %v12140_v51 = vcombine.high %v2944_v53, %v2948_v46  ;;  %v3569_v13 = vld [vmem:[#allocation8 + $0x7c0] sm:$0xff]  ;;  %v3534_v17 = vld [vmem:[#allocation8 + $0x6a8] sm:$0xff] }
 0x376   : > { %3455 = vmatprep.mubr.bf16.mxu1 %v13805_v0  ;;  %3496 = vmatprep.mubr.bf16.mxu0 %v13805_v0  ;;  %v12253_v4 = vcombine.low %v3569_v13, %v3573_v57 }
 0x378   : > { %3426 = vmatpush1.bf16.msra.mxu1 %v12185_v58  ;;  %3467 = vmatpush1.bf16.msra.mxu0 %v12187_v42  ;;  %v12139_v58 = vcombine.low %v2944_v53, %v2948_v46  ;;  %v12254_v42 = vcombine.high %v3569_v13, %v3573_v57  ;;  %v12223_v46 = vcombine.low %v3538_v26, %v3542_v1  ;;  %v3522_v13 = vld [vmem:[#allocation8 + $0x648] sm:$0xff] }
 0x379   : > { %3427 = vmatprep.subr.bf16.mxu1 %v12178_v52  ;;  %3468 = vmatprep.subr.bf16.mxu0 %v12180_v20  ;;  %v12256_v52 = vcombine.high %v3570_v48, %v3574_v61  ;;  %v3561_v20 = vld [vmem:[#allocation8 + $0x780] sm:$0xff]  ;;  %v3526_v57 = vld [vmem:[#allocation8 + $0x668] sm:$0xff] }
 0x37a   : > { %v12245_v15 = vcombine.low %v3561_v20, %v3565_v12 }
 0x37c   : > { %3428 = vmatpush1.bf16.msra.mxu1 %v12177_v30  ;;  %3469 = vmatpush1.bf16.msra.mxu0 %v12179_v5  ;;  %v12255_v30 = vcombine.low %v3570_v48, %v3574_v61  ;;  %v12246_v5 = vcombine.high %v3561_v20, %v3565_v12  ;;  %v12215_v61 = vcombine.low %v3530_v3, %v3534_v17  ;;  %v3514_v20 = vld [vmem:[#allocation8 + $0x608] sm:$0xff] }
 0x37d   : > { %3429 = vmatprep.subr.bf16.mxu1 %v12170_v8  ;;  %3470 = vmatprep.subr.bf16.mxu0 %v12172_v49  ;;  %v12248_v8 = vcombine.high %v3562_v45, %v3566_v2  ;;  %v3553_v49 = vld [vmem:[#allocation8 + $0x740] sm:$0xff]  ;;  %v3518_v12 = vld [vmem:[#allocation8 + $0x628] sm:$0xff] }
 0x37e   : > { %v12237_v7 = vcombine.low %v3553_v49, %v3557_v35 }
 0x380   : > { %3430 = vmatpush1.bf16.msra.mxu1 %v12169_v19  ;;  %3471 = vmatpush1.bf16.msra.mxu0 %v12171_v60  ;;  %v12247_v19 = vcombine.low %v3562_v45, %v3566_v2  ;;  %v12238_v60 = vcombine.high %v3553_v49, %v3557_v35  ;;  %v12207_v2 = vcombine.low %v3522_v13, %v3526_v57  ;;  %v3572_v49 = vld [vmem:[#allocation8 + $0x7d8] sm:$0xff] }
 0x381   : > { %3431 = vmatprep.subr.bf16.mxu1 %v12162_v34  ;;  %3472 = vmatprep.subr.bf16.mxu0 %v12164_v21  ;;  %v12240_v34 = vcombine.high %v3554_v62, %v3558_v10  ;;  %v3545_v21 = vld [vmem:[#allocation8 + $0x700] sm:$0xff]  ;;  %v3576_v35 = vld [vmem:[#allocation8 + $0x7f8] sm:$0xff] }
 0x382   : > { %v12229_v22 = vcombine.low %v3545_v21, %v3549_v54 }
 0x384   : > { %3432 = vmatpush1.bf16.msra.mxu1 %v12161_v24  ;;  %3473 = vmatpush1.bf16.msra.mxu0 %v12163_v37  ;;  %v12230_v24 = vcombine.high %v3545_v21, %v3549_v54  ;;  %v12232_v37 = vcombine.high %v3546_v31, %v3550_v55  ;;  %v3564_v21 = vld [vmem:[#allocation8 + $0x798] sm:$0xff]  ;;  %v12259_v55 = vcombine.low %v3572_v49, %v3576_v35 }
 0x385   : > { %3433 = vmatprep.subr.bf16.mxu1 %v12154_v6  ;;  %3474 = vmatprep.subr.bf16.mxu0 %v12156_v23  ;;  %v3537_v6 = vld [vmem:[#allocation8 + $0x6c0] sm:$0xff]  ;;  %v3568_v54 = vld [vmem:[#allocation8 + $0x7b8] sm:$0xff] }
 0x386   : > { %v3541_v23 = vld [vmem:[#allocation8 + $0x6e0] sm:$0xff] }
 0x387   : > { %v12221_v53 = vcombine.low %v3537_v6, %v3541_v23 }
 0x388   : > { %3434 = vmatpush1.bf16.msra.mxu1 %v12153_v36  ;;  %3475 = vmatpush1.bf16.msra.mxu0 %v12155_v50  ;;  %v12222_v36 = vcombine.high %v3537_v6, %v3541_v23  ;;  %v12224_v50 = vcombine.high %v3538_v26, %v3542_v1  ;;  %v3559_v6 = vld [vmem:[#allocation8 + $0x770] sm:$0xff]  ;;  %v3556_v23 = vld [vmem:[#allocation8 + $0x758] sm:$0xff] }
 0x389   : > { %3435 = vmatprep.subr.bf16.mxu1 %v12146_v47  ;;  %3476 = vmatprep.subr.bf16.mxu0 %v12148_v40  ;;  %v3529_v47 = vld [vmem:[#allocation8 + $0x680] sm:$0xff]  ;;  %v3560_v26 = vld [vmem:[#allocation8 + $0x778] sm:$0xff] }
 0x38a   : > { %v3533_v40 = vld [vmem:[#allocation8 + $0x6a0] sm:$0xff] }
 0x38b   : > { %v12213_v48 = vcombine.low %v3529_v47, %v3533_v40 }
 0x38c   : > { %3436 = vmatpush1.bf16.msra.mxu1 %v12145_v27  ;;  %3477 = vmatpush1.bf16.msra.mxu0 %v12147_v59  ;;  %v12214_v27 = vcombine.high %v3529_v47, %v3533_v40  ;;  %v12216_v59 = vcombine.high %v3530_v3, %v3534_v17  ;;  %v12244_v40 = vcombine.high %v3556_v23, %v3560_v26  ;;  %v3547_v3 = vld [vmem:[#allocation8 + $0x710] sm:$0xff] }
 0x38d   : > { %3437 = vmatprep.subr.bf16.mxu1 %v12138_v28  ;;  %3478 = vmatprep.subr.bf16.mxu0 %v12140_v51  ;;  %v3521_v28 = vld [vmem:[#allocation8 + $0x640] sm:$0xff]  ;;  %v3551_v17 = vld [vmem:[#allocation8 + $0x730] sm:$0xff] }
 0x38e   : > { %v3525_v51 = vld [vmem:[#allocation8 + $0x660] sm:$0xff] }
 0x38f   : > { %v12205_v45 = vcombine.low %v3521_v28, %v3525_v51 }
 0x390   : > { %3438 = vmatpush1.bf16.msra.mxu1 %v12137_v38  ;;  %3479 = vmatpush1.bf16.msra.mxu0 %v12139_v58  ;;  %v12206_v38 = vcombine.high %v3521_v28, %v3525_v51  ;;  %v12208_v58 = vcombine.high %v3522_v13, %v3526_v57  ;;  %v12243_v51 = vcombine.low %v3556_v23, %v3560_v26 }
 0x391   : > { %3913 = vmatprep.subr.bf16.mxu1 %v12254_v42  ;;  %3954 = vmatprep.subr.bf16.mxu0 %v12256_v52  ;;  %v3513_v42 = vld [vmem:[#allocation8 + $0x600] sm:$0xff] }
 0x392   : > { %v3517_v52 = vld [vmem:[#allocation8 + $0x620] sm:$0xff] }
 0x393   : > { %3456 = vmatmul.mubr.bf16.vlgmr.msra.gmra.mxu1 %v14696_v11  ;;  %3497 = vmatmul.mubr.bf16.vlgmr.msra.gmra.mxu0 %v14696_v11  ;;  %v12239_v11 = vcombine.low %v3554_v62, %v3558_v10  ;;  %v12197_v62 = vcombine.low %v3513_v42, %v3517_v52  ;;  %v12199_v10 = vcombine.low %v3514_v20, %v3518_v12 }
 0x394   : > { %3914 = vmatpush1.bf16.msra.mxu1 %v12253_v4  ;;  %3955 = vmatpush1.bf16.msra.mxu0 %v12255_v30  ;;  %v12198_v4 = vcombine.high %v3513_v42, %v3517_v52  ;;  %v12200_v30 = vcombine.high %v3514_v20, %v3518_v12  ;;  %v3540_v42 = vld [vmem:[#allocation8 + $0x6d8] sm:$0xff]  ;;  %v12233_v20 = vcombine.low %v3547_v3, %v3551_v17 }
 0x395   : > { %3915 = vmatprep.subr.bf16.mxu1 %v12246_v5  ;;  %3956 = vmatprep.subr.bf16.mxu0 %v12248_v8  ;;  %v3571_v5 = vld [vmem:[#allocation8 + $0x7d0] sm:$0xff]  ;;  %v3544_v52 = vld [vmem:[#allocation8 + $0x6f8] sm:$0xff] }
 0x396   : > { %3945 = vmatprep.mubr.bf16.mxu1 %v13805_v0  ;;  %3986 = vmatprep.mubr.bf16.mxu0 %v13805_v0  ;;  %v3575_v8 = vld [vmem:[#allocation8 + $0x7f0] sm:$0xff] }
 0x397   : > { %v12257_v31 = vcombine.low %v3571_v5, %v3575_v8 }
 0x398   : > { %3916 = vmatpush1.bf16.msra.mxu1 %v12245_v15  ;;  %3957 = vmatpush1.bf16.msra.mxu0 %v12247_v19  ;;  %v12258_v15 = vcombine.high %v3571_v5, %v3575_v8  ;;  %v12260_v19 = vcombine.high %v3572_v49, %v3576_v35  ;;  %v3532_v5 = vld [vmem:[#allocation8 + $0x698] sm:$0xff]  ;;  %v12227_v35 = vcombine.low %v3540_v42, %v3544_v52 }
 0x399   : > { %3917 = vmatprep.subr.bf16.mxu1 %v12238_v60  ;;  %3958 = vmatprep.subr.bf16.mxu0 %v12240_v34  ;;  %v3563_v60 = vld [vmem:[#allocation8 + $0x790] sm:$0xff]  ;;  %v3536_v8 = vld [vmem:[#allocation8 + $0x6b8] sm:$0xff] }
 0x39a   : > { %v3567_v34 = vld [vmem:[#allocation8 + $0x7b0] sm:$0xff] }
 0x39c   : > { %3918 = vmatpush1.bf16.msra.mxu1 %v12237_v7  ;;  %3959 = vmatpush1.bf16.msra.mxu0 %v12239_v11  ;;  %v14708_v7 = vpack.c.b16 %v14593_v43, %v14593_v43  ;;  %v12250_v11 = vcombine.high %v3563_v60, %v3567_v34  ;;  %v12249_v43 = vcombine.low %v3563_v60, %v3567_v34  ;;  %v3524_v60 = vld [vmem:[#allocation8 + $0x658] sm:$0xff] }
 0x39d   : > { %3919 = vmatprep.subr.bf16.mxu1 %v12230_v24  ;;  %3960 = vmatprep.subr.bf16.mxu0 %v12232_v37  ;;  %v12252_v24 = vcombine.high %v3564_v21, %v3568_v54  ;;  %v3555_v37 = vld [vmem:[#allocation8 + $0x750] sm:$0xff]  ;;  %v3528_v34 = vld [vmem:[#allocation8 + $0x678] sm:$0xff] }
 0x39e   : > { %v12242_v47 = vcombine.high %v3555_v37, %v3559_v6  ;;  %v12241_v28 = vcombine.low %v3555_v37, %v3559_v6  ;;  %v3516_v37 = vld [vmem:[#allocation8 + $0x618] sm:$0xff]  ;;  %v12211_v26 = vcombine.low %v3524_v60, %v3528_v34 }
 0x39f   : > { %v3520_v6 = vld [vmem:[#allocation8 + $0x638] sm:$0xff] }
 0x3a0   : > { %3920 = vmatpush1.bf16.msra.mxu1 %v12229_v22  ;;  %3961 = vmatpush1.bf16.msra.mxu0 %v12231_v9  ;;  %v12251_v9 = vcombine.low %v3564_v21, %v3568_v54  ;;  %v12219_v54 = vcombine.low %v3532_v5, %v3536_v8 }
 0x3a1   : > { %3921 = vmatprep.subr.bf16.mxu1 %v12222_v36  ;;  %3962 = vmatprep.subr.bf16.mxu0 %v12224_v50 }
 0x3a4   : > { %3922 = vmatpush1.bf16.msra.mxu1 %v12221_v53  ;;  %3963 = vmatpush1.bf16.msra.mxu0 %v12223_v46  ;;  %v3548_v53 = vld [vmem:[#allocation8 + $0x718] sm:$0xff] }
 0x3a5   : > { %3923 = vmatprep.subr.bf16.mxu1 %v12214_v27  ;;  %3964 = vmatprep.subr.bf16.mxu0 %v12216_v59  ;;  %v3552_v46 = vld [vmem:[#allocation8 + $0x738] sm:$0xff] }
 0x3a6   : > { %v12235_v12 = vcombine.low %v3548_v53, %v3552_v46 }
 0x3a8   : > { %3924 = vmatpush1.bf16.msra.mxu1 %v12213_v48  ;;  %3965 = vmatpush1.bf16.msra.mxu0 %v12215_v61  ;;  %v12234_v48 = vcombine.high %v3547_v3, %v3551_v17  ;;  %v12236_v61 = vcombine.high %v3548_v53, %v3552_v46  ;;  %v4142_v3 = vld [vmem:[#allocation8 + $0x9c8] sm:$0xff]  ;;  %v12203_v46 = vcombine.low %v3516_v37, %v3520_v6 }
 0x3a9   : > { %3925 = vmatprep.subr.bf16.mxu1 %v12206_v38  ;;  %3966 = vmatprep.subr.bf16.mxu0 %v12208_v58  ;;  %v3539_v38 = vld [vmem:[#allocation8 + $0x6d0] sm:$0xff]  ;;  %v4146_v17 = vld [vmem:[#allocation8 + $0x9e8] sm:$0xff] }
 0x3aa   : > { %v3543_v58 = vld [vmem:[#allocation8 + $0x6f0] sm:$0xff] }
 0x3ab   : > { %v12225_v49 = vcombine.low %v3539_v38, %v3543_v58 }
 0x3ac   : > { %3926 = vmatpush1.bf16.msra.mxu1 %v12205_v45  ;;  %3967 = vmatpush1.bf16.msra.mxu0 %v12207_v2  ;;  %v12226_v45 = vcombine.high %v3539_v38, %v3543_v58  ;;  %v12228_v2 = vcombine.high %v3540_v42, %v3544_v52  ;;  %v4125_v42 = vld [vmem:[#allocation8 + $0x940] sm:$0xff] }
 0x3ad   : > { %3927 = vmatprep.subr.bf16.mxu1 %v12198_v4  ;;  %3968 = vmatprep.subr.bf16.mxu0 %v12200_v30  ;;  %v3531_v4 = vld [vmem:[#allocation8 + $0x690] sm:$0xff]  ;;  %v4129_v52 = vld [vmem:[#allocation8 + $0x960] sm:$0xff] }
 0x3ae   : > { %v3535_v30 = vld [vmem:[#allocation8 + $0x6b0] sm:$0xff] }
 0x3af   : > { %v12217_v21 = vcombine.low %v3531_v4, %v3535_v30 }
 0x3b0   : > { %3928 = vmatpush1.bf16.msra.mxu1 %v12197_v62  ;;  %3969 = vmatpush1.bf16.msra.mxu0 %v12199_v10  ;;  %v12218_v62 = vcombine.high %v3531_v4, %v3535_v30  ;;  %v12220_v10 = vcombine.high %v3532_v5, %v3536_v8 }
 0x3b1   : > { %3995 = vmatprep.subr.bf16.mxu1 %v12258_v15  ;;  %4036 = vmatprep.subr.bf16.mxu0 %v12260_v19  ;;  %v3523_v15 = vld [vmem:[#allocation8 + $0x650] sm:$0xff] }
 0x3b2   : > { %v3527_v19 = vld [vmem:[#allocation8 + $0x670] sm:$0xff] }
 0x3b3   : > { %3946 = vmatmul.mubr.bf16.vlgmr.msra.gmra.mxu1 %v14708_v7  ;;  %3987 = vmatmul.mubr.bf16.vlgmr.msra.gmra.mxu0 %v14708_v7  ;;  %v14712_v1 = vpop.f32.mrf.mxu1  ;;  %v14714_v22 = vpop.f32.mrf.mxu0  ;;  %v12209_v23 = vcombine.low %v3523_v15, %v3527_v19 }
 0x3b4   : > { %3996 = vmatpush1.bf16.msra.mxu1 %v12257_v31  ;;  %4037 = vmatpush1.bf16.msra.mxu0 %v12259_v55  ;;  %v12210_v31 = vcombine.high %v3523_v15, %v3527_v19  ;;  %v12212_v55 = vcombine.high %v3524_v60, %v3528_v34  ;;  %v4118_v15 = vld [vmem:[#allocation8 + $0x908] sm:$0xff]  ;;  %v12301_v34 = vcombine.low %v4125_v42, %v4129_v52 }
 0x3b5   : > { %v14716_v36 = vpop.f32.mrf.mxu1  ;;  %v14718_v50 = vpop.f32.mrf.mxu0  ;;  %3997 = vmatprep.subr.bf16.mxu1 %v12250_v11  ;;  %4038 = vmatprep.subr.bf16.mxu0 %v12252_v24  ;;  %v3515_v11 = vld [vmem:[#allocation8 + $0x610] sm:$0xff]  ;;  %v4122_v19 = vld [vmem:[#allocation8 + $0x928] sm:$0xff] }
 0x3b6   : > { %4027 = vmatprep.mubr.bf16.mxu1 %v13805_v0  ;;  %4068 = vmatprep.mubr.bf16.mxu0 %v13805_v0  ;;  %v3519_v24 = vld [vmem:[#allocation8 + $0x630] sm:$0xff] }
 0x3b7   : > { %v2315_v27 = vpop.f32.mrf.mxu1  ;;  %v2356_v59 = vpop.f32.mrf.mxu0  ;;  %v12201_v53 = vcombine.low %v3515_v11, %v3519_v24 }
 0x3b8   : > { %3998 = vmatpush1.bf16.msra.mxu1 %v12249_v43  ;;  %4039 = vmatpush1.bf16.msra.mxu0 %v12251_v9  ;;  %v12202_v43 = vcombine.high %v3515_v11, %v3519_v24  ;;  %v12204_v9 = vcombine.high %v3516_v37, %v3520_v6  ;;  %v12320_v59 = vcombine.high %v4142_v3, %v4146_v17  ;;  %v4109_v24 = vld [vmem:[#allocation8 + $0x8c0] sm:$0xff]  ;;  %v4110_v6 = vld [vmem:[#allocation8 + $0x8c8] sm:$0xff] }
 0x3b9   : > { %v2316_v13 = vpop.f32.mrf.mxu1  ;;  %v2357_v57 = vpop.f32.mrf.mxu0  ;;  %3999 = vmatprep.subr.bf16.mxu1 %v12242_v47  ;;  %4040 = vmatprep.subr.bf16.mxu0 %v12244_v40  ;;  %v4141_v47 = vld [vmem:[#allocation8 + $0x9c0] sm:$0xff]  ;;  %v12296_v11 = vcombine.high %v4118_v15, %v4122_v19 }
 0x3ba   : > { %v4145_v40 = vld [vmem:[#allocation8 + $0x9e0] sm:$0xff]  ;;  %v4134_v13 = vld [vmem:[#allocation8 + $0x988] sm:$0xff] }
 0x3bb   : > { %v12318_v27 = vcombine.high %v4141_v47, %v4145_v40  ;;  %v4138_v57 = vld [vmem:[#allocation8 + $0x9a8] sm:$0xff]  ;;  %v4113_v37 = vld [vmem:[#allocation8 + $0x8e0] sm:$0xff] }
 0x3bc   : > { %4000 = vmatpush1.bf16.msra.mxu1 %v12241_v28  ;;  %4041 = vmatpush1.bf16.msra.mxu0 %v12243_v51  ;;  %v4133_v28 = vld [vmem:[#allocation8 + $0x980] sm:$0xff]  ;;  %v12312_v58 = vcombine.high %v4134_v13, %v4138_v57  ;;  %v12311_v30 = vcombine.low %v4134_v13, %v4138_v57  ;;  %v4094_v57 = vld [vmem:[#allocation8 + $0x848] sm:$0xff] }
 0x3bd   : > { %4001 = vmatprep.subr.bf16.mxu1 %v12234_v48  ;;  %4042 = vmatprep.subr.bf16.mxu0 %v12236_v61  ;;  %v4137_v51 = vld [vmem:[#allocation8 + $0x9a0] sm:$0xff]  ;;  %v12317_v48 = vcombine.low %v4141_v47, %v4145_v40  ;;  %v12319_v61 = vcombine.low %v4142_v3, %v4146_v17  ;;  %v4102_v17 = vld [vmem:[#allocation8 + $0x888] sm:$0xff] }
 0x3be   : > { %v12310_v38 = vcombine.high %v4133_v28, %v4137_v51  ;;  %v12309_v4 = vcombine.low %v4133_v28, %v4137_v51  ;;  %v4101_v40 = vld [vmem:[#allocation8 + $0x880] sm:$0xff] }
 0x3bf   : > { %v4105_v3 = vld [vmem:[#allocation8 + $0x8a0] sm:$0xff] }
 0x3c0   : > { %4002 = vmatpush1.bf16.msra.mxu1 %v12233_v20  ;;  %4043 = vmatpush1.bf16.msra.mxu0 %v12235_v12  ;;  %v4126_v20 = vld [vmem:[#allocation8 + $0x948] sm:$0xff]  ;;  %v4093_v51 = vld [vmem:[#allocation8 + $0x840] sm:$0xff] }
 0x3c1   : > { %4003 = vmatprep.subr.bf16.mxu1 %v12226_v45  ;;  %4044 = vmatprep.subr.bf16.mxu0 %v12228_v2  ;;  %v4130_v12 = vld [vmem:[#allocation8 + $0x968] sm:$0xff]  ;;  %v4097_v13 = vld [vmem:[#allocation8 + $0x860] sm:$0xff] }
 0x3c4   : > { %4004 = vmatpush1.bf16.msra.mxu1 %v12225_v49  ;;  %4045 = vmatpush1.bf16.msra.mxu0 %v12227_v35  ;;  %v12302_v49 = vcombine.high %v4125_v42, %v4129_v52  ;;  %v12304_v35 = vcombine.high %v4126_v20, %v4130_v12  ;;  %v4085_v52 = vld [vmem:[#allocation8 + $0x800] sm:$0xff] }
 0x3c5   : > { %4005 = vmatprep.subr.bf16.mxu1 %v12218_v62  ;;  %4046 = vmatprep.subr.bf16.mxu0 %v12220_v10  ;;  %v4117_v62 = vld [vmem:[#allocation8 + $0x900] sm:$0xff] }
 0x3c6   : > { %v4121_v10 = vld [vmem:[#allocation8 + $0x920] sm:$0xff] }
 0x3c8   : > { %4006 = vmatpush1.bf16.msra.mxu1 %v12217_v21  ;;  %4047 = vmatpush1.bf16.msra.mxu0 %v12219_v54  ;;  %v12303_v21 = vcombine.low %v4126_v20, %v4130_v12  ;;  %v4089_v20 = vld [vmem:[#allocation8 + $0x820] sm:$0xff]  ;;  %v4086_v12 = vld [vmem:[#allocation8 + $0x808] sm:$0xff] }
 0x3c9   : > { %4007 = vmatprep.subr.bf16.mxu1 %v12210_v31  ;;  %4048 = vmatprep.subr.bf16.mxu0 %v12212_v55  ;;  %v12294_v55 = vcombine.high %v4117_v62, %v4121_v10 }
 0x3cc   : > { %4008 = vmatpush1.bf16.msra.mxu1 %v12209_v23  ;;  %4049 = vmatpush1.bf16.msra.mxu0 %v12211_v26  ;;  %v4114_v23 = vld [vmem:[#allocation8 + $0x8e8] sm:$0xff]  ;;  %v12293_v26 = vcombine.low %v4117_v62, %v4121_v10  ;;  %v4143_v10 = vld [vmem:[#allocation8 + $0x9d0] sm:$0xff] }
 0x3cd   : > { %4009 = vmatprep.subr.bf16.mxu1 %v12202_v43  ;;  %4050 = vmatprep.subr.bf16.mxu0 %v12204_v9  ;;  %v12295_v43 = vcombine.low %v4118_v15, %v4122_v19  ;;  %v12286_v9 = vcombine.high %v4109_v24, %v4113_v37  ;;  %v12288_v47 = vcombine.high %v4110_v6, %v4114_v23  ;;  %v4147_v15 = vld [vmem:[#allocation8 + $0x9f0] sm:$0xff]  ;;  %v4144_v19 = vld [vmem:[#allocation8 + $0x9d8] sm:$0xff] }
 0x3d0   : > { %4010 = vmatpush1.bf16.msra.mxu1 %v12201_v53  ;;  %4051 = vmatpush1.bf16.msra.mxu0 %v12203_v46  ;;  %v4106_v53 = vld [vmem:[#allocation8 + $0x8a8] sm:$0xff]  ;;  %v12285_v46 = vcombine.low %v4109_v24, %v4113_v37  ;;  %v4140_v24 = vld [vmem:[#allocation8 + $0x9b8] sm:$0xff]  ;;  %v12321_v37 = vcombine.low %v4143_v10, %v4147_v15 }
 0x3d1   : > { %4485 = vmatprep.subr.bf16.mxu1 %v12318_v27  ;;  %4526 = vmatprep.subr.bf16.mxu0 %v12320_v59  ;;  %v12287_v27 = vcombine.low %v4110_v6, %v4114_v23  ;;  %v12278_v59 = vcombine.high %v4101_v40, %v4105_v3  ;;  %v12280_v28 = vcombine.high %v4102_v17, %v4106_v53 }
 0x3d2   : > { %v14736_v23 = vpack.c.b16 %v14596_v33, %v14596_v33 }
 0x3d3   : > { %v14722_v45 = vpop.f32.mrf.mxu1  ;;  %v14724_v2 = vpop.f32.mrf.mxu0  ;;  %4028 = vmatmul.mubr.bf16.vlgmr.msra.gmra.mxu1 %v14708_v7  ;;  %4069 = vmatmul.mubr.bf16.vlgmr.msra.gmra.mxu0 %v14708_v7 }
 0x3d4   : > { %4486 = vmatpush1.bf16.msra.mxu1 %v12317_v48  ;;  %4527 = vmatpush1.bf16.msra.mxu0 %v12319_v61  ;;  %v4098_v48 = vld [vmem:[#allocation8 + $0x868] sm:$0xff]  ;;  %v12277_v61 = vcombine.low %v4101_v40, %v4105_v3  ;;  %v4128_v40 = vld [vmem:[#allocation8 + $0x958] sm:$0xff] }
 0x3d5   : > { %v14728_v5 = vpop.f32.mrf.mxu1  ;;  %v14730_v8 = vpop.f32.mrf.mxu0  ;;  %4487 = vmatprep.subr.bf16.mxu1 %v12310_v38  ;;  %4528 = vmatprep.subr.bf16.mxu0 %v12312_v58  ;;  %v12279_v38 = vcombine.low %v4102_v17, %v4106_v53  ;;  %v12270_v58 = vcombine.high %v4093_v51, %v4097_v13  ;;  %v12272_v42 = vcombine.high %v4094_v57, %v4098_v48  ;;  %v4132_v3 = vld [vmem:[#allocation8 + $0x978] sm:$0xff] }
 0x3d6   : > { %4517 = vmatprep.mubr.bf16.mxu1 %v13805_v0  ;;  %4558 = vmatprep.mubr.bf16.mxu0 %v13805_v0 }
 0x3d7   : > { %v2397_v7 = vpop.f32.mrf.mxu1  ;;  %v2438_v60 = vpop.f32.mrf.mxu0 }
 0x3d8   : > { %4488 = vmatpush1.bf16.msra.mxu1 %v12309_v4  ;;  %4529 = vmatpush1.bf16.msra.mxu0 %v12311_v30  ;;  %v4090_v4 = vld [vmem:[#allocation8 + $0x828] sm:$0xff]  ;;  %v12269_v30 = vcombine.low %v4093_v51, %v4097_v13  ;;  %v4148_v7 = vld [vmem:[#allocation8 + $0x9f8] sm:$0xff]  ;;  %v12261_v60 = vcombine.low %v4085_v52, %v4089_v20 }
 0x3d9   : > { %v2398_v54 = vpop.f32.mrf.mxu1  ;;  %v2439_v31 = vpop.f32.mrf.mxu0  ;;  %4489 = vmatprep.subr.bf16.mxu1 %v12302_v49  ;;  %4530 = vmatprep.subr.bf16.mxu0 %v12304_v35  ;;  %v12271_v49 = vcombine.low %v4094_v57, %v4098_v48  ;;  %v12262_v35 = vcombine.high %v4085_v52, %v4089_v20  ;;  %v12264_v62 = vcombine.high %v4086_v12, %v4090_v4  ;;  %v4119_v48 = vld [vmem:[#allocation8 + $0x910] sm:$0xff] }
 0x3da   : > { %v12324_v54 = vcombine.high %v4144_v19, %v4148_v7  ;;  %v4135_v31 = vld [vmem:[#allocation8 + $0x990] sm:$0xff]  ;;  %v12323_v6 = vcombine.low %v4144_v19, %v4148_v7  ;;  %v12308_v57 = vcombine.high %v4128_v40, %v4132_v3 }
 0x3dc   : > { %4490 = vmatpush1.bf16.msra.mxu1 %v12301_v34  ;;  %4531 = vmatpush1.bf16.msra.mxu0 %v12303_v21  ;;  %v12263_v34 = vcombine.low %v4086_v12, %v4090_v4  ;;  %v12322_v21 = vcombine.high %v4143_v10, %v4147_v15  ;;  %v12307_v12 = vcombine.low %v4128_v40, %v4132_v3  ;;  %v4116_v10 = vld [vmem:[#allocation8 + $0x8f8] sm:$0xff] }
 0x3dd   : > { %4491 = vmatprep.subr.bf16.mxu1 %v12294_v55  ;;  %4532 = vmatprep.subr.bf16.mxu0 %v12296_v11  ;;  %v4139_v55 = vld [vmem:[#allocation8 + $0x9b0] sm:$0xff]  ;;  %v4136_v11 = vld [vmem:[#allocation8 + $0x998] sm:$0xff] }
 0x3e0   : > { %4492 = vmatpush1.bf16.msra.mxu1 %v12293_v26  ;;  %4533 = vmatpush1.bf16.msra.mxu0 %v12295_v43  ;;  %v12314_v26 = vcombine.high %v4135_v31, %v4139_v55  ;;  %v12316_v43 = vcombine.high %v4136_v11, %v4140_v24 }
 0x3e1   : > { %4493 = vmatprep.subr.bf16.mxu1 %v12286_v9  ;;  %4534 = vmatprep.subr.bf16.mxu0 %v12288_v47  ;;  %v4127_v9 = vld [vmem:[#allocation8 + $0x950] sm:$0xff] }
 0x3e2   : > { %v4131_v47 = vld [vmem:[#allocation8 + $0x970] sm:$0xff] }
 0x3e3   : > { %v12306_v13 = vcombine.high %v4127_v9, %v4131_v47  ;;  %v12305_v20 = vcombine.low %v4127_v9, %v4131_v47  ;;  %v4100_v9 = vld [vmem:[#allocation8 + $0x878] sm:$0xff] }
 0x3e4   : > { %4494 = vmatpush1.bf16.msra.mxu1 %v12285_v46  ;;  %4535 = vmatpush1.bf16.msra.mxu0 %v12287_v27  ;;  %v12313_v46 = vcombine.low %v4135_v31, %v4139_v55  ;;  %v4108_v31 = vld [vmem:[#allocation8 + $0x8b8] sm:$0xff] }
 0x3e5   : > { %4495 = vmatprep.subr.bf16.mxu1 %v12278_v59  ;;  %4536 = vmatprep.subr.bf16.mxu0 %v12280_v28  ;;  %v12315_v59 = vcombine.low %v4136_v11, %v4140_v24 }
 0x3e8   : > { %4496 = vmatpush1.bf16.msra.mxu1 %v12277_v61  ;;  %4537 = vmatpush1.bf16.msra.mxu0 %v12279_v38 }
 0x3e9   : > { %4497 = vmatprep.subr.bf16.mxu1 %v12270_v58  ;;  %4538 = vmatprep.subr.bf16.mxu0 %v12272_v42  ;;  %v4120_v58 = vld [vmem:[#allocation8 + $0x918] sm:$0xff] }
 0x3ec   : > { %4498 = vmatpush1.bf16.msra.mxu1 %v12269_v30  ;;  %4539 = vmatpush1.bf16.msra.mxu0 %v12271_v49  ;;  %v4111_v49 = vld [vmem:[#allocation8 + $0x8d0] sm:$0xff] }
 0x3ed   : > { %4499 = vmatprep.subr.bf16.mxu1 %v12262_v35  ;;  %4540 = vmatprep.subr.bf16.mxu0 %v12264_v62  ;;  %v4115_v35 = vld [vmem:[#allocation8 + $0x8f0] sm:$0xff]  ;;  %v4112_v62 = vld [vmem:[#allocation8 + $0x8d8] sm:$0xff] }
 0x3ee   : > { %v12290_v7 = vcombine.high %v4111_v49, %v4115_v35  ;;  %v12289_v55 = vcombine.low %v4111_v49, %v4115_v35  ;;  %v12291_v11 = vcombine.low %v4112_v62, %v4116_v10  ;;  %v4710_v49 = vld [vmem:[#allocation8 + $0xba8] sm:$0xff] }
 0x3f0   : > { %4500 = vmatpush1.bf16.msra.mxu1 %v12261_v60  ;;  %4541 = vmatpush1.bf16.msra.mxu0 %v12263_v34  ;;  %v12292_v60 = vcombine.high %v4112_v62, %v4116_v10  ;;  %v4103_v34 = vld [vmem:[#allocation8 + $0x890] sm:$0xff] }
 0x3f1   : > { %4567 = vmatprep.subr.bf16.mxu1 %v12322_v21  ;;  %4608 = vmatprep.subr.bf16.mxu0 %v12324_v54  ;;  %v4107_v21 = vld [vmem:[#allocation8 + $0x8b0] sm:$0xff]  ;;  %v4104_v54 = vld [vmem:[#allocation8 + $0x898] sm:$0xff] }
 0x3f2   : > { %v12282_v24 = vcombine.high %v4103_v34, %v4107_v21  ;;  %v12281_v47 = vcombine.low %v4103_v34, %v4107_v21  ;;  %v12283_v40 = vcombine.low %v4104_v54, %v4108_v31  ;;  %v4702_v34 = vld [vmem:[#allocation8 + $0xb68] sm:$0xff] }
 0x3f3   : > { %v2811_v17 = vpop.f32.mrf.mxu1  ;;  %v2852_v53 = vpop.f32.mrf.mxu0  ;;  %4518 = vmatmul.mubr.bf16.vlgmr.msra.gmra.mxu1 %v14736_v23  ;;  %4559 = vmatmul.mubr.bf16.vlgmr.msra.gmra.mxu0 %v14736_v23 }
 0x3f4   : > { %v14741_v27 = vadd.f32 %v2811_v17, %v14712_v1  ;;  %v14744_v33 = vadd.f32 %v2852_v53, %v14714_v22  ;;  %4568 = vmatpush1.bf16.msra.mxu1 %v12321_v37  ;;  %4609 = vmatpush1.bf16.msra.mxu0 %v12323_v6  ;;  %v4123_v1 = vld [vmem:[#allocation8 + $0x930] sm:$0xff]  ;;  %v4124_v22 = vld [vmem:[#allocation8 + $0x938] sm:$0xff]  ;;  %v12284_v37 = vcombine.high %v4104_v54, %v4108_v31 }
 0x3f5   : > { %v2813_v28 = vpop.f32.mrf.mxu1  ;;  %v2854_v51 = vpop.f32.mrf.mxu0  ;;  %4569 = vmatprep.subr.bf16.mxu1 %v12314_v26  ;;  %4610 = vmatprep.subr.bf16.mxu0 %v12316_v43  ;;  %v12297_v15 = vcombine.low %v4119_v48, %v4123_v1  ;;  %v12299_v19 = vcombine.low %v4120_v58, %v4124_v22  ;;  %v4095_v6 = vld [vmem:[#allocation8 + $0x850] sm:$0xff]  ;;  %v4096_v43 = vld [vmem:[#allocation8 + $0x858] sm:$0xff] }
 0x3f6   : > { %v14747_v61 = vadd.f32 %v2813_v28, %v14716_v36  ;;  %v14750_v38 = vadd.f32 %v2854_v51, %v14718_v50  ;;  %4599 = vmatprep.mubr.bf16.mxu1 %v13805_v0  ;;  %4640 = vmatprep.mubr.bf16.mxu0 %v13805_v0  ;;  %v12298_v36 = vcombine.high %v4119_v48, %v4123_v1  ;;  %v4099_v26 = vld [vmem:[#allocation8 + $0x870] sm:$0xff]  ;;  %v4092_v28 = vld [vmem:[#allocation8 + $0x838] sm:$0xff]  ;;  %v4713_v1 = vld [vmem:[#allocation8 + $0xbc0] sm:$0xff] }
 0x3f7   : > { %v2815_v42 = vpop.f32.mrf.mxu1  ;;  %v2856_v52 = vpop.f32.mrf.mxu0  ;;  %v12300_v50 = vcombine.high %v4120_v58, %v4124_v22  ;;  %v12274_v3 = vcombine.high %v4095_v6, %v4099_v26  ;;  %v12276_v17 = vcombine.high %v4096_v43, %v4100_v9  ;;  %v4087_v53 = vld [vmem:[#allocation8 + $0x810] sm:$0xff]  ;;  %v12273_v51 = vcombine.low %v4095_v6, %v4099_v26  ;;  %v4717_v58 = vld [vmem:[#allocation8 + $0xbe0] sm:$0xff]  ;;  %v4714_v22 = vld [vmem:[#allocation8 + $0xbc8] sm:$0xff] }
 0x3f8   : > { %4570 = vmatpush1.bf16.msra.mxu1 %v12313_v46  ;;  %4611 = vmatpush1.bf16.msra.mxu0 %v12315_v59  ;;  %v4091_v46 = vld [vmem:[#allocation8 + $0x830] sm:$0xff]  ;;  %v4088_v59 = vld [vmem:[#allocation8 + $0x818] sm:$0xff]  ;;  %v4718_v42 = vld [vmem:[#allocation8 + $0xbe8] sm:$0xff]  ;;  %v12381_v35 = vcombine.low %v4713_v1, %v4717_v58 }
 0x3f9   : > { %v2816_v4 = vpop.f32.mrf.mxu1  ;;  %v2857_v30 = vpop.f32.mrf.mxu0  ;;  %4571 = vmatprep.subr.bf16.mxu1 %v12306_v13  ;;  %4612 = vmatprep.subr.bf16.mxu0 %v12308_v57  ;;  %v12275_v13 = vcombine.low %v4096_v43, %v4100_v9  ;;  %v12266_v57 = vcombine.high %v4087_v53, %v4091_v46  ;;  %v12268_v48 = vcombine.high %v4088_v59, %v4092_v28  ;;  %v4689_v9 = vld [vmem:[#allocation8 + $0xb00] sm:$0xff] }
 0x3fa   : > { %v12265_v52 = vcombine.low %v4087_v53, %v4091_v46  ;;  %v12384_v4 = vcombine.high %v4714_v22, %v4718_v42  ;;  %v4705_v30 = vld [vmem:[#allocation8 + $0xb80] sm:$0xff]  ;;  %v12383_v62 = vcombine.low %v4714_v22, %v4718_v42 }
 0x3fc   : > { %4572 = vmatpush1.bf16.msra.mxu1 %v12305_v20  ;;  %4613 = vmatpush1.bf16.msra.mxu0 %v12307_v12  ;;  %v12267_v20 = vcombine.low %v4088_v59, %v4092_v28  ;;  %v12382_v12 = vcombine.high %v4713_v1, %v4717_v58 }
 0x3fd   : > { %4573 = vmatprep.subr.bf16.mxu1 %v12298_v36  ;;  %4614 = vmatprep.subr.bf16.mxu0 %v12300_v50  ;;  %v4709_v36 = vld [vmem:[#allocation8 + $0xba0] sm:$0xff]  ;;  %v4706_v50 = vld [vmem:[#allocation8 + $0xb88] sm:$0xff] }
 0x3fe   : > { %v12374_v10 = vcombine.high %v4705_v30, %v4709_v36  ;;  %v12373_v31 = vcombine.low %v4705_v30, %v4709_v36 }
 0x400   : > { %4574 = vmatpush1.bf16.msra.mxu1 %v12297_v15  ;;  %4615 = vmatpush1.bf16.msra.mxu0 %v12299_v19  ;;  %v12376_v15 = vcombine.high %v4706_v50, %v4710_v49  ;;  %v4697_v19 = vld [vmem:[#allocation8 + $0xb40] sm:$0xff] }
 0x401   : > { %4575 = vmatprep.subr.bf16.mxu1 %v12290_v7  ;;  %4616 = vmatprep.subr.bf16.mxu0 %v12292_v60  ;;  %v4701_v7 = vld [vmem:[#allocation8 + $0xb60] sm:$0xff]  ;;  %v4698_v60 = vld [vmem:[#allocation8 + $0xb48] sm:$0xff] }
 0x402   : > { %v12366_v26 = vcombine.high %v4697_v19, %v4701_v7  ;;  %v12368_v43 = vcombine.high %v4698_v60, %v4702_v34  ;;  %v12365_v53 = vcombine.low %v4697_v19, %v4701_v7  ;;  %v12367_v46 = vcombine.low %v4698_v60, %v4702_v34 }
 0x404   : > { %4576 = vmatpush1.bf16.msra.mxu1 %v12289_v55  ;;  %4617 = vmatpush1.bf16.msra.mxu0 %v12291_v11 }
 0x405   : > { %4577 = vmatprep.subr.bf16.mxu1 %v12282_v24  ;;  %4618 = vmatprep.subr.bf16.mxu0 %v12284_v37  ;;  %v12375_v24 = vcombine.low %v4706_v50, %v4710_v49 }
 0x408   : > { %4578 = vmatpush1.bf16.msra.mxu1 %v12281_v47  ;;  %4619 = vmatpush1.bf16.msra.mxu0 %v12283_v40  ;;  %v4690_v40 = vld [vmem:[#allocation8 + $0xb08] sm:$0xff] }
 0x409   : > { %4579 = vmatprep.subr.bf16.mxu1 %v12274_v3  ;;  %4620 = vmatprep.subr.bf16.mxu0 %v12276_v17 }
 0x40c   : > { %4580 = vmatpush1.bf16.msra.mxu1 %v12273_v51  ;;  %4621 = vmatpush1.bf16.msra.mxu0 %v12275_v13  ;;  %v4681_v51 = vld [vmem:[#allocation8 + $0xac0] sm:$0xff] }
 0x40d   : > { %4581 = vmatprep.subr.bf16.mxu1 %v12266_v57  ;;  %4622 = vmatprep.subr.bf16.mxu0 %v12268_v48  ;;  %v4685_v13 = vld [vmem:[#allocation8 + $0xae0] sm:$0xff]  ;;  %v4682_v57 = vld [vmem:[#allocation8 + $0xac8] sm:$0xff] }
 0x40e   : > { %v4686_v48 = vld [vmem:[#allocation8 + $0xae8] sm:$0xff]  ;;  %v12350_v22 = vcombine.high %v4681_v51, %v4685_v13  ;;  %v12349_v30 = vcombine.low %v4681_v51, %v4685_v13 }
 0x40f   : > { %v12352_v42 = vcombine.high %v4682_v57, %v4686_v48  ;;  %v12351_v36 = vcombine.low %v4682_v57, %v4686_v48  ;;  %v14772_v57 = vpack.c.b16 %v14612_v18, %v14612_v18 }
 0x410   : > { %4582 = vmatpush1.bf16.msra.mxu1 %v12265_v52  ;;  %4623 = vmatpush1.bf16.msra.mxu0 %v12267_v20  ;;  %v4673_v52 = vld [vmem:[#allocation8 + $0xa80] sm:$0xff] }
 0x411   : > { %5057 = vmatprep.subr.bf16.mxu1 %v12382_v12  ;;  %5098 = vmatprep.subr.bf16.mxu0 %v12384_v4  ;;  %v4677_v20 = vld [vmem:[#allocation8 + $0xaa0] sm:$0xff]  ;;  %v4674_v12 = vld [vmem:[#allocation8 + $0xa88] sm:$0xff] }
 0x412   : > { %v4678_v4 = vld [vmem:[#allocation8 + $0xaa8] sm:$0xff]  ;;  %v12342_v50 = vcombine.high %v4673_v52, %v4677_v20  ;;  %v12341_v19 = vcombine.low %v4673_v52, %v4677_v20  ;;  %v4704_v52 = vld [vmem:[#allocation8 + $0xb78] sm:$0xff] }
 0x413   : > { %v2893_v21 = vpop.f32.mrf.mxu1  ;;  %v2934_v54 = vpop.f32.mrf.mxu0  ;;  %4600 = vmatmul.mubr.bf16.vlgmr.msra.gmra.mxu1 %v14736_v23  ;;  %4641 = vmatmul.mubr.bf16.vlgmr.msra.gmra.mxu0 %v14736_v23  ;;  %v12344_v49 = vcombine.high %v4674_v12, %v4678_v4  ;;  %v12343_v7 = vcombine.low %v4674_v12, %v4678_v4 }
 0x414   : > { %v14757_v55 = vadd.f32 %v2893_v21, %v14722_v45  ;;  %v14760_v11 = vadd.f32 %v2934_v54, %v14724_v2  ;;  %5058 = vmatpush1.bf16.msra.mxu1 %v12381_v35  ;;  %5099 = vmatpush1.bf16.msra.mxu0 %v12383_v62  ;;  %v4693_v45 = vld [vmem:[#allocation8 + $0xb20] sm:$0xff]  ;;  %v4694_v2 = vld [vmem:[#allocation8 + $0xb28] sm:$0xff] }
 0x415   : > { %v2895_v37 = vpop.f32.mrf.mxu1  ;;  %v2936_v6 = vpop.f32.mrf.mxu0  ;;  %5059 = vmatprep.subr.bf16.mxu1 %v12374_v10  ;;  %5100 = vmatprep.subr.bf16.mxu0 %v12376_v15  ;;  %v12357_v1 = vcombine.low %v4689_v9, %v4693_v45  ;;  %v12359_v58 = vcombine.low %v4690_v40, %v4694_v2  ;;  %v4665_v35 = vld [vmem:[#allocation8 + $0xa40] sm:$0xff]  ;;  %v4666_v10 = vld [vmem:[#allocation8 + $0xa48] sm:$0xff] }
 0x416   : > { %v14763_v47 = vadd.f32 %v2895_v37, %v14728_v5  ;;  %v14766_v23 = vadd.f32 %v2936_v6, %v14730_v8  ;;  %5089 = vmatprep.mubr.bf16.mxu1 %v13805_v0  ;;  %5130 = vmatprep.mubr.bf16.mxu0 %v13805_v0  ;;  %v12358_v5 = vcombine.high %v4689_v9, %v4693_v45  ;;  %v4669_v62 = vld [vmem:[#allocation8 + $0xa60] sm:$0xff]  ;;  %v4670_v15 = vld [vmem:[#allocation8 + $0xa68] sm:$0xff]  ;;  %v4715_v9 = vld [vmem:[#allocation8 + $0xbd0] sm:$0xff] }
 0x417   : > { %v2897_v3 = vpop.f32.mrf.mxu1  ;;  %v2938_v17 = vpop.f32.mrf.mxu0  ;;  %v12360_v8 = vcombine.high %v4690_v40, %v4694_v2  ;;  %v12334_v60 = vcombine.high %v4665_v35, %v4669_v62  ;;  %v12336_v34 = vcombine.high %v4666_v10, %v4670_v15  ;;  %v4657_v21 = vld [vmem:[#allocation8 + $0xa00] sm:$0xff]  ;;  %v12333_v37 = vcombine.low %v4665_v35, %v4669_v62  ;;  %v4719_v45 = vld [vmem:[#allocation8 + $0xbf0] sm:$0xff]  ;;  %v4716_v40 = vld [vmem:[#allocation8 + $0xbd8] sm:$0xff] }
 0x418   : > { %5060 = vmatpush1.bf16.msra.mxu1 %v12373_v31  ;;  %5101 = vmatpush1.bf16.msra.mxu0 %v12375_v24  ;;  %v4661_v54 = vld [vmem:[#allocation8 + $0xa20] sm:$0xff]  ;;  %v4658_v31 = vld [vmem:[#allocation8 + $0xa08] sm:$0xff]  ;;  %v12335_v6 = vcombine.low %v4666_v10, %v4670_v15  ;;  %v4720_v2 = vld [vmem:[#allocation8 + $0xbf8] sm:$0xff]  ;;  %v12385_v51 = vcombine.low %v4715_v9, %v4719_v45 }
 0x419   : > { %v2898_v59 = vpop.f32.mrf.mxu1  ;;  %v2939_v28 = vpop.f32.mrf.mxu0  ;;  %5061 = vmatprep.subr.bf16.mxu1 %v12366_v26  ;;  %5102 = vmatprep.subr.bf16.mxu0 %v12368_v43  ;;  %v4662_v24 = vld [vmem:[#allocation8 + $0xa28] sm:$0xff]  ;;  %v12326_v26 = vcombine.high %v4657_v21, %v4661_v54  ;;  %v12325_v3 = vcombine.low %v4657_v21, %v4661_v54  ;;  %v12387_v13 = vcombine.low %v4716_v40, %v4720_v2  ;;  %v4691_v10 = vld [vmem:[#allocation8 + $0xb10] sm:$0xff] }
 0x41a   : > { %v12328_v43 = vcombine.high %v4658_v31, %v4662_v24  ;;  %v12327_v17 = vcombine.low %v4658_v31, %v4662_v24  ;;  %v4707_v59 = vld [vmem:[#allocation8 + $0xb90] sm:$0xff] }
 0x41b   : > { %v4711_v28 = vld [vmem:[#allocation8 + $0xbb0] sm:$0xff] }
 0x41c   : > { %5062 = vmatpush1.bf16.msra.mxu1 %v12365_v53  ;;  %5103 = vmatpush1.bf16.msra.mxu0 %v12367_v46  ;;  %v12386_v53 = vcombine.high %v4715_v9, %v4719_v45  ;;  %v12388_v46 = vcombine.high %v4716_v40, %v4720_v2  ;;  %v12378_v48 = vcombine.high %v4707_v59, %v4711_v28 }
 0x41d   : > { %5063 = vmatprep.subr.bf16.mxu1 %v12358_v5  ;;  %5104 = vmatprep.subr.bf16.mxu0 %v12360_v8  ;;  %v4708_v5 = vld [vmem:[#allocation8 + $0xb98] sm:$0xff]  ;;  %v12377_v4 = vcombine.low %v4707_v59, %v4711_v28 }
 0x41e   : > { %v4712_v8 = vld [vmem:[#allocation8 + $0xbb8] sm:$0xff] }
 0x420   : > { %5064 = vmatpush1.bf16.msra.mxu1 %v12357_v1  ;;  %5105 = vmatpush1.bf16.msra.mxu0 %v12359_v58  ;;  %v12380_v1 = vcombine.high %v4708_v5, %v4712_v8  ;;  %v4699_v58 = vld [vmem:[#allocation8 + $0xb50] sm:$0xff] }
 0x421   : > { %5065 = vmatprep.subr.bf16.mxu1 %v12350_v22  ;;  %5106 = vmatprep.subr.bf16.mxu0 %v12352_v42  ;;  %v4703_v22 = vld [vmem:[#allocation8 + $0xb70] sm:$0xff]  ;;  %v4700_v42 = vld [vmem:[#allocation8 + $0xb58] sm:$0xff] }
 0x422   : > { %v12370_v35 = vcombine.high %v4699_v58, %v4703_v22  ;;  %v12372_v62 = vcombine.high %v4700_v42, %v4704_v52  ;;  %v12369_v21 = vcombine.low %v4699_v58, %v4703_v22  ;;  %v12371_v54 = vcombine.low %v4700_v42, %v4704_v52 }
 0x424   : > { %5066 = vmatpush1.bf16.msra.mxu1 %v12349_v30  ;;  %5107 = vmatpush1.bf16.msra.mxu0 %v12351_v36  ;;  %v12379_v36 = vcombine.low %v4708_v5, %v4712_v8 }
 0x425   : > { %5067 = vmatprep.subr.bf16.mxu1 %v12342_v50  ;;  %5108 = vmatprep.subr.bf16.mxu0 %v12344_v49 }
 0x428   : > { %5068 = vmatpush1.bf16.msra.mxu1 %v12341_v19  ;;  %5109 = vmatpush1.bf16.msra.mxu0 %v12343_v7  ;;  %v4692_v7 = vld [vmem:[#allocation8 + $0xb18] sm:$0xff] }
 0x429   : > { %5069 = vmatprep.subr.bf16.mxu1 %v12334_v60  ;;  %5110 = vmatprep.subr.bf16.mxu0 %v12336_v34 }
 0x42c   : > { %5070 = vmatpush1.bf16.msra.mxu1 %v12333_v37  ;;  %5111 = vmatpush1.bf16.msra.mxu0 %v12335_v6  ;;  %v4683_v37 = vld [vmem:[#allocation8 + $0xad0] sm:$0xff] }
 0x42d   : > { %5071 = vmatprep.subr.bf16.mxu1 %v12326_v26  ;;  %5112 = vmatprep.subr.bf16.mxu0 %v12328_v43  ;;  %v4687_v6 = vld [vmem:[#allocation8 + $0xaf0] sm:$0xff]  ;;  %v4684_v26 = vld [vmem:[#allocation8 + $0xad8] sm:$0xff] }
 0x42e   : > { %v4688_v43 = vld [vmem:[#allocation8 + $0xaf8] sm:$0xff]  ;;  %v12354_v40 = vcombine.high %v4683_v37, %v4687_v6  ;;  %v12353_v59 = vcombine.low %v4683_v37, %v4687_v6 }
 0x42f   : > { %v12356_v2 = vcombine.high %v4684_v26, %v4688_v43  ;;  %v12355_v28 = vcombine.low %v4684_v26, %v4688_v43 }
 0x430   : > { %5072 = vmatpush1.bf16.msra.mxu1 %v12325_v3  ;;  %5113 = vmatpush1.bf16.msra.mxu0 %v12327_v17  ;;  %v4675_v3 = vld [vmem:[#allocation8 + $0xa90] sm:$0xff] }
 0x431   : > { %5139 = vmatprep.subr.bf16.mxu1 %v12386_v53  ;;  %5180 = vmatprep.subr.bf16.mxu0 %v12388_v46  ;;  %v4679_v17 = vld [vmem:[#allocation8 + $0xab0] sm:$0xff]  ;;  %v4676_v53 = vld [vmem:[#allocation8 + $0xa98] sm:$0xff] }
 0x432   : > { %v4680_v46 = vld [vmem:[#allocation8 + $0xab8] sm:$0xff]  ;;  %v12346_v5 = vcombine.high %v4675_v3, %v4679_v17  ;;  %v12345_v58 = vcombine.low %v4675_v3, %v4679_v17 }
 0x433   : > { %v3375_v20 = vpop.f32.mrf.mxu1  ;;  %v3416_v12 = vpop.f32.mrf.mxu0  ;;  %5090 = vmatmul.mubr.bf16.vlgmr.msra.gmra.mxu1 %v14772_v57  ;;  %5131 = vmatmul.mubr.bf16.vlgmr.msra.gmra.mxu0 %v14772_v57  ;;  %v12348_v8 = vcombine.high %v4676_v53, %v4680_v46  ;;  %v12347_v22 = vcombine.low %v4676_v53, %v4680_v46 }
 0x434   : > { %v14777_v30 = vadd.f32 %v3375_v20, %v14741_v27  ;;  %v14780_v18 = vadd.f32 %v3416_v12, %v14744_v33  ;;  %5140 = vmatpush1.bf16.msra.mxu1 %v12385_v51  ;;  %5181 = vmatpush1.bf16.msra.mxu0 %v12387_v13  ;;  %v4695_v27 = vld [vmem:[#allocation8 + $0xb30] sm:$0xff]  ;;  %v4696_v33 = vld [vmem:[#allocation8 + $0xb38] sm:$0xff] }
 0x435   : > { %v3377_v50 = vpop.f32.mrf.mxu1  ;;  %v3418_v49 = vpop.f32.mrf.mxu0  ;;  %5141 = vmatprep.subr.bf16.mxu1 %v12378_v48  ;;  %5182 = vmatprep.subr.bf16.mxu0 %v12380_v1  ;;  %v12361_v9 = vcombine.low %v4691_v10, %v4695_v27  ;;  %v12363_v45 = vcombine.low %v4692_v7, %v4696_v33  ;;  %v4667_v51 = vld [vmem:[#allocation8 + $0xa50] sm:$0xff]  ;;  %v4668_v48 = vld [vmem:[#allocation8 + $0xa58] sm:$0xff] }
 0x436   : > { %v14783_v15 = vadd.f32 %v3377_v50, %v14747_v61  ;;  %v14786_v19 = vadd.f32 %v3418_v49, %v14750_v38  ;;  %5171 = vmatprep.mubr.bf16.mxu1 %v13805_v0  ;;  %5212 = vmatprep.mubr.bf16.mxu0 %v13805_v0  ;;  %v12362_v61 = vcombine.high %v4691_v10, %v4695_v27  ;;  %v4671_v13 = vld [vmem:[#allocation8 + $0xa70] sm:$0xff]  ;;  %v4672_v1 = vld [vmem:[#allocation8 + $0xa78] sm:$0xff]  ;;  %v5285_v10 = vld [vmem:[#allocation8 + $0xdc0] sm:$0xff] }
 0x437   : > { %v3379_v60 = vpop.f32.mrf.mxu1  ;;  %v3420_v34 = vpop.f32.mrf.mxu0  ;;  %v12364_v38 = vcombine.high %v4692_v7, %v4696_v33  ;;  %v12338_v42 = vcombine.high %v4667_v51, %v4671_v13  ;;  %v12340_v52 = vcombine.high %v4668_v48, %v4672_v1  ;;  %v4659_v20 = vld [vmem:[#allocation8 + $0xa10] sm:$0xff]  ;;  %v12337_v50 = vcombine.low %v4667_v51, %v4671_v13  ;;  %v5289_v27 = vld [vmem:[#allocation8 + $0xde0] sm:$0xff]  ;;  %v5286_v7 = vld [vmem:[#allocation8 + $0xdc8] sm:$0xff] }
 0x438   : > { %5142 = vmatpush1.bf16.msra.mxu1 %v12377_v4  ;;  %5183 = vmatpush1.bf16.msra.mxu0 %v12379_v36  ;;  %v4663_v12 = vld [vmem:[#allocation8 + $0xa30] sm:$0xff]  ;;  %v4660_v4 = vld [vmem:[#allocation8 + $0xa18] sm:$0xff]  ;;  %v12339_v49 = vcombine.low %v4668_v48, %v4672_v1  ;;  %v5290_v33 = vld [vmem:[#allocation8 + $0xde8] sm:$0xff]  ;;  %v12445_v37 = vcombine.low %v5285_v10, %v5289_v27 }
 0x439   : > { %v3380_v31 = vpop.f32.mrf.mxu1  ;;  %v3421_v24 = vpop.f32.mrf.mxu0  ;;  %5143 = vmatprep.subr.bf16.mxu1 %v12370_v35  ;;  %5184 = vmatprep.subr.bf16.mxu0 %v12372_v62  ;;  %v4664_v36 = vld [vmem:[#allocation8 + $0xa38] sm:$0xff]  ;;  %v12330_v35 = vcombine.high %v4659_v20, %v4663_v12  ;;  %v12329_v60 = vcombine.low %v4659_v20, %v4663_v12  ;;  %v12447_v6 = vcombine.low %v5286_v7, %v5290_v33  ;;  %v5261_v48 = vld [vmem:[#allocation8 + $0xd00] sm:$0xff] }
 0x43a   : > { %v12332_v62 = vcombine.high %v4660_v4, %v4664_v36  ;;  %v12331_v34 = vcombine.low %v4660_v4, %v4664_v36  ;;  %v5277_v31 = vld [vmem:[#allocation8 + $0xd80] sm:$0xff] }
 0x43b   : > { %v5281_v24 = vld [vmem:[#allocation8 + $0xda0] sm:$0xff] }
 0x43c   : > { %5144 = vmatpush1.bf16.msra.mxu1 %v12369_v21  ;;  %5185 = vmatpush1.bf16.msra.mxu0 %v12371_v54  ;;  %v12446_v21 = vcombine.high %v5285_v10, %v5289_v27  ;;  %v12448_v54 = vcombine.high %v5286_v7, %v5290_v33  ;;  %v12438_v26 = vcombine.high %v5277_v31, %v5281_v24  ;;  %v5253_v36 = vld [vmem:[#allocation8 + $0xcc0] sm:$0xff] }
 0x43d   : > { %5145 = vmatprep.subr.bf16.mxu1 %v12362_v61  ;;  %5186 = vmatprep.subr.bf16.mxu0 %v12364_v38  ;;  %v5278_v61 = vld [vmem:[#allocation8 + $0xd88] sm:$0xff]  ;;  %v12437_v53 = vcombine.low %v5277_v31, %v5281_v24  ;;  %v5245_v33 = vld [vmem:[#allocation8 + $0xc80] sm:$0xff] }
 0x43e   : > { %v5282_v38 = vld [vmem:[#allocation8 + $0xda8] sm:$0xff] }
 0x43f   : > { %v12440_v43 = vcombine.high %v5278_v61, %v5282_v38 }
 0x440   : > { %5146 = vmatpush1.bf16.msra.mxu1 %v12361_v9  ;;  %5187 = vmatpush1.bf16.msra.mxu0 %v12363_v45  ;;  %v5269_v9 = vld [vmem:[#allocation8 + $0xd40] sm:$0xff] }
 0x441   : > { %5147 = vmatprep.subr.bf16.mxu1 %v12354_v40  ;;  %5188 = vmatprep.subr.bf16.mxu0 %v12356_v2  ;;  %v5273_v45 = vld [vmem:[#allocation8 + $0xd60] sm:$0xff]  ;;  %v5270_v40 = vld [vmem:[#allocation8 + $0xd48] sm:$0xff] }
 0x442   : > { %v5274_v2 = vld [vmem:[#allocation8 + $0xd68] sm:$0xff]  ;;  %v12430_v51 = vcombine.high %v5269_v9, %v5273_v45 }
 0x443   : > { %v12432_v13 = vcombine.high %v5270_v40, %v5274_v2  ;;  %v12431_v20 = vcombine.low %v5270_v40, %v5274_v2  ;;  %v5229_v2 = vld [vmem:[#allocation8 + $0xc00] sm:$0xff] }
 0x444   : > { %5148 = vmatpush1.bf16.msra.mxu1 %v12353_v59  ;;  %5189 = vmatpush1.bf16.msra.mxu0 %v12355_v28  ;;  %v12439_v28 = vcombine.low %v5278_v61, %v5282_v38  ;;  %v5237_v38 = vld [vmem:[#allocation8 + $0xc40] sm:$0xff] }
 0x445   : > { %5149 = vmatprep.subr.bf16.mxu1 %v12346_v5  ;;  %5190 = vmatprep.subr.bf16.mxu0 %v12348_v8 }
 0x448   : > { %5150 = vmatpush1.bf16.msra.mxu1 %v12345_v58  ;;  %5191 = vmatpush1.bf16.msra.mxu0 %v12347_v22  ;;  %v5262_v58 = vld [vmem:[#allocation8 + $0xd08] sm:$0xff] }
 0x449   : > { %5151 = vmatprep.subr.bf16.mxu1 %v12338_v42  ;;  %5192 = vmatprep.subr.bf16.mxu0 %v12340_v52  ;;  %v12429_v52 = vcombine.low %v5269_v9, %v5273_v45 }
 0x44c   : > { %5152 = vmatpush1.bf16.msra.mxu1 %v12337_v50  ;;  %5193 = vmatpush1.bf16.msra.mxu0 %v12339_v49  ;;  %v5257_v50 = vld [vmem:[#allocation8 + $0xce0] sm:$0xff]  ;;  %v5254_v49 = vld [vmem:[#allocation8 + $0xcc8] sm:$0xff] }
 0x44d   : > { %5153 = vmatprep.subr.bf16.mxu1 %v12330_v35  ;;  %5194 = vmatprep.subr.bf16.mxu0 %v12332_v62  ;;  %v5258_v35 = vld [vmem:[#allocation8 + $0xce8] sm:$0xff]  ;;  %v12414_v27 = vcombine.high %v5253_v36, %v5257_v50 }
 0x44e   : > { %v12416_v7 = vcombine.high %v5254_v49, %v5258_v35  ;;  %v12415_v31 = vcombine.low %v5254_v49, %v5258_v35 }
 0x450   : > { %5154 = vmatpush1.bf16.msra.mxu1 %v12329_v60  ;;  %5195 = vmatpush1.bf16.msra.mxu0 %v12331_v34  ;;  %v5249_v60 = vld [vmem:[#allocation8 + $0xca0] sm:$0xff]  ;;  %v5246_v34 = vld [vmem:[#allocation8 + $0xc88] sm:$0xff] }
 0x451   : > { %5629 = vmatprep.subr.bf16.mxu1 %v12446_v21  ;;  %5670 = vmatprep.subr.bf16.mxu0 %v12448_v54  ;;  %v5250_v21 = vld [vmem:[#allocation8 + $0xca8] sm:$0xff]  ;;  %v12413_v54 = vcombine.low %v5253_v36, %v5257_v50  ;;  %v12406_v24 = vcombine.high %v5245_v33, %v5249_v60  ;;  %v14808_v50 = vpack.c.b16 %v14615_v16, %v14615_v16 }
 0x452   : > { %v12408_v61 = vcombine.high %v5246_v34, %v5250_v21  ;;  %v12407_v9 = vcombine.low %v5246_v34, %v5250_v21 }
 0x453   : > { %v3457_v3 = vpop.f32.mrf.mxu1  ;;  %v3498_v17 = vpop.f32.mrf.mxu0  ;;  %5172 = vmatmul.mubr.bf16.vlgmr.msra.gmra.mxu1 %v14772_v57  ;;  %5213 = vmatmul.mubr.bf16.vlgmr.msra.gmra.mxu0 %v14772_v57 }
 0x454   : > { %v14793_v46 = vadd.f32 %v3457_v3, %v14757_v55  ;;  %v14796_v59 = vadd.f32 %v3498_v17, %v14760_v11  ;;  %5630 = vmatpush1.bf16.msra.mxu1 %v12445_v37  ;;  %5671 = vmatpush1.bf16.msra.mxu0 %v12447_v6  ;;  %v5265_v55 = vld [vmem:[#allocation8 + $0xd20] sm:$0xff]  ;;  %v5266_v11 = vld [vmem:[#allocation8 + $0xd28] sm:$0xff] }
 0x455   : > { %v3459_v5 = vpop.f32.mrf.mxu1  ;;  %v3500_v8 = vpop.f32.mrf.mxu0  ;;  %5631 = vmatprep.subr.bf16.mxu1 %v12438_v26  ;;  %5672 = vmatprep.subr.bf16.mxu0 %v12440_v43  ;;  %v12421_v62 = vcombine.low %v5261_v48, %v5265_v55  ;;  %v12423_v10 = vcombine.low %v5262_v58, %v5266_v11  ;;  %v5241_v37 = vld [vmem:[#allocation8 + $0xc60] sm:$0xff]  ;;  %v5238_v6 = vld [vmem:[#allocation8 + $0xc48] sm:$0xff]  ;;  %v12405_v43 = vcombine.low %v5245_v33, %v5249_v60 }
 0x456   : > { %v14799_v1 = vadd.f32 %v3459_v5, %v14763_v47  ;;  %v14802_v57 = vadd.f32 %v3500_v8, %v14766_v23  ;;  %5661 = vmatprep.mubr.bf16.mxu1 %v13805_v0  ;;  %5702 = vmatprep.mubr.bf16.mxu0 %v13805_v0  ;;  %v12422_v47 = vcombine.high %v5261_v48, %v5265_v55  ;;  %v5242_v26 = vld [vmem:[#allocation8 + $0xc68] sm:$0xff]  ;;  %v5233_v3 = vld [vmem:[#allocation8 + $0xc20] sm:$0xff]  ;;  %v5291_v48 = vld [vmem:[#allocation8 + $0xdf0] sm:$0xff] }
 0x457   : > { %v3461_v22 = vpop.f32.mrf.mxu1  ;;  %v3502_v42 = vpop.f32.mrf.mxu0  ;;  %v12424_v23 = vcombine.high %v5262_v58, %v5266_v11  ;;  %v12398_v45 = vcombine.high %v5237_v38, %v5241_v37  ;;  %v12400_v40 = vcombine.high %v5238_v6, %v5242_v26  ;;  %v5230_v17 = vld [vmem:[#allocation8 + $0xc08] sm:$0xff]  ;;  %v12399_v5 = vcombine.low %v5238_v6, %v5242_v26  ;;  %v5288_v55 = vld [vmem:[#allocation8 + $0xdd8] sm:$0xff] }
 0x458   : > { %5632 = vmatpush1.bf16.msra.mxu1 %v12437_v53  ;;  %5673 = vmatpush1.bf16.msra.mxu0 %v12439_v28  ;;  %v5234_v53 = vld [vmem:[#allocation8 + $0xc28] sm:$0xff]  ;;  %v12397_v28 = vcombine.low %v5237_v38, %v5241_v37  ;;  %v12390_v8 = vcombine.high %v5229_v2, %v5233_v3  ;;  %v5292_v58 = vld [vmem:[#allocation8 + $0xdf8] sm:$0xff]  ;;  %v12389_v11 = vcombine.low %v5229_v2, %v5233_v3  ;;  %v5263_v37 = vld [vmem:[#allocation8 + $0xd10] sm:$0xff] }
 0x459   : > { %v3462_v12 = vpop.f32.mrf.mxu1  ;;  %v3503_v4 = vpop.f32.mrf.mxu0  ;;  %5633 = vmatprep.subr.bf16.mxu1 %v12430_v51  ;;  %5674 = vmatprep.subr.bf16.mxu0 %v12432_v13  ;;  %v12392_v51 = vcombine.high %v5230_v17, %v5234_v53  ;;  %v5287_v13 = vld [vmem:[#allocation8 + $0xdd0] sm:$0xff]  ;;  %v12391_v22 = vcombine.low %v5230_v17, %v5234_v53  ;;  %v12451_v36 = vcombine.low %v5288_v55, %v5292_v58 }
 0x45a   : > { %v12450_v42 = vcombine.high %v5287_v13, %v5291_v48  ;;  %v5283_v12 = vld [vmem:[#allocation8 + $0xdb0] sm:$0xff]  ;;  %v5280_v4 = vld [vmem:[#allocation8 + $0xd98] sm:$0xff] }
 0x45b   : > { %v5255_v53 = vld [vmem:[#allocation8 + $0xcd0] sm:$0xff] }
 0x45c   : > { %5634 = vmatpush1.bf16.msra.mxu1 %v12429_v52  ;;  %5675 = vmatpush1.bf16.msra.mxu0 %v12431_v20  ;;  %v12452_v52 = vcombine.high %v5288_v55, %v5292_v58  ;;  %v5279_v20 = vld [vmem:[#allocation8 + $0xd90] sm:$0xff] }
 0x45d   : > { %5635 = vmatprep.subr.bf16.mxu1 %v12422_v47  ;;  %5676 = vmatprep.subr.bf16.mxu0 %v12424_v23  ;;  %v5284_v47 = vld [vmem:[#allocation8 + $0xdb8] sm:$0xff]  ;;  %v12449_v23 = vcombine.low %v5287_v13, %v5291_v48  ;;  %v12442_v49 = vcombine.high %v5279_v20, %v5283_v12  ;;  %v12441_v34 = vcombine.low %v5279_v20, %v5283_v12  ;;  %v5247_v58 = vld [vmem:[#allocation8 + $0xc90] sm:$0xff] }
 0x45e   : > { %v12444_v35 = vcombine.high %v5280_v4, %v5284_v47 }
 0x460   : > { %5636 = vmatpush1.bf16.msra.mxu1 %v12421_v62  ;;  %5677 = vmatpush1.bf16.msra.mxu0 %v12423_v10  ;;  %v5271_v62 = vld [vmem:[#allocation8 + $0xd50] sm:$0xff] }
 0x461   : > { %5637 = vmatprep.subr.bf16.mxu1 %v12414_v27  ;;  %5678 = vmatprep.subr.bf16.mxu0 %v12416_v7  ;;  %v5275_v10 = vld [vmem:[#allocation8 + $0xd70] sm:$0xff]  ;;  %v5272_v27 = vld [vmem:[#allocation8 + $0xd58] sm:$0xff] }
 0x462   : > { %v5276_v7 = vld [vmem:[#allocation8 + $0xd78] sm:$0xff] }
 0x463   : > { %v12436_v38 = vcombine.high %v5272_v27, %v5276_v7  ;;  %v12435_v2 = vcombine.low %v5272_v27, %v5276_v7  ;;  %v5231_v7 = vld [vmem:[#allocation8 + $0xc10] sm:$0xff] }
 0x464   : > { %5638 = vmatpush1.bf16.msra.mxu1 %v12413_v54  ;;  %5679 = vmatpush1.bf16.msra.mxu0 %v12415_v31  ;;  %v12443_v54 = vcombine.low %v5280_v4, %v5284_v47  ;;  %v5239_v47 = vld [vmem:[#allocation8 + $0xc50] sm:$0xff] }
 0x465   : > { %5639 = vmatprep.subr.bf16.mxu1 %v12406_v24  ;;  %5680 = vmatprep.subr.bf16.mxu0 %v12408_v61  ;;  %v12434_v61 = vcombine.high %v5271_v62, %v5275_v10 }
 0x468   : > { %5640 = vmatpush1.bf16.msra.mxu1 %v12405_v43  ;;  %5681 = vmatpush1.bf16.msra.mxu0 %v12407_v9  ;;  %v5264_v43 = vld [vmem:[#allocation8 + $0xd18] sm:$0xff] }
 0x469   : > { %5641 = vmatprep.subr.bf16.mxu1 %v12398_v45  ;;  %5682 = vmatprep.subr.bf16.mxu0 %v12400_v40  ;;  %v12433_v40 = vcombine.low %v5271_v62, %v5275_v10 }
 0x46c   : > { %5642 = vmatpush1.bf16.msra.mxu1 %v12397_v28  ;;  %5683 = vmatpush1.bf16.msra.mxu0 %v12399_v5  ;;  %v5259_v28 = vld [vmem:[#allocation8 + $0xcf0] sm:$0xff]  ;;  %v5256_v5 = vld [vmem:[#allocation8 + $0xcd8] sm:$0xff] }
 0x46d   : > { %5643 = vmatprep.subr.bf16.mxu1 %v12390_v8  ;;  %5684 = vmatprep.subr.bf16.mxu0 %v12392_v51  ;;  %v5260_v8 = vld [vmem:[#allocation8 + $0xcf8] sm:$0xff]  ;;  %v12418_v48 = vcombine.high %v5255_v53, %v5259_v28 }
 0x46e   : > { %v12420_v55 = vcombine.high %v5256_v5, %v5260_v8  ;;  %v12419_v20 = vcombine.low %v5256_v5, %v5260_v8  ;;  %v5841_v8 = vld [vmem:[#allocation8 + $0xf40] sm:$0xff] }
 0x470   : > { %5644 = vmatpush1.bf16.msra.mxu1 %v12389_v11  ;;  %5685 = vmatpush1.bf16.msra.mxu0 %v12391_v22  ;;  %v5251_v11 = vld [vmem:[#allocation8 + $0xcb0] sm:$0xff]  ;;  %v5248_v22 = vld [vmem:[#allocation8 + $0xc98] sm:$0xff] }
 0x471   : > { %5711 = vmatprep.subr.bf16.mxu1 %v12450_v42  ;;  %5752 = vmatprep.subr.bf16.mxu0 %v12452_v52  ;;  %v5252_v42 = vld [vmem:[#allocation8 + $0xcb8] sm:$0xff]  ;;  %v12417_v52 = vcombine.low %v5255_v53, %v5259_v28  ;;  %v12410_v12 = vcombine.high %v5247_v58, %v5251_v11 }
 0x472   : > { %v12412_v4 = vcombine.high %v5248_v22, %v5252_v42  ;;  %v12411_v62 = vcombine.low %v5248_v22, %v5252_v42 }
 0x473   : > { %v3947_v33 = vpop.f32.mrf.mxu1  ;;  %v3988_v60 = vpop.f32.mrf.mxu0  ;;  %5662 = vmatmul.mubr.bf16.vlgmr.msra.gmra.mxu1 %v14808_v50  ;;  %5703 = vmatmul.mubr.bf16.vlgmr.msra.gmra.mxu0 %v14808_v50 }
 0x474   : > { %v14813_v21 = vadd.f32 %v3947_v33, %v14777_v30  ;;  %v14816_v16 = vadd.f32 %v3988_v60, %v14780_v18  ;;  %5712 = vmatpush1.bf16.msra.mxu1 %v12449_v23  ;;  %5753 = vmatpush1.bf16.msra.mxu0 %v12451_v36  ;;  %v5267_v30 = vld [vmem:[#allocation8 + $0xd30] sm:$0xff]  ;;  %v5268_v18 = vld [vmem:[#allocation8 + $0xd38] sm:$0xff] }
 0x475   : > { %v3949_v31 = vpop.f32.mrf.mxu1  ;;  %v3990_v24 = vpop.f32.mrf.mxu0  ;;  %5713 = vmatprep.subr.bf16.mxu1 %v12442_v49  ;;  %5754 = vmatprep.subr.bf16.mxu0 %v12444_v35  ;;  %v12425_v51 = vcombine.low %v5263_v37, %v5267_v30  ;;  %v12427_v13 = vcombine.low %v5264_v43, %v5268_v18  ;;  %v5243_v23 = vld [vmem:[#allocation8 + $0xc70] sm:$0xff]  ;;  %v5240_v36 = vld [vmem:[#allocation8 + $0xc58] sm:$0xff]  ;;  %v12409_v35 = vcombine.low %v5247_v58, %v5251_v11 }
 0x476   : > { %v14819_v6 = vadd.f32 %v3949_v31, %v14783_v15  ;;  %v14822_v26 = vadd.f32 %v3990_v24, %v14786_v19  ;;  %5743 = vmatprep.mubr.bf16.mxu1 %v13805_v0  ;;  %5784 = vmatprep.mubr.bf16.mxu0 %v13805_v0  ;;  %v12426_v15 = vcombine.high %v5263_v37, %v5267_v30  ;;  %v5244_v49 = vld [vmem:[#allocation8 + $0xc78] sm:$0xff]  ;;  %v5235_v33 = vld [vmem:[#allocation8 + $0xc30] sm:$0xff]  ;;  %v5861_v37 = vld [vmem:[#allocation8 + $0xfe0] sm:$0xff] }
 0x477   : > { %v3951_v9 = vpop.f32.mrf.mxu1  ;;  %v3992_v45 = vpop.f32.mrf.mxu0  ;;  %v12428_v19 = vcombine.high %v5264_v43, %v5268_v18  ;;  %v12402_v10 = vcombine.high %v5239_v47, %v5243_v23  ;;  %v12404_v27 = vcombine.high %v5240_v36, %v5244_v49  ;;  %v5232_v60 = vld [vmem:[#allocation8 + $0xc18] sm:$0xff]  ;;  %v12403_v31 = vcombine.low %v5240_v36, %v5244_v49  ;;  %v5858_v30 = vld [vmem:[#allocation8 + $0xfc8] sm:$0xff] }
 0x478   : > { %5714 = vmatpush1.bf16.msra.mxu1 %v12441_v34  ;;  %5755 = vmatpush1.bf16.msra.mxu0 %v12443_v54  ;;  %v5236_v34 = vld [vmem:[#allocation8 + $0xc38] sm:$0xff]  ;;  %v12401_v54 = vcombine.low %v5239_v47, %v5243_v23  ;;  %v12394_v24 = vcombine.high %v5231_v7, %v5235_v33  ;;  %v5862_v43 = vld [vmem:[#allocation8 + $0xfe8] sm:$0xff]  ;;  %v12393_v18 = vcombine.low %v5231_v7, %v5235_v33  ;;  %v5833_v23 = vld [vmem:[#allocation8 + $0xf00] sm:$0xff] }
 0x479   : > { %v3952_v3 = vpop.f32.mrf.mxu1  ;;  %v3993_v17 = vpop.f32.mrf.mxu0  ;;  %5715 = vmatprep.subr.bf16.mxu1 %v12434_v61  ;;  %5756 = vmatprep.subr.bf16.mxu0 %v12436_v38  ;;  %v12396_v61 = vcombine.high %v5232_v60, %v5236_v34  ;;  %v5857_v38 = vld [vmem:[#allocation8 + $0xfc0] sm:$0xff]  ;;  %v12395_v9 = vcombine.low %v5232_v60, %v5236_v34  ;;  %v12511_v53 = vcombine.low %v5858_v30, %v5862_v43  ;;  %v5834_v49 = vld [vmem:[#allocation8 + $0xf08] sm:$0xff] }
 0x47a   : > { %v12510_v45 = vcombine.high %v5857_v38, %v5861_v37  ;;  %v5853_v3 = vld [vmem:[#allocation8 + $0xfa0] sm:$0xff]  ;;  %v5850_v17 = vld [vmem:[#allocation8 + $0xf88] sm:$0xff] }
 0x47b   : > { %v5825_v60 = vld [vmem:[#allocation8 + $0xec0] sm:$0xff] }
 0x47c   : > { %5716 = vmatpush1.bf16.msra.mxu1 %v12433_v40  ;;  %5757 = vmatpush1.bf16.msra.mxu0 %v12435_v2  ;;  %v12512_v40 = vcombine.high %v5858_v30, %v5862_v43  ;;  %v5849_v2 = vld [vmem:[#allocation8 + $0xf80] sm:$0xff] }
 0x47d   : > { %5717 = vmatprep.subr.bf16.mxu1 %v12426_v15  ;;  %5758 = vmatprep.subr.bf16.mxu0 %v12428_v19  ;;  %v5854_v15 = vld [vmem:[#allocation8 + $0xfa8] sm:$0xff]  ;;  %v12509_v19 = vcombine.low %v5857_v38, %v5861_v37  ;;  %v12502_v28 = vcombine.high %v5849_v2, %v5853_v3  ;;  %v12501_v11 = vcombine.low %v5849_v2, %v5853_v3  ;;  %v5829_v34 = vld [vmem:[#allocation8 + $0xee0] sm:$0xff] }
 0x47e   : > { %v12504_v5 = vcombine.high %v5850_v17, %v5854_v15  ;;  %v12478_v38 = vcombine.high %v5825_v60, %v5829_v34  ;;  %v5817_v30 = vld [vmem:[#allocation8 + $0xe80] sm:$0xff] }
 0x47f   : > { %v5821_v43 = vld [vmem:[#allocation8 + $0xea0] sm:$0xff] }
 0x480   : > { %5718 = vmatpush1.bf16.msra.mxu1 %v12425_v51  ;;  %5759 = vmatpush1.bf16.msra.mxu0 %v12427_v13  ;;  %v5845_v51 = vld [vmem:[#allocation8 + $0xf60] sm:$0xff]  ;;  %v5842_v13 = vld [vmem:[#allocation8 + $0xf48] sm:$0xff]  ;;  %v12470_v2 = vcombine.high %v5817_v30, %v5821_v43 }
 0x481   : > { %5719 = vmatprep.subr.bf16.mxu1 %v12418_v48  ;;  %5760 = vmatprep.subr.bf16.mxu0 %v12420_v55  ;;  %v5846_v48 = vld [vmem:[#allocation8 + $0xf68] sm:$0xff] }
 0x482   : > { %v12496_v47 = vcombine.high %v5842_v13, %v5846_v48 }
 0x484   : > { %5720 = vmatpush1.bf16.msra.mxu1 %v12417_v52  ;;  %5761 = vmatpush1.bf16.msra.mxu0 %v12419_v20  ;;  %v12503_v52 = vcombine.low %v5850_v17, %v5854_v15  ;;  %v5809_v17 = vld [vmem:[#allocation8 + $0xe40] sm:$0xff] }
 0x485   : > { %5721 = vmatprep.subr.bf16.mxu1 %v12410_v12  ;;  %5762 = vmatprep.subr.bf16.mxu0 %v12412_v4  ;;  %v12494_v4 = vcombine.high %v5841_v8, %v5845_v51  ;;  %v5813_v15 = vld [vmem:[#allocation8 + $0xe60] sm:$0xff] }
 0x488   : > { %5722 = vmatpush1.bf16.msra.mxu1 %v12409_v35  ;;  %5763 = vmatpush1.bf16.msra.mxu0 %v12411_v62 }
 0x489   : > { %5723 = vmatprep.subr.bf16.mxu1 %v12402_v10  ;;  %5764 = vmatprep.subr.bf16.mxu0 %v12404_v27  ;;  %v12493_v10 = vcombine.low %v5841_v8, %v5845_v51  ;;  %v12495_v27 = vcombine.low %v5842_v13, %v5846_v48  ;;  %v12462_v8 = vcombine.high %v5809_v17, %v5813_v15  ;;  %v5801_v13 = vld [vmem:[#allocation8 + $0xe00] sm:$0xff] }
 0x48a   : > { %v5805_v48 = vld [vmem:[#allocation8 + $0xe20] sm:$0xff] }
 0x48c   : > { %5724 = vmatpush1.bf16.msra.mxu1 %v12401_v54  ;;  %5765 = vmatpush1.bf16.msra.mxu0 %v12403_v31  ;;  %v5826_v54 = vld [vmem:[#allocation8 + $0xec8] sm:$0xff] }
 0x48d   : > { %5725 = vmatprep.subr.bf16.mxu1 %v12394_v24  ;;  %5766 = vmatprep.subr.bf16.mxu0 %v12396_v61  ;;  %v5830_v31 = vld [vmem:[#allocation8 + $0xee8] sm:$0xff] }
 0x48e   : > { %v12480_v37 = vcombine.high %v5826_v54, %v5830_v31 }
 0x490   : > { %5726 = vmatpush1.bf16.msra.mxu1 %v12393_v18  ;;  %5767 = vmatpush1.bf16.msra.mxu0 %v12395_v9  ;;  %v5818_v18 = vld [vmem:[#allocation8 + $0xe88] sm:$0xff] }
 0x491   : > { %6201 = vmatprep.subr.bf16.mxu1 %v12510_v45  ;;  %6242 = vmatprep.subr.bf16.mxu0 %v12512_v40  ;;  %v5822_v9 = vld [vmem:[#allocation8 + $0xea8] sm:$0xff]  ;;  %v12477_v45 = vcombine.low %v5825_v60, %v5829_v34  ;;  %v12479_v40 = vcombine.low %v5826_v54, %v5830_v31  ;;  %v14844_v60 = vpack.c.b16 %v14622_v32, %v14622_v32  ;;  %v5843_v31 = vld [vmem:[#allocation8 + $0xf50] sm:$0xff] }
 0x492   : > { %v12472_v3 = vcombine.high %v5818_v18, %v5822_v9 }
 0x493   : > { %v4029_v55 = vpop.f32.mrf.mxu1  ;;  %v4070_v58 = vpop.f32.mrf.mxu0  ;;  %5744 = vmatmul.mubr.bf16.vlgmr.msra.gmra.mxu1 %v14808_v50  ;;  %5785 = vmatmul.mubr.bf16.vlgmr.msra.gmra.mxu0 %v14808_v50 }
 0x494   : > { %v14829_v22 = vadd.f32 %v4029_v55, %v14793_v46  ;;  %v14832_v42 = vadd.f32 %v4070_v58, %v14796_v59  ;;  %6202 = vmatpush1.bf16.msra.mxu1 %v12509_v19  ;;  %6243 = vmatpush1.bf16.msra.mxu0 %v12511_v53  ;;  %v5837_v46 = vld [vmem:[#allocation8 + $0xf20] sm:$0xff]  ;;  %v5838_v59 = vld [vmem:[#allocation8 + $0xf28] sm:$0xff] }
 0x495   : > { %v4031_v20 = vpop.f32.mrf.mxu1  ;;  %v4072_v12 = vpop.f32.mrf.mxu0  ;;  %6203 = vmatprep.subr.bf16.mxu1 %v12502_v28  ;;  %6244 = vmatprep.subr.bf16.mxu0 %v12504_v5  ;;  %v12485_v24 = vcombine.low %v5833_v23, %v5837_v46  ;;  %v12487_v61 = vcombine.low %v5834_v49, %v5838_v59  ;;  %v5810_v19 = vld [vmem:[#allocation8 + $0xe48] sm:$0xff]  ;;  %v12469_v28 = vcombine.low %v5817_v30, %v5821_v43 }
 0x496   : > { %v14835_v36 = vadd.f32 %v4031_v20, %v14799_v1  ;;  %v14838_v50 = vadd.f32 %v4072_v12, %v14802_v57  ;;  %6233 = vmatprep.mubr.bf16.mxu1 %v13805_v0  ;;  %6274 = vmatprep.mubr.bf16.mxu0 %v13805_v0  ;;  %v12486_v1 = vcombine.high %v5833_v23, %v5837_v46  ;;  %v5814_v53 = vld [vmem:[#allocation8 + $0xe68] sm:$0xff]  ;;  %v5860_v23 = vld [vmem:[#allocation8 + $0xfd8] sm:$0xff] }
 0x497   : > { %v4033_v35 = vpop.f32.mrf.mxu1  ;;  %v4074_v62 = vpop.f32.mrf.mxu0  ;;  %v12488_v57 = vcombine.high %v5834_v49, %v5838_v59  ;;  %v12471_v5 = vcombine.low %v5818_v18, %v5822_v9  ;;  %v12464_v51 = vcombine.high %v5810_v19, %v5814_v53  ;;  %v5802_v55 = vld [vmem:[#allocation8 + $0xe08] sm:$0xff]  ;;  %v12454_v20 = vcombine.high %v5801_v13, %v5805_v48  ;;  %v5864_v46 = vld [vmem:[#allocation8 + $0xff8] sm:$0xff] }
 0x498   : > { %6204 = vmatpush1.bf16.msra.mxu1 %v12501_v11  ;;  %6245 = vmatpush1.bf16.msra.mxu0 %v12503_v52  ;;  %v5806_v58 = vld [vmem:[#allocation8 + $0xe28] sm:$0xff]  ;;  %v12461_v11 = vcombine.low %v5809_v17, %v5813_v15  ;;  %v12463_v52 = vcombine.low %v5810_v19, %v5814_v53  ;;  %v12453_v49 = vcombine.low %v5801_v13, %v5805_v48  ;;  %v5835_v17 = vld [vmem:[#allocation8 + $0xf10] sm:$0xff]  ;;  %v5836_v53 = vld [vmem:[#allocation8 + $0xf18] sm:$0xff] }
 0x499   : > { %v4034_v7 = vpop.f32.mrf.mxu1  ;;  %v4075_v33 = vpop.f32.mrf.mxu0  ;;  %6205 = vmatprep.subr.bf16.mxu1 %v12494_v4  ;;  %6246 = vmatprep.subr.bf16.mxu0 %v12496_v47  ;;  %v12456_v12 = vcombine.high %v5802_v55, %v5806_v58  ;;  %v5859_v4 = vld [vmem:[#allocation8 + $0xfd0] sm:$0xff]  ;;  %v12455_v59 = vcombine.low %v5802_v55, %v5806_v58  ;;  %v12516_v62 = vcombine.high %v5860_v23, %v5864_v46 }
 0x49a   : > { %v5863_v47 = vld [vmem:[#allocation8 + $0xff0] sm:$0xff]  ;;  %v5852_v7 = vld [vmem:[#allocation8 + $0xf98] sm:$0xff] }
 0x49b   : > { %v12514_v35 = vcombine.high %v5859_v4, %v5863_v47  ;;  %v5856_v33 = vld [vmem:[#allocation8 + $0xfb8] sm:$0xff]  ;;  %v5827_v55 = vld [vmem:[#allocation8 + $0xed0] sm:$0xff] }
 0x49c   : > { %6206 = vmatpush1.bf16.msra.mxu1 %v12493_v10  ;;  %6247 = vmatpush1.bf16.msra.mxu0 %v12495_v27  ;;  %v5851_v10 = vld [vmem:[#allocation8 + $0xf90] sm:$0xff]  ;;  %v12508_v54 = vcombine.high %v5852_v7, %v5856_v33  ;;  %v12507_v9 = vcombine.low %v5852_v7, %v5856_v33 }
 0x49d   : > { %6207 = vmatprep.subr.bf16.mxu1 %v12486_v1  ;;  %6248 = vmatprep.subr.bf16.mxu0 %v12488_v57  ;;  %v5855_v27 = vld [vmem:[#allocation8 + $0xfb0] sm:$0xff]  ;;  %v12513_v1 = vcombine.low %v5859_v4, %v5863_v47  ;;  %v12515_v57 = vcombine.low %v5860_v23, %v5864_v46 }
 0x49e   : > { %v12506_v34 = vcombine.high %v5851_v10, %v5855_v27  ;;  %v12505_v43 = vcombine.low %v5851_v10, %v5855_v27  ;;  %v5831_v58 = vld [vmem:[#allocation8 + $0xef0] sm:$0xff] }
 0x49f   : > { %v12482_v4 = vcombine.high %v5827_v55, %v5831_v58  ;;  %v5819_v23 = vld [vmem:[#allocation8 + $0xe90] sm:$0xff] }
 0x4a0   : > { %6208 = vmatpush1.bf16.msra.mxu1 %v12485_v24  ;;  %6249 = vmatpush1.bf16.msra.mxu0 %v12487_v61  ;;  %v5847_v24 = vld [vmem:[#allocation8 + $0xf70] sm:$0xff]  ;;  %v5844_v61 = vld [vmem:[#allocation8 + $0xf58] sm:$0xff] }
 0x4a1   : > { %6209 = vmatprep.subr.bf16.mxu1 %v12478_v38  ;;  %6250 = vmatprep.subr.bf16.mxu0 %v12480_v37  ;;  %v5848_v38 = vld [vmem:[#allocation8 + $0xf78] sm:$0xff]  ;;  %v5823_v46 = vld [vmem:[#allocation8 + $0xeb0] sm:$0xff] }
 0x4a2   : > { %v12474_v10 = vcombine.high %v5819_v23, %v5823_v46  ;;  %v5811_v7 = vld [vmem:[#allocation8 + $0xe50] sm:$0xff] }
 0x4a3   : > { %v5815_v33 = vld [vmem:[#allocation8 + $0xe70] sm:$0xff] }
 0x4a4   : > { %6210 = vmatpush1.bf16.msra.mxu1 %v12477_v45  ;;  %6251 = vmatpush1.bf16.msra.mxu0 %v12479_v40 }
 0x4a5   : > { %6211 = vmatprep.subr.bf16.mxu1 %v12470_v2  ;;  %6252 = vmatprep.subr.bf16.mxu0 %v12472_v3  ;;  %v12498_v2 = vcombine.high %v5843_v31, %v5847_v24  ;;  %v12500_v3 = vcombine.high %v5844_v61, %v5848_v38 }
 0x4a8   : > { %6212 = vmatpush1.bf16.msra.mxu1 %v12469_v28  ;;  %6253 = vmatpush1.bf16.msra.mxu0 %v12471_v5 }
 0x4a9   : > { %6213 = vmatprep.subr.bf16.mxu1 %v12462_v8  ;;  %6254 = vmatprep.subr.bf16.mxu0 %v12464_v51  ;;  %v12497_v8 = vcombine.low %v5843_v31, %v5847_v24  ;;  %v12499_v51 = vcombine.low %v5844_v61, %v5848_v38  ;;  %v12466_v31 = vcombine.high %v5811_v7, %v5815_v33  ;;  %v5803_v61 = vld [vmem:[#allocation8 + $0xe10] sm:$0xff] }
 0x4aa   : > { %v5807_v38 = vld [vmem:[#allocation8 + $0xe30] sm:$0xff] }
 0x4ac   : > { %6214 = vmatpush1.bf16.msra.mxu1 %v12461_v11  ;;  %6255 = vmatpush1.bf16.msra.mxu0 %v12463_v52  ;;  %v5828_v11 = vld [vmem:[#allocation8 + $0xed8] sm:$0xff] }
 0x4ad   : > { %6215 = vmatprep.subr.bf16.mxu1 %v12454_v20  ;;  %6256 = vmatprep.subr.bf16.mxu0 %v12456_v12  ;;  %v5832_v52 = vld [vmem:[#allocation8 + $0xef8] sm:$0xff] }
 0x4ae   : > { %v12484_v47 = vcombine.high %v5828_v11, %v5832_v52 }
 0x4b0   : > { %6216 = vmatpush1.bf16.msra.mxu1 %v12453_v49  ;;  %6257 = vmatpush1.bf16.msra.mxu0 %v12455_v59  ;;  %v5820_v49 = vld [vmem:[#allocation8 + $0xe98] sm:$0xff] }
 0x4b1   : > { %6283 = vmatprep.subr.bf16.mxu1 %v12514_v35  ;;  %6324 = vmatprep.subr.bf16.mxu0 %v12516_v62  ;;  %v5824_v59 = vld [vmem:[#allocation8 + $0xeb8] sm:$0xff]  ;;  %v12481_v35 = vcombine.low %v5827_v55, %v5831_v58  ;;  %v12483_v62 = vcombine.low %v5828_v11, %v5832_v52  ;;  %v6421_v11 = vld [vmem:[#allocation8 + $0x1140] sm:$0xff] }
 0x4b2   : > { %v12476_v27 = vcombine.high %v5820_v49, %v5824_v59  ;;  %v6425_v52 = vld [vmem:[#allocation8 + $0x1160] sm:$0xff] }
 0x4b3   : > { %v4519_v37 = vpop.f32.mrf.mxu1  ;;  %v4560_v30 = vpop.f32.mrf.mxu0  ;;  %6234 = vmatmul.mubr.bf16.vlgmr.msra.gmra.mxu1 %v14844_v60  ;;  %6275 = vmatmul.mubr.bf16.vlgmr.msra.gmra.mxu0 %v14844_v60 }
 0x4b4   : > { %v14849_v18 = vadd.f32 %v4519_v37, %v14813_v21  ;;  %v14852_v32 = vadd.f32 %v4560_v30, %v14816_v16  ;;  %6284 = vmatpush1.bf16.msra.mxu1 %v12513_v1  ;;  %6325 = vmatpush1.bf16.msra.mxu0 %v12515_v57  ;;  %v5839_v21 = vld [vmem:[#allocation8 + $0xf30] sm:$0xff]  ;;  %v5840_v16 = vld [vmem:[#allocation8 + $0xf38] sm:$0xff] }
 0x4b5   : > { %v4521_v45 = vpop.f32.mrf.mxu1  ;;  %v4562_v40 = vpop.f32.mrf.mxu0  ;;  %6285 = vmatprep.subr.bf16.mxu1 %v12506_v34  ;;  %6326 = vmatprep.subr.bf16.mxu0 %v12508_v54  ;;  %v12489_v20 = vcombine.low %v5835_v17, %v5839_v21  ;;  %v12491_v12 = vcombine.low %v5836_v53, %v5840_v16  ;;  %v5812_v1 = vld [vmem:[#allocation8 + $0xe58] sm:$0xff]  ;;  %v12473_v34 = vcombine.low %v5819_v23, %v5823_v46 }
 0x4b6   : > { %v14855_v15 = vadd.f32 %v4521_v45, %v14819_v6  ;;  %v14858_v19 = vadd.f32 %v4562_v40, %v14822_v26  ;;  %6315 = vmatprep.mubr.bf16.mxu1 %v13805_v0  ;;  %6356 = vmatprep.mubr.bf16.mxu0 %v13805_v0  ;;  %v12490_v6 = vcombine.high %v5835_v17, %v5839_v21  ;;  %v5816_v57 = vld [vmem:[#allocation8 + $0xe78] sm:$0xff]  ;;  %v6438_v17 = vld [vmem:[#allocation8 + $0x11c8] sm:$0xff] }
 0x4b7   : > { %v4523_v28 = vpop.f32.mrf.mxu1  ;;  %v4564_v5 = vpop.f32.mrf.mxu0  ;;  %v12492_v26 = vcombine.high %v5836_v53, %v5840_v16  ;;  %v12475_v54 = vcombine.low %v5820_v49, %v5824_v59  ;;  %v12468_v24 = vcombine.high %v5812_v1, %v5816_v57  ;;  %v5804_v37 = vld [vmem:[#allocation8 + $0xe18] sm:$0xff]  ;;  %v12458_v45 = vcombine.high %v5803_v61, %v5807_v38  ;;  %v6442_v21 = vld [vmem:[#allocation8 + $0x11e8] sm:$0xff] }
 0x4b8   : > { %6286 = vmatpush1.bf16.msra.mxu1 %v12505_v43  ;;  %6327 = vmatpush1.bf16.msra.mxu0 %v12507_v9  ;;  %v5808_v30 = vld [vmem:[#allocation8 + $0xe38] sm:$0xff]  ;;  %v12465_v43 = vcombine.low %v5811_v7, %v5815_v33  ;;  %v12467_v9 = vcombine.low %v5812_v1, %v5816_v57  ;;  %v12457_v53 = vcombine.low %v5803_v61, %v5807_v38  ;;  %v6413_v7 = vld [vmem:[#allocation8 + $0x1100] sm:$0xff]  ;;  %v6414_v1 = vld [vmem:[#allocation8 + $0x1108] sm:$0xff] }
 0x4b9   : > { %v4524_v13 = vpop.f32.mrf.mxu1  ;;  %v4565_v48 = vpop.f32.mrf.mxu0  ;;  %6287 = vmatprep.subr.bf16.mxu1 %v12498_v2  ;;  %6328 = vmatprep.subr.bf16.mxu0 %v12500_v3  ;;  %v12460_v40 = vcombine.high %v5804_v37, %v5808_v30  ;;  %v6437_v2 = vld [vmem:[#allocation8 + $0x11c0] sm:$0xff]  ;;  %v12459_v16 = vcombine.low %v5804_v37, %v5808_v30  ;;  %v12576_v5 = vcombine.high %v6438_v17, %v6442_v21  ;;  %v6406_v30 = vld [vmem:[#allocation8 + $0x10c8] sm:$0xff] }
 0x4ba   : > { %v6441_v3 = vld [vmem:[#allocation8 + $0x11e0] sm:$0xff]  ;;  %v6430_v13 = vld [vmem:[#allocation8 + $0x1188] sm:$0xff] }
 0x4bb   : > { %v12574_v28 = vcombine.high %v6437_v2, %v6441_v3  ;;  %v6434_v48 = vld [vmem:[#allocation8 + $0x11a8] sm:$0xff]  ;;  %v6405_v38 = vld [vmem:[#allocation8 + $0x10c0] sm:$0xff] }
 0x4bc   : > { %6288 = vmatpush1.bf16.msra.mxu1 %v12497_v8  ;;  %6329 = vmatpush1.bf16.msra.mxu0 %v12499_v51  ;;  %v6429_v8 = vld [vmem:[#allocation8 + $0x1180] sm:$0xff]  ;;  %v12568_v58 = vcombine.high %v6430_v13, %v6434_v48  ;;  %v12567_v59 = vcombine.low %v6430_v13, %v6434_v48  ;;  %v6390_v48 = vld [vmem:[#allocation8 + $0x1048] sm:$0xff] }
 0x4bd   : > { %6289 = vmatprep.subr.bf16.mxu1 %v12490_v6  ;;  %6330 = vmatprep.subr.bf16.mxu0 %v12492_v26  ;;  %v6433_v51 = vld [vmem:[#allocation8 + $0x11a0] sm:$0xff]  ;;  %v12573_v6 = vcombine.low %v6437_v2, %v6441_v3  ;;  %v12575_v26 = vcombine.low %v6438_v17, %v6442_v21  ;;  %v6398_v21 = vld [vmem:[#allocation8 + $0x1088] sm:$0xff] }
 0x4be   : > { %v12566_v55 = vcombine.high %v6429_v8, %v6433_v51  ;;  %v12565_v23 = vcombine.low %v6429_v8, %v6433_v51  ;;  %v6409_v37 = vld [vmem:[#allocation8 + $0x10e0] sm:$0xff] }
 0x4bf   : > { %v6397_v3 = vld [vmem:[#allocation8 + $0x1080] sm:$0xff] }
 0x4c0   : > { %6290 = vmatpush1.bf16.msra.mxu1 %v12489_v20  ;;  %6331 = vmatpush1.bf16.msra.mxu0 %v12491_v12  ;;  %v6422_v20 = vld [vmem:[#allocation8 + $0x1148] sm:$0xff]  ;;  %v6401_v17 = vld [vmem:[#allocation8 + $0x10a0] sm:$0xff] }
 0x4c1   : > { %6291 = vmatprep.subr.bf16.mxu1 %v12482_v4  ;;  %6332 = vmatprep.subr.bf16.mxu0 %v12484_v47  ;;  %v6426_v12 = vld [vmem:[#allocation8 + $0x1168] sm:$0xff]  ;;  %v6389_v51 = vld [vmem:[#allocation8 + $0x1040] sm:$0xff] }
 0x4c2   : > { %v6393_v13 = vld [vmem:[#allocation8 + $0x1060] sm:$0xff] }
 0x4c4   : > { %6292 = vmatpush1.bf16.msra.mxu1 %v12481_v35  ;;  %6333 = vmatpush1.bf16.msra.mxu0 %v12483_v62 }
 0x4c5   : > { %6293 = vmatprep.subr.bf16.mxu1 %v12474_v10  ;;  %6334 = vmatprep.subr.bf16.mxu0 %v12476_v27  ;;  %v12558_v10 = vcombine.high %v6421_v11, %v6425_v52  ;;  %v12560_v27 = vcombine.high %v6422_v20, %v6426_v12 }
 0x4c8   : > { %6294 = vmatpush1.bf16.msra.mxu1 %v12473_v34  ;;  %6335 = vmatpush1.bf16.msra.mxu0 %v12475_v54  ;;  %v12557_v54 = vcombine.low %v6421_v11, %v6425_v52  ;;  %v6381_v52 = vld [vmem:[#allocation8 + $0x1000] sm:$0xff] }
 0x4c9   : > { %6295 = vmatprep.subr.bf16.mxu1 %v12466_v31  ;;  %6336 = vmatprep.subr.bf16.mxu0 %v12468_v24  ;;  %v12559_v31 = vcombine.low %v6422_v20, %v6426_v12  ;;  %v6385_v20 = vld [vmem:[#allocation8 + $0x1020] sm:$0xff]  ;;  %v6382_v12 = vld [vmem:[#allocation8 + $0x1008] sm:$0xff] }
 0x4cc   : > { %6296 = vmatpush1.bf16.msra.mxu1 %v12465_v43  ;;  %6337 = vmatpush1.bf16.msra.mxu0 %v12467_v9  ;;  %v6410_v43 = vld [vmem:[#allocation8 + $0x10e8] sm:$0xff] }
 0x4cd   : > { %6297 = vmatprep.subr.bf16.mxu1 %v12458_v45  ;;  %6338 = vmatprep.subr.bf16.mxu0 %v12460_v40  ;;  %v12542_v40 = vcombine.high %v6405_v38, %v6409_v37  ;;  %v12544_v2 = vcombine.high %v6406_v30, %v6410_v43 }
 0x4d0   : > { %6298 = vmatpush1.bf16.msra.mxu1 %v12457_v53  ;;  %6339 = vmatpush1.bf16.msra.mxu0 %v12459_v16  ;;  %v6402_v53 = vld [vmem:[#allocation8 + $0x10a8] sm:$0xff]  ;;  %v12541_v16 = vcombine.low %v6405_v38, %v6409_v37 }
 0x4d1   : > { %6797 = vmatprep.subr.bf16.mxu1 %v12574_v28  ;;  %6838 = vmatprep.subr.bf16.mxu0 %v12576_v5  ;;  %v12543_v28 = vcombine.low %v6406_v30, %v6410_v43  ;;  %v12534_v5 = vcombine.high %v6397_v3, %v6401_v17  ;;  %v12536_v8 = vcombine.high %v6398_v21, %v6402_v53  ;;  %v6423_v30 = vld [vmem:[#allocation8 + $0x1150] sm:$0xff] }
 0x4d2   : > { %v6427_v43 = vld [vmem:[#allocation8 + $0x1170] sm:$0xff] }
 0x4d3   : > { %v4601_v4 = vpop.f32.mrf.mxu1  ;;  %v4642_v47 = vpop.f32.mrf.mxu0  ;;  %6316 = vmatmul.mubr.bf16.vlgmr.msra.gmra.mxu1 %v14844_v60  ;;  %6357 = vmatmul.mubr.bf16.vlgmr.msra.gmra.mxu0 %v14844_v60 }
 0x4d4   : > { %v14865_v46 = vadd.f32 %v4601_v4, %v14829_v22  ;;  %v14868_v49 = vadd.f32 %v4642_v47, %v14832_v42  ;;  %6798 = vmatpush1.bf16.msra.mxu1 %v12573_v6  ;;  %6839 = vmatpush1.bf16.msra.mxu0 %v12575_v26  ;;  %v6417_v22 = vld [vmem:[#allocation8 + $0x1120] sm:$0xff]  ;;  %v6418_v42 = vld [vmem:[#allocation8 + $0x1128] sm:$0xff]  ;;  %v12533_v26 = vcombine.low %v6397_v3, %v6401_v17 }
 0x4d5   : > { %v4603_v35 = vpop.f32.mrf.mxu1  ;;  %v4644_v62 = vpop.f32.mrf.mxu0  ;;  %6799 = vmatprep.subr.bf16.mxu1 %v12566_v55  ;;  %6840 = vmatprep.subr.bf16.mxu0 %v12568_v58  ;;  %v12549_v9 = vcombine.low %v6413_v7, %v6417_v22  ;;  %v12551_v45 = vcombine.low %v6414_v1, %v6418_v42  ;;  %v6394_v6 = vld [vmem:[#allocation8 + $0x1068] sm:$0xff]  ;;  %v12535_v55 = vcombine.low %v6398_v21, %v6402_v53 }
 0x4d6   : > { %v14871_v33 = vadd.f32 %v4603_v35, %v14835_v36  ;;  %v14874_v60 = vadd.f32 %v4644_v62, %v14838_v50  ;;  %6829 = vmatprep.mubr.bf16.mxu1 %v13805_v0  ;;  %6870 = vmatprep.mubr.bf16.mxu0 %v13805_v0  ;;  %v12550_v36 = vcombine.high %v6413_v7, %v6417_v22  ;;  %v6386_v4 = vld [vmem:[#allocation8 + $0x1028] sm:$0xff]  ;;  %v6439_v62 = vld [vmem:[#allocation8 + $0x11d0] sm:$0xff]  ;;  %v6444_v7 = vld [vmem:[#allocation8 + $0x11f8] sm:$0xff] }
 0x4d7   : > { %v4605_v57 = vpop.f32.mrf.mxu1  ;;  %v4646_v34 = vpop.f32.mrf.mxu0  ;;  %v12552_v50 = vcombine.high %v6414_v1, %v6418_v42  ;;  %v12526_v58 = vcombine.high %v6389_v51, %v6393_v13  ;;  %v12528_v11 = vcombine.high %v6390_v48, %v6394_v6  ;;  %v12525_v47 = vcombine.low %v6389_v51, %v6393_v13 }
 0x4d8   : > { %6800 = vmatpush1.bf16.msra.mxu1 %v12565_v23  ;;  %6841 = vmatpush1.bf16.msra.mxu0 %v12567_v59  ;;  %v12527_v23 = vcombine.low %v6390_v48, %v6394_v6  ;;  %v12518_v59 = vcombine.high %v6381_v52, %v6385_v20  ;;  %v12520_v35 = vcombine.high %v6382_v12, %v6386_v4  ;;  %v6431_v34 = vld [vmem:[#allocation8 + $0x1190] sm:$0xff]  ;;  %v6416_v48 = vld [vmem:[#allocation8 + $0x1118] sm:$0xff] }
 0x4d9   : > { %v4606_v24 = vpop.f32.mrf.mxu1  ;;  %v4647_v61 = vpop.f32.mrf.mxu0  ;;  %6801 = vmatprep.subr.bf16.mxu1 %v12558_v10  ;;  %6842 = vmatprep.subr.bf16.mxu0 %v12560_v27  ;;  %v6443_v10 = vld [vmem:[#allocation8 + $0x11f0] sm:$0xff]  ;;  %v6440_v27 = vld [vmem:[#allocation8 + $0x11d8] sm:$0xff]  ;;  %v12517_v22 = vcombine.low %v6381_v52, %v6385_v20  ;;  %v12519_v1 = vcombine.low %v6382_v12, %v6386_v4 }
 0x4da   : > { %v12578_v42 = vcombine.high %v6439_v62, %v6443_v10  ;;  %v12580_v57 = vcombine.high %v6440_v27, %v6444_v7  ;;  %v6436_v24 = vld [vmem:[#allocation8 + $0x11b8] sm:$0xff]  ;;  %v12577_v61 = vcombine.low %v6439_v62, %v6443_v10  ;;  %v6407_v20 = vld [vmem:[#allocation8 + $0x10d0] sm:$0xff] }
 0x4db   : > { %v6411_v12 = vld [vmem:[#allocation8 + $0x10f0] sm:$0xff]  ;;  %v6408_v4 = vld [vmem:[#allocation8 + $0x10d8] sm:$0xff] }
 0x4dc   : > { %6802 = vmatpush1.bf16.msra.mxu1 %v12557_v54  ;;  %6843 = vmatpush1.bf16.msra.mxu0 %v12559_v31  ;;  %v6435_v54 = vld [vmem:[#allocation8 + $0x11b0] sm:$0xff]  ;;  %v6432_v31 = vld [vmem:[#allocation8 + $0x1198] sm:$0xff] }
 0x4dd   : > { %6803 = vmatprep.subr.bf16.mxu1 %v12550_v36  ;;  %6844 = vmatprep.subr.bf16.mxu0 %v12552_v50  ;;  %v12579_v36 = vcombine.low %v6440_v27, %v6444_v7  ;;  %v14880_v50 = vpack.c.b16 %v14632_v44, %v14632_v44  ;;  %v12570_v38 = vcombine.high %v6431_v34, %v6435_v54  ;;  %v6399_v10 = vld [vmem:[#allocation8 + $0x1090] sm:$0xff]  ;;  %v6400_v7 = vld [vmem:[#allocation8 + $0x1098] sm:$0xff] }
 0x4de   : > { %v12572_v37 = vcombine.high %v6432_v31, %v6436_v24  ;;  %v12569_v3 = vcombine.low %v6431_v34, %v6435_v54  ;;  %v12571_v21 = vcombine.low %v6432_v31, %v6436_v24  ;;  %v6403_v27 = vld [vmem:[#allocation8 + $0x10b0] sm:$0xff]  ;;  %v6392_v24 = vld [vmem:[#allocation8 + $0x1058] sm:$0xff] }
 0x4df   : > { %v6391_v54 = vld [vmem:[#allocation8 + $0x1050] sm:$0xff] }
 0x4e0   : > { %6804 = vmatpush1.bf16.msra.mxu1 %v12549_v9  ;;  %6845 = vmatpush1.bf16.msra.mxu0 %v12551_v45  ;;  %v6424_v9 = vld [vmem:[#allocation8 + $0x1158] sm:$0xff]  ;;  %v6395_v31 = vld [vmem:[#allocation8 + $0x1070] sm:$0xff] }
 0x4e1   : > { %6805 = vmatprep.subr.bf16.mxu1 %v12542_v40  ;;  %6846 = vmatprep.subr.bf16.mxu0 %v12544_v2  ;;  %v6428_v45 = vld [vmem:[#allocation8 + $0x1178] sm:$0xff] }
 0x4e4   : > { %6806 = vmatpush1.bf16.msra.mxu1 %v12541_v16  ;;  %6847 = vmatpush1.bf16.msra.mxu0 %v12543_v28  ;;  %v12562_v28 = vcombine.high %v6423_v30, %v6427_v43 }
 0x4e5   : > { %6807 = vmatprep.subr.bf16.mxu1 %v12534_v5  ;;  %6848 = vmatprep.subr.bf16.mxu0 %v12536_v8  ;;  %v12564_v5 = vcombine.high %v6424_v9, %v6428_v45  ;;  %v6415_v8 = vld [vmem:[#allocation8 + $0x1110] sm:$0xff] }
 0x4e8   : > { %6808 = vmatpush1.bf16.msra.mxu1 %v12533_v26  ;;  %6849 = vmatpush1.bf16.msra.mxu0 %v12535_v55  ;;  %v12561_v55 = vcombine.low %v6423_v30, %v6427_v43  ;;  %v6383_v43 = vld [vmem:[#allocation8 + $0x1010] sm:$0xff] }
 0x4e9   : > { %6809 = vmatprep.subr.bf16.mxu1 %v12526_v58  ;;  %6850 = vmatprep.subr.bf16.mxu0 %v12528_v11  ;;  %v12563_v58 = vcombine.low %v6424_v9, %v6428_v45  ;;  %v6387_v9 = vld [vmem:[#allocation8 + $0x1030] sm:$0xff]  ;;  %v6384_v45 = vld [vmem:[#allocation8 + $0x1018] sm:$0xff] }
 0x4ec   : > { %6810 = vmatpush1.bf16.msra.mxu1 %v12525_v47  ;;  %6851 = vmatpush1.bf16.msra.mxu0 %v12527_v23  ;;  %v6412_v47 = vld [vmem:[#allocation8 + $0x10f8] sm:$0xff] }
 0x4ed   : > { %6811 = vmatprep.subr.bf16.mxu1 %v12518_v59  ;;  %6852 = vmatprep.subr.bf16.mxu0 %v12520_v35  ;;  %v12546_v35 = vcombine.high %v6407_v20, %v6411_v12  ;;  %v12548_v62 = vcombine.high %v6408_v4, %v6412_v47 }
 0x4f0   : > { %6812 = vmatpush1.bf16.msra.mxu1 %v12517_v22  ;;  %6853 = vmatpush1.bf16.msra.mxu0 %v12519_v1  ;;  %v6404_v22 = vld [vmem:[#allocation8 + $0x10b8] sm:$0xff]  ;;  %v12545_v1 = vcombine.low %v6407_v20, %v6411_v12  ;;  %v7009_v12 = vld [vmem:[#allocation8 + $0x1340] sm:$0xff] }
 0x4f1   : > { %6879 = vmatprep.subr.bf16.mxu1 %v12578_v42  ;;  %6920 = vmatprep.subr.bf16.mxu0 %v12580_v57  ;;  %v12547_v42 = vcombine.low %v6408_v4, %v6412_v47  ;;  %v12538_v57 = vcombine.high %v6399_v10, %v6403_v27  ;;  %v12540_v34 = vcombine.high %v6400_v7, %v6404_v22  ;;  %v7013_v4 = vld [vmem:[#allocation8 + $0x1360] sm:$0xff]  ;;  %v7010_v47 = vld [vmem:[#allocation8 + $0x1348] sm:$0xff] }
 0x4f3   : > { %v5091_v40 = vpop.f32.mrf.mxu1  ;;  %v5132_v2 = vpop.f32.mrf.mxu0  ;;  %6830 = vmatmul.mubr.bf16.vlgmr.msra.gmra.mxu1 %v14880_v50  ;;  %6871 = vmatmul.mubr.bf16.vlgmr.msra.gmra.mxu0 %v14880_v50 }
 0x4f4   : > { %v14885_v17 = vadd.f32 %v5091_v40, %v14849_v18  ;;  %v14888_v44 = vadd.f32 %v5132_v2, %v14852_v32  ;;  %6880 = vmatpush1.bf16.msra.mxu1 %v12577_v61  ;;  %6921 = vmatpush1.bf16.msra.mxu0 %v12579_v36  ;;  %v6419_v18 = vld [vmem:[#allocation8 + $0x1130] sm:$0xff]  ;;  %v6420_v32 = vld [vmem:[#allocation8 + $0x1138] sm:$0xff]  ;;  %v12537_v36 = vcombine.low %v6399_v10, %v6403_v27 }
 0x4f5   : > { %v5093_v53 = vpop.f32.mrf.mxu1  ;;  %v5134_v16 = vpop.f32.mrf.mxu0  ;;  %6881 = vmatprep.subr.bf16.mxu1 %v12570_v38  ;;  %6922 = vmatprep.subr.bf16.mxu0 %v12572_v37  ;;  %v12553_v23 = vcombine.low %v6415_v8, %v6419_v18  ;;  %v12555_v59 = vcombine.low %v6416_v48, %v6420_v32  ;;  %v6396_v61 = vld [vmem:[#allocation8 + $0x1078] sm:$0xff]  ;;  %v12539_v38 = vcombine.low %v6400_v7, %v6404_v22 }
 0x4f6   : > { %v14891_v51 = vadd.f32 %v5093_v53, %v14855_v15  ;;  %v14894_v13 = vadd.f32 %v5134_v16, %v14858_v19  ;;  %6911 = vmatprep.mubr.bf16.mxu1 %v13805_v0  ;;  %6952 = vmatprep.mubr.bf16.mxu0 %v13805_v0  ;;  %v12554_v15 = vcombine.high %v6415_v8, %v6419_v18  ;;  %v6388_v40 = vld [vmem:[#allocation8 + $0x1038] sm:$0xff]  ;;  %v7025_v16 = vld [vmem:[#allocation8 + $0x13c0] sm:$0xff]  ;;  %v7030_v8 = vld [vmem:[#allocation8 + $0x13e8] sm:$0xff] }
 0x4f7   : > { %v5095_v6 = vpop.f32.mrf.mxu1  ;;  %v5136_v26 = vpop.f32.mrf.mxu0  ;;  %v12556_v19 = vcombine.high %v6416_v48, %v6420_v32  ;;  %v12530_v37 = vcombine.high %v6391_v54, %v6395_v31  ;;  %v12532_v30 = vcombine.high %v6392_v24, %v6396_v61  ;;  %v12529_v2 = vcombine.low %v6391_v54, %v6395_v31  ;;  %v7002_v31 = vld [vmem:[#allocation8 + $0x1308] sm:$0xff] }
 0x4f8   : > { %6882 = vmatpush1.bf16.msra.mxu1 %v12569_v3  ;;  %6923 = vmatpush1.bf16.msra.mxu0 %v12571_v21  ;;  %v12531_v3 = vcombine.low %v6392_v24, %v6396_v61  ;;  %v12522_v21 = vcombine.high %v6383_v43, %v6387_v9  ;;  %v12524_v53 = vcombine.high %v6384_v45, %v6388_v40  ;;  %v7017_v26 = vld [vmem:[#allocation8 + $0x1380] sm:$0xff] }
 0x4f9   : > { %v5096_v11 = vpop.f32.mrf.mxu1  ;;  %v5137_v52 = vpop.f32.mrf.mxu0  ;;  %6883 = vmatprep.subr.bf16.mxu1 %v12562_v28  ;;  %6924 = vmatprep.subr.bf16.mxu0 %v12564_v5  ;;  %v7029_v28 = vld [vmem:[#allocation8 + $0x13e0] sm:$0xff]  ;;  %v7026_v5 = vld [vmem:[#allocation8 + $0x13c8] sm:$0xff]  ;;  %v12521_v18 = vcombine.low %v6383_v43, %v6387_v9  ;;  %v12523_v48 = vcombine.low %v6384_v45, %v6388_v40 }
 0x4fa   : > { %v12638_v32 = vcombine.high %v7025_v16, %v7029_v28  ;;  %v12640_v6 = vcombine.high %v7026_v5, %v7030_v8  ;;  %v7022_v11 = vld [vmem:[#allocation8 + $0x13a8] sm:$0xff]  ;;  %v12637_v52 = vcombine.low %v7025_v16, %v7029_v28  ;;  %v6993_v43 = vld [vmem:[#allocation8 + $0x12c0] sm:$0xff] }
 0x4fb   : > { %v6997_v9 = vld [vmem:[#allocation8 + $0x12e0] sm:$0xff]  ;;  %v6994_v45 = vld [vmem:[#allocation8 + $0x12c8] sm:$0xff] }
 0x4fc   : > { %6884 = vmatpush1.bf16.msra.mxu1 %v12561_v55  ;;  %6925 = vmatpush1.bf16.msra.mxu0 %v12563_v58  ;;  %v7021_v55 = vld [vmem:[#allocation8 + $0x13a0] sm:$0xff]  ;;  %v7018_v58 = vld [vmem:[#allocation8 + $0x1388] sm:$0xff] }
 0x4fd   : > { %6885 = vmatprep.subr.bf16.mxu1 %v12554_v15  ;;  %6926 = vmatprep.subr.bf16.mxu0 %v12556_v19  ;;  %v12639_v15 = vcombine.low %v7026_v5, %v7030_v8  ;;  %v12630_v19 = vcombine.high %v7017_v26, %v7021_v55  ;;  %v12632_v20 = vcombine.high %v7018_v58, %v7022_v11  ;;  %v6998_v40 = vld [vmem:[#allocation8 + $0x12e8] sm:$0xff]  ;;  %v6985_v16 = vld [vmem:[#allocation8 + $0x1280] sm:$0xff] }
 0x4fe   : > { %v12631_v7 = vcombine.low %v7018_v58, %v7022_v11  ;;  %v6989_v28 = vld [vmem:[#allocation8 + $0x12a0] sm:$0xff]  ;;  %v6986_v5 = vld [vmem:[#allocation8 + $0x1288] sm:$0xff] }
 0x4ff   : > { %v6990_v8 = vld [vmem:[#allocation8 + $0x12a8] sm:$0xff] }
 0x500   : > { %6886 = vmatpush1.bf16.msra.mxu1 %v12553_v23  ;;  %6927 = vmatpush1.bf16.msra.mxu0 %v12555_v59  ;;  %v7014_v23 = vld [vmem:[#allocation8 + $0x1368] sm:$0xff] }
 0x501   : > { %6887 = vmatprep.subr.bf16.mxu1 %v12546_v35  ;;  %6928 = vmatprep.subr.bf16.mxu0 %v12548_v62  ;;  %v12629_v62 = vcombine.low %v7017_v26, %v7021_v55  ;;  %v6977_v26 = vld [vmem:[#allocation8 + $0x1240] sm:$0xff]  ;;  %v6978_v58 = vld [vmem:[#allocation8 + $0x1248] sm:$0xff] }
 0x502   : > { %v6981_v55 = vld [vmem:[#allocation8 + $0x1260] sm:$0xff]  ;;  %v6982_v11 = vld [vmem:[#allocation8 + $0x1268] sm:$0xff] }
 0x504   : > { %6888 = vmatpush1.bf16.msra.mxu1 %v12545_v1  ;;  %6929 = vmatpush1.bf16.msra.mxu0 %v12547_v42  ;;  %v12622_v42 = vcombine.high %v7009_v12, %v7013_v4 }
 0x505   : > { %6889 = vmatprep.subr.bf16.mxu1 %v12538_v57  ;;  %6930 = vmatprep.subr.bf16.mxu0 %v12540_v34  ;;  %v12624_v57 = vcombine.high %v7010_v47, %v7014_v23  ;;  %v7001_v34 = vld [vmem:[#allocation8 + $0x1300] sm:$0xff] }
 0x508   : > { %6890 = vmatpush1.bf16.msra.mxu1 %v12537_v36  ;;  %6931 = vmatpush1.bf16.msra.mxu0 %v12539_v38  ;;  %v12621_v36 = vcombine.low %v7009_v12, %v7013_v4  ;;  %v12623_v38 = vcombine.low %v7010_v47, %v7014_v23  ;;  %v6969_v12 = vld [vmem:[#allocation8 + $0x1200] sm:$0xff]  ;;  %v6970_v47 = vld [vmem:[#allocation8 + $0x1208] sm:$0xff] }
 0x509   : > { %6891 = vmatprep.subr.bf16.mxu1 %v12530_v37  ;;  %6932 = vmatprep.subr.bf16.mxu0 %v12532_v30  ;;  %v6973_v4 = vld [vmem:[#allocation8 + $0x1220] sm:$0xff]  ;;  %v6974_v23 = vld [vmem:[#allocation8 + $0x1228] sm:$0xff] }
 0x50c   : > { %6892 = vmatpush1.bf16.msra.mxu1 %v12529_v2  ;;  %6933 = vmatpush1.bf16.msra.mxu0 %v12531_v3 }
 0x50d   : > { %6893 = vmatprep.subr.bf16.mxu1 %v12522_v21  ;;  %6934 = vmatprep.subr.bf16.mxu0 %v12524_v53  ;;  %v12606_v21 = vcombine.high %v6993_v43, %v6997_v9  ;;  %v12608_v53 = vcombine.high %v6994_v45, %v6998_v40 }
 0x510   : > { %6894 = vmatpush1.bf16.msra.mxu1 %v12521_v18  ;;  %6935 = vmatpush1.bf16.msra.mxu0 %v12523_v48  ;;  %v12605_v18 = vcombine.low %v6993_v43, %v6997_v9  ;;  %v12607_v48 = vcombine.low %v6994_v45, %v6998_v40  ;;  %v7011_v9 = vld [vmem:[#allocation8 + $0x1350] sm:$0xff]  ;;  %v7012_v40 = vld [vmem:[#allocation8 + $0x1358] sm:$0xff] }
 0x511   : > { %7369 = vmatprep.subr.bf16.mxu1 %v12638_v32  ;;  %7410 = vmatprep.subr.bf16.mxu0 %v12640_v6  ;;  %v12598_v32 = vcombine.high %v6985_v16, %v6989_v28  ;;  %v12600_v6 = vcombine.high %v6986_v5, %v6990_v8  ;;  %v7015_v45 = vld [vmem:[#allocation8 + $0x1370] sm:$0xff] }
 0x513   : > { %v5173_v59 = vpop.f32.mrf.mxu1  ;;  %v5214_v35 = vpop.f32.mrf.mxu0  ;;  %6912 = vmatmul.mubr.bf16.vlgmr.msra.gmra.mxu1 %v14880_v50  ;;  %6953 = vmatmul.mubr.bf16.vlgmr.msra.gmra.mxu0 %v14880_v50 }
 0x514   : > { %v14901_v10 = vadd.f32 %v5173_v59, %v14865_v46  ;;  %v14904_v27 = vadd.f32 %v5214_v35, %v14868_v49  ;;  %7370 = vmatpush1.bf16.msra.mxu1 %v12637_v52  ;;  %7411 = vmatpush1.bf16.msra.mxu0 %v12639_v15  ;;  %v7005_v46 = vld [vmem:[#allocation8 + $0x1320] sm:$0xff]  ;;  %v7006_v49 = vld [vmem:[#allocation8 + $0x1328] sm:$0xff]  ;;  %v12597_v52 = vcombine.low %v6985_v16, %v6989_v28 }
 0x515   : > { %v5175_v22 = vpop.f32.mrf.mxu1  ;;  %v5216_v1 = vpop.f32.mrf.mxu0  ;;  %7371 = vmatprep.subr.bf16.mxu1 %v12630_v19  ;;  %7412 = vmatprep.subr.bf16.mxu0 %v12632_v20  ;;  %v12613_v2 = vcombine.low %v7001_v34, %v7005_v46  ;;  %v12615_v3 = vcombine.low %v7002_v31, %v7006_v49  ;;  %v12599_v15 = vcombine.low %v6986_v5, %v6990_v8 }
 0x516   : > { %v14907_v54 = vadd.f32 %v5175_v22, %v14871_v33  ;;  %v14910_v50 = vadd.f32 %v5216_v1, %v14874_v60  ;;  %7401 = vmatprep.mubr.bf16.mxu1 %v13805_v0  ;;  %7442 = vmatprep.mubr.bf16.mxu0 %v13805_v0  ;;  %v12614_v33 = vcombine.high %v7001_v34, %v7005_v46  ;;  %v7027_v22 = vld [vmem:[#allocation8 + $0x13d0] sm:$0xff] }
 0x517   : > { %v5177_v24 = vpop.f32.mrf.mxu1  ;;  %v5218_v61 = vpop.f32.mrf.mxu0  ;;  %v12616_v60 = vcombine.high %v7002_v31, %v7006_v49  ;;  %v12590_v19 = vcombine.high %v6977_v26, %v6981_v55  ;;  %v12592_v20 = vcombine.high %v6978_v58, %v6982_v11  ;;  %v12589_v59 = vcombine.low %v6977_v26, %v6981_v55  ;;  %v7031_v1 = vld [vmem:[#allocation8 + $0x13f0] sm:$0xff]  ;;  %v7004_v55 = vld [vmem:[#allocation8 + $0x1318] sm:$0xff] }
 0x518   : > { %7372 = vmatpush1.bf16.msra.mxu1 %v12629_v62  ;;  %7413 = vmatpush1.bf16.msra.mxu0 %v12631_v7  ;;  %v12591_v35 = vcombine.low %v6978_v58, %v6982_v11  ;;  %v12582_v62 = vcombine.high %v6969_v12, %v6973_v4  ;;  %v12584_v7 = vcombine.high %v6970_v47, %v6974_v23  ;;  %v7019_v24 = vld [vmem:[#allocation8 + $0x1390] sm:$0xff] }
 0x519   : > { %v5178_v37 = vpop.f32.mrf.mxu1  ;;  %v5219_v30 = vpop.f32.mrf.mxu0  ;;  %7373 = vmatprep.subr.bf16.mxu1 %v12622_v42  ;;  %7414 = vmatprep.subr.bf16.mxu0 %v12624_v57  ;;  %v7028_v42 = vld [vmem:[#allocation8 + $0x13d8] sm:$0xff]  ;;  %v12581_v34 = vcombine.low %v6969_v12, %v6973_v4  ;;  %v12583_v46 = vcombine.low %v6970_v47, %v6974_v23  ;;  %v12642_v31 = vcombine.high %v7027_v22, %v7031_v1  ;;  %v7023_v61 = vld [vmem:[#allocation8 + $0x13b0] sm:$0xff] }
 0x51a   : > { %v7032_v57 = vld [vmem:[#allocation8 + $0x13f8] sm:$0xff]  ;;  %v12641_v37 = vcombine.low %v7027_v22, %v7031_v1  ;;  %v6995_v12 = vld [vmem:[#allocation8 + $0x12d0] sm:$0xff] }
 0x51b   : > { %v12644_v49 = vcombine.high %v7028_v42, %v7032_v57  ;;  %v12643_v30 = vcombine.low %v7028_v42, %v7032_v57  ;;  %v6999_v4 = vld [vmem:[#allocation8 + $0x12f0] sm:$0xff]  ;;  %v6996_v47 = vld [vmem:[#allocation8 + $0x12d8] sm:$0xff] }
 0x51c   : > { %7374 = vmatpush1.bf16.msra.mxu1 %v12621_v36  ;;  %7415 = vmatpush1.bf16.msra.mxu0 %v12623_v38  ;;  %v7020_v36 = vld [vmem:[#allocation8 + $0x1398] sm:$0xff]  ;;  %v6987_v22 = vld [vmem:[#allocation8 + $0x1290] sm:$0xff] }
 0x51d   : > { %7375 = vmatprep.subr.bf16.mxu1 %v12614_v33  ;;  %7416 = vmatprep.subr.bf16.mxu0 %v12616_v60  ;;  %v7024_v38 = vld [vmem:[#allocation8 + $0x13b8] sm:$0xff]  ;;  %v14916_v33 = vpack.c.b16 %v14635_v14, %v14635_v14  ;;  %v12634_v60 = vcombine.high %v7019_v24, %v7023_v61  ;;  %v6991_v1 = vld [vmem:[#allocation8 + $0x12b0] sm:$0xff] }
 0x51e   : > { %v12636_v43 = vcombine.high %v7020_v36, %v7024_v38  ;;  %v12635_v28 = vcombine.low %v7020_v36, %v7024_v38  ;;  %v7000_v23 = vld [vmem:[#allocation8 + $0x12f8] sm:$0xff] }
 0x51f   : > { %v6988_v42 = vld [vmem:[#allocation8 + $0x1298] sm:$0xff] }
 0x520   : > { %7376 = vmatpush1.bf16.msra.mxu1 %v12613_v2  ;;  %7417 = vmatpush1.bf16.msra.mxu0 %v12615_v3  ;;  %v7016_v2 = vld [vmem:[#allocation8 + $0x1378] sm:$0xff] }
 0x521   : > { %7377 = vmatprep.subr.bf16.mxu1 %v12606_v21  ;;  %7418 = vmatprep.subr.bf16.mxu0 %v12608_v53  ;;  %v12633_v53 = vcombine.low %v7019_v24, %v7023_v61  ;;  %v6992_v57 = vld [vmem:[#allocation8 + $0x12b8] sm:$0xff]  ;;  %v6979_v24 = vld [vmem:[#allocation8 + $0x1250] sm:$0xff] }
 0x522   : > { %v6983_v61 = vld [vmem:[#allocation8 + $0x1270] sm:$0xff]  ;;  %v6980_v36 = vld [vmem:[#allocation8 + $0x1258] sm:$0xff] }
 0x523   : > { %v6984_v38 = vld [vmem:[#allocation8 + $0x1278] sm:$0xff] }
 0x524   : > { %7378 = vmatpush1.bf16.msra.mxu1 %v12605_v18  ;;  %7419 = vmatpush1.bf16.msra.mxu0 %v12607_v48  ;;  %v12626_v18 = vcombine.high %v7011_v9, %v7015_v45  ;;  %v12628_v48 = vcombine.high %v7012_v40, %v7016_v2 }
 0x525   : > { %7379 = vmatprep.subr.bf16.mxu1 %v12598_v32  ;;  %7420 = vmatprep.subr.bf16.mxu0 %v12600_v6  ;;  %v7003_v32 = vld [vmem:[#allocation8 + $0x1310] sm:$0xff] }
 0x528   : > { %7380 = vmatpush1.bf16.msra.mxu1 %v12597_v52  ;;  %7421 = vmatpush1.bf16.msra.mxu0 %v12599_v15  ;;  %v12625_v52 = vcombine.low %v7011_v9, %v7015_v45  ;;  %v12627_v15 = vcombine.low %v7012_v40, %v7016_v2  ;;  %v6971_v9 = vld [vmem:[#allocation8 + $0x1210] sm:$0xff]  ;;  %v6972_v40 = vld [vmem:[#allocation8 + $0x1218] sm:$0xff] }
 0x529   : > { %7381 = vmatprep.subr.bf16.mxu1 %v12590_v19  ;;  %7422 = vmatprep.subr.bf16.mxu0 %v12592_v20  ;;  %v6975_v45 = vld [vmem:[#allocation8 + $0x1230] sm:$0xff]  ;;  %v6976_v2 = vld [vmem:[#allocation8 + $0x1238] sm:$0xff] }
 0x52c   : > { %7382 = vmatpush1.bf16.msra.mxu1 %v12589_v59  ;;  %7423 = vmatpush1.bf16.msra.mxu0 %v12591_v35 }
 0x52d   : > { %7383 = vmatprep.subr.bf16.mxu1 %v12582_v62  ;;  %7424 = vmatprep.subr.bf16.mxu0 %v12584_v7  ;;  %v12610_v62 = vcombine.high %v6995_v12, %v6999_v4  ;;  %v12612_v7 = vcombine.high %v6996_v47, %v7000_v23 }
 0x530   : > { %7384 = vmatpush1.bf16.msra.mxu1 %v12581_v34  ;;  %7425 = vmatpush1.bf16.msra.mxu0 %v12583_v46  ;;  %v12609_v34 = vcombine.low %v6995_v12, %v6999_v4  ;;  %v12611_v46 = vcombine.low %v6996_v47, %v7000_v23  ;;  %v7581_v12 = vld [vmem:[#allocation8 + $0x1540] sm:$0xff]  ;;  %v7582_v47 = vld [vmem:[#allocation8 + $0x1548] sm:$0xff] }
 0x531   : > { %7451 = vmatprep.subr.bf16.mxu1 %v12642_v31  ;;  %7492 = vmatprep.subr.bf16.mxu0 %v12644_v49  ;;  %v12602_v31 = vcombine.high %v6987_v22, %v6991_v1  ;;  %v12604_v49 = vcombine.high %v6988_v42, %v6992_v57  ;;  %v7585_v4 = vld [vmem:[#allocation8 + $0x1560] sm:$0xff]  ;;  %v7586_v23 = vld [vmem:[#allocation8 + $0x1568] sm:$0xff] }
 0x533   : > { %v5663_v3 = vpop.f32.mrf.mxu1  ;;  %v5704_v21 = vpop.f32.mrf.mxu0  ;;  %7402 = vmatmul.mubr.bf16.vlgmr.msra.gmra.mxu1 %v14916_v33  ;;  %7443 = vmatmul.mubr.bf16.vlgmr.msra.gmra.mxu0 %v14916_v33 }
 0x534   : > { %v14921_v16 = vadd.f32 %v5663_v3, %v14885_v17  ;;  %v14924_v14 = vadd.f32 %v5704_v21, %v14888_v44  ;;  %7452 = vmatpush1.bf16.msra.mxu1 %v12641_v37  ;;  %7493 = vmatpush1.bf16.msra.mxu0 %v12643_v30  ;;  %v7007_v17 = vld [vmem:[#allocation8 + $0x1330] sm:$0xff]  ;;  %v7008_v44 = vld [vmem:[#allocation8 + $0x1338] sm:$0xff]  ;;  %v12601_v37 = vcombine.low %v6987_v22, %v6991_v1 }
 0x535   : > { %v5665_v5 = vpop.f32.mrf.mxu1  ;;  %v5706_v8 = vpop.f32.mrf.mxu0  ;;  %7453 = vmatprep.subr.bf16.mxu1 %v12634_v60  ;;  %7494 = vmatprep.subr.bf16.mxu0 %v12636_v43  ;;  %v12617_v59 = vcombine.low %v7003_v32, %v7007_v17  ;;  %v12619_v35 = vcombine.low %v7004_v55, %v7008_v44  ;;  %v12603_v30 = vcombine.low %v6988_v42, %v6992_v57 }
 0x536   : > { %v14927_v6 = vadd.f32 %v5665_v5, %v14891_v51  ;;  %v14930_v26 = vadd.f32 %v5706_v8, %v14894_v13  ;;  %7483 = vmatprep.mubr.bf16.mxu1 %v13805_v0  ;;  %7524 = vmatprep.mubr.bf16.mxu0 %v13805_v0  ;;  %v12618_v51 = vcombine.high %v7003_v32, %v7007_v17  ;;  %v7597_v5 = vld [vmem:[#allocation8 + $0x15c0] sm:$0xff] }
 0x537   : > { %v5667_v58 = vpop.f32.mrf.mxu1  ;;  %v5708_v11 = vpop.f32.mrf.mxu0  ;;  %v12620_v13 = vcombine.high %v7004_v55, %v7008_v44  ;;  %v12594_v60 = vcombine.high %v6979_v24, %v6983_v61  ;;  %v12596_v43 = vcombine.high %v6980_v36, %v6984_v38  ;;  %v12593_v3 = vcombine.low %v6979_v24, %v6983_v61  ;;  %v7601_v8 = vld [vmem:[#allocation8 + $0x15e0] sm:$0xff]  ;;  %v7574_v24 = vld [vmem:[#allocation8 + $0x1508] sm:$0xff] }
 0x538   : > { %7454 = vmatpush1.bf16.msra.mxu1 %v12633_v53  ;;  %7495 = vmatpush1.bf16.msra.mxu0 %v12635_v28  ;;  %v12595_v21 = vcombine.low %v6980_v36, %v6984_v38  ;;  %v12586_v53 = vcombine.high %v6971_v9, %v6975_v45  ;;  %v12588_v28 = vcombine.high %v6972_v40, %v6976_v2  ;;  %v7589_v58 = vld [vmem:[#allocation8 + $0x1580] sm:$0xff] }
 0x539   : > { %v5668_v19 = vpop.f32.mrf.mxu1  ;;  %v5709_v20 = vpop.f32.mrf.mxu0  ;;  %7455 = vmatprep.subr.bf16.mxu1 %v12626_v18  ;;  %7496 = vmatprep.subr.bf16.mxu0 %v12628_v48  ;;  %v7598_v18 = vld [vmem:[#allocation8 + $0x15c8] sm:$0xff]  ;;  %v12585_v32 = vcombine.low %v6971_v9, %v6975_v45  ;;  %v12587_v17 = vcombine.low %v6972_v40, %v6976_v2  ;;  %v12702_v55 = vcombine.high %v7597_v5, %v7601_v8  ;;  %v7593_v11 = vld [vmem:[#allocation8 + $0x15a0] sm:$0xff] }
 0x53a   : > { %v7602_v48 = vld [vmem:[#allocation8 + $0x15e8] sm:$0xff]  ;;  %v12701_v19 = vcombine.low %v7597_v5, %v7601_v8  ;;  %v12685_v38 = vcombine.low %v7581_v12, %v7585_v4  ;;  %v7569_v9 = vld [vmem:[#allocation8 + $0x14e0] sm:$0xff] }
 0x53b   : > { %v12704_v44 = vcombine.high %v7598_v18, %v7602_v48  ;;  %v12703_v20 = vcombine.low %v7598_v18, %v7602_v48  ;;  %v7566_v45 = vld [vmem:[#allocation8 + $0x14c8] sm:$0xff]  ;;  %v7561_v5 = vld [vmem:[#allocation8 + $0x14a0] sm:$0xff] }
 0x53c   : > { %7456 = vmatpush1.bf16.msra.mxu1 %v12625_v52  ;;  %7497 = vmatpush1.bf16.msra.mxu0 %v12627_v15  ;;  %v7590_v52 = vld [vmem:[#allocation8 + $0x1588] sm:$0xff] }
 0x53d   : > { %7457 = vmatprep.subr.bf16.mxu1 %v12618_v51  ;;  %7498 = vmatprep.subr.bf16.mxu0 %v12620_v13  ;;  %v7594_v15 = vld [vmem:[#allocation8 + $0x15a8] sm:$0xff]  ;;  %v12694_v51 = vcombine.high %v7589_v58, %v7593_v11 }
 0x53e   : > { %v12696_v13 = vcombine.high %v7590_v52, %v7594_v15  ;;  %v12695_v1 = vcombine.low %v7590_v52, %v7594_v15  ;;  %v7570_v40 = vld [vmem:[#allocation8 + $0x14e8] sm:$0xff] }
 0x53f   : > { %v7558_v8 = vld [vmem:[#allocation8 + $0x1488] sm:$0xff] }
 0x540   : > { %7458 = vmatpush1.bf16.msra.mxu1 %v12617_v59  ;;  %7499 = vmatpush1.bf16.msra.mxu0 %v12619_v35  ;;  %v7562_v18 = vld [vmem:[#allocation8 + $0x14a8] sm:$0xff] }
 0x541   : > { %7459 = vmatprep.subr.bf16.mxu1 %v12610_v62  ;;  %7500 = vmatprep.subr.bf16.mxu0 %v12612_v7  ;;  %v12693_v62 = vcombine.low %v7589_v58, %v7593_v11  ;;  %v7553_v58 = vld [vmem:[#allocation8 + $0x1460] sm:$0xff]  ;;  %v7550_v11 = vld [vmem:[#allocation8 + $0x1448] sm:$0xff] }
 0x542   : > { %v7554_v52 = vld [vmem:[#allocation8 + $0x1468] sm:$0xff] }
 0x544   : > { %7460 = vmatpush1.bf16.msra.mxu1 %v12609_v34  ;;  %7501 = vmatpush1.bf16.msra.mxu0 %v12611_v46  ;;  %v12686_v34 = vcombine.high %v7581_v12, %v7585_v4  ;;  %v12688_v46 = vcombine.high %v7582_v47, %v7586_v23  ;;  %v7545_v12 = vld [vmem:[#allocation8 + $0x1420] sm:$0xff]  ;;  %v7542_v4 = vld [vmem:[#allocation8 + $0x1408] sm:$0xff] }
 0x545   : > { %7461 = vmatprep.subr.bf16.mxu1 %v12602_v31  ;;  %7502 = vmatprep.subr.bf16.mxu0 %v12604_v49  ;;  %v7573_v31 = vld [vmem:[#allocation8 + $0x1500] sm:$0xff] }
 0x548   : > { %7462 = vmatpush1.bf16.msra.mxu1 %v12601_v37  ;;  %7503 = vmatpush1.bf16.msra.mxu0 %v12603_v30  ;;  %v12687_v37 = vcombine.low %v7582_v47, %v7586_v23  ;;  %v7546_v47 = vld [vmem:[#allocation8 + $0x1428] sm:$0xff] }
 0x549   : > { %7463 = vmatprep.subr.bf16.mxu1 %v12594_v60  ;;  %7504 = vmatprep.subr.bf16.mxu0 %v12596_v43  ;;  %v7565_v43 = vld [vmem:[#allocation8 + $0x14c0] sm:$0xff] }
 0x54a   : > { %v12669_v48 = vcombine.low %v7565_v43, %v7569_v9 }
 0x54c   : > { %7464 = vmatpush1.bf16.msra.mxu1 %v12593_v3  ;;  %7505 = vmatpush1.bf16.msra.mxu0 %v12595_v21  ;;  %v12670_v21 = vcombine.high %v7565_v43, %v7569_v9  ;;  %v7583_v43 = vld [vmem:[#allocation8 + $0x1550] sm:$0xff] }
 0x54d   : > { %7465 = vmatprep.subr.bf16.mxu1 %v12586_v53  ;;  %7506 = vmatprep.subr.bf16.mxu0 %v12588_v28  ;;  %v12672_v53 = vcombine.high %v7566_v45, %v7570_v40  ;;  %v7557_v28 = vld [vmem:[#allocation8 + $0x1480] sm:$0xff]  ;;  %v7587_v9 = vld [vmem:[#allocation8 + $0x1570] sm:$0xff] }
 0x54e   : > { %v12661_v15 = vcombine.low %v7557_v28, %v7561_v5 }
 0x550   : > { %7466 = vmatpush1.bf16.msra.mxu1 %v12585_v32  ;;  %7507 = vmatpush1.bf16.msra.mxu0 %v12587_v17  ;;  %v12671_v32 = vcombine.low %v7566_v45, %v7570_v40  ;;  %v12662_v17 = vcombine.high %v7557_v28, %v7561_v5  ;;  %v7584_v45 = vld [vmem:[#allocation8 + $0x1558] sm:$0xff] }
 0x551   : > { %7941 = vmatprep.subr.bf16.mxu1 %v12702_v55  ;;  %7982 = vmatprep.subr.bf16.mxu0 %v12704_v44  ;;  %v12664_v55 = vcombine.high %v7558_v8, %v7562_v18  ;;  %v7549_v44 = vld [vmem:[#allocation8 + $0x1440] sm:$0xff]  ;;  %v7588_v40 = vld [vmem:[#allocation8 + $0x1578] sm:$0xff] }
 0x552   : > { %v12653_v23 = vcombine.low %v7549_v44, %v7553_v58 }
 0x553   : > { %v5745_v59 = vpop.f32.mrf.mxu1  ;;  %v5786_v35 = vpop.f32.mrf.mxu0  ;;  %7484 = vmatmul.mubr.bf16.vlgmr.msra.gmra.mxu1 %v14916_v33  ;;  %7525 = vmatmul.mubr.bf16.vlgmr.msra.gmra.mxu0 %v14916_v33 }
 0x554   : > { %v14937_v7 = vadd.f32 %v5745_v59, %v14901_v10  ;;  %v14940_v22 = vadd.f32 %v5786_v35, %v14904_v27  ;;  %7942 = vmatpush1.bf16.msra.mxu1 %v12701_v19  ;;  %7983 = vmatpush1.bf16.msra.mxu0 %v12703_v20  ;;  %v7577_v10 = vld [vmem:[#allocation8 + $0x1520] sm:$0xff]  ;;  %v7578_v27 = vld [vmem:[#allocation8 + $0x1528] sm:$0xff]  ;;  %v12663_v19 = vcombine.low %v7558_v8, %v7562_v18 }
 0x555   : > { %v5747_v42 = vpop.f32.mrf.mxu1  ;;  %v5788_v57 = vpop.f32.mrf.mxu0  ;;  %7943 = vmatprep.subr.bf16.mxu1 %v12694_v51  ;;  %7984 = vmatprep.subr.bf16.mxu0 %v12696_v13  ;;  %v12677_v2 = vcombine.low %v7573_v31, %v7577_v10  ;;  %v12679_v3 = vcombine.low %v7574_v24, %v7578_v27  ;;  %v12654_v20 = vcombine.high %v7549_v44, %v7553_v58  ;;  %v7541_v13 = vld [vmem:[#allocation8 + $0x1400] sm:$0xff]  ;;  %v7576_v44 = vld [vmem:[#allocation8 + $0x1518] sm:$0xff] }
 0x556   : > { %v14943_v49 = vadd.f32 %v5747_v42, %v14907_v54  ;;  %v14946_v33 = vadd.f32 %v5788_v57, %v14910_v50  ;;  %7973 = vmatprep.mubr.bf16.mxu1 %v13805_v0  ;;  %8014 = vmatprep.mubr.bf16.mxu0 %v13805_v0  ;;  %v12678_v54 = vcombine.high %v7573_v31, %v7577_v10  ;;  %v7603_v42 = vld [vmem:[#allocation8 + $0x15f0] sm:$0xff]  ;;  %v7600_v57 = vld [vmem:[#allocation8 + $0x15d8] sm:$0xff] }
 0x557   : > { %v5749_v61 = vpop.f32.mrf.mxu1  ;;  %v5790_v36 = vpop.f32.mrf.mxu0  ;;  %v12680_v50 = vcombine.high %v7574_v24, %v7578_v27  ;;  %v12656_v51 = vcombine.high %v7550_v11, %v7554_v52  ;;  %v12655_v59 = vcombine.low %v7550_v11, %v7554_v52  ;;  %v12646_v35 = vcombine.high %v7541_v13, %v7545_v12  ;;  %v7591_v27 = vld [vmem:[#allocation8 + $0x1590] sm:$0xff] }
 0x558   : > { %7944 = vmatpush1.bf16.msra.mxu1 %v12693_v62  ;;  %7985 = vmatpush1.bf16.msra.mxu0 %v12695_v1  ;;  %v12648_v62 = vcombine.high %v7542_v4, %v7546_v47  ;;  %v7599_v1 = vld [vmem:[#allocation8 + $0x15d0] sm:$0xff]  ;;  %v12647_v31 = vcombine.low %v7542_v4, %v7546_v47  ;;  %v7592_v36 = vld [vmem:[#allocation8 + $0x1598] sm:$0xff]  ;;  %v12690_v18 = vcombine.high %v7583_v43, %v7587_v9 }
 0x559   : > { %v5750_v30 = vpop.f32.mrf.mxu1  ;;  %v5791_v60 = vpop.f32.mrf.mxu0  ;;  %7945 = vmatprep.subr.bf16.mxu1 %v12686_v34  ;;  %7986 = vmatprep.subr.bf16.mxu0 %v12688_v46  ;;  %v7604_v34 = vld [vmem:[#allocation8 + $0x15f8] sm:$0xff]  ;;  %v12645_v46 = vcombine.low %v7541_v13, %v7545_v12  ;;  %v12706_v10 = vcombine.high %v7599_v1, %v7603_v42  ;;  %v7595_v61 = vld [vmem:[#allocation8 + $0x15b0] sm:$0xff]  ;;  %v12689_v52 = vcombine.low %v7583_v43, %v7587_v9 }
 0x55a   : > { %v12708_v24 = vcombine.high %v7600_v57, %v7604_v34  ;;  %v12707_v30 = vcombine.low %v7600_v57, %v7604_v34  ;;  %v14952_v60 = vpack.c.b16 %v14643_v56, %v14643_v56  ;;  %v7571_v13 = vld [vmem:[#allocation8 + $0x14f0] sm:$0xff]  ;;  %v7568_v12 = vld [vmem:[#allocation8 + $0x14d8] sm:$0xff] }
 0x55b   : > { %v7572_v4 = vld [vmem:[#allocation8 + $0x14f8] sm:$0xff]  ;;  %v7547_v43 = vld [vmem:[#allocation8 + $0x1430] sm:$0xff] }
 0x55c   : > { %7946 = vmatpush1.bf16.msra.mxu1 %v12685_v38  ;;  %7987 = vmatpush1.bf16.msra.mxu0 %v12687_v37  ;;  %v7596_v38 = vld [vmem:[#allocation8 + $0x15b8] sm:$0xff]  ;;  %v12705_v37 = vcombine.low %v7599_v1, %v7603_v42  ;;  %v7563_v1 = vld [vmem:[#allocation8 + $0x14b0] sm:$0xff] }
 0x55d   : > { %7947 = vmatprep.subr.bf16.mxu1 %v12678_v54  ;;  %7988 = vmatprep.subr.bf16.mxu0 %v12680_v50  ;;  %v12698_v54 = vcombine.high %v7591_v27, %v7595_v61  ;;  %v12700_v50 = vcombine.high %v7592_v36, %v7596_v38  ;;  %v12699_v28 = vcombine.low %v7592_v36, %v7596_v38  ;;  %v7560_v42 = vld [vmem:[#allocation8 + $0x1498] sm:$0xff] }
 0x55e   : > { %v7564_v57 = vld [vmem:[#allocation8 + $0x14b8] sm:$0xff] }
 0x55f   : > { %v7556_v36 = vld [vmem:[#allocation8 + $0x1478] sm:$0xff] }
 0x560   : > { %7948 = vmatpush1.bf16.msra.mxu1 %v12677_v2  ;;  %7989 = vmatpush1.bf16.msra.mxu0 %v12679_v3  ;;  %v7544_v9 = vld [vmem:[#allocation8 + $0x1418] sm:$0xff] }
 0x561   : > { %7949 = vmatprep.subr.bf16.mxu1 %v12670_v21  ;;  %7990 = vmatprep.subr.bf16.mxu0 %v12672_v53  ;;  %v12697_v21 = vcombine.low %v7591_v27, %v7595_v61  ;;  %v7555_v27 = vld [vmem:[#allocation8 + $0x1470] sm:$0xff]  ;;  %v7552_v61 = vld [vmem:[#allocation8 + $0x1458] sm:$0xff] }
 0x564   : > { %7950 = vmatpush1.bf16.msra.mxu1 %v12669_v48  ;;  %7991 = vmatpush1.bf16.msra.mxu0 %v12671_v32  ;;  %v12692_v48 = vcombine.high %v7584_v45, %v7588_v40  ;;  %v7575_v32 = vld [vmem:[#allocation8 + $0x1510] sm:$0xff] }
 0x565   : > { %7951 = vmatprep.subr.bf16.mxu1 %v12662_v17  ;;  %7992 = vmatprep.subr.bf16.mxu0 %v12664_v55 }
 0x568   : > { %7952 = vmatpush1.bf16.msra.mxu1 %v12661_v15  ;;  %7993 = vmatpush1.bf16.msra.mxu0 %v12663_v19  ;;  %v12691_v15 = vcombine.low %v7584_v45, %v7588_v40  ;;  %v7548_v45 = vld [vmem:[#allocation8 + $0x1438] sm:$0xff] }
 0x569   : > { %7953 = vmatprep.subr.bf16.mxu1 %v12654_v20  ;;  %7994 = vmatprep.subr.bf16.mxu0 %v12656_v51  ;;  %v7567_v51 = vld [vmem:[#allocation8 + $0x14d0] sm:$0xff] }
 0x56a   : > { %v12673_v34 = vcombine.low %v7567_v51, %v7571_v13 }
 0x56c   : > { %7954 = vmatpush1.bf16.msra.mxu1 %v12653_v23  ;;  %7995 = vmatpush1.bf16.msra.mxu0 %v12655_v59  ;;  %v12674_v59 = vcombine.high %v7567_v51, %v7571_v13  ;;  %v8157_v51 = vld [vmem:[#allocation8 + $0x1760] sm:$0xff]  ;;  %v8154_v13 = vld [vmem:[#allocation8 + $0x1748] sm:$0xff] }
 0x56d   : > { %7955 = vmatprep.subr.bf16.mxu1 %v12646_v35  ;;  %7996 = vmatprep.subr.bf16.mxu0 %v12648_v62  ;;  %v12676_v35 = vcombine.high %v7568_v12, %v7572_v4  ;;  %v7559_v62 = vld [vmem:[#allocation8 + $0x1490] sm:$0xff] }
 0x56e   : > { %v12665_v38 = vcombine.low %v7559_v62, %v7563_v1 }
 0x570   : > { %7956 = vmatpush1.bf16.msra.mxu1 %v12645_v46  ;;  %7997 = vmatpush1.bf16.msra.mxu0 %v12647_v31  ;;  %v12675_v46 = vcombine.low %v7568_v12, %v7572_v4  ;;  %v12666_v31 = vcombine.high %v7559_v62, %v7563_v1  ;;  %v8158_v12 = vld [vmem:[#allocation8 + $0x1768] sm:$0xff] }
 0x571   : > { %8023 = vmatprep.subr.bf16.mxu1 %v12706_v10  ;;  %8064 = vmatprep.subr.bf16.mxu0 %v12708_v24  ;;  %v12668_v10 = vcombine.high %v7560_v42, %v7564_v57  ;;  %v7551_v24 = vld [vmem:[#allocation8 + $0x1450] sm:$0xff] }
 0x572   : > { %v12657_v40 = vcombine.low %v7551_v24, %v7555_v27 }
 0x573   : > { %v6235_v2 = vpop.f32.mrf.mxu1  ;;  %v6276_v3 = vpop.f32.mrf.mxu0  ;;  %7974 = vmatmul.mubr.bf16.vlgmr.msra.gmra.mxu1 %v14952_v60  ;;  %8015 = vmatmul.mubr.bf16.vlgmr.msra.gmra.mxu0 %v14952_v60 }
 0x574   : > { %v14957_v53 = vadd.f32 %v6235_v2, %v14921_v16  ;;  %v14960_v56 = vadd.f32 %v6276_v3, %v14924_v14  ;;  %8024 = vmatpush1.bf16.msra.mxu1 %v12705_v37  ;;  %8065 = vmatpush1.bf16.msra.mxu0 %v12707_v30  ;;  %v7579_v16 = vld [vmem:[#allocation8 + $0x1530] sm:$0xff]  ;;  %v7580_v14 = vld [vmem:[#allocation8 + $0x1538] sm:$0xff]  ;;  %v12667_v37 = vcombine.low %v7560_v42, %v7564_v57 }
 0x575   : > { %v6237_v5 = vpop.f32.mrf.mxu1  ;;  %v6278_v8 = vpop.f32.mrf.mxu0  ;;  %8025 = vmatprep.subr.bf16.mxu1 %v12698_v54  ;;  %8066 = vmatprep.subr.bf16.mxu0 %v12700_v50  ;;  %v12681_v47 = vcombine.low %v7575_v32, %v7579_v16  ;;  %v12683_v23 = vcombine.low %v7576_v44, %v7580_v14  ;;  %v12658_v30 = vcombine.high %v7551_v24, %v7555_v27  ;;  %v7543_v50 = vld [vmem:[#allocation8 + $0x1410] sm:$0xff] }
 0x576   : > { %v14963_v17 = vadd.f32 %v6237_v5, %v14927_v6  ;;  %v14966_v55 = vadd.f32 %v6278_v8, %v14930_v26  ;;  %8055 = vmatprep.mubr.bf16.mxu1 %v13805_v0  ;;  %8096 = vmatprep.mubr.bf16.mxu0 %v13805_v0  ;;  %v12682_v6 = vcombine.high %v7575_v32, %v7579_v16  ;;  %v8173_v5 = vld [vmem:[#allocation8 + $0x17e0] sm:$0xff]  ;;  %v8170_v8 = vld [vmem:[#allocation8 + $0x17c8] sm:$0xff] }
 0x577   : > { %v6239_v58 = vpop.f32.mrf.mxu1  ;;  %v6280_v11 = vpop.f32.mrf.mxu0  ;;  %v12684_v26 = vcombine.high %v7576_v44, %v7580_v14  ;;  %v12660_v54 = vcombine.high %v7552_v61, %v7556_v36  ;;  %v12659_v2 = vcombine.low %v7552_v61, %v7556_v36  ;;  %v12650_v3 = vcombine.high %v7543_v50, %v7547_v43  ;;  %v8161_v14 = vld [vmem:[#allocation8 + $0x1780] sm:$0xff] }
 0x578   : > { %8026 = vmatpush1.bf16.msra.mxu1 %v12697_v21  ;;  %8067 = vmatpush1.bf16.msra.mxu0 %v12699_v28  ;;  %v12652_v21 = vcombine.high %v7544_v9, %v7548_v45  ;;  %v8169_v28 = vld [vmem:[#allocation8 + $0x17c0] sm:$0xff]  ;;  %v12651_v32 = vcombine.low %v7544_v9, %v7548_v45  ;;  %v8162_v11 = vld [vmem:[#allocation8 + $0x1788] sm:$0xff]  ;;  %v12751_v36 = vcombine.low %v8154_v13, %v8158_v12 }
 0x579   : > { %v6240_v19 = vpop.f32.mrf.mxu1  ;;  %v6281_v20 = vpop.f32.mrf.mxu0  ;;  %8027 = vmatprep.subr.bf16.mxu1 %v12690_v18  ;;  %8068 = vmatprep.subr.bf16.mxu0 %v12692_v48  ;;  %v8174_v18 = vld [vmem:[#allocation8 + $0x17e8] sm:$0xff]  ;;  %v12649_v48 = vcombine.low %v7543_v50, %v7547_v43  ;;  %v12766_v16 = vcombine.high %v8169_v28, %v8173_v5  ;;  %v8165_v58 = vld [vmem:[#allocation8 + $0x17a0] sm:$0xff] }
 0x57a   : > { %v12768_v44 = vcombine.high %v8170_v8, %v8174_v18  ;;  %v12767_v19 = vcombine.low %v8170_v8, %v8174_v18  ;;  %v12758_v20 = vcombine.high %v8161_v14, %v8165_v58  ;;  %v8138_v50 = vld [vmem:[#allocation8 + $0x16c8] sm:$0xff] }
 0x57b   : > { %v8142_v43 = vld [vmem:[#allocation8 + $0x16e8] sm:$0xff] }
 0x57c   : > { %8028 = vmatpush1.bf16.msra.mxu1 %v12689_v52  ;;  %8069 = vmatpush1.bf16.msra.mxu0 %v12691_v15  ;;  %v8166_v52 = vld [vmem:[#allocation8 + $0x17a8] sm:$0xff]  ;;  %v12765_v15 = vcombine.low %v8169_v28, %v8173_v5  ;;  %v12735_v18 = vcombine.low %v8138_v50, %v8142_v43 }
 0x57d   : > { %8029 = vmatprep.subr.bf16.mxu1 %v12682_v6  ;;  %8070 = vmatprep.subr.bf16.mxu0 %v12684_v26  ;;  %v12760_v6 = vcombine.high %v8162_v11, %v8166_v52  ;;  %v8153_v26 = vld [vmem:[#allocation8 + $0x1740] sm:$0xff]  ;;  %v12759_v62 = vcombine.low %v8162_v11, %v8166_v52  ;;  %v8130_v28 = vld [vmem:[#allocation8 + $0x1688] sm:$0xff] }
 0x57e   : > { %v12750_v57 = vcombine.high %v8153_v26, %v8157_v51  ;;  %v12749_v61 = vcombine.low %v8153_v26, %v8157_v51  ;;  %v8134_v5 = vld [vmem:[#allocation8 + $0x16a8] sm:$0xff] }
 0x57f   : > { %v12727_v52 = vcombine.low %v8130_v28, %v8134_v5  ;;  %v8114_v26 = vld [vmem:[#allocation8 + $0x1608] sm:$0xff] }
 0x580   : > { %8030 = vmatpush1.bf16.msra.mxu1 %v12681_v47  ;;  %8071 = vmatpush1.bf16.msra.mxu0 %v12683_v23  ;;  %v12757_v23 = vcombine.low %v8161_v14, %v8165_v58  ;;  %v8122_v14 = vld [vmem:[#allocation8 + $0x1648] sm:$0xff] }
 0x581   : > { %8031 = vmatprep.subr.bf16.mxu1 %v12674_v59  ;;  %8072 = vmatprep.subr.bf16.mxu0 %v12676_v35  ;;  %v8126_v58 = vld [vmem:[#allocation8 + $0x1668] sm:$0xff] }
 0x582   : > { %v8118_v51 = vld [vmem:[#allocation8 + $0x1628] sm:$0xff] }
 0x584   : > { %8032 = vmatpush1.bf16.msra.mxu1 %v12673_v34  ;;  %8073 = vmatpush1.bf16.msra.mxu0 %v12675_v46  ;;  %v12752_v34 = vcombine.high %v8154_v13, %v8158_v12  ;;  %v8145_v46 = vld [vmem:[#allocation8 + $0x1700] sm:$0xff]  ;;  %v12719_v12 = vcombine.low %v8122_v14, %v8126_v58 }
 0x585   : > { %8033 = vmatprep.subr.bf16.mxu1 %v12666_v31  ;;  %8074 = vmatprep.subr.bf16.mxu0 %v12668_v10  ;;  %v8146_v10 = vld [vmem:[#allocation8 + $0x1708] sm:$0xff] }
 0x588   : > { %8034 = vmatpush1.bf16.msra.mxu1 %v12665_v38  ;;  %8075 = vmatpush1.bf16.msra.mxu0 %v12667_v37 }
 0x589   : > { %8035 = vmatprep.subr.bf16.mxu1 %v12658_v30  ;;  %8076 = vmatprep.subr.bf16.mxu0 %v12660_v54  ;;  %v8137_v30 = vld [vmem:[#allocation8 + $0x16c0] sm:$0xff] }
 0x58a   : > { %v8141_v54 = vld [vmem:[#allocation8 + $0x16e0] sm:$0xff] }
 0x58b   : > { %v12733_v8 = vcombine.low %v8137_v30, %v8141_v54 }
 0x58c   : > { %8036 = vmatpush1.bf16.msra.mxu1 %v12657_v40  ;;  %8077 = vmatpush1.bf16.msra.mxu0 %v12659_v2  ;;  %v12734_v40 = vcombine.high %v8137_v30, %v8141_v54  ;;  %v12736_v2 = vcombine.high %v8138_v50, %v8142_v43  ;;  %v8159_v30 = vld [vmem:[#allocation8 + $0x1770] sm:$0xff]  ;;  %v8156_v54 = vld [vmem:[#allocation8 + $0x1758] sm:$0xff] }
 0x58d   : > { %8037 = vmatprep.subr.bf16.mxu1 %v12650_v3  ;;  %8078 = vmatprep.subr.bf16.mxu0 %v12652_v21  ;;  %v8129_v3 = vld [vmem:[#allocation8 + $0x1680] sm:$0xff]  ;;  %v8160_v50 = vld [vmem:[#allocation8 + $0x1778] sm:$0xff] }
 0x58e   : > { %v8133_v21 = vld [vmem:[#allocation8 + $0x16a0] sm:$0xff] }
 0x58f   : > { %v12725_v11 = vcombine.low %v8129_v3, %v8133_v21 }
 0x590   : > { %8038 = vmatpush1.bf16.msra.mxu1 %v12649_v48  ;;  %8079 = vmatpush1.bf16.msra.mxu0 %v12651_v32  ;;  %v12726_v48 = vcombine.high %v8129_v3, %v8133_v21  ;;  %v12728_v32 = vcombine.high %v8130_v28, %v8134_v5  ;;  %v12756_v5 = vcombine.high %v8156_v54, %v8160_v50 }
 0x591   : > { %8513 = vmatprep.subr.bf16.mxu1 %v12766_v16  ;;  %8554 = vmatprep.subr.bf16.mxu0 %v12768_v44  ;;  %v8121_v16 = vld [vmem:[#allocation8 + $0x1640] sm:$0xff] }
 0x592   : > { %v8125_v44 = vld [vmem:[#allocation8 + $0x1660] sm:$0xff] }
 0x593   : > { %v6317_v4 = vpop.f32.mrf.mxu1  ;;  %v6358_v47 = vpop.f32.mrf.mxu0  ;;  %8056 = vmatmul.mubr.bf16.vlgmr.msra.gmra.mxu1 %v14952_v60  ;;  %8097 = vmatmul.mubr.bf16.vlgmr.msra.gmra.mxu0 %v14952_v60  ;;  %v12717_v13 = vcombine.low %v8121_v16, %v8125_v44 }
 0x594   : > { %v14973_v59 = vadd.f32 %v6317_v4, %v14937_v7  ;;  %v14976_v35 = vadd.f32 %v6358_v47, %v14940_v22  ;;  %8514 = vmatpush1.bf16.msra.mxu1 %v12765_v15  ;;  %8555 = vmatpush1.bf16.msra.mxu0 %v12767_v19  ;;  %v8149_v7 = vld [vmem:[#allocation8 + $0x1720] sm:$0xff]  ;;  %v8150_v22 = vld [vmem:[#allocation8 + $0x1728] sm:$0xff]  ;;  %v12718_v15 = vcombine.high %v8121_v16, %v8125_v44 }
 0x595   : > { %v6319_v1 = vpop.f32.mrf.mxu1  ;;  %v6360_v42 = vpop.f32.mrf.mxu0  ;;  %8515 = vmatprep.subr.bf16.mxu1 %v12758_v20  ;;  %8556 = vmatprep.subr.bf16.mxu0 %v12760_v6  ;;  %v12741_v9 = vcombine.low %v8145_v46, %v8149_v7  ;;  %v12743_v45 = vcombine.low %v8146_v10, %v8150_v22  ;;  %v12720_v19 = vcombine.high %v8122_v14, %v8126_v58  ;;  %v8113_v20 = vld [vmem:[#allocation8 + $0x1600] sm:$0xff] }
 0x596   : > { %v14979_v31 = vadd.f32 %v6319_v1, %v14943_v49  ;;  %v14982_v60 = vadd.f32 %v6360_v42, %v14946_v33  ;;  %8545 = vmatprep.mubr.bf16.mxu1 %v13805_v0  ;;  %8586 = vmatprep.mubr.bf16.mxu0 %v13805_v0  ;;  %v12742_v49 = vcombine.high %v8145_v46, %v8149_v7  ;;  %v8117_v6 = vld [vmem:[#allocation8 + $0x1620] sm:$0xff]  ;;  %v8172_v1 = vld [vmem:[#allocation8 + $0x17d8] sm:$0xff] }
 0x597   : > { %v6321_v24 = vpop.f32.mrf.mxu1  ;;  %v6362_v27 = vpop.f32.mrf.mxu0  ;;  %v12744_v33 = vcombine.high %v8146_v10, %v8150_v22  ;;  %v12710_v4 = vcombine.high %v8113_v20, %v8117_v6  ;;  %v12712_v47 = vcombine.high %v8114_v26, %v8118_v51  ;;  %v8176_v42 = vld [vmem:[#allocation8 + $0x17f8] sm:$0xff]  ;;  %v8163_v10 = vld [vmem:[#allocation8 + $0x1790] sm:$0xff]  ;;  %v12755_v58 = vcombine.low %v8156_v54, %v8160_v50 }
 0x598   : > { %8516 = vmatpush1.bf16.msra.mxu1 %v12757_v23  ;;  %8557 = vmatpush1.bf16.msra.mxu0 %v12759_v62  ;;  %v8171_v23 = vld [vmem:[#allocation8 + $0x17d0] sm:$0xff]  ;;  %v12772_v7 = vcombine.high %v8172_v1, %v8176_v42  ;;  %v8164_v24 = vld [vmem:[#allocation8 + $0x1798] sm:$0xff] }
 0x599   : > { %v6322_v38 = vpop.f32.mrf.mxu1  ;;  %v6363_v37 = vpop.f32.mrf.mxu0  ;;  %8517 = vmatprep.subr.bf16.mxu1 %v12750_v57  ;;  %8558 = vmatprep.subr.bf16.mxu0 %v12752_v34  ;;  %v8175_v62 = vld [vmem:[#allocation8 + $0x17f0] sm:$0xff]  ;;  %v12709_v57 = vcombine.low %v8113_v20, %v8117_v6  ;;  %v12711_v34 = vcombine.low %v8114_v26, %v8118_v51  ;;  %v8168_v27 = vld [vmem:[#allocation8 + $0x17b8] sm:$0xff] }
 0x59a   : > { %v12770_v46 = vcombine.high %v8171_v23, %v8175_v62  ;;  %v8167_v22 = vld [vmem:[#allocation8 + $0x17b0] sm:$0xff]  ;;  %v14988_v38 = vpack.c.b16 %v14649_v41, %v14649_v41  ;;  %v8140_v20 = vld [vmem:[#allocation8 + $0x16d8] sm:$0xff] }
 0x59b   : > { %v12762_v37 = vcombine.high %v8163_v10, %v8167_v22  ;;  %v8144_v6 = vld [vmem:[#allocation8 + $0x16f8] sm:$0xff] }
 0x59c   : > { %8518 = vmatpush1.bf16.msra.mxu1 %v12749_v61  ;;  %8559 = vmatpush1.bf16.msra.mxu0 %v12751_v36  ;;  %v12769_v61 = vcombine.low %v8171_v23, %v8175_v62  ;;  %v12771_v36 = vcombine.low %v8172_v1, %v8176_v42  ;;  %v8132_v23 = vld [vmem:[#allocation8 + $0x1698] sm:$0xff]  ;;  %v12739_v42 = vcombine.low %v8140_v20, %v8144_v6 }
 0x59d   : > { %8519 = vmatprep.subr.bf16.mxu1 %v12742_v49  ;;  %8560 = vmatprep.subr.bf16.mxu0 %v12744_v33  ;;  %v12764_v49 = vcombine.high %v8164_v24, %v8168_v27  ;;  %v8155_v33 = vld [vmem:[#allocation8 + $0x1750] sm:$0xff]  ;;  %v8136_v62 = vld [vmem:[#allocation8 + $0x16b8] sm:$0xff] }
 0x59e   : > { %v12754_v28 = vcombine.high %v8155_v33, %v8159_v30  ;;  %v12753_v14 = vcombine.low %v8155_v33, %v8159_v30  ;;  %v8116_v33 = vld [vmem:[#allocation8 + $0x1618] sm:$0xff] }
 0x59f   : > { %v8120_v30 = vld [vmem:[#allocation8 + $0x1638] sm:$0xff] }
 0x5a0   : > { %8520 = vmatpush1.bf16.msra.mxu1 %v12741_v9  ;;  %8561 = vmatpush1.bf16.msra.mxu0 %v12743_v45  ;;  %v12761_v45 = vcombine.low %v8163_v10, %v8167_v22  ;;  %v8124_v10 = vld [vmem:[#allocation8 + $0x1658] sm:$0xff] }
 0x5a1   : > { %8521 = vmatprep.subr.bf16.mxu1 %v12734_v40  ;;  %8562 = vmatprep.subr.bf16.mxu0 %v12736_v2  ;;  %v12763_v2 = vcombine.low %v8164_v24, %v8168_v27  ;;  %v8128_v22 = vld [vmem:[#allocation8 + $0x1678] sm:$0xff]  ;;  %v12731_v27 = vcombine.low %v8132_v23, %v8136_v62 }
 0x5a2   : > { %v12723_v50 = vcombine.low %v8124_v10, %v8128_v22 }
 0x5a4   : > { %8522 = vmatpush1.bf16.msra.mxu1 %v12733_v8  ;;  %8563 = vmatpush1.bf16.msra.mxu0 %v12735_v18  ;;  %v8147_v8 = vld [vmem:[#allocation8 + $0x1710] sm:$0xff] }
 0x5a5   : > { %8523 = vmatprep.subr.bf16.mxu1 %v12726_v48  ;;  %8564 = vmatprep.subr.bf16.mxu0 %v12728_v32  ;;  %v8148_v32 = vld [vmem:[#allocation8 + $0x1718] sm:$0xff] }
 0x5a8   : > { %8524 = vmatpush1.bf16.msra.mxu1 %v12725_v11  ;;  %8565 = vmatpush1.bf16.msra.mxu0 %v12727_v52 }
 0x5a9   : > { %8525 = vmatprep.subr.bf16.mxu1 %v12718_v15  ;;  %8566 = vmatprep.subr.bf16.mxu0 %v12720_v19  ;;  %v8139_v15 = vld [vmem:[#allocation8 + $0x16d0] sm:$0xff] }
 0x5aa   : > { %v8143_v19 = vld [vmem:[#allocation8 + $0x16f0] sm:$0xff] }
 0x5ab   : > { %v12737_v1 = vcombine.low %v8139_v15, %v8143_v19 }
 0x5ac   : > { %8526 = vmatpush1.bf16.msra.mxu1 %v12717_v13  ;;  %8567 = vmatpush1.bf16.msra.mxu0 %v12719_v12  ;;  %v12738_v13 = vcombine.high %v8139_v15, %v8143_v19  ;;  %v12740_v12 = vcombine.high %v8140_v20, %v8144_v6  ;;  %v8726_v15 = vld [vmem:[#allocation8 + $0x1948] sm:$0xff] }
 0x5ad   : > { %8527 = vmatprep.subr.bf16.mxu1 %v12710_v4  ;;  %8568 = vmatprep.subr.bf16.mxu0 %v12712_v47  ;;  %v8131_v4 = vld [vmem:[#allocation8 + $0x1690] sm:$0xff]  ;;  %v8730_v19 = vld [vmem:[#allocation8 + $0x1968] sm:$0xff] }
 0x5ae   : > { %v8135_v47 = vld [vmem:[#allocation8 + $0x16b0] sm:$0xff] }
 0x5af   : > { %v12729_v24 = vcombine.low %v8131_v4, %v8135_v47 }
 0x5b0   : > { %8528 = vmatpush1.bf16.msra.mxu1 %v12709_v57  ;;  %8569 = vmatpush1.bf16.msra.mxu0 %v12711_v34  ;;  %v12730_v57 = vcombine.high %v8131_v4, %v8135_v47  ;;  %v12732_v34 = vcombine.high %v8132_v23, %v8136_v62  ;;  %v12816_v62 = vcombine.high %v8726_v15, %v8730_v19 }
 0x5b1   : > { %8595 = vmatprep.subr.bf16.mxu1 %v12770_v46  ;;  %8636 = vmatprep.subr.bf16.mxu0 %v12772_v7  ;;  %v8123_v46 = vld [vmem:[#allocation8 + $0x1650] sm:$0xff] }
 0x5b2   : > { %v8127_v7 = vld [vmem:[#allocation8 + $0x1670] sm:$0xff] }
 0x5b3   : > { %v6831_v43 = vpop.f32.mrf.mxu1  ;;  %v6872_v9 = vpop.f32.mrf.mxu0  ;;  %8546 = vmatmul.mubr.bf16.vlgmr.msra.gmra.mxu1 %v14988_v38  ;;  %8587 = vmatmul.mubr.bf16.vlgmr.msra.gmra.mxu0 %v14988_v38  ;;  %v12721_v54 = vcombine.low %v8123_v46, %v8127_v7 }
 0x5b4   : > { %v14993_v40 = vadd.f32 %v6831_v43, %v14957_v53  ;;  %v14996_v41 = vadd.f32 %v6872_v9, %v14960_v56  ;;  %8596 = vmatpush1.bf16.msra.mxu1 %v12769_v61  ;;  %8637 = vmatpush1.bf16.msra.mxu0 %v12771_v36  ;;  %v8151_v53 = vld [vmem:[#allocation8 + $0x1730] sm:$0xff]  ;;  %v8152_v56 = vld [vmem:[#allocation8 + $0x1738] sm:$0xff]  ;;  %v12722_v61 = vcombine.high %v8123_v46, %v8127_v7 }
 0x5b5   : > { %v6833_v3 = vpop.f32.mrf.mxu1  ;;  %v6874_v21 = vpop.f32.mrf.mxu0  ;;  %8597 = vmatprep.subr.bf16.mxu1 %v12762_v37  ;;  %8638 = vmatprep.subr.bf16.mxu0 %v12764_v49  ;;  %v12745_v26 = vcombine.low %v8147_v8, %v8151_v53  ;;  %v12747_v51 = vcombine.low %v8148_v32, %v8152_v56  ;;  %v12724_v36 = vcombine.high %v8124_v10, %v8128_v22  ;;  %v8115_v37 = vld [vmem:[#allocation8 + $0x1610] sm:$0xff] }
 0x5b6   : > { %v14999_v18 = vadd.f32 %v6833_v3, %v14963_v17  ;;  %v15002_v48 = vadd.f32 %v6874_v21, %v14966_v55  ;;  %8627 = vmatprep.mubr.bf16.mxu1 %v13805_v0  ;;  %8668 = vmatprep.mubr.bf16.mxu0 %v13805_v0  ;;  %v12746_v17 = vcombine.high %v8147_v8, %v8151_v53  ;;  %v8119_v49 = vld [vmem:[#allocation8 + $0x1630] sm:$0xff]  ;;  %v8742_v3 = vld [vmem:[#allocation8 + $0x19c8] sm:$0xff] }
 0x5b7   : > { %v6835_v16 = vpop.f32.mrf.mxu1  ;;  %v6876_v44 = vpop.f32.mrf.mxu0  ;;  %v12748_v55 = vcombine.high %v8148_v32, %v8152_v56  ;;  %v12714_v43 = vcombine.high %v8115_v37, %v8119_v49  ;;  %v12716_v9 = vcombine.high %v8116_v33, %v8120_v30  ;;  %v8746_v21 = vld [vmem:[#allocation8 + $0x19e8] sm:$0xff]  ;;  %v8733_v32 = vld [vmem:[#allocation8 + $0x1980] sm:$0xff]  ;;  %v12815_v10 = vcombine.low %v8726_v15, %v8730_v19 }
 0x5b8   : > { %8598 = vmatpush1.bf16.msra.mxu1 %v12761_v45  ;;  %8639 = vmatpush1.bf16.msra.mxu0 %v12763_v2  ;;  %v8741_v45 = vld [vmem:[#allocation8 + $0x19c0] sm:$0xff]  ;;  %v12832_v53 = vcombine.high %v8742_v3, %v8746_v21  ;;  %v8734_v16 = vld [vmem:[#allocation8 + $0x1988] sm:$0xff] }
 0x5b9   : > { %v6836_v11 = vpop.f32.mrf.mxu1  ;;  %v6877_v52 = vpop.f32.mrf.mxu0  ;;  %8599 = vmatprep.subr.bf16.mxu1 %v12754_v28  ;;  %8640 = vmatprep.subr.bf16.mxu0 %v12756_v5  ;;  %v8745_v2 = vld [vmem:[#allocation8 + $0x19e0] sm:$0xff]  ;;  %v12713_v28 = vcombine.low %v8115_v37, %v8119_v49  ;;  %v12715_v5 = vcombine.low %v8116_v33, %v8120_v30  ;;  %v8738_v44 = vld [vmem:[#allocation8 + $0x19a8] sm:$0xff] }
 0x5ba   : > { %v12830_v8 = vcombine.high %v8741_v45, %v8745_v2  ;;  %v8737_v56 = vld [vmem:[#allocation8 + $0x19a0] sm:$0xff]  ;;  %v12824_v52 = vcombine.high %v8734_v16, %v8738_v44  ;;  %v8714_v37 = vld [vmem:[#allocation8 + $0x18e8] sm:$0xff] }
 0x5bb   : > { %v12822_v11 = vcombine.high %v8733_v32, %v8737_v56 }
 0x5bc   : > { %8600 = vmatpush1.bf16.msra.mxu1 %v12753_v14  ;;  %8641 = vmatpush1.bf16.msra.mxu0 %v12755_v58  ;;  %v12829_v14 = vcombine.low %v8741_v45, %v8745_v2  ;;  %v12831_v58 = vcombine.low %v8742_v3, %v8746_v21  ;;  %v8706_v45 = vld [vmem:[#allocation8 + $0x18a8] sm:$0xff] }
 0x5bd   : > { %8601 = vmatprep.subr.bf16.mxu1 %v12746_v17  ;;  %8642 = vmatprep.subr.bf16.mxu0 %v12748_v55  ;;  %v8725_v17 = vld [vmem:[#allocation8 + $0x1940] sm:$0xff] }
 0x5be   : > { %v8729_v55 = vld [vmem:[#allocation8 + $0x1960] sm:$0xff] }
 0x5bf   : > { %v12814_v23 = vcombine.high %v8725_v17, %v8729_v55  ;;  %v12813_v7 = vcombine.low %v8725_v17, %v8729_v55  ;;  %v8690_v17 = vld [vmem:[#allocation8 + $0x1828] sm:$0xff] }
 0x5c0   : > { %8602 = vmatpush1.bf16.msra.mxu1 %v12745_v26  ;;  %8643 = vmatpush1.bf16.msra.mxu0 %v12747_v51  ;;  %v12821_v26 = vcombine.low %v8733_v32, %v8737_v56  ;;  %v8698_v32 = vld [vmem:[#allocation8 + $0x1868] sm:$0xff] }
 0x5c1   : > { %8603 = vmatprep.subr.bf16.mxu1 %v12738_v13  ;;  %8644 = vmatprep.subr.bf16.mxu0 %v12740_v12  ;;  %v12823_v12 = vcombine.low %v8734_v16, %v8738_v44 }
 0x5c4   : > { %8604 = vmatpush1.bf16.msra.mxu1 %v12737_v1  ;;  %8645 = vmatpush1.bf16.msra.mxu0 %v12739_v42  ;;  %v8717_v1 = vld [vmem:[#allocation8 + $0x1900] sm:$0xff] }
 0x5c5   : > { %8605 = vmatprep.subr.bf16.mxu1 %v12730_v57  ;;  %8646 = vmatprep.subr.bf16.mxu0 %v12732_v34  ;;  %v8718_v57 = vld [vmem:[#allocation8 + $0x1908] sm:$0xff] }
 0x5c8   : > { %8606 = vmatpush1.bf16.msra.mxu1 %v12729_v24  ;;  %8647 = vmatpush1.bf16.msra.mxu0 %v12731_v27  ;;  %v8709_v27 = vld [vmem:[#allocation8 + $0x18c0] sm:$0xff] }
 0x5c9   : > { %8607 = vmatprep.subr.bf16.mxu1 %v12722_v61  ;;  %8648 = vmatprep.subr.bf16.mxu0 %v12724_v36  ;;  %v8713_v61 = vld [vmem:[#allocation8 + $0x18e0] sm:$0xff]  ;;  %v8710_v36 = vld [vmem:[#allocation8 + $0x18c8] sm:$0xff] }
 0x5ca   : > { %v12798_v30 = vcombine.high %v8709_v27, %v8713_v61  ;;  %v12797_v2 = vcombine.low %v8709_v27, %v8713_v61  ;;  %v12799_v3 = vcombine.low %v8710_v36, %v8714_v37  ;;  %v8728_v27 = vld [vmem:[#allocation8 + $0x1958] sm:$0xff] }
 0x5cb   : > { %v8732_v61 = vld [vmem:[#allocation8 + $0x1978] sm:$0xff] }
 0x5cc   : > { %8608 = vmatpush1.bf16.msra.mxu1 %v12721_v54  ;;  %8649 = vmatpush1.bf16.msra.mxu0 %v12723_v50  ;;  %v12800_v54 = vcombine.high %v8710_v36, %v8714_v37  ;;  %v8701_v50 = vld [vmem:[#allocation8 + $0x1880] sm:$0xff] }
 0x5cd   : > { %8609 = vmatprep.subr.bf16.mxu1 %v12714_v43  ;;  %8650 = vmatprep.subr.bf16.mxu0 %v12716_v9  ;;  %v8705_v43 = vld [vmem:[#allocation8 + $0x18a0] sm:$0xff]  ;;  %v8702_v9 = vld [vmem:[#allocation8 + $0x1888] sm:$0xff] }
 0x5ce   : > { %v12790_v21 = vcombine.high %v8701_v50, %v8705_v43  ;;  %v12789_v56 = vcombine.low %v8701_v50, %v8705_v43  ;;  %v12791_v16 = vcombine.low %v8702_v9, %v8706_v45 }
 0x5d0   : > { %8610 = vmatpush1.bf16.msra.mxu1 %v12713_v28  ;;  %8651 = vmatpush1.bf16.msra.mxu0 %v12715_v5  ;;  %v12792_v28 = vcombine.high %v8702_v9, %v8706_v45  ;;  %v8693_v5 = vld [vmem:[#allocation8 + $0x1840] sm:$0xff]  ;;  %v12820_v9 = vcombine.high %v8728_v27, %v8732_v61  ;;  %v8719_v45 = vld [vmem:[#allocation8 + $0x1910] sm:$0xff] }
 0x5d1   : > { %9085 = vmatprep.subr.bf16.mxu1 %v12830_v8  ;;  %9126 = vmatprep.subr.bf16.mxu0 %v12832_v53  ;;  %v8697_v8 = vld [vmem:[#allocation8 + $0x1860] sm:$0xff]  ;;  %v8694_v53 = vld [vmem:[#allocation8 + $0x1848] sm:$0xff] }
 0x5d2   : > { %v12782_v44 = vcombine.high %v8693_v5, %v8697_v8  ;;  %v12781_v55 = vcombine.low %v8693_v5, %v8697_v8  ;;  %v12783_v15 = vcombine.low %v8694_v53, %v8698_v32 }
 0x5d3   : > { %v6913_v20 = vpop.f32.mrf.mxu1  ;;  %v6954_v6 = vpop.f32.mrf.mxu0  ;;  %8628 = vmatmul.mubr.bf16.vlgmr.msra.gmra.mxu1 %v14988_v38  ;;  %8669 = vmatmul.mubr.bf16.vlgmr.msra.gmra.mxu0 %v14988_v38 }
 0x5d4   : > { %v15009_v51 = vadd.f32 %v6913_v20, %v14973_v59  ;;  %v15012_v13 = vadd.f32 %v6954_v6, %v14976_v35  ;;  %9086 = vmatpush1.bf16.msra.mxu1 %v12829_v14  ;;  %9127 = vmatpush1.bf16.msra.mxu0 %v12831_v58  ;;  %v8721_v59 = vld [vmem:[#allocation8 + $0x1920] sm:$0xff]  ;;  %v8722_v35 = vld [vmem:[#allocation8 + $0x1928] sm:$0xff]  ;;  %v12784_v14 = vcombine.high %v8694_v53, %v8698_v32  ;;  %v8743_v6 = vld [vmem:[#allocation8 + $0x19d0] sm:$0xff] }
 0x5d5   : > { %v6915_v4 = vpop.f32.mrf.mxu1  ;;  %v6956_v47 = vpop.f32.mrf.mxu0  ;;  %9087 = vmatprep.subr.bf16.mxu1 %v12822_v11  ;;  %9128 = vmatprep.subr.bf16.mxu0 %v12824_v52  ;;  %v12805_v49 = vcombine.low %v8717_v1, %v8721_v59  ;;  %v12807_v33 = vcombine.low %v8718_v57, %v8722_v35  ;;  %v8685_v58 = vld [vmem:[#allocation8 + $0x1800] sm:$0xff]  ;;  %v8686_v52 = vld [vmem:[#allocation8 + $0x1808] sm:$0xff]  ;;  %v12819_v53 = vcombine.low %v8728_v27, %v8732_v61 }
 0x5d6   : > { %v15015_v42 = vadd.f32 %v6915_v4, %v14979_v31  ;;  %v15018_v38 = vadd.f32 %v6956_v47, %v14982_v60  ;;  %9117 = vmatprep.mubr.bf16.mxu1 %v13805_v0  ;;  %9158 = vmatprep.mubr.bf16.mxu0 %v13805_v0  ;;  %v12806_v31 = vcombine.high %v8717_v1, %v8721_v59  ;;  %v8689_v11 = vld [vmem:[#allocation8 + $0x1820] sm:$0xff]  ;;  %v8748_v4 = vld [vmem:[#allocation8 + $0x19f8] sm:$0xff]  ;;  %v8735_v59 = vld [vmem:[#allocation8 + $0x1990] sm:$0xff] }
 0x5d7   : > { %v6917_v34 = vpop.f32.mrf.mxu1  ;;  %v6958_v46 = vpop.f32.mrf.mxu0  ;;  %v12808_v60 = vcombine.high %v8718_v57, %v8722_v35  ;;  %v12774_v19 = vcombine.high %v8685_v58, %v8689_v11  ;;  %v12776_v20 = vcombine.high %v8686_v52, %v8690_v17  ;;  %v12773_v47 = vcombine.low %v8685_v58, %v8689_v11  ;;  %v8739_v57 = vld [vmem:[#allocation8 + $0x19b0] sm:$0xff]  ;;  %v8736_v35 = vld [vmem:[#allocation8 + $0x1998] sm:$0xff] }
 0x5d8   : > { %9088 = vmatpush1.bf16.msra.mxu1 %v12821_v26  ;;  %9129 = vmatpush1.bf16.msra.mxu0 %v12823_v12  ;;  %v8747_v26 = vld [vmem:[#allocation8 + $0x19f0] sm:$0xff]  ;;  %v8744_v12 = vld [vmem:[#allocation8 + $0x19d8] sm:$0xff] }
 0x5d9   : > { %v6918_v22 = vpop.f32.mrf.mxu1  ;;  %v6959_v24 = vpop.f32.mrf.mxu0  ;;  %9089 = vmatprep.subr.bf16.mxu1 %v12814_v23  ;;  %9130 = vmatprep.subr.bf16.mxu0 %v12816_v62  ;;  %v12775_v23 = vcombine.low %v8686_v52, %v8690_v17  ;;  %v12834_v62 = vcombine.high %v8743_v6, %v8747_v26  ;;  %v12836_v1 = vcombine.high %v8744_v12, %v8748_v4  ;;  %v8740_v34 = vld [vmem:[#allocation8 + $0x19b8] sm:$0xff] }
 0x5da   : > { %v12833_v46 = vcombine.low %v8743_v6, %v8747_v26  ;;  %v12826_v22 = vcombine.high %v8735_v59, %v8739_v57  ;;  %v12828_v24 = vcombine.high %v8736_v35, %v8740_v34  ;;  %v8716_v58 = vld [vmem:[#allocation8 + $0x18f8] sm:$0xff] }
 0x5db   : > { %v8708_v6 = vld [vmem:[#allocation8 + $0x18b8] sm:$0xff] }
 0x5dc   : > { %9090 = vmatpush1.bf16.msra.mxu1 %v12813_v7  ;;  %9131 = vmatpush1.bf16.msra.mxu0 %v12815_v10  ;;  %v12835_v7 = vcombine.low %v8744_v12, %v8748_v4  ;;  %v15024_v10 = vpack.c.b16 %v14660_v63, %v14660_v63 }
 0x5dd   : > { %9091 = vmatprep.subr.bf16.mxu1 %v12806_v31  ;;  %9132 = vmatprep.subr.bf16.mxu0 %v12808_v60  ;;  %v8727_v31 = vld [vmem:[#allocation8 + $0x1950] sm:$0xff] }
 0x5de   : > { %v8731_v60 = vld [vmem:[#allocation8 + $0x1970] sm:$0xff] }
 0x5df   : > { %v12818_v43 = vcombine.high %v8727_v31, %v8731_v60  ;;  %v12817_v8 = vcombine.low %v8727_v31, %v8731_v60  ;;  %v8692_v31 = vld [vmem:[#allocation8 + $0x1838] sm:$0xff] }
 0x5e0   : > { %9092 = vmatpush1.bf16.msra.mxu1 %v12805_v49  ;;  %9133 = vmatpush1.bf16.msra.mxu0 %v12807_v33  ;;  %v12825_v49 = vcombine.low %v8735_v59, %v8739_v57  ;;  %v8700_v59 = vld [vmem:[#allocation8 + $0x1878] sm:$0xff] }
 0x5e1   : > { %9093 = vmatprep.subr.bf16.mxu1 %v12798_v30  ;;  %9134 = vmatprep.subr.bf16.mxu0 %v12800_v54  ;;  %v12827_v30 = vcombine.low %v8736_v35, %v8740_v34 }
 0x5e4   : > { %9094 = vmatpush1.bf16.msra.mxu1 %v12797_v2  ;;  %9135 = vmatpush1.bf16.msra.mxu0 %v12799_v3 }
 0x5e5   : > { %9095 = vmatprep.subr.bf16.mxu1 %v12790_v21  ;;  %9136 = vmatprep.subr.bf16.mxu0 %v12792_v28  ;;  %v8720_v21 = vld [vmem:[#allocation8 + $0x1918] sm:$0xff] }
 0x5e8   : > { %9096 = vmatpush1.bf16.msra.mxu1 %v12789_v56  ;;  %9137 = vmatpush1.bf16.msra.mxu0 %v12791_v16  ;;  %v8711_v16 = vld [vmem:[#allocation8 + $0x18d0] sm:$0xff] }
 0x5e9   : > { %9097 = vmatprep.subr.bf16.mxu1 %v12782_v44  ;;  %9138 = vmatprep.subr.bf16.mxu0 %v12784_v14  ;;  %v8715_v44 = vld [vmem:[#allocation8 + $0x18f0] sm:$0xff]  ;;  %v8712_v14 = vld [vmem:[#allocation8 + $0x18d8] sm:$0xff] }
 0x5ea   : > { %v12802_v17 = vcombine.high %v8711_v16, %v8715_v44  ;;  %v12801_v26 = vcombine.low %v8711_v16, %v8715_v44  ;;  %v12803_v12 = vcombine.low %v8712_v14, %v8716_v58  ;;  %v9302_v16 = vld [vmem:[#allocation8 + $0x1b68] sm:$0xff] }
 0x5ec   : > { %9098 = vmatpush1.bf16.msra.mxu1 %v12781_v55  ;;  %9139 = vmatpush1.bf16.msra.mxu0 %v12783_v15  ;;  %v12804_v55 = vcombine.high %v8712_v14, %v8716_v58  ;;  %v8703_v15 = vld [vmem:[#allocation8 + $0x1890] sm:$0xff] }
 0x5ed   : > { %9099 = vmatprep.subr.bf16.mxu1 %v12774_v19  ;;  %9140 = vmatprep.subr.bf16.mxu0 %v12776_v20  ;;  %v8707_v19 = vld [vmem:[#allocation8 + $0x18b0] sm:$0xff]  ;;  %v8704_v20 = vld [vmem:[#allocation8 + $0x1898] sm:$0xff] }
 0x5ee   : > { %v12794_v4 = vcombine.high %v8703_v15, %v8707_v19  ;;  %v12793_v57 = vcombine.low %v8703_v15, %v8707_v19  ;;  %v12795_v35 = vcombine.low %v8704_v20, %v8708_v6 }
 0x5f0   : > { %9100 = vmatpush1.bf16.msra.mxu1 %v12773_v47  ;;  %9141 = vmatpush1.bf16.msra.mxu0 %v12775_v23  ;;  %v12796_v47 = vcombine.high %v8704_v20, %v8708_v6  ;;  %v8695_v23 = vld [vmem:[#allocation8 + $0x1850] sm:$0xff]  ;;  %v9289_v6 = vld [vmem:[#allocation8 + $0x1b00] sm:$0xff] }
 0x5f1   : > { %9167 = vmatprep.subr.bf16.mxu1 %v12834_v62  ;;  %9208 = vmatprep.subr.bf16.mxu0 %v12836_v1  ;;  %v8699_v62 = vld [vmem:[#allocation8 + $0x1870] sm:$0xff]  ;;  %v8696_v1 = vld [vmem:[#allocation8 + $0x1858] sm:$0xff] }
 0x5f2   : > { %v12786_v34 = vcombine.high %v8695_v23, %v8699_v62  ;;  %v12785_v60 = vcombine.low %v8695_v23, %v8699_v62  ;;  %v12787_v27 = vcombine.low %v8696_v1, %v8700_v59 }
 0x5f3   : > { %v7403_v36 = vpop.f32.mrf.mxu1  ;;  %v7444_v37 = vpop.f32.mrf.mxu0  ;;  %9118 = vmatmul.mubr.bf16.vlgmr.msra.gmra.mxu1 %v15024_v10  ;;  %9159 = vmatmul.mubr.bf16.vlgmr.msra.gmra.mxu0 %v15024_v10 }
 0x5f4   : > { %v15029_v33 = vadd.f32 %v7403_v36, %v14993_v40  ;;  %v15032_v63 = vadd.f32 %v7444_v37, %v14996_v41  ;;  %9168 = vmatpush1.bf16.msra.mxu1 %v12833_v46  ;;  %9209 = vmatpush1.bf16.msra.mxu0 %v12835_v7  ;;  %v8723_v40 = vld [vmem:[#allocation8 + $0x1930] sm:$0xff]  ;;  %v8724_v41 = vld [vmem:[#allocation8 + $0x1938] sm:$0xff]  ;;  %v12788_v46 = vcombine.high %v8696_v1, %v8700_v59  ;;  %v9313_v37 = vld [vmem:[#allocation8 + $0x1bc0] sm:$0xff] }
 0x5f5   : > { %v7405_v54 = vpop.f32.mrf.mxu1  ;;  %v7446_v50 = vpop.f32.mrf.mxu0  ;;  %9169 = vmatprep.subr.bf16.mxu1 %v12826_v22  ;;  %9210 = vmatprep.subr.bf16.mxu0 %v12828_v24  ;;  %v12809_v11 = vcombine.low %v8719_v45, %v8723_v40  ;;  %v12811_v52 = vcombine.low %v8720_v21, %v8724_v41  ;;  %v8687_v7 = vld [vmem:[#allocation8 + $0x1810] sm:$0xff]  ;;  %v8688_v24 = vld [vmem:[#allocation8 + $0x1818] sm:$0xff] }
 0x5f6   : > { %v15035_v2 = vadd.f32 %v7405_v54, %v14999_v18  ;;  %v15038_v3 = vadd.f32 %v7446_v50, %v15002_v48  ;;  %9199 = vmatprep.mubr.bf16.mxu1 %v13805_v0  ;;  %9240 = vmatprep.mubr.bf16.mxu0 %v13805_v0  ;;  %v12810_v18 = vcombine.high %v8719_v45, %v8723_v40  ;;  %v8691_v22 = vld [vmem:[#allocation8 + $0x1830] sm:$0xff]  ;;  %v9318_v54 = vld [vmem:[#allocation8 + $0x1be8] sm:$0xff]  ;;  %v9305_v40 = vld [vmem:[#allocation8 + $0x1b80] sm:$0xff] }
 0x5f7   : > { %v7407_v28 = vpop.f32.mrf.mxu1  ;;  %v7448_v5 = vpop.f32.mrf.mxu0  ;;  %v12812_v48 = vcombine.high %v8720_v21, %v8724_v41  ;;  %v12778_v61 = vcombine.high %v8687_v7, %v8691_v22  ;;  %v12780_v36 = vcombine.high %v8688_v24, %v8692_v31  ;;  %v12777_v50 = vcombine.low %v8687_v7, %v8691_v22  ;;  %v9309_v21 = vld [vmem:[#allocation8 + $0x1ba0] sm:$0xff]  ;;  %v9306_v41 = vld [vmem:[#allocation8 + $0x1b88] sm:$0xff] }
 0x5f8   : > { %9170 = vmatpush1.bf16.msra.mxu1 %v12825_v49  ;;  %9211 = vmatpush1.bf16.msra.mxu0 %v12827_v30  ;;  %v9317_v49 = vld [vmem:[#allocation8 + $0x1be0] sm:$0xff]  ;;  %v9314_v30 = vld [vmem:[#allocation8 + $0x1bc8] sm:$0xff]  ;;  %v12885_v58 = vcombine.low %v9305_v40, %v9309_v21 }
 0x5f9   : > { %v7408_v32 = vpop.f32.mrf.mxu1  ;;  %v7449_v56 = vpop.f32.mrf.mxu0  ;;  %9171 = vmatprep.subr.bf16.mxu1 %v12818_v43  ;;  %9212 = vmatprep.subr.bf16.mxu0 %v12820_v9  ;;  %v12779_v43 = vcombine.low %v8688_v24, %v8692_v31  ;;  %v12894_v9 = vcombine.high %v9313_v37, %v9317_v49  ;;  %v12896_v45 = vcombine.high %v9314_v30, %v9318_v54  ;;  %v9310_v28 = vld [vmem:[#allocation8 + $0x1ba8] sm:$0xff] }
 0x5fa   : > { %v12893_v5 = vcombine.low %v9313_v37, %v9317_v49  ;;  %v12888_v32 = vcombine.high %v9306_v41, %v9310_v28  ;;  %v9297_v56 = vld [vmem:[#allocation8 + $0x1b40] sm:$0xff] }
 0x5fc   : > { %9172 = vmatpush1.bf16.msra.mxu1 %v12817_v8  ;;  %9213 = vmatpush1.bf16.msra.mxu0 %v12819_v53  ;;  %v12895_v8 = vcombine.low %v9314_v30, %v9318_v54  ;;  %v12886_v53 = vcombine.high %v9305_v40, %v9309_v21 }
 0x5fd   : > { %9173 = vmatprep.subr.bf16.mxu1 %v12810_v18  ;;  %9214 = vmatprep.subr.bf16.mxu0 %v12812_v48  ;;  %v9301_v18 = vld [vmem:[#allocation8 + $0x1b60] sm:$0xff]  ;;  %v9298_v48 = vld [vmem:[#allocation8 + $0x1b48] sm:$0xff] }
 0x5fe   : > { %v12878_v19 = vcombine.high %v9297_v56, %v9301_v18  ;;  %v12880_v20 = vcombine.high %v9298_v48, %v9302_v16  ;;  %v12877_v23 = vcombine.low %v9297_v56, %v9301_v18  ;;  %v12879_v62 = vcombine.low %v9298_v48, %v9302_v16 }
 0x600   : > { %9174 = vmatpush1.bf16.msra.mxu1 %v12809_v11  ;;  %9215 = vmatpush1.bf16.msra.mxu0 %v12811_v52 }
 0x601   : > { %9175 = vmatprep.subr.bf16.mxu1 %v12802_v17  ;;  %9216 = vmatprep.subr.bf16.mxu0 %v12804_v55  ;;  %v12887_v17 = vcombine.low %v9306_v41, %v9310_v28 }
 0x604   : > { %9176 = vmatpush1.bf16.msra.mxu1 %v12801_v26  ;;  %9217 = vmatpush1.bf16.msra.mxu0 %v12803_v12  ;;  %v9290_v12 = vld [vmem:[#allocation8 + $0x1b08] sm:$0xff] }
 0x605   : > { %9177 = vmatprep.subr.bf16.mxu1 %v12794_v4  ;;  %9218 = vmatprep.subr.bf16.mxu0 %v12796_v47 }
 0x608   : > { %9178 = vmatpush1.bf16.msra.mxu1 %v12793_v57  ;;  %9219 = vmatpush1.bf16.msra.mxu0 %v12795_v35  ;;  %v9281_v57 = vld [vmem:[#allocation8 + $0x1ac0] sm:$0xff] }
 0x609   : > { %9179 = vmatprep.subr.bf16.mxu1 %v12786_v34  ;;  %9220 = vmatprep.subr.bf16.mxu0 %v12788_v46  ;;  %v9285_v35 = vld [vmem:[#allocation8 + $0x1ae0] sm:$0xff]  ;;  %v9282_v34 = vld [vmem:[#allocation8 + $0x1ac8] sm:$0xff] }
 0x60a   : > { %v9286_v46 = vld [vmem:[#allocation8 + $0x1ae8] sm:$0xff]  ;;  %v12862_v24 = vcombine.high %v9281_v57, %v9285_v35  ;;  %v12861_v37 = vcombine.low %v9281_v57, %v9285_v35  ;;  %v9304_v57 = vld [vmem:[#allocation8 + $0x1b78] sm:$0xff] }
 0x60b   : > { %v12864_v31 = vcombine.high %v9282_v34, %v9286_v46  ;;  %v12863_v49 = vcombine.low %v9282_v34, %v9286_v46 }
 0x60c   : > { %9180 = vmatpush1.bf16.msra.mxu1 %v12785_v60  ;;  %9221 = vmatpush1.bf16.msra.mxu0 %v12787_v27  ;;  %v9273_v60 = vld [vmem:[#allocation8 + $0x1a80] sm:$0xff] }
 0x60d   : > { %9181 = vmatprep.subr.bf16.mxu1 %v12778_v61  ;;  %9222 = vmatprep.subr.bf16.mxu0 %v12780_v36  ;;  %v9277_v27 = vld [vmem:[#allocation8 + $0x1aa0] sm:$0xff]  ;;  %v9274_v61 = vld [vmem:[#allocation8 + $0x1a88] sm:$0xff] }
 0x60e   : > { %v9278_v36 = vld [vmem:[#allocation8 + $0x1aa8] sm:$0xff]  ;;  %v12854_v30 = vcombine.high %v9273_v60, %v9277_v27  ;;  %v12853_v40 = vcombine.low %v9273_v60, %v9277_v27 }
 0x60f   : > { %v12856_v54 = vcombine.high %v9274_v61, %v9278_v36  ;;  %v12855_v21 = vcombine.low %v9274_v61, %v9278_v36  ;;  %v9291_v61 = vld [vmem:[#allocation8 + $0x1b10] sm:$0xff] }
 0x610   : > { %9182 = vmatpush1.bf16.msra.mxu1 %v12777_v50  ;;  %9223 = vmatpush1.bf16.msra.mxu0 %v12779_v43  ;;  %v9265_v50 = vld [vmem:[#allocation8 + $0x1a40] sm:$0xff] }
 0x611   : > { %9657 = vmatprep.subr.bf16.mxu1 %v12894_v9  ;;  %9698 = vmatprep.subr.bf16.mxu0 %v12896_v45  ;;  %v9269_v43 = vld [vmem:[#allocation8 + $0x1a60] sm:$0xff]  ;;  %v9266_v9 = vld [vmem:[#allocation8 + $0x1a48] sm:$0xff] }
 0x612   : > { %v9270_v45 = vld [vmem:[#allocation8 + $0x1a68] sm:$0xff]  ;;  %v12846_v41 = vcombine.high %v9265_v50, %v9269_v43  ;;  %v12845_v56 = vcombine.low %v9265_v50, %v9269_v43 }
 0x613   : > { %v7485_v44 = vpop.f32.mrf.mxu1  ;;  %v7526_v14 = vpop.f32.mrf.mxu0  ;;  %9200 = vmatmul.mubr.bf16.vlgmr.msra.gmra.mxu1 %v15024_v10  ;;  %9241 = vmatmul.mubr.bf16.vlgmr.msra.gmra.mxu0 %v15024_v10  ;;  %v12848_v28 = vcombine.high %v9266_v9, %v9270_v45  ;;  %v12847_v18 = vcombine.low %v9266_v9, %v9270_v45 }
 0x614   : > { %v15045_v11 = vadd.f32 %v7485_v44, %v15009_v51  ;;  %v15048_v52 = vadd.f32 %v7526_v14, %v15012_v13  ;;  %9658 = vmatpush1.bf16.msra.mxu1 %v12893_v5  ;;  %9699 = vmatpush1.bf16.msra.mxu0 %v12895_v8  ;;  %v9293_v51 = vld [vmem:[#allocation8 + $0x1b20] sm:$0xff]  ;;  %v9294_v13 = vld [vmem:[#allocation8 + $0x1b28] sm:$0xff]  ;;  %v9315_v44 = vld [vmem:[#allocation8 + $0x1bd0] sm:$0xff] }
 0x615   : > { %v7487_v55 = vpop.f32.mrf.mxu1  ;;  %v7528_v15 = vpop.f32.mrf.mxu0  ;;  %9659 = vmatprep.subr.bf16.mxu1 %v12886_v53  ;;  %9700 = vmatprep.subr.bf16.mxu0 %v12888_v32  ;;  %v12869_v7 = vcombine.low %v9289_v6, %v9293_v51  ;;  %v12871_v22 = vcombine.low %v9290_v12, %v9294_v13  ;;  %v9257_v5 = vld [vmem:[#allocation8 + $0x1a00] sm:$0xff]  ;;  %v9258_v53 = vld [vmem:[#allocation8 + $0x1a08] sm:$0xff]  ;;  %v9319_v14 = vld [vmem:[#allocation8 + $0x1bf0] sm:$0xff] }
 0x616   : > { %v15051_v26 = vadd.f32 %v7487_v55, %v15015_v42  ;;  %v15054_v10 = vadd.f32 %v7528_v15, %v15018_v38  ;;  %9689 = vmatprep.mubr.bf16.mxu1 %v13805_v0  ;;  %9730 = vmatprep.mubr.bf16.mxu0 %v13805_v0  ;;  %v12870_v42 = vcombine.high %v9289_v6, %v9293_v51  ;;  %v9261_v8 = vld [vmem:[#allocation8 + $0x1a20] sm:$0xff]  ;;  %v9262_v32 = vld [vmem:[#allocation8 + $0x1a28] sm:$0xff]  ;;  %v9307_v6 = vld [vmem:[#allocation8 + $0x1b90] sm:$0xff] }
 0x617   : > { %v7489_v4 = vpop.f32.mrf.mxu1  ;;  %v7530_v47 = vpop.f32.mrf.mxu0  ;;  %v12872_v38 = vcombine.high %v9290_v12, %v9294_v13  ;;  %v12838_v48 = vcombine.high %v9257_v5, %v9261_v8  ;;  %v12840_v16 = vcombine.high %v9258_v53, %v9262_v32  ;;  %v12837_v55 = vcombine.low %v9257_v5, %v9261_v8  ;;  %v9311_v51 = vld [vmem:[#allocation8 + $0x1bb0] sm:$0xff]  ;;  %v9308_v12 = vld [vmem:[#allocation8 + $0x1b98] sm:$0xff] }
 0x618   : > { %9660 = vmatpush1.bf16.msra.mxu1 %v12885_v58  ;;  %9701 = vmatpush1.bf16.msra.mxu0 %v12887_v17  ;;  %v9316_v58 = vld [vmem:[#allocation8 + $0x1bd8] sm:$0xff]  ;;  %v12839_v15 = vcombine.low %v9258_v53, %v9262_v32  ;;  %v12897_v4 = vcombine.low %v9315_v44, %v9319_v14  ;;  %v12889_v46 = vcombine.low %v9307_v6, %v9311_v51 }
 0x619   : > { %v7490_v1 = vpop.f32.mrf.mxu1  ;;  %v7531_v59 = vpop.f32.mrf.mxu0  ;;  %9661 = vmatprep.subr.bf16.mxu1 %v12878_v19  ;;  %9702 = vmatprep.subr.bf16.mxu0 %v12880_v20  ;;  %v9320_v17 = vld [vmem:[#allocation8 + $0x1bf8] sm:$0xff]  ;;  %v12898_v19 = vcombine.high %v9315_v44, %v9319_v14 }
 0x61a   : > { %v12900_v20 = vcombine.high %v9316_v58, %v9320_v17  ;;  %v9312_v13 = vld [vmem:[#allocation8 + $0x1bb8] sm:$0xff]  ;;  %v12899_v47 = vcombine.low %v9316_v58, %v9320_v17  ;;  %v9299_v59 = vld [vmem:[#allocation8 + $0x1b50] sm:$0xff] }
 0x61b   : > { %v12892_v1 = vcombine.high %v9308_v12, %v9312_v13 }
 0x61c   : > { %9662 = vmatpush1.bf16.msra.mxu1 %v12877_v23  ;;  %9703 = vmatpush1.bf16.msra.mxu0 %v12879_v62  ;;  %v15060_v23 = vpack.c.b16 %v14663_v29, %v14663_v29  ;;  %v12890_v62 = vcombine.high %v9307_v6, %v9311_v51 }
 0x61d   : > { %9663 = vmatprep.subr.bf16.mxu1 %v12870_v42  ;;  %9704 = vmatprep.subr.bf16.mxu0 %v12872_v38  ;;  %v9303_v42 = vld [vmem:[#allocation8 + $0x1b70] sm:$0xff]  ;;  %v9300_v38 = vld [vmem:[#allocation8 + $0x1b58] sm:$0xff] }
 0x61e   : > { %v12882_v60 = vcombine.high %v9299_v59, %v9303_v42  ;;  %v12884_v27 = vcombine.high %v9300_v38, %v9304_v57  ;;  %v12881_v50 = vcombine.low %v9299_v59, %v9303_v42  ;;  %v12883_v43 = vcombine.low %v9300_v38, %v9304_v57 }
 0x620   : > { %9664 = vmatpush1.bf16.msra.mxu1 %v12869_v7  ;;  %9705 = vmatpush1.bf16.msra.mxu0 %v12871_v22  ;;  %v12891_v22 = vcombine.low %v9308_v12, %v9312_v13 }
 0x621   : > { %9665 = vmatprep.subr.bf16.mxu1 %v12862_v24  ;;  %9706 = vmatprep.subr.bf16.mxu0 %v12864_v31 }
 0x624   : > { %9666 = vmatpush1.bf16.msra.mxu1 %v12861_v37  ;;  %9707 = vmatpush1.bf16.msra.mxu0 %v12863_v49  ;;  %v9292_v49 = vld [vmem:[#allocation8 + $0x1b18] sm:$0xff] }
 0x625   : > { %9667 = vmatprep.subr.bf16.mxu1 %v12854_v30  ;;  %9708 = vmatprep.subr.bf16.mxu0 %v12856_v54 }
 0x628   : > { %9668 = vmatpush1.bf16.msra.mxu1 %v12853_v40  ;;  %9709 = vmatpush1.bf16.msra.mxu0 %v12855_v21  ;;  %v9283_v40 = vld [vmem:[#allocation8 + $0x1ad0] sm:$0xff] }
 0x629   : > { %9669 = vmatprep.subr.bf16.mxu1 %v12846_v41  ;;  %9710 = vmatprep.subr.bf16.mxu0 %v12848_v28  ;;  %v9287_v21 = vld [vmem:[#allocation8 + $0x1af0] sm:$0xff]  ;;  %v9284_v41 = vld [vmem:[#allocation8 + $0x1ad8] sm:$0xff] }
 0x62a   : > { %v9288_v28 = vld [vmem:[#allocation8 + $0x1af8] sm:$0xff]  ;;  %v12866_v53 = vcombine.high %v9283_v40, %v9287_v21  ;;  %v12865_v44 = vcombine.low %v9283_v40, %v9287_v21 }
 0x62b   : > { %v12868_v32 = vcombine.high %v9284_v41, %v9288_v28  ;;  %v12867_v14 = vcombine.low %v9284_v41, %v9288_v28 }
 0x62c   : > { %9670 = vmatpush1.bf16.msra.mxu1 %v12845_v56  ;;  %9711 = vmatpush1.bf16.msra.mxu0 %v12847_v18  ;;  %v9275_v56 = vld [vmem:[#allocation8 + $0x1a90] sm:$0xff] }
 0x62d   : > { %9671 = vmatprep.subr.bf16.mxu1 %v12838_v48  ;;  %9712 = vmatprep.subr.bf16.mxu0 %v12840_v16  ;;  %v9279_v18 = vld [vmem:[#allocation8 + $0x1ab0] sm:$0xff]  ;;  %v9276_v48 = vld [vmem:[#allocation8 + $0x1a98] sm:$0xff] }
 0x62e   : > { %v9280_v16 = vld [vmem:[#allocation8 + $0x1ab8] sm:$0xff]  ;;  %v12858_v58 = vcombine.high %v9275_v56, %v9279_v18  ;;  %v12857_v6 = vcombine.low %v9275_v56, %v9279_v18 }
 0x62f   : > { %v12860_v17 = vcombine.high %v9276_v48, %v9280_v16  ;;  %v12859_v51 = vcombine.low %v9276_v48, %v9280_v16  ;;  %v9861_v48 = vld [vmem:[#allocation8 + $0x1d00] sm:$0xff] }
 0x630   : > { %9672 = vmatpush1.bf16.msra.mxu1 %v12837_v55  ;;  %9713 = vmatpush1.bf16.msra.mxu0 %v12839_v15  ;;  %v9267_v55 = vld [vmem:[#allocation8 + $0x1a50] sm:$0xff] }
 0x631   : > { %9739 = vmatprep.subr.bf16.mxu1 %v12898_v19  ;;  %9780 = vmatprep.subr.bf16.mxu0 %v12900_v20  ;;  %v9271_v15 = vld [vmem:[#allocation8 + $0x1a70] sm:$0xff]  ;;  %v9268_v19 = vld [vmem:[#allocation8 + $0x1a58] sm:$0xff] }
 0x632   : > { %v9272_v20 = vld [vmem:[#allocation8 + $0x1a78] sm:$0xff]  ;;  %v12850_v12 = vcombine.high %v9267_v55, %v9271_v15  ;;  %v12849_v59 = vcombine.low %v9267_v55, %v9271_v15 }
 0x633   : > { %v7975_v35 = vpop.f32.mrf.mxu1  ;;  %v8016_v34 = vpop.f32.mrf.mxu0  ;;  %9690 = vmatmul.mubr.bf16.vlgmr.msra.gmra.mxu1 %v15060_v23  ;;  %9731 = vmatmul.mubr.bf16.vlgmr.msra.gmra.mxu0 %v15060_v23  ;;  %v12852_v13 = vcombine.high %v9268_v19, %v9272_v20  ;;  %v12851_v42 = vcombine.low %v9268_v19, %v9272_v20  ;;  %v9853_v20 = vld [vmem:[#allocation8 + $0x1cc0] sm:$0xff] }
 0x634   : > { %v15065_v7 = vadd.f32 %v7975_v35, %v15029_v33  ;;  %v15068_v29 = vadd.f32 %v8016_v34, %v15032_v63  ;;  %9740 = vmatpush1.bf16.msra.mxu1 %v12897_v4  ;;  %9781 = vmatpush1.bf16.msra.mxu0 %v12899_v47  ;;  %v9295_v33 = vld [vmem:[#allocation8 + $0x1b30] sm:$0xff]  ;;  %v9296_v63 = vld [vmem:[#allocation8 + $0x1b38] sm:$0xff]  ;;  %v9885_v35 = vld [vmem:[#allocation8 + $0x1dc0] sm:$0xff] }
 0x635   : > { %v7977_v24 = vpop.f32.mrf.mxu1  ;;  %v8018_v31 = vpop.f32.mrf.mxu0  ;;  %9741 = vmatprep.subr.bf16.mxu1 %v12890_v62  ;;  %9782 = vmatprep.subr.bf16.mxu0 %v12892_v1  ;;  %v12873_v5 = vcombine.low %v9291_v61, %v9295_v33  ;;  %v12875_v8 = vcombine.low %v9292_v49, %v9296_v63  ;;  %v9259_v4 = vld [vmem:[#allocation8 + $0x1a10] sm:$0xff]  ;;  %v9260_v62 = vld [vmem:[#allocation8 + $0x1a18] sm:$0xff]  ;;  %v9889_v34 = vld [vmem:[#allocation8 + $0x1de0] sm:$0xff] }
 0x636   : > { %v15071_v36 = vadd.f32 %v7977_v24, %v15035_v2  ;;  %v15074_v37 = vadd.f32 %v8018_v31, %v15038_v3  ;;  %9771 = vmatprep.mubr.bf16.mxu1 %v13805_v0  ;;  %9812 = vmatprep.mubr.bf16.mxu0 %v13805_v0  ;;  %v12874_v2 = vcombine.high %v9291_v61, %v9295_v33  ;;  %v9263_v47 = vld [vmem:[#allocation8 + $0x1a30] sm:$0xff]  ;;  %v9264_v1 = vld [vmem:[#allocation8 + $0x1a38] sm:$0xff]  ;;  %v9877_v61 = vld [vmem:[#allocation8 + $0x1d80] sm:$0xff] }
 0x637   : > { %v7979_v30 = vpop.f32.mrf.mxu1  ;;  %v8020_v54 = vpop.f32.mrf.mxu0  ;;  %v12876_v3 = vcombine.high %v9292_v49, %v9296_v63  ;;  %v12842_v38 = vcombine.high %v9259_v4, %v9263_v47  ;;  %v12844_v57 = vcombine.high %v9260_v62, %v9264_v1  ;;  %v12841_v24 = vcombine.low %v9259_v4, %v9263_v47  ;;  %v9881_v33 = vld [vmem:[#allocation8 + $0x1da0] sm:$0xff]  ;;  %v9878_v49 = vld [vmem:[#allocation8 + $0x1d88] sm:$0xff] }
 0x638   : > { %9742 = vmatpush1.bf16.msra.mxu1 %v12889_v46  ;;  %9783 = vmatpush1.bf16.msra.mxu0 %v12891_v22  ;;  %v9886_v46 = vld [vmem:[#allocation8 + $0x1dc8] sm:$0xff]  ;;  %v12843_v31 = vcombine.low %v9260_v62, %v9264_v1  ;;  %v12957_v30 = vcombine.low %v9885_v35, %v9889_v34  ;;  %v12949_v41 = vcombine.low %v9877_v61, %v9881_v33  ;;  %v9845_v1 = vld [vmem:[#allocation8 + $0x1c80] sm:$0xff] }
 0x639   : > { %v7980_v9 = vpop.f32.mrf.mxu1  ;;  %v8021_v45 = vpop.f32.mrf.mxu0  ;;  %9743 = vmatprep.subr.bf16.mxu1 %v12882_v60  ;;  %9784 = vmatprep.subr.bf16.mxu0 %v12884_v27  ;;  %v9890_v22 = vld [vmem:[#allocation8 + $0x1de8] sm:$0xff]  ;;  %v12958_v60 = vcombine.high %v9885_v35, %v9889_v34 }
 0x63a   : > { %v12960_v27 = vcombine.high %v9886_v46, %v9890_v22  ;;  %v9882_v63 = vld [vmem:[#allocation8 + $0x1da8] sm:$0xff]  ;;  %v12959_v54 = vcombine.low %v9886_v46, %v9890_v22  ;;  %v9869_v9 = vld [vmem:[#allocation8 + $0x1d40] sm:$0xff] }
 0x63b   : > { %v9873_v45 = vld [vmem:[#allocation8 + $0x1d60] sm:$0xff] }
 0x63c   : > { %9744 = vmatpush1.bf16.msra.mxu1 %v12881_v50  ;;  %9785 = vmatpush1.bf16.msra.mxu0 %v12883_v43  ;;  %v12950_v50 = vcombine.high %v9877_v61, %v9881_v33  ;;  %v12952_v43 = vcombine.high %v9878_v49, %v9882_v63  ;;  %v12942_v56 = vcombine.high %v9869_v9, %v9873_v45  ;;  %v9837_v22 = vld [vmem:[#allocation8 + $0x1c40] sm:$0xff] }
 0x63d   : > { %9745 = vmatprep.subr.bf16.mxu1 %v12874_v2  ;;  %9786 = vmatprep.subr.bf16.mxu0 %v12876_v3  ;;  %v9870_v2 = vld [vmem:[#allocation8 + $0x1d48] sm:$0xff] }
 0x63e   : > { %v9874_v3 = vld [vmem:[#allocation8 + $0x1d68] sm:$0xff] }
 0x63f   : > { %v12944_v18 = vcombine.high %v9870_v2, %v9874_v3  ;;  %v12943_v55 = vcombine.low %v9870_v2, %v9874_v3  ;;  %v9887_v3 = vld [vmem:[#allocation8 + $0x1dd0] sm:$0xff] }
 0x640   : > { %9746 = vmatpush1.bf16.msra.mxu1 %v12873_v5  ;;  %9787 = vmatpush1.bf16.msra.mxu0 %v12875_v8  ;;  %v12951_v8 = vcombine.low %v9878_v49, %v9882_v63  ;;  %v9829_v63 = vld [vmem:[#allocation8 + $0x1c00] sm:$0xff] }
 0x641   : > { %9747 = vmatprep.subr.bf16.mxu1 %v12866_v53  ;;  %9788 = vmatprep.subr.bf16.mxu0 %v12868_v32 }
 0x644   : > { %9748 = vmatpush1.bf16.msra.mxu1 %v12865_v44  ;;  %9789 = vmatpush1.bf16.msra.mxu0 %v12867_v14  ;;  %v9862_v44 = vld [vmem:[#allocation8 + $0x1d08] sm:$0xff] }
 0x645   : > { %9749 = vmatprep.subr.bf16.mxu1 %v12858_v58  ;;  %9790 = vmatprep.subr.bf16.mxu0 %v12860_v17  ;;  %v12941_v17 = vcombine.low %v9869_v9, %v9873_v45 }
 0x648   : > { %9750 = vmatpush1.bf16.msra.mxu1 %v12857_v6  ;;  %9791 = vmatpush1.bf16.msra.mxu0 %v12859_v51  ;;  %v9857_v6 = vld [vmem:[#allocation8 + $0x1ce0] sm:$0xff]  ;;  %v9854_v51 = vld [vmem:[#allocation8 + $0x1cc8] sm:$0xff] }
 0x649   : > { %9751 = vmatprep.subr.bf16.mxu1 %v12850_v12  ;;  %9792 = vmatprep.subr.bf16.mxu0 %v12852_v13  ;;  %v9858_v12 = vld [vmem:[#allocation8 + $0x1ce8] sm:$0xff]  ;;  %v12926_v47 = vcombine.high %v9853_v20, %v9857_v6 }
 0x64a   : > { %v12928_v62 = vcombine.high %v9854_v51, %v9858_v12  ;;  %v12927_v35 = vcombine.low %v9854_v51, %v9858_v12 }
 0x64c   : > { %9752 = vmatpush1.bf16.msra.mxu1 %v12849_v59  ;;  %9793 = vmatpush1.bf16.msra.mxu0 %v12851_v42  ;;  %v9849_v59 = vld [vmem:[#allocation8 + $0x1ca0] sm:$0xff]  ;;  %v9846_v42 = vld [vmem:[#allocation8 + $0x1c88] sm:$0xff] }
 0x64d   : > { %9753 = vmatprep.subr.bf16.mxu1 %v12842_v38  ;;  %9794 = vmatprep.subr.bf16.mxu0 %v12844_v57  ;;  %v9850_v38 = vld [vmem:[#allocation8 + $0x1ca8] sm:$0xff]  ;;  %v12925_v57 = vcombine.low %v9853_v20, %v9857_v6  ;;  %v12918_v34 = vcombine.high %v9845_v1, %v9849_v59 }
 0x64e   : > { %v12920_v46 = vcombine.high %v9846_v42, %v9850_v38  ;;  %v12919_v61 = vcombine.low %v9846_v42, %v9850_v38 }
 0x650   : > { %9754 = vmatpush1.bf16.msra.mxu1 %v12841_v24  ;;  %9795 = vmatpush1.bf16.msra.mxu0 %v12843_v31  ;;  %v9841_v24 = vld [vmem:[#allocation8 + $0x1c60] sm:$0xff]  ;;  %v9838_v31 = vld [vmem:[#allocation8 + $0x1c48] sm:$0xff] }
 0x651   : > { %10229 = vmatprep.subr.bf16.mxu1 %v12958_v60  ;;  %10270 = vmatprep.subr.bf16.mxu0 %v12960_v27  ;;  %v9842_v60 = vld [vmem:[#allocation8 + $0x1c68] sm:$0xff]  ;;  %v12917_v27 = vcombine.low %v9845_v1, %v9849_v59  ;;  %v12910_v33 = vcombine.high %v9837_v22, %v9841_v24  ;;  %v9863_v59 = vld [vmem:[#allocation8 + $0x1d10] sm:$0xff] }
 0x652   : > { %v12912_v49 = vcombine.high %v9838_v31, %v9842_v60  ;;  %v12911_v9 = vcombine.low %v9838_v31, %v9842_v60  ;;  %v9855_v60 = vld [vmem:[#allocation8 + $0x1cd0] sm:$0xff] }
 0x653   : > { %v8057_v40 = vpop.f32.mrf.mxu1  ;;  %v8098_v21 = vpop.f32.mrf.mxu0  ;;  %9772 = vmatmul.mubr.bf16.vlgmr.msra.gmra.mxu1 %v15060_v23  ;;  %9813 = vmatmul.mubr.bf16.vlgmr.msra.gmra.mxu0 %v15060_v23 }
 0x654   : > { %v15081_v28 = vadd.f32 %v8057_v40, %v15045_v11  ;;  %v15084_v5 = vadd.f32 %v8098_v21, %v15048_v52  ;;  %10230 = vmatpush1.bf16.msra.mxu1 %v12957_v30  ;;  %10271 = vmatpush1.bf16.msra.mxu0 %v12959_v54  ;;  %v9865_v11 = vld [vmem:[#allocation8 + $0x1d20] sm:$0xff]  ;;  %v9866_v52 = vld [vmem:[#allocation8 + $0x1d28] sm:$0xff]  ;;  %v9891_v40 = vld [vmem:[#allocation8 + $0x1df0] sm:$0xff] }
 0x655   : > { %v8059_v53 = vpop.f32.mrf.mxu1  ;;  %v8100_v32 = vpop.f32.mrf.mxu0  ;;  %10231 = vmatprep.subr.bf16.mxu1 %v12950_v50  ;;  %10272 = vmatprep.subr.bf16.mxu0 %v12952_v43  ;;  %v12933_v13 = vcombine.low %v9861_v48, %v9865_v11  ;;  %v12935_v4 = vcombine.low %v9862_v44, %v9866_v52  ;;  %v9833_v30 = vld [vmem:[#allocation8 + $0x1c20] sm:$0xff]  ;;  %v9830_v54 = vld [vmem:[#allocation8 + $0x1c08] sm:$0xff]  ;;  %v12909_v43 = vcombine.low %v9837_v22, %v9841_v24  ;;  %v9888_v21 = vld [vmem:[#allocation8 + $0x1dd8] sm:$0xff] }
 0x656   : > { %v15087_v16 = vadd.f32 %v8059_v53, %v15051_v26  ;;  %v15090_v23 = vadd.f32 %v8100_v32, %v15054_v10  ;;  %10261 = vmatprep.mubr.bf16.mxu1 %v13805_v0  ;;  %10302 = vmatprep.mubr.bf16.mxu0 %v13805_v0  ;;  %v12934_v26 = vcombine.high %v9861_v48, %v9865_v11  ;;  %v9834_v50 = vld [vmem:[#allocation8 + $0x1c28] sm:$0xff]  ;;  %v9883_v48 = vld [vmem:[#allocation8 + $0x1db0] sm:$0xff]  ;;  %v9880_v11 = vld [vmem:[#allocation8 + $0x1d98] sm:$0xff] }
 0x657   : > { %v8061_v14 = vpop.f32.mrf.mxu1  ;;  %v8102_v58 = vpop.f32.mrf.mxu0  ;;  %v12936_v10 = vcombine.high %v9862_v44, %v9866_v52  ;;  %v12902_v45 = vcombine.high %v9829_v63, %v9833_v30  ;;  %v12904_v2 = vcombine.high %v9830_v54, %v9834_v50  ;;  %v12903_v53 = vcombine.low %v9830_v54, %v9834_v50  ;;  %v9884_v44 = vld [vmem:[#allocation8 + $0x1db8] sm:$0xff]  ;;  %v9847_v50 = vld [vmem:[#allocation8 + $0x1c90] sm:$0xff] }
 0x658   : > { %10232 = vmatpush1.bf16.msra.mxu1 %v12949_v41  ;;  %10273 = vmatpush1.bf16.msra.mxu0 %v12951_v8  ;;  %v9892_v41 = vld [vmem:[#allocation8 + $0x1df8] sm:$0xff]  ;;  %v12901_v8 = vcombine.low %v9829_v63, %v9833_v30  ;;  %v12962_v32 = vcombine.high %v9887_v3, %v9891_v40  ;;  %v12961_v52 = vcombine.low %v9887_v3, %v9891_v40 }
 0x659   : > { %v8062_v15 = vpop.f32.mrf.mxu1  ;;  %v8103_v19 = vpop.f32.mrf.mxu0  ;;  %10233 = vmatprep.subr.bf16.mxu1 %v12942_v56  ;;  %10274 = vmatprep.subr.bf16.mxu0 %v12944_v18  ;;  %v12964_v56 = vcombine.high %v9888_v21, %v9892_v41  ;;  %v9879_v18 = vld [vmem:[#allocation8 + $0x1d90] sm:$0xff]  ;;  %v12963_v14 = vcombine.low %v9888_v21, %v9892_v41  ;;  %v15096_v58 = vpack.c.b16 %v14670_v25, %v14670_v25 }
 0x65a   : > { %v9871_v15 = vld [vmem:[#allocation8 + $0x1d50] sm:$0xff]  ;;  %v12953_v51 = vcombine.low %v9879_v18, %v9883_v48 }
 0x65b   : > { %v9875_v19 = vld [vmem:[#allocation8 + $0x1d70] sm:$0xff] }
 0x65c   : > { %10234 = vmatpush1.bf16.msra.mxu1 %v12941_v17  ;;  %10275 = vmatpush1.bf16.msra.mxu0 %v12943_v55  ;;  %v12954_v17 = vcombine.high %v9879_v18, %v9883_v48  ;;  %v12956_v55 = vcombine.high %v9880_v11, %v9884_v44  ;;  %v9839_v41 = vld [vmem:[#allocation8 + $0x1c50] sm:$0xff] }
 0x65d   : > { %10235 = vmatprep.subr.bf16.mxu1 %v12934_v26  ;;  %10276 = vmatprep.subr.bf16.mxu0 %v12936_v10  ;;  %v9872_v26 = vld [vmem:[#allocation8 + $0x1d58] sm:$0xff] }
 0x65e   : > { %v9876_v10 = vld [vmem:[#allocation8 + $0x1d78] sm:$0xff] }
 0x65f   : > { %v12948_v1 = vcombine.high %v9872_v26, %v9876_v10  ;;  %v12947_v22 = vcombine.low %v9872_v26, %v9876_v10  ;;  %v10457_v10 = vld [vmem:[#allocation8 + $0x1fc0] sm:$0xff] }
 0x660   : > { %10236 = vmatpush1.bf16.msra.mxu1 %v12933_v13  ;;  %10277 = vmatpush1.bf16.msra.mxu0 %v12935_v4  ;;  %v12955_v13 = vcombine.low %v9880_v11, %v9884_v44  ;;  %v9831_v44 = vld [vmem:[#allocation8 + $0x1c10] sm:$0xff] }
 0x661   : > { %10237 = vmatprep.subr.bf16.mxu1 %v12926_v47  ;;  %10278 = vmatprep.subr.bf16.mxu0 %v12928_v62  ;;  %v12946_v62 = vcombine.high %v9871_v15, %v9875_v19 }
 0x664   : > { %10238 = vmatpush1.bf16.msra.mxu1 %v12925_v57  ;;  %10279 = vmatpush1.bf16.msra.mxu0 %v12927_v35  ;;  %v9864_v57 = vld [vmem:[#allocation8 + $0x1d18] sm:$0xff] }
 0x665   : > { %10239 = vmatprep.subr.bf16.mxu1 %v12918_v34  ;;  %10280 = vmatprep.subr.bf16.mxu0 %v12920_v46  ;;  %v12945_v46 = vcombine.low %v9871_v15, %v9875_v19 }
 0x668   : > { %10240 = vmatpush1.bf16.msra.mxu1 %v12917_v27  ;;  %10281 = vmatpush1.bf16.msra.mxu0 %v12919_v61  ;;  %v9859_v27 = vld [vmem:[#allocation8 + $0x1cf0] sm:$0xff]  ;;  %v9856_v61 = vld [vmem:[#allocation8 + $0x1cd8] sm:$0xff] }
 0x669   : > { %10241 = vmatprep.subr.bf16.mxu1 %v12910_v33  ;;  %10282 = vmatprep.subr.bf16.mxu0 %v12912_v49  ;;  %v9860_v33 = vld [vmem:[#allocation8 + $0x1cf8] sm:$0xff]  ;;  %v12930_v30 = vcombine.high %v9855_v60, %v9859_v27 }
 0x66a   : > { %v12932_v54 = vcombine.high %v9856_v61, %v9860_v33  ;;  %v12931_v3 = vcombine.low %v9856_v61, %v9860_v33 }
 0x66c   : > { %10242 = vmatpush1.bf16.msra.mxu1 %v12909_v43  ;;  %10283 = vmatpush1.bf16.msra.mxu0 %v12911_v9  ;;  %v9851_v43 = vld [vmem:[#allocation8 + $0x1cb0] sm:$0xff]  ;;  %v9848_v9 = vld [vmem:[#allocation8 + $0x1c98] sm:$0xff] }
 0x66d   : > { %10243 = vmatprep.subr.bf16.mxu1 %v12902_v45  ;;  %10284 = vmatprep.subr.bf16.mxu0 %v12904_v2  ;;  %v9852_v45 = vld [vmem:[#allocation8 + $0x1cb8] sm:$0xff]  ;;  %v12929_v2 = vcombine.low %v9855_v60, %v9859_v27  ;;  %v12922_v40 = vcombine.high %v9847_v50, %v9851_v43 }
 0x66e   : > { %v12924_v21 = vcombine.high %v9848_v9, %v9852_v45  ;;  %v12923_v18 = vcombine.low %v9848_v9, %v9852_v45  ;;  %v10434_v45 = vld [vmem:[#allocation8 + $0x1f08] sm:$0xff] }
 0x670   : > { %10244 = vmatpush1.bf16.msra.mxu1 %v12901_v8  ;;  %10285 = vmatpush1.bf16.msra.mxu0 %v12903_v53  ;;  %v9843_v8 = vld [vmem:[#allocation8 + $0x1c70] sm:$0xff]  ;;  %v9840_v53 = vld [vmem:[#allocation8 + $0x1c58] sm:$0xff] }
 0x671   : > { %10311 = vmatprep.subr.bf16.mxu1 %v12962_v32  ;;  %10352 = vmatprep.subr.bf16.mxu0 %v12964_v56  ;;  %v9844_v32 = vld [vmem:[#allocation8 + $0x1c78] sm:$0xff]  ;;  %v12921_v56 = vcombine.low %v9847_v50, %v9851_v43  ;;  %v12914_v48 = vcombine.high %v9839_v41, %v9843_v8  ;;  %v10433_v43 = vld [vmem:[#allocation8 + $0x1f00] sm:$0xff] }
 0x672   : > { %v12916_v11 = vcombine.high %v9840_v53, %v9844_v32  ;;  %v12915_v15 = vcombine.low %v9840_v53, %v9844_v32  ;;  %v10425_v53 = vld [vmem:[#allocation8 + $0x1ec0] sm:$0xff] }
 0x673   : > { %v8547_v20 = vpop.f32.mrf.mxu1  ;;  %v8588_v6 = vpop.f32.mrf.mxu0  ;;  %10262 = vmatmul.mubr.bf16.vlgmr.msra.gmra.mxu1 %v15096_v58  ;;  %10303 = vmatmul.mubr.bf16.vlgmr.msra.gmra.mxu0 %v15096_v58  ;;  %v10429_v32 = vld [vmem:[#allocation8 + $0x1ee0] sm:$0xff] }
 0x674   : > { %v15101_v12 = vadd.f32 %v8547_v20, %v15065_v7  ;;  %v15104_v25 = vadd.f32 %v8588_v6, %v15068_v29  ;;  %10312 = vmatpush1.bf16.msra.mxu1 %v12961_v52  ;;  %10353 = vmatpush1.bf16.msra.mxu0 %v12963_v14  ;;  %v9867_v7 = vld [vmem:[#allocation8 + $0x1d30] sm:$0xff]  ;;  %v9868_v29 = vld [vmem:[#allocation8 + $0x1d38] sm:$0xff]  ;;  %v10461_v20 = vld [vmem:[#allocation8 + $0x1fe0] sm:$0xff] }
 0x675   : > { %v8549_v4 = vpop.f32.mrf.mxu1  ;;  %v8590_v47 = vpop.f32.mrf.mxu0  ;;  %10313 = vmatprep.subr.bf16.mxu1 %v12954_v17  ;;  %10354 = vmatprep.subr.bf16.mxu0 %v12956_v55  ;;  %v12937_v49 = vcombine.low %v9863_v59, %v9867_v7  ;;  %v12939_v63 = vcombine.low %v9864_v57, %v9868_v29  ;;  %v9835_v52 = vld [vmem:[#allocation8 + $0x1c30] sm:$0xff]  ;;  %v9832_v14 = vld [vmem:[#allocation8 + $0x1c18] sm:$0xff]  ;;  %v12913_v55 = vcombine.low %v9839_v41, %v9843_v8  ;;  %v10458_v6 = vld [vmem:[#allocation8 + $0x1fc8] sm:$0xff] }
 0x676   : > { %v15107_v42 = vadd.f32 %v8549_v4, %v15071_v36  ;;  %v15110_v38 = vadd.f32 %v8590_v47, %v15074_v37  ;;  %10343 = vmatprep.mubr.bf16.mxu1 %v13805_v0  ;;  %10384 = vmatprep.mubr.bf16.mxu0 %v13805_v0  ;;  %v12938_v36 = vcombine.high %v9863_v59, %v9867_v7  ;;  %v9836_v17 = vld [vmem:[#allocation8 + $0x1c38] sm:$0xff]  ;;  %v10453_v59 = vld [vmem:[#allocation8 + $0x1fa0] sm:$0xff]  ;;  %v10450_v7 = vld [vmem:[#allocation8 + $0x1f88] sm:$0xff] }
 0x677   : > { %v8551_v35 = vpop.f32.mrf.mxu1  ;;  %v8592_v34 = vpop.f32.mrf.mxu0  ;;  %v12940_v37 = vcombine.high %v9864_v57, %v9868_v29  ;;  %v12906_v19 = vcombine.high %v9831_v44, %v9835_v52  ;;  %v12908_v26 = vcombine.high %v9832_v14, %v9836_v17  ;;  %v12907_v4 = vcombine.low %v9832_v14, %v9836_v17  ;;  %v10454_v57 = vld [vmem:[#allocation8 + $0x1fa8] sm:$0xff]  ;;  %v10417_v14 = vld [vmem:[#allocation8 + $0x1e80] sm:$0xff] }
 0x678   : > { %10314 = vmatpush1.bf16.msra.mxu1 %v12953_v51  ;;  %10355 = vmatpush1.bf16.msra.mxu0 %v12955_v13  ;;  %v10462_v51 = vld [vmem:[#allocation8 + $0x1fe8] sm:$0xff]  ;;  %v12905_v13 = vcombine.low %v9831_v44, %v9835_v52  ;;  %v13022_v47 = vcombine.high %v10457_v10, %v10461_v20  ;;  %v13021_v29 = vcombine.low %v10457_v10, %v10461_v20  ;;  %v10421_v17 = vld [vmem:[#allocation8 + $0x1ea0] sm:$0xff] }
 0x679   : > { %v8552_v24 = vpop.f32.mrf.mxu1  ;;  %v8593_v31 = vpop.f32.mrf.mxu0  ;;  %10315 = vmatprep.subr.bf16.mxu1 %v12946_v62  ;;  %10356 = vmatprep.subr.bf16.mxu0 %v12948_v1  ;;  %v13024_v62 = vcombine.high %v10458_v6, %v10462_v51  ;;  %v10449_v1 = vld [vmem:[#allocation8 + $0x1f80] sm:$0xff]  ;;  %v13023_v35 = vcombine.low %v10458_v6, %v10462_v51  ;;  %v12990_v44 = vcombine.high %v10425_v53, %v10429_v32 }
 0x67a   : > { %v13014_v34 = vcombine.high %v10449_v1, %v10453_v59  ;;  %v10445_v24 = vld [vmem:[#allocation8 + $0x1f60] sm:$0xff]  ;;  %v10442_v31 = vld [vmem:[#allocation8 + $0x1f48] sm:$0xff]  ;;  %v13013_v27 = vcombine.low %v10449_v1, %v10453_v59  ;;  %v12982_v10 = vcombine.high %v10417_v14, %v10421_v17 }
 0x67b   : > { %v10409_v6 = vld [vmem:[#allocation8 + $0x1e40] sm:$0xff] }
 0x67c   : > { %10316 = vmatpush1.bf16.msra.mxu1 %v12945_v46  ;;  %10357 = vmatpush1.bf16.msra.mxu0 %v12947_v22  ;;  %v13016_v46 = vcombine.high %v10450_v7, %v10454_v57  ;;  %v10441_v22 = vld [vmem:[#allocation8 + $0x1f40] sm:$0xff] }
 0x67d   : > { %10317 = vmatprep.subr.bf16.mxu1 %v12938_v36  ;;  %10358 = vmatprep.subr.bf16.mxu0 %v12940_v37  ;;  %v10446_v36 = vld [vmem:[#allocation8 + $0x1f68] sm:$0xff]  ;;  %v10413_v51 = vld [vmem:[#allocation8 + $0x1e60] sm:$0xff] }
 0x67e   : > { %v13008_v50 = vcombine.high %v10442_v31, %v10446_v36  ;;  %v12974_v1 = vcombine.high %v10409_v6, %v10413_v51 }
 0x680   : > { %10318 = vmatpush1.bf16.msra.mxu1 %v12937_v49  ;;  %10359 = vmatpush1.bf16.msra.mxu0 %v12939_v63  ;;  %v13015_v49 = vcombine.low %v10450_v7, %v10454_v57  ;;  %v10401_v7 = vld [vmem:[#allocation8 + $0x1e00] sm:$0xff] }
 0x681   : > { %10319 = vmatprep.subr.bf16.mxu1 %v12930_v30  ;;  %10360 = vmatprep.subr.bf16.mxu0 %v12932_v54  ;;  %v13006_v54 = vcombine.high %v10441_v22, %v10445_v24  ;;  %v10405_v57 = vld [vmem:[#allocation8 + $0x1e20] sm:$0xff] }
 0x684   : > { %10320 = vmatpush1.bf16.msra.mxu1 %v12929_v2  ;;  %10361 = vmatpush1.bf16.msra.mxu0 %v12931_v3 }
 0x685   : > { %10321 = vmatprep.subr.bf16.mxu1 %v12922_v40  ;;  %10362 = vmatprep.subr.bf16.mxu0 %v12924_v21  ;;  %v13005_v40 = vcombine.low %v10441_v22, %v10445_v24  ;;  %v13007_v21 = vcombine.low %v10442_v31, %v10446_v36  ;;  %v12966_v22 = vcombine.high %v10401_v7, %v10405_v57  ;;  %v10459_v31 = vld [vmem:[#allocation8 + $0x1fd0] sm:$0xff] }
 0x686   : > { %v10463_v36 = vld [vmem:[#allocation8 + $0x1ff0] sm:$0xff] }
 0x688   : > { %10322 = vmatpush1.bf16.msra.mxu1 %v12921_v56  ;;  %10363 = vmatpush1.bf16.msra.mxu0 %v12923_v18  ;;  %v10426_v56 = vld [vmem:[#allocation8 + $0x1ec8] sm:$0xff] }
 0x689   : > { %10323 = vmatprep.subr.bf16.mxu1 %v12914_v48  ;;  %10364 = vmatprep.subr.bf16.mxu0 %v12916_v11  ;;  %v10430_v18 = vld [vmem:[#allocation8 + $0x1ee8] sm:$0xff] }
 0x68a   : > { %v12992_v52 = vcombine.high %v10426_v56, %v10430_v18 }
 0x68c   : > { %10324 = vmatpush1.bf16.msra.mxu1 %v12913_v55  ;;  %10365 = vmatpush1.bf16.msra.mxu0 %v12915_v15  ;;  %v10418_v55 = vld [vmem:[#allocation8 + $0x1e88] sm:$0xff] }
 0x68d   : > { %10325 = vmatprep.subr.bf16.mxu1 %v12906_v19  ;;  %10366 = vmatprep.subr.bf16.mxu0 %v12908_v26  ;;  %v10422_v15 = vld [vmem:[#allocation8 + $0x1ea8] sm:$0xff]  ;;  %v12989_v19 = vcombine.low %v10425_v53, %v10429_v32  ;;  %v12991_v26 = vcombine.low %v10426_v56, %v10430_v18 }
 0x68e   : > { %v12984_v20 = vcombine.high %v10418_v55, %v10422_v15 }
 0x690   : > { %10326 = vmatpush1.bf16.msra.mxu1 %v12905_v13  ;;  %10367 = vmatpush1.bf16.msra.mxu0 %v12907_v4  ;;  %v10410_v13 = vld [vmem:[#allocation8 + $0x1e48] sm:$0xff] }
 0x691   : > { %10801 = vmatprep.subr.bf16.mxu1 %v13022_v47  ;;  %10842 = vmatprep.subr.bf16.mxu0 %v13024_v62  ;;  %v10414_v4 = vld [vmem:[#allocation8 + $0x1e68] sm:$0xff]  ;;  %v12981_v47 = vcombine.low %v10417_v14, %v10421_v17  ;;  %v12983_v62 = vcombine.low %v10418_v55, %v10422_v15  ;;  %v10435_v14 = vld [vmem:[#allocation8 + $0x1f10] sm:$0xff]  ;;  %v10436_v15 = vld [vmem:[#allocation8 + $0x1f18] sm:$0xff] }
 0x692   : > { %v12976_v59 = vcombine.high %v10410_v13, %v10414_v4 }
 0x693   : > { %v8629_v37 = vpop.f32.mrf.mxu1  ;;  %v8670_v60 = vpop.f32.mrf.mxu0  ;;  %10344 = vmatmul.mubr.bf16.vlgmr.msra.gmra.mxu1 %v15096_v58  ;;  %10385 = vmatmul.mubr.bf16.vlgmr.msra.gmra.mxu0 %v15096_v58 }
 0x694   : > { %v15117_v61 = vadd.f32 %v8629_v37, %v15081_v28  ;;  %v15120_v33 = vadd.f32 %v8670_v60, %v15084_v5  ;;  %10802 = vmatpush1.bf16.msra.mxu1 %v13021_v29  ;;  %10843 = vmatpush1.bf16.msra.mxu0 %v13023_v35  ;;  %v10437_v28 = vld [vmem:[#allocation8 + $0x1f20] sm:$0xff]  ;;  %v10438_v5 = vld [vmem:[#allocation8 + $0x1f28] sm:$0xff]  ;;  %v10460_v37 = vld [vmem:[#allocation8 + $0x1fd8] sm:$0xff] }
 0x695   : > { %v8631_v63 = vpop.f32.mrf.mxu1  ;;  %v8672_v30 = vpop.f32.mrf.mxu0  ;;  %10803 = vmatprep.subr.bf16.mxu1 %v13014_v34  ;;  %10844 = vmatprep.subr.bf16.mxu0 %v13016_v46  ;;  %v12997_v48 = vcombine.low %v10433_v43, %v10437_v28  ;;  %v12999_v11 = vcombine.low %v10434_v45, %v10438_v5  ;;  %v10402_v29 = vld [vmem:[#allocation8 + $0x1e08] sm:$0xff]  ;;  %v12973_v34 = vcombine.low %v10409_v6, %v10413_v51  ;;  %v10464_v60 = vld [vmem:[#allocation8 + $0x1ff8] sm:$0xff] }
 0x696   : > { %v15123_v9 = vadd.f32 %v8631_v63, %v15087_v16  ;;  %v15126_v58 = vadd.f32 %v8672_v30, %v15090_v23  ;;  %10833 = vmatprep.mubr.bf16.mxu1 %v13805_v0  ;;  %10874 = vmatprep.mubr.bf16.mxu0 %v13805_v0  ;;  %v12998_v16 = vcombine.high %v10433_v43, %v10437_v28  ;;  %v10406_v35 = vld [vmem:[#allocation8 + $0x1e28] sm:$0xff]  ;;  %v10452_v43 = vld [vmem:[#allocation8 + $0x1f98] sm:$0xff] }
 0x697   : > { %v8633_v2 = vpop.f32.mrf.mxu1  ;;  %v8674_v3 = vpop.f32.mrf.mxu0  ;;  %v13000_v23 = vcombine.high %v10434_v45, %v10438_v5  ;;  %v12975_v46 = vcombine.low %v10410_v13, %v10414_v4  ;;  %v12968_v24 = vcombine.high %v10402_v29, %v10406_v35  ;;  %v13026_v63 = vcombine.high %v10459_v31, %v10463_v36  ;;  %v10456_v28 = vld [vmem:[#allocation8 + $0x1fb8] sm:$0xff]  ;;  %v10427_v13 = vld [vmem:[#allocation8 + $0x1ed0] sm:$0xff] }
 0x698   : > { %10804 = vmatpush1.bf16.msra.mxu1 %v13013_v27  ;;  %10845 = vmatpush1.bf16.msra.mxu0 %v13015_v49  ;;  %v12965_v27 = vcombine.low %v10401_v7, %v10405_v57  ;;  %v12967_v49 = vcombine.low %v10402_v29, %v10406_v35  ;;  %v13028_v30 = vcombine.high %v10460_v37, %v10464_v60  ;;  %v10431_v4 = vld [vmem:[#allocation8 + $0x1ef0] sm:$0xff]  ;;  %v10420_v35 = vld [vmem:[#allocation8 + $0x1e98] sm:$0xff] }
 0x699   : > { %v8634_v41 = vpop.f32.mrf.mxu1  ;;  %v8675_v8 = vpop.f32.mrf.mxu0  ;;  %10805 = vmatprep.subr.bf16.mxu1 %v13006_v54  ;;  %10846 = vmatprep.subr.bf16.mxu0 %v13008_v50  ;;  %v10451_v54 = vld [vmem:[#allocation8 + $0x1f90] sm:$0xff]  ;;  %v13025_v45 = vcombine.low %v10459_v31, %v10463_v36  ;;  %v13027_v5 = vcombine.low %v10460_v37, %v10464_v60  ;;  %v15132_v2 = vpack.c.b16 %v14676_v39, %v14676_v39  ;;  %v10412_v60 = vld [vmem:[#allocation8 + $0x1e58] sm:$0xff] }
 0x69a   : > { %v10455_v50 = vld [vmem:[#allocation8 + $0x1fb0] sm:$0xff]  ;;  %v10444_v8 = vld [vmem:[#allocation8 + $0x1f58] sm:$0xff]  ;;  %v13019_v18 = vcombine.low %v10452_v43, %v10456_v28 }
 0x69b   : > { %v13018_v3 = vcombine.high %v10451_v54, %v10455_v50  ;;  %v10447_v41 = vld [vmem:[#allocation8 + $0x1f70] sm:$0xff]  ;;  %v13017_v32 = vcombine.low %v10451_v54, %v10455_v50 }
 0x69c   : > { %10806 = vmatpush1.bf16.msra.mxu1 %v13005_v40  ;;  %10847 = vmatpush1.bf16.msra.mxu0 %v13007_v21  ;;  %v13020_v40 = vcombine.high %v10452_v43, %v10456_v28  ;;  %v10443_v21 = vld [vmem:[#allocation8 + $0x1f50] sm:$0xff]  ;;  %v10404_v28 = vld [vmem:[#allocation8 + $0x1e18] sm:$0xff] }
 0x69d   : > { %10807 = vmatprep.subr.bf16.mxu1 %v12998_v16  ;;  %10848 = vmatprep.subr.bf16.mxu0 %v13000_v23  ;;  %v10448_v16 = vld [vmem:[#allocation8 + $0x1f78] sm:$0xff]  ;;  %v10419_v57 = vld [vmem:[#allocation8 + $0x1e90] sm:$0xff] }
 0x69e   : > { %v10423_v29 = vld [vmem:[#allocation8 + $0x1eb0] sm:$0xff] }
 0x69f   : > { %v10411_v36 = vld [vmem:[#allocation8 + $0x1e50] sm:$0xff] }
 0x6a0   : > { %10808 = vmatpush1.bf16.msra.mxu1 %v12997_v48  ;;  %10849 = vmatpush1.bf16.msra.mxu0 %v12999_v11  ;;  %v10415_v37 = vld [vmem:[#allocation8 + $0x1e70] sm:$0xff] }
 0x6a1   : > { %10809 = vmatprep.subr.bf16.mxu1 %v12990_v44  ;;  %10850 = vmatprep.subr.bf16.mxu0 %v12992_v52  ;;  %v13010_v44 = vcombine.high %v10443_v21, %v10447_v41  ;;  %v13012_v52 = vcombine.high %v10444_v8, %v10448_v16  ;;  %v10403_v50 = vld [vmem:[#allocation8 + $0x1e10] sm:$0xff] }
 0x6a2   : > { %v10407_v43 = vld [vmem:[#allocation8 + $0x1e30] sm:$0xff] }
 0x6a4   : > { %10810 = vmatpush1.bf16.msra.mxu1 %v12989_v19  ;;  %10851 = vmatpush1.bf16.msra.mxu0 %v12991_v26 }
 0x6a5   : > { %10811 = vmatprep.subr.bf16.mxu1 %v12982_v10  ;;  %10852 = vmatprep.subr.bf16.mxu0 %v12984_v20  ;;  %v13009_v10 = vcombine.low %v10443_v21, %v10447_v41  ;;  %v13011_v20 = vcombine.low %v10444_v8, %v10448_v16  ;;  %v12969_v41 = vcombine.low %v10403_v50, %v10407_v43 }
 0x6a8   : > { %10812 = vmatpush1.bf16.msra.mxu1 %v12981_v47  ;;  %10853 = vmatpush1.bf16.msra.mxu0 %v12983_v62  ;;  %v10428_v47 = vld [vmem:[#allocation8 + $0x1ed8] sm:$0xff] }
 0x6a9   : > { %10813 = vmatprep.subr.bf16.mxu1 %v12974_v1  ;;  %10854 = vmatprep.subr.bf16.mxu0 %v12976_v59  ;;  %v10432_v62 = vld [vmem:[#allocation8 + $0x1ef8] sm:$0xff]  ;;  %v12994_v59 = vcombine.high %v10427_v13, %v10431_v4 }
 0x6aa   : > { %v12996_v7 = vcombine.high %v10428_v47, %v10432_v62 }
 0x6ac   : > { %10814 = vmatpush1.bf16.msra.mxu1 %v12973_v34  ;;  %10855 = vmatpush1.bf16.msra.mxu0 %v12975_v46  ;;  %v10424_v34 = vld [vmem:[#allocation8 + $0x1eb8] sm:$0xff]  ;;  %v12993_v46 = vcombine.low %v10427_v13, %v10431_v4  ;;  %v13481_v13 = vld [vmem:[#allocation11 + $0x20] sm:$0xff]  }
 0x6ad   : > { %10815 = vmatprep.subr.bf16.mxu1 %v12966_v22  ;;  %10856 = vmatprep.subr.bf16.mxu0 %v12968_v24  ;;  %v12995_v22 = vcombine.low %v10428_v47, %v10432_v62  ;;  %v12986_v24 = vcombine.high %v10419_v57, %v10423_v29  ;;  %v12988_v31 = vcombine.high %v10420_v35, %v10424_v34  ;;  %v13482_v4 = vld [vmem:[#allocation11 + $0xa0] sm:$0xff]   ;;  %v13483_v47 = vld [vmem:[#allocation11 + $0x58] sm:$0xff]  }
 0x6ae   : > { %v13484_v62 = vld [vmem:[#allocation11 + $0xd8] sm:$0xff]  }
 0x6b0   : > { %10816 = vmatpush1.bf16.msra.mxu1 %v12965_v27  ;;  %10857 = vmatpush1.bf16.msra.mxu0 %v12967_v49  ;;  %v10416_v27 = vld [vmem:[#allocation8 + $0x1e78] sm:$0xff]  ;;  %v12985_v49 = vcombine.low %v10419_v57, %v10423_v29 }
 0x6b1   : > { %10883 = vmatprep.subr.bf16.mxu1 %v13026_v63  ;;  %10924 = vmatprep.subr.bf16.mxu0 %v13028_v30  ;;  %v12987_v63 = vcombine.low %v10420_v35, %v10424_v34  ;;  %v12978_v30 = vcombine.high %v10411_v36, %v10415_v37  ;;  %v12980_v54 = vcombine.high %v10412_v60, %v10416_v27 }
 0x6b3   : > { %v9119_v23 = vpop.f32.mrf.mxu1  ;;  %v9160_v53 = vpop.f32.mrf.mxu0  ;;  %10834 = vmatmul.mubr.bf16.vlgmr.msra.gmra.mxu1 %v15132_v2  ;;  %10875 = vmatmul.mubr.bf16.vlgmr.msra.gmra.mxu0 %v15132_v2 }
 0x6b4   : > { %v15137_v56 = vadd.f32 %v9119_v23, %v15101_v12  ;;  %v15140_v39 = vadd.f32 %v9160_v53, %v15104_v25  ;;  %10884 = vmatpush1.bf16.msra.mxu1 %v13025_v45  ;;  %10925 = vmatpush1.bf16.msra.mxu0 %v13027_v5  ;;  %v10439_v12 = vld [vmem:[#allocation8 + $0x1f30] sm:$0xff]  ;;  %v10440_v25 = vld [vmem:[#allocation8 + $0x1f38] sm:$0xff]  ;;  %v12977_v5 = vcombine.low %v10411_v36, %v10415_v37 }
 0x6b5   : > { %v9121_v48 = vpop.f32.mrf.mxu1  ;;  %v9162_v11 = vpop.f32.mrf.mxu0  ;;  %10885 = vmatprep.subr.bf16.mxu1 %v13018_v3  ;;  %10926 = vmatprep.subr.bf16.mxu0 %v13020_v40  ;;  %v13001_v1 = vcombine.low %v10435_v14, %v10439_v12  ;;  %v10408_v45 = vld [vmem:[#allocation8 + $0x1e38] sm:$0xff]  ;;  %v12979_v3 = vcombine.low %v10412_v60, %v10416_v27  ;;  %v12970_v40 = vcombine.high %v10403_v50, %v10407_v43  ;;  %v13497_v50 = vld [vmem:[#allocation11] sm:$0xff]  }
 0x6b6   : > { %v15143_v17 = vadd.f32 %v9121_v48, %v15107_v42  ;;  %v15146_v55 = vadd.f32 %v9162_v11, %v15110_v38  ;;  %10915 = vmatprep.mubr.bf16.mxu1 %v13805_v0  ;;  %10956 = vmatprep.mubr.bf16.mxu0 %v13805_v0  ;;  %v13002_v42 = vcombine.high %v10435_v14, %v10439_v12  ;;  %v13487_v60 = vld [vmem:[#allocation11 + $0x50] sm:$0xff]   ;;  %v13498_v43 = vld [vmem:[#allocation11 + $0x80] sm:$0xff]  }
 0x6b7   : > { %v9123_v19 = vpop.f32.mrf.mxu1  ;;  %v9164_v26 = vpop.f32.mrf.mxu0  ;;  %v13004_v38 = vcombine.high %v10436_v15, %v10440_v25  ;;  %v13003_v0 = vcombine.low %v10436_v15, %v10440_v25  ;;  %v12972_v21 = vcombine.high %v10404_v28, %v10408_v45  ;;  %v12971_v8 = vcombine.low %v10404_v28, %v10408_v45  ;;  %v13467_v25 = vld [vmem:[#allocation11 + $0x78] sm:$0xff]   ;;  %v13488_v27 = vld [vmem:[#allocation11 + $0xd0] sm:$0xff]  }
 0x6b8   : > { %10886 = vmatpush1.bf16.msra.mxu1 %v13017_v32  ;;  %10927 = vmatpush1.bf16.msra.mxu0 %v13019_v18  ;;  %v13469_v19 = vld [vmem:[#allocation11 + $0x38] sm:$0xff]   ;;  %v13471_v26 = vld [vmem:[#allocation11 + $0x70] sm:$0xff]  }
 0x6b9   : > { %v9124_v6 = vpop.f32.mrf.mxu1  ;;  %v9165_v51 = vpop.f32.mrf.mxu0  ;;  %10887 = vmatprep.subr.bf16.mxu1 %v13010_v44  ;;  %10928 = vmatprep.subr.bf16.mxu0 %v13012_v52  ;;  %v13499_v28 = vld [vmem:[#allocation11 + $0x178] sm:$0xff]  }
 0x6ba   : > { %v13477_v6 = vld [vmem:[#allocation11 + $0x28] sm:$0xff]   ;;  %v13500_v45 = vld [vmem:[#allocation11 + $0x1f8] sm:$0xff]  }
 0x6bb   : > { %v13478_v51 = vld [vmem:[#allocation11 + $0xa8] sm:$0xff]  }
 0x6bc   : > { %10888 = vmatpush1.bf16.msra.mxu1 %v13009_v10  ;;  %10929 = vmatpush1.bf16.msra.mxu0 %v13011_v20  ;;  %v13472_v10 = vld [vmem:[#allocation11 + $0xf0] sm:$0xff]   ;;  %v13476_v20 = vld [vmem:[#allocation11 + $0xe8] sm:$0xff]  }
 0x6bd   : > { %10889 = vmatprep.subr.bf16.mxu1 %v13002_v42  ;;  %10930 = vmatprep.subr.bf16.mxu0 %v13004_v38  ;;  %v13479_v42 = vld [vmem:[#allocation11 + $0x60] sm:$0xff]  }
 0x6be   : > { %v13480_v38 = vld [vmem:[#allocation11 + $0xe0] sm:$0xff]  }
 0x6c0   : > { %10890 = vmatpush1.bf16.msra.mxu1 %v13001_v1  ;;  %10931 = vmatpush1.bf16.msra.mxu0 %v13003_v0  ;;  %v13485_v1 = vld [vmem:[#allocation11 + $0x18] sm:$0xff]  }
 0x6c1   : > { %10891 = vmatprep.subr.bf16.mxu1 %v12994_v59  ;;  %10932 = vmatprep.subr.bf16.mxu0 %v12996_v7  ;;  %v13486_v0 = vld [vmem:[#allocation11 + $0x98] sm:$0xff]  }
 0x6c4   : > { %10892 = vmatpush1.bf16.msra.mxu1 %v12993_v46  ;;  %10933 = vmatpush1.bf16.msra.mxu0 %v12995_v22 }
 0x6c5   : > { %10893 = vmatprep.subr.bf16.mxu1 %v12986_v24  ;;  %10934 = vmatprep.subr.bf16.mxu0 %v12988_v31 }
 0x6c8   : > { %10894 = vmatpush1.bf16.msra.mxu1 %v12985_v49  ;;  %10935 = vmatpush1.bf16.msra.mxu0 %v12987_v63  ;;  %v13489_v49 = vld [vmem:[#allocation11 + $0x10] sm:$0xff]  }
 0x6c9   : > { %10895 = vmatprep.subr.bf16.mxu1 %v12978_v30  ;;  %10936 = vmatprep.subr.bf16.mxu0 %v12980_v54  ;;  %v13490_v63 = vld [vmem:[#allocation11 + $0x90] sm:$0xff]   ;;  %v13493_v30 = vld [vmem:[#allocation11 + $0x8] sm:$0xff]   ;;  %v13496_v54 = vld [vmem:[#allocation11 + $0xc0] sm:$0xff]  }
 0x6cc   : > { %10896 = vmatpush1.bf16.msra.mxu1 %v12977_v5  ;;  %10937 = vmatpush1.bf16.msra.mxu0 %v12979_v3 }
 0x6cd   : > { %10897 = vmatprep.subr.bf16.mxu1 %v12970_v40  ;;  %10938 = vmatprep.subr.bf16.mxu0 %v12972_v21 }
 0x6d0   : > { %10898 = vmatpush1.bf16.msra.mxu1 %v12969_v41  ;;  %10939 = vmatpush1.bf16.msra.mxu0 %v12971_v8 }
 0x6d1   : > { %13114 = vmatprep.subr.bf16.mxu1 %v13467_v25 }
 0x6d3   : > { %v9201_v16 = vpop.f32.mrf.mxu1  ;;  %v9242_v23 = vpop.f32.mrf.mxu0  ;;  %10916 = vmatmul.mubr.bf16.vlgmr.msra.gmra.mxu1 %v15132_v2  ;;  %10957 = vmatmul.mubr.bf16.vlgmr.msra.gmra.mxu0 %v15132_v2  ;;  %v13468_v2 = vld [vmem:[#allocation11 + $0xf8] sm:$0xff]  }
 0x6d4   : > { %v15153_v53 = vadd.f32 %v9201_v16, %v15117_v61  ;;  %v15156_v32 = vadd.f32 %v9242_v23, %v15120_v33  ;;  %v13470_v61 = vld [vmem:[#allocation11 + $0xb8] sm:$0xff]   ;;  %13136 = vmatprep.subr.bf16.mxu0 %v13468_v2  ;;  %13115 = vmatpush3.bf16.msra.mxu1 %v13469_v19  ;;  %v13473_v33 = vld [vmem:[#allocation11 + $0x30] sm:$0xff]  }
 0x6d5   : > { %v9203_v18 = vpop.f32.mrf.mxu1  ;;  %v9244_v48 = vpop.f32.mrf.mxu0  ;;  %13137 = vmatpush3.bf16.msra.mxu0 %v13470_v61  ;;  %13116 = vmatprep.subr.bf16.mxu1 %v13471_v26 }
 0x6d6   : > { %v15159_v11 = vadd.f32 %v9203_v18, %v15123_v9  ;;  %v15162_v44 = vadd.f32 %v9244_v48, %v15126_v58  ;;  %v13474_v9 = vld [vmem:[#allocation11 + $0xb0] sm:$0xff]   ;;  %13138 = vmatprep.subr.bf16.mxu0 %v13472_v10  ;;  %v13475_v58 = vld [vmem:[#allocation11 + $0x68] sm:$0xff]  }
 0x6d7   : > { %v9205_v52 = vpop.f32.mrf.mxu1  ;;  %v9246_v14 = vpop.f32.mrf.mxu0 }
 0x6d8   : > { %13117 = vmatpush3.bf16.msra.mxu1 %v13473_v33 }
 0x6d9   : > { %v9206_v12 = vpop.f32.mrf.mxu1  ;;  %v9247_v15 = vpop.f32.mrf.mxu0  ;;  %13139 = vmatpush3.bf16.msra.mxu0 %v13474_v9  ;;  %13118 = vmatprep.subr.bf16.mxu1 %v13475_v58 }
 0x6da   : > { %13140 = vmatprep.subr.bf16.mxu0 %v13476_v20 }
 0x6dc   : > { %13119 = vmatpush3.bf16.msra.mxu1 %v13477_v6 }
 0x6dd   : > { %13141 = vmatpush3.bf16.msra.mxu0 %v13478_v51  ;;  %13120 = vmatprep.subr.bf16.mxu1 %v13479_v42 }
 0x6de   : > { %13142 = vmatprep.subr.bf16.mxu0 %v13480_v38 }
 0x6e0   : > { %13121 = vmatpush3.bf16.msra.mxu1 %v13481_v13  ;;  %v10975_v13 = vlaneseq }
 0x6e1   : > { %13143 = vmatpush3.bf16.msra.mxu0 %v13482_v4  ;;  %13122 = vmatprep.subr.bf16.mxu1 %v13483_v47 }
 0x6e2   : > { %13144 = vmatprep.subr.bf16.mxu0 %v13484_v62  ;;  %v15188_v4 = vshrl.u32 %v10975_v13, 7 }
 0x6e4   : > { %13123 = vmatpush3.bf16.msra.mxu1 %v13485_v1  ;;  %v10977_v47 = vsub.s32 0, %v15188_v4  ;;  %v10985_v62 = vsub.s32 2, %v15188_v4  ;;  %v15192_v1 = vld [vmem:[#allocation10] sm:$0xff]  ;;  %v11001_v13 = vsub.s32 6, %v15188_v4 }
 0x6e5   : > { %13145 = vmatpush3.bf16.msra.mxu0 %v13486_v0  ;;  %13124 = vmatprep.subr.bf16.mxu1 %v13487_v60  ;;  %v10981_v0 = vsub.s32 1, %v15188_v4 }
 0x6e6   : > { %13146 = vmatprep.subr.bf16.mxu0 %v13488_v27 }
 0x6e8   : > { %13125 = vmatpush3.bf16.msra.mxu1 %v13489_v49 }
 0x6e9   : > { %13147 = vmatpush3.bf16.msra.mxu0 %v13490_v63 }
 0x6f3   : > { %v9691_v59 = vpop.f32.mrf.mxu1  ;;  %v9732_v7 = vpop.f32.mrf.mxu0 }
 0x6f4   : > { %v9821_v57 = vadd.f32 %v9691_v59, %v15137_v56  ;;  %v9823_v29 = vadd.f32 %v9732_v7, %v15140_v39  ;;  %v13491_v56 = vld [vmem:[#allocation11 + $0x48] sm:$0xff]   ;;  %v10989_v59 = vsub.s32 3, %v15188_v4  ;;  %v10978_v7 = vrot.slane %v15192_v1, %v10977_v47 }
 0x6f5   : > { %v9693_v35 = vpop.f32.mrf.mxu1  ;;  %v9734_v34 = vpop.f32.mrf.mxu0  ;;  %v13492_v39 = vld [vmem:[#allocation11 + $0xc8] sm:$0xff]   ;;  %13126 = vmatprep.subr.bf16.mxu1 %v13491_v56  ;;  %v10997_v47 = vsub.s32 5, %v15188_v4 }
 0x6f6   : > { %v15167_v46 = vadd.f32 %v9693_v35, %v15143_v17  ;;  %v15170_v22 = vadd.f32 %v9734_v34, %v15146_v55  ;;  %v13494_v17 = vld [vmem:[#allocation11 + $0x88] sm:$0xff]   ;;  %13148 = vmatprep.subr.bf16.mxu0 %v13492_v39  ;;  %v13495_v55 = vld [vmem:[#allocation11 + $0x40] sm:$0xff]   ;;  %13127 = vmatpush3.bf16.msra.mxu1 %v13493_v30  ;;  %v10982_v34 = vrot.slane %v15192_v1, %v10981_v0  ;;  %v13521_v0 = vld [vmem:[#allocation11 + $0x110] sm:$0xff]  }
 0x6f7   : > { %v9695_v24 = vpop.f32.mrf.mxu1  ;;  %v9736_v31 = vpop.f32.mrf.mxu0  ;;  %13149 = vmatpush3.bf16.msra.mxu0 %v13494_v17  ;;  %13128 = vmatprep.subr.bf16.mxu1 %v13495_v55 }
 0x6f8   : > { %13150 = vmatprep.subr.bf16.mxu0 %v13496_v54  ;;  %v10990_v24 = vrot.slane %v15192_v1, %v10989_v59  ;;  %v13522_v59 = vld [vmem:[#allocation11 + $0x190] sm:$0xff]  }
 0x6f9   : > { %v9696_v36 = vpop.f32.mrf.mxu1  ;;  %v9737_v37 = vpop.f32.mrf.mxu0 }
 0x6fa   : > { %13129 = vmatpush3.bf16.msra.mxu1 %v13497_v50 }
 0x6fb   : > { %13151 = vmatpush3.bf16.msra.mxu0 %v13498_v43  ;;  %13158 = vmatprep.subr.bf16.mxu1 %v13499_v28 }
 0x6fc   : > { %13180 = vmatprep.subr.bf16.mxu0 %v13500_v45 }
 0x713   : > { %v9773_v5 = vpop.f32.mrf.mxu1  ;;  %v9814_v3 = vpop.f32.mrf.mxu0 }
 0x714   : > { %v9825_v40 = vadd.f32 %v9773_v5, %v15153_v53  ;;  %v9827_v21 = vadd.f32 %v9814_v3, %v15156_v32 }
 0x715   : > { %v9775_v41 = vpop.f32.mrf.mxu1  ;;  %v9816_v8 = vpop.f32.mrf.mxu0 }
 0x716   : > { %v15175_v16 = vadd.f32 %v9775_v41, %v15159_v11  ;;  %v15178_v23 = vadd.f32 %v9816_v8, %v15162_v44  ;;  %v13502_v41 = vld [vmem:[#allocation11 + $0x1b8] sm:$0xff]  }
 0x717   : > { %v9777_v18 = vpop.f32.mrf.mxu1  ;;  %v9818_v48 = vpop.f32.mrf.mxu0 }
 0x718   : > { %v13503_v48 = vld [vmem:[#allocation11 + $0x170] sm:$0xff]  }
 0x719   : > { %v9778_v52 = vpop.f32.mrf.mxu1  ;;  %v9819_v14 = vpop.f32.mrf.mxu0 }
 0x71a   : > { %v13504_v52 = vld [vmem:[#allocation11 + $0x1f0] sm:$0xff]  }
 0x71b   : > { %v13505_v14 = vld [vmem:[#allocation11 + $0x130] sm:$0xff]  }
 0x733   : > { %v10263_v12 = vpop.f32.mrf.mxu1  ;;  %v10304_v15 = vpop.f32.mrf.mxu0 }
 0x734   : > { %v10393_v25 = vadd.f32 %v10263_v12, %v9821_v57  ;;  %v10395_v2 = vadd.f32 %v10304_v15, %v9823_v29  ;;  %v10986_v57 = vrot.slane %v15192_v1, %v10985_v62  ;;  %v13506_v12 = vld [vmem:[#allocation11 + $0x1b0] sm:$0xff]   ;;  %v13507_v15 = vld [vmem:[#allocation11 + $0x168] sm:$0xff]   ;;  %v11005_v62 = vsub.s32 7, %v15188_v4 }
 0x735   : > { %v10265_v19 = vpop.f32.mrf.mxu1  ;;  %v10306_v53 = vpop.f32.mrf.mxu0 }
 0x736   : > { %v10394_v31 = vadd.f32 %v10265_v19, %v15167_v46  ;;  %v10396_v36 = vadd.f32 %v10306_v53, %v15170_v22  ;;  %v13510_v19 = vld [vmem:[#allocation11 + $0x1a8] sm:$0xff]   ;;  %v13511_v53 = vld [vmem:[#allocation11 + $0x160] sm:$0xff]  }
 0x737   : > { %v10267_v61 = vpop.f32.mrf.mxu1  ;;  %v10308_v32 = vpop.f32.mrf.mxu0 }
 0x738   : > { %v13512_v61 = vld [vmem:[#allocation11 + $0x1e0] sm:$0xff]  }
 0x739   : > { %v10268_v26 = vpop.f32.mrf.mxu1  ;;  %v10309_v10 = vpop.f32.mrf.mxu0  ;;  %v13513_v32 = vld [vmem:[#allocation11 + $0x120] sm:$0xff]  }
 0x73a   : > { %v13514_v26 = vld [vmem:[#allocation11 + $0x1a0] sm:$0xff]   ;;  %v13515_v10 = vld [vmem:[#allocation11 + $0x158] sm:$0xff]  }
 0x753   : > { %v10345_v33 = vpop.f32.mrf.mxu1  ;;  %v10386_v11 = vpop.f32.mrf.mxu0 }
 0x754   : > { %v15180_v9 = vadd.f32 %v10345_v33, %v9825_v40  ;;  %v15182_v44 = vadd.f32 %v10386_v11, %v9827_v21  ;;  %v13501_v21 = vld [vmem:[#allocation11 + $0x138] sm:$0xff]  }
 0x755   : > { %v15184_v58 = vpop.f32.mrf.mxu1  ;;  %v15186_v20 = vpop.f32.mrf.mxu0  ;;  %v13516_v33 = vld [vmem:[#allocation11 + $0x1d8] sm:$0xff]  }
 0x756   : > { %v13517_v11 = vld [vmem:[#allocation11 + $0x118] sm:$0xff]  }
 0x757   : > { %v10349_v6 = vpop.f32.mrf.mxu1  ;;  %v10390_v51 = vpop.f32.mrf.mxu0 }
 0x758   : > { %v13518_v6 = vld [vmem:[#allocation11 + $0x198] sm:$0xff]   ;;  %v13519_v51 = vld [vmem:[#allocation11 + $0x150] sm:$0xff]  }
 0x759   : > { %v10350_v42 = vpop.f32.mrf.mxu1  ;;  %v10391_v38 = vpop.f32.mrf.mxu0 }
 0x75a   : > { %v13520_v42 = vld [vmem:[#allocation11 + $0x1d0] sm:$0xff]   ;;  %v10993_v38 = vsub.s32 4, %v15188_v4  ;;  %v11006_v4 = vrot.slane %v15192_v1, %v11005_v62 }
 0x773   : > { %v10835_v29 = vpop.f32.mrf.mxu1  ;;  %v10876_v35 = vpop.f32.mrf.mxu0 }
 0x774   : > { %v10965_v37 = vadd.f32 %v10835_v29, %v10393_v25  ;;  %v10967_v60 = vadd.f32 %v10876_v35, %v10395_v2  ;;  %v13508_v25 = vld [vmem:[#allocation11 + $0x1e8] sm:$0xff]   ;;  %v10994_v29 = vrot.slane %v15192_v1, %v10993_v38  ;;  %v11002_v35 = vrot.slane %v15192_v1, %v11001_v13 }
 0x775   : > { %v10837_v27 = vpop.f32.mrf.mxu1  ;;  %v10878_v49 = vpop.f32.mrf.mxu0  ;;  %v13509_v2 = vld [vmem:[#allocation11 + $0x128] sm:$0xff]  }
 0x776   : > { %v11015_v63 = vadd.f32 %v10978_v7, %v10965_v37  ;;  %v11017_v56 = vadd.f32 %v10986_v57, %v10967_v60  ;;  %v10966_v39 = vadd.f32 %v10837_v27, %v10394_v31  ;;  %v10968_v30 = vadd.f32 %v10878_v49, %v10396_v36  ;;  %v13523_v7 = vld [vmem:[#allocation11 + $0x148] sm:$0xff]  }
 0x777   : > { %v10839_v17 = vpop.f32.mrf.mxu1  ;;  %v10880_v55 = vpop.f32.mrf.mxu0  ;;  %v13524_v57 = vld [vmem:[#allocation11 + $0x1c8] sm:$0xff]   ;;  %v10998_v36 = vrot.slane %v15192_v1, %v10997_v47  ;;  %v10400_v37 = vadd.f32 %v15186_v20, %v15178_v23 }
 0x778   : > { %v11016_v54 = vadd.f32 %v10982_v34, %v10966_v39  ;;  %v11018_v50 = vadd.f32 %v10990_v24, %v10968_v30  ;;  %v11023_v43 = vmax.f32 %v11015_v63, 0.0  ;;  %v11025_v28 = vmax.f32 %v11017_v56, 0.0  ;;  %v13525_v49 = vld [vmem:[#allocation11 + $0x108] sm:$0xff]  }
 0x779   : > { %v10840_v45 = vpop.f32.mrf.mxu1  ;;  %v10881_v5 = vpop.f32.mrf.mxu0  ;;  %v10398_v34 = vadd.f32 %v15184_v58, %v15175_v16  ;;  %v13526_v63 = vld [vmem:[#allocation11 + $0x188] sm:$0xff]   ;;  %v13527_v16 = vld [vmem:[#allocation11 + $0x140] sm:$0xff]  }
 0x77a   : > { %v11024_v3 = vmax.f32 %v11016_v54, 0.0  ;;  %v11026_v46 = vmax.f32 %v11018_v50, 0.0  ;;  %v11031_v8 = vpack.c.bf16 %v11023_v43, %v11023_v43  ;;  %v11033_v18 = vpack.c.bf16 %v11025_v28, %v11025_v28  ;;  %v13528_v58 = vld [vmem:[#allocation11 + $0x1c0] sm:$0xff]  }
 0x77b   : > { %v13530_v50 = vld [vmem:[#allocation11 + $0x180] sm:$0xff]  }
 0x77c   : > { %v11032_v40 = vpack.c.bf16 %v11024_v3, %v11024_v3  ;;  %v11034_v22 = vpack.c.bf16 %v11026_v46, %v11026_v46 }
 0x77e   : > { %11590 = vmatprep.mubr.bf16.mxu1 %v11032_v40  ;;  %11630 = vmatprep.mubr.bf16.mxu0 %v11034_v22 }
 0x77f   : > { %11591 = vmatmul.mubr.bf16.vlgmr.msra.gmra.mxu1 %v11031_v8  ;;  %11631 = vmatmul.mubr.bf16.vlgmr.msra.gmra.mxu0 %v11033_v18 }
 0x780   : > { %13159 = vmatpush3.bf16.msra.mxu1 %v13501_v21  ;;  %13181 = vmatpush3.bf16.msra.mxu0 %v13502_v41 }
 0x781   : > { %13160 = vmatprep.subr.bf16.mxu1 %v13503_v48  ;;  %13182 = vmatprep.subr.bf16.mxu0 %v13504_v52 }
 0x784   : > { %13161 = vmatpush3.bf16.msra.mxu1 %v13505_v14  ;;  %13183 = vmatpush3.bf16.msra.mxu0 %v13506_v12 }
 0x785   : > { %13162 = vmatprep.subr.bf16.mxu1 %v13507_v15  ;;  %13184 = vmatprep.subr.bf16.mxu0 %v13508_v25 }
 0x788   : > { %13163 = vmatpush3.bf16.msra.mxu1 %v13509_v2  ;;  %13185 = vmatpush3.bf16.msra.mxu0 %v13510_v19  ;;  %v13029_v19 = vld [vmem:[#allocation13] ss:$0 sm:$0xff] }
 0x789   : > { %13164 = vmatprep.subr.bf16.mxu1 %v13511_v53  ;;  %13186 = vmatprep.subr.bf16.mxu0 %v13512_v61 }
 0x78c   : > { %13165 = vmatpush3.bf16.msra.mxu1 %v13513_v32  ;;  %13187 = vmatpush3.bf16.msra.mxu0 %v13514_v26 }
 0x78d   : > { %13166 = vmatprep.subr.bf16.mxu1 %v13515_v10  ;;  %13188 = vmatprep.subr.bf16.mxu0 %v13516_v33 }
 0x790   : > { %13167 = vmatpush3.bf16.msra.mxu1 %v13517_v11  ;;  %13189 = vmatpush3.bf16.msra.mxu0 %v13518_v6 }
 0x791   : > { %13168 = vmatprep.subr.bf16.mxu1 %v13519_v51  ;;  %13190 = vmatprep.subr.bf16.mxu0 %v13520_v42 }
 0x793   : > { %v10917_v24 = vpop.f32.mrf.mxu1  ;;  %v10958_v31 = vpop.f32.mrf.mxu0 }
 0x794   : > { %v10969_v60 = vadd.f32 %v10917_v24, %v15180_v9  ;;  %v10971_v27 = vadd.f32 %v10958_v31, %v15182_v44  ;;  %13169 = vmatpush3.bf16.msra.mxu1 %v13521_v0  ;;  %13191 = vmatpush3.bf16.msra.mxu0 %v13522_v59  ;;  %v13529_v44 = vld [vmem:[#allocation11 + $0x100] sm:$0xff]  }
 0x795   : > { %v10919_v56 = vpop.f32.mrf.mxu1  ;;  %v10960_v39 = vpop.f32.mrf.mxu0  ;;  %13170 = vmatprep.subr.bf16.mxu1 %v13523_v7  ;;  %13192 = vmatprep.subr.bf16.mxu0 %v13524_v57 }
 0x796   : > { %v11019_v30 = vadd.f32 %v10994_v29, %v10969_v60  ;;  %v11021_v17 = vadd.f32 %v11002_v35, %v10971_v27  ;;  %v10970_v1 = vadd.f32 %v10919_v56, %v10398_v34  ;;  %v10972_v55 = vadd.f32 %v10960_v39, %v10400_v37 }
 0x797   : > { %v10921_v54 = vpop.f32.mrf.mxu1  ;;  %v10962_v23 = vpop.f32.mrf.mxu0 }
 0x798   : > { %v11020_v20 = vadd.f32 %v10998_v36, %v10970_v1  ;;  %v11022_v9 = vadd.f32 %v11006_v4, %v10972_v55  ;;  %13171 = vmatpush3.bf16.msra.mxu1 %v13525_v49  ;;  %13193 = vmatpush3.bf16.msra.mxu0 %v13526_v63  ;;  %v11027_v43 = vmax.f32 %v11019_v30, 0.0  ;;  %v11029_v28 = vmax.f32 %v11021_v17, 0.0 }
 0x799   : > { %v10922_v45 = vpop.f32.mrf.mxu1  ;;  %v10963_v5 = vpop.f32.mrf.mxu0  ;;  %13172 = vmatprep.subr.bf16.mxu1 %v13527_v16  ;;  %13194 = vmatprep.subr.bf16.mxu0 %v13528_v58 }
 0x79a   : > { %v11028_v3 = vmax.f32 %v11020_v20, 0.0  ;;  %v11030_v46 = vmax.f32 %v11022_v9, 0.0  ;;  %v11035_v21 = vpack.c.bf16 %v11027_v43, %v11027_v43  ;;  %v11037_v41 = vpack.c.bf16 %v11029_v28, %v11029_v28 }
 0x79c   : > { %v11036_v40 = vpack.c.bf16 %v11028_v3, %v11028_v3  ;;  %v11038_v22 = vpack.c.bf16 %v11030_v46, %v11030_v46  ;;  %13173 = vmatpush3.bf16.msra.mxu1 %v13529_v44  ;;  %13195 = vmatpush3.bf16.msra.mxu0 %v13530_v50 }
 0x79e   : > { %11670 = vmatprep.mubr.bf16.mxu1 %v11036_v40  ;;  %11710 = vmatprep.mubr.bf16.mxu0 %v11038_v22 }
 0x79f   : > { %11671 = vmatmul.mubr.bf16.vlgmr.msra.gmra.mxu1 %v11035_v21  ;;  %11711 = vmatmul.mubr.bf16.vlgmr.msra.gmra.mxu0 %v11037_v41 }
 0x83f   : > { %v13130_v8 = vpop.f32.mrf.mxu1  ;;  %v13152_v18 = vpop.f32.mrf.mxu0 }
 0x841   : > { %v13131_v48 = vpop.f32.mrf.mxu1  ;;  %v13153_v52 = vpop.f32.mrf.mxu0 }
 0x842   : > { %v13132_v2 = vadd.f32 %v13131_v48, %v13130_v8  ;;  %v13154_v26 = vadd.f32 %v13153_v52, %v13152_v18 }
 0x843   : > { %v13133_v14 = vpop.f32.mrf.mxu1  ;;  %v13155_v12 = vpop.f32.mrf.mxu0 }
 0x844   : > { %v11593_v53 = vadd.f32 %v13132_v2, %v13029_v19 }
 0x845   : > { %v13134_v15 = vpop.f32.mrf.mxu1  ;;  %v13156_v25 = vpop.f32.mrf.mxu0 }
 0x846   : > { %v11633_v11 = vadd.f32 %v13154_v26, %v11593_v53 }
 0x85f   : > { %v13174_v61 = vpop.f32.mrf.mxu1  ;;  %v13196_v32 = vpop.f32.mrf.mxu0 }
 0x861   : > { %v13175_v10 = vpop.f32.mrf.mxu1  ;;  %v13197_v33 = vpop.f32.mrf.mxu0 }
 0x862   : > { %v13176_v6 = vadd.f32 %v13175_v10, %v13174_v61  ;;  %v13198_v13 = vadd.f32 %v13197_v33, %v13196_v32 }
 0x863   : > { %v13177_v51 = vpop.f32.mrf.mxu1  ;;  %v13199_v42 = vpop.f32.mrf.mxu0 }
 0x864   : > { %v11673_v38 = vadd.f32 %v13176_v6, %v11633_v11 }
 0x865   : > { %v13178_v47 = vpop.f32.mrf.mxu1  ;;  %v13200_v62 = vpop.f32.mrf.mxu0 }
 0x866   : > { %v11713_v0 = vadd.f32 %v13198_v13, %v11673_v38 }
 0x868   : > { %11718 = vst [vmem:[%s397_s10] sm:$0xff] %v11713_v0 }
 0x869   : > { %13727 = shalt.err (!%p13724_p0)
}
 0x86a   : > { %s13728_s13 = scalar_lea.hbm %s11731_s21, 128  ;;  %s13732_s19 = scalar_lea.hbm %s15258_s8, 256 }
 0x86b   : > { %p13729_p3 = scmp.ne.s32.totalorder %s11731_s21, %s13728_s13  ;;  %p13733_p9 = scmp.lt.s32.totalorder %s11731_s21, %s15258_s8 }
 0x86c   : > { %p13734_p2 = scmp.lt.s32.totalorder %s13732_s19, %s13728_s13 }
 0x86d   : > { %p13730_p6 = pnand %p13729_p3, %p15281_p8 }
 0x86e   : > { %p13735_p4 = por %p13734_p2, %p13733_p9 }
 0x86f   : > { %p13731_p12 = pneg %p13730_p6 }
 0x871   : > { %p13736_p7 = pnand %p13735_p4, %p13731_p12 }
 0x873   : > { %13739 = shalt.err (!%p13736_p7)
}
 0x874   : > { %13263 = dma.vmem_to_hbm [thread:$0]  (%p15281_p8), %s11734_s22, 128, %s11731_s21, %s11720_s25  }
 0x875 PF: > { %p13305_p5 = scmp.ge.s32.totalorder %s13790_s30, 2  ;;  %s11745_s14 = sand.u32 1, %s13778_s27  }
 0x876   : > { %p15282_p10 = scmp.ne.s32.totalorder %s15266_s16, 0  ;;  %s11746_s18 = scalar_lea.sflag [#allocation4], %s11745_s14 }
 0x878   : > { %p13288_p11 = pnand %p13305_p5, %p15282_p10 }
 0x87a   : > { %p13289_p1 = pneg %p13288_p11 }
 0x87c   : > { %13773 = dma.done.wait (%p13289_p1), %s11746_s18, 128  }
 0x87d   : > { %13775 = vsyncadd (%p13289_p1), %s11746_s18, 4294967168  ;;  %s15283_s17 = sld [smem:[#allocation20_spill]]  ;;  %p22_p13 = scmp.ge.s32.totalorder %s13877_s11, 4  }
 0x87e   : > { %s15284_s27 = smov %s13782_s28  ;;  %s15285_s28 = smov %s13786_s29 }
 0x87f   : > { %s15287_s30 = smov %s13877_s11  ;;  %24 = sbr.rel (!%p22_p13) target bundleno = 7 (0x7), region = 116 }
 0x883   : > { %s15286_s29 = smov %s15283_s17 }
 0x884   :  { %11751 = vsyncpa [#allocation3], 1 }
 0x885   :  { %11753 = vsyncpa [#allocation3 + $0x1], 1 }
 0x886   :  { %11754 = vsyncpa [#allocation6], 1 }
 0x887   :  { %11755 = vsyncpa [#allocation9], 1 }
 0x888   :  { %11756 = vsyncpa [#allocation12], 1 }
 0x889   :  { %11757 = vsyncpa [#allocation4], 1 }
 0x88a   :  { %11759 = vsyncpa [#allocation4 + $0x1], 1 }

</bundles_post_ra>
